<compile_context>
chip_gen: v7x
topology: tpu7x:2x2x1
jax: 0.10.0
libtpu: 0.0.40
codegen_flags: <defaults>
</compile_context>

<pallas_src>
import jax
import jax.numpy as jnp
import numpy as np
from jax.experimental import pallas as pl
from jax.experimental.pallas import tpu as pltpu

POOL_DIM = 768    # CLIP ViT-B/32 vision pooler_output dim
EMB_DIM = 512     # CLIP projected embedding dim
HID_DIM = 312     # classifier hidden dim
BN_EPS = 1e-5
# Classes per grid step.  Must be a multiple of 16 so c_tile*HID_DIM is an
# exact multiple of 128 lanes (16*312 = 4992 = 39*128).  32 keeps the
# double-buffered bf16 w1 block (~31 MiB) inside v7x's 64 MiB/TC VMEM.
C_TILE = 32
B_SUBLANE = 16    # batch padding (bf16 sublane packing = 16 rows per vreg)


def _round_up(x, m):
    return (x + m - 1) // m * m


# ----------------------------------------------------------------------------
# Pallas kernel: classifier heads for one tile of c_tile classes.
# ----------------------------------------------------------------------------
def _cls_heads_kernel(img_ref, w1_ref, hbias_ref, selw2_ref, cls_ref):
    # ONE flattened (B_pad, c_tile*312) bf16 MXU matmul with f32 accumulation.
    h = jax.lax.dot_general(img_ref[...], w1_ref[...], (((1,), (1,)), ((), ())),
                            preferred_element_type=jnp.float32)      # (B_pad, c_tile*312)
    # + per-class folded (text-half + Linear bias), ReLU.
    g = jnp.maximum(h + hbias_ref[0], 0.0)                           # (B_pad, c_tile*312)
    # Block-diagonal selector whose nonzeros are the folded BN*Linear(312,1)
    # weights: per-class weighted 312-wide reduction as one lane-dense matmul.
    cls = jax.lax.dot_general(g, selw2_ref[...], (((1,), (0,)), ((), ())),
                              preferred_element_type=jnp.float32)    # (B_pad, c_tile)
    cls_ref[...] = cls[None]


# ----------------------------------------------------------------------------
# Wrapper: one pallas_call over a class-tiled grid for ALL (adj+noun) classes,
# plus the tiny Linear(1280,1) heads in plain XLA.
# ----------------------------------------------------------------------------
def run_heads(image_out, fused, *, c_tile=C_TILE):
    B = image_out.shape[0]
    C = fused['wlin_img'].shape[0]
    c_tile = min(c_tile, _round_up(C, 16))           # stays a multiple of 16
    c_pad = _round_up(C, c_tile)
    nt = c_pad // c_tile
    b_pad = _round_up(max(B, B_SUBLANE), B_SUBLANE)
    K = c_tile * HID_DIM                             # multiple of 128 lanes

    pooled = image_out.astype(jnp.float32)

    # ---- tiny Linear(768+512, 1) heads: total weights ~C*3 KB -> plain XLA f32
    #      matmul; text halves + biases were folded into lin_bias at trace time.
    lin = pooled @ fused['wlin_img'].T + fused['lin_bias']           # (B, C)

    # ---- classifier heads: fused class-tiled Pallas kernel (bf16 weight stream).
    img_bf = jnp.pad(pooled, ((0, b_pad - B), (0, 0))).astype(jnp.bfloat16)

    def pad_c(x):
        return jnp.pad(x, ((0, c_pad - C),) + ((0, 0),) * (x.ndim - 1))

    # bf16 weight streaming halves HBM->VMEM traffic for the dominant operand.
    w1 = pad_c(fused['w1_img']).reshape(c_pad * HID_DIM, POOL_DIM).astype(jnp.bfloat16)
    hbias = pad_c(fused['h_bias']).reshape(nt, 1, K)                 # f32
    # Per-tile block-diagonal selector carrying the folded BN*W2 weights
    # (replaces the 0/1 selector + separate (B, K) VPU multiply of v1).
    w2f_t = pad_c(fused['w2f']).reshape(nt, c_tile, HID_DIM)
    eye = jnp.eye(c_tile, dtype=jnp.float32)
    selw2 = jnp.einsum('tch,cj->tchj', w2f_t, eye).reshape(nt * K, c_tile)

    flops = (2 * b_pad * POOL_DIM * c_pad * HID_DIM            # w1 matmul
             + 2 * b_pad * c_pad * HID_DIM * c_tile)           # selector matmul
    bytes_accessed = (c_pad * HID_DIM * POOL_DIM * 2           # bf16 w1 stream (dominant)
                      + nt * K * c_tile * 4                    # selector blocks
                      + c_pad * HID_DIM * 4                    # hoisted bias
                      + b_pad * POOL_DIM * 2                   # resident image tile
                      + nt * b_pad * c_tile * 4)               # output

    cls3 = pl.pallas_call(
        _cls_heads_kernel,
        grid=(nt,),
        in_specs=[
            pl.BlockSpec((b_pad, POOL_DIM), lambda t: (0, 0)),   # bf16 image, stays resident
            pl.BlockSpec((K, POOL_DIM), lambda t: (t, 0)),       # flattened bf16 weights
            pl.BlockSpec((1, 1, K), lambda t: (t, 0, 0)),        # folded text-half + bias
            pl.BlockSpec((K, c_tile), lambda t: (t, 0)),         # block-diag BN*W2 selector
        ],
        out_specs=pl.BlockSpec((1, b_pad, c_tile), lambda t: (t, 0, 0)),
        out_shape=jax.ShapeDtypeStruct((nt, b_pad, c_tile), jnp.float32),
        compiler_params=pltpu.CompilerParams(
            # class tiles are independent -> split across v7x's 2 TensorCores
            # (keep nt even for real class counts so the split is balanced).
            dimension_semantics=("parallel",),
            vmem_limit_bytes=48 * 1024 * 1024),    # fits v7x's 64 MiB/TC physical VMEM
        cost_estimate=pl.CostEstimate(flops=flops, transcendentals=0,
                                      bytes_accessed=bytes_accessed),
    )(img_bf, w1, hbias, selw2)

    # (nt, B_pad, c_tile) lane-dense slabs -> (B, C); add batch-independent bias.
    cls = cls3.transpose(1, 0, 2).reshape(b_pad, c_pad)[:B, :C] + fused['b2f']
    return lin, cls


# ----------------------------------------------------------------------------
# Trace-time parameter folding (all batch-independent, exact in eval mode).
# ----------------------------------------------------------------------------
def fold_group_params(p, text_emb):
    inv = jax.lax.rsqrt(p['var'] + BN_EPS)                                       # (C, HID)
    lin_bias = jnp.sum(text_emb * p['wlin_txt'], axis=-1)[None, :] + p['blin']   # (1, C)
    h_bias = jnp.einsum('ce,che->ch', text_emb, p['w1_txt']) + p['b1']           # (C, HID)
    w2f = p['w2'] * p['gamma'] * inv                                             # (C, HID)
    b2f = p['b2'] + jnp.sum((p['beta'] - p['mean'] * p['gamma'] * inv) * p['w2'],
                            axis=-1)[None, :]                                    # (1, C)
    return dict(wlin_img=p['wlin_img'], w1_img=p['w1_img'],
                lin_bias=lin_bias, h_bias=h_bias, w2f=w2f, b2f=b2f)


def fuse_groups(fa, fb):
    return {k: (jnp.concatenate([fa[k], fb[k]], axis=-1) if k in ('lin_bias', 'b2f')
                else jnp.concatenate([fa[k], fb[k]], axis=0)) for k in fa}


# ----------------------------------------------------------------------------
# Deterministic parameter construction (shapes from the module's __init__).
# ----------------------------------------------------------------------------
def init_head_params(key, num_classes):
    ks = jax.random.split(key, 8)

    def norm(k, shape, scale=0.02):
        return (scale * jax.random.normal(k, shape)).astype(jnp.float32)

    return dict(
        # nn.Linear(768+512, 1) per class; weight split into image/text halves
        wlin_img=norm(ks[0], (num_classes, POOL_DIM)),
        wlin_txt=norm(ks[1], (num_classes, EMB_DIM)),
        blin=norm(ks[2], (1, num_classes)),
        # classifier: Linear(1280,312) -> ReLU -> BatchNorm1d(312) -> Linear(312,1)
        w1_img=norm(ks[3], (num_classes, HID_DIM, POOL_DIM)),
        w1_txt=norm(ks[4], (num_classes, HID_DIM, EMB_DIM)),
        b1=norm(ks[5], (num_classes, HID_DIM)),
        gamma=jnp.ones((num_classes, HID_DIM), jnp.float32),   # BN affine (default init)
        beta=jnp.zeros((num_classes, HID_DIM), jnp.float32),
        mean=jnp.zeros((num_classes, HID_DIM), jnp.float32),   # BN running stats (eval mode)
        var=jnp.ones((num_classes, HID_DIM), jnp.float32),
        w2=norm(ks[6], (num_classes, HID_DIM)),
        b2=norm(ks[7], (1, num_classes)),
    )


# ----------------------------------------------------------------------------
# Forward pass.
# ----------------------------------------------------------------------------
def clip_text_image_concat_forward(images, adjective_text_embeddings,
                                   noun_text_embeddings, adj_params,
                                   noun_params, backbone):
    # TODO(synk): the pretrained CLIP ViT-B/32 backbone (vision/text transformers
    # + CLIPProcessor tokenization of text=['']) has no clean Pallas equivalent;
    # it is replaced by a deterministic stub mapping images -> pooler_output
    # (B,768) and projected, L2-normalized image_embeds (B,512).
    B = images.shape[0]
    pooled = images.reshape(B, -1).astype(jnp.float32)          # (B, 768) "pooler_output"
    image_embed = pooled @ backbone['visual_proj']              # (B, 512)
    image_embed = image_embed / jnp.linalg.norm(image_embed, axis=-1, keepdims=True)
    empty_text = backbone['empty_text_embed']
    empty_text = empty_text / jnp.linalg.norm(empty_text, axis=-1, keepdims=True)
    # (B,1) matmul — far too small for a kernel; plain jnp.
    logits_per_image = jnp.exp(backbone['logit_scale']) * (image_embed @ empty_text.T)

    A = adjective_text_embeddings.shape[0]
    fused = fuse_groups(fold_group_params(adj_params, adjective_text_embeddings),
                        fold_group_params(noun_params, noun_text_embeddings))
    lin_all, cls_all = run_heads(pooled, fused)                 # each (B, A+N)

    classifications = [lin_all[:, :A], lin_all[:, A:],          # adj/noun linear heads
                       cls_all[:, :A], cls_all[:, A:]]          # adj/noun classifier heads
    return classifications, logits_per_image


# ----------------------------------------------------------------------------
# Pure-JAX reference (mirrors the torch per-class computation, f32).
# ----------------------------------------------------------------------------
def reference_heads(pooled, text_emb, p):
    B = pooled.shape[0]
    C = text_emb.shape[0]
    inv = jax.lax.rsqrt(p['var'] + BN_EPS)
    lins, clss = [], []
    for c in range(C):
        final_out = jnp.concatenate(
            [pooled, jnp.tile(text_emb[c][None, :], (B, 1))], axis=1)      # (B, 1280)
        wlin = jnp.concatenate([p['wlin_img'][c], p['wlin_txt'][c]])       # (1280,)
        lins.append(final_out @ wlin + p['blin'][0, c])
        w1 = jnp.concatenate([p['w1_img'][c], p['w1_txt'][c]], axis=1)     # (312, 1280)
        h = jnp.maximum(final_out @ w1.T + p['b1'][c], 0.0)
        h = (h - p['mean'][c]) * (p['gamma'][c] * inv[c]) + p['beta'][c]
        clss.append(h @ p['w2'][c] + p['b2'][0, c])
    return jnp.stack(lins, axis=1), jnp.stack(clss, axis=1)


if __name__ == "__main__":
    key = jax.random.PRNGKey(0)
    k_img, k_at, k_nt, k_ap, k_np_, k_b1, k_b2 = jax.random.split(key, 7)

    B, ADJ, NOUN = 2, 10, 6
    # NCHW images; 3*16*16 = 768 so the backbone stub's pooler_output is exactly 768-d.
    images = jax.random.normal(k_img, (B, 3, 16, 16), jnp.float32)
    adjective_text_embeddings = jax.random.normal(k_at, (ADJ, EMB_DIM), jnp.float32)
    noun_text_embeddings = jax.random.normal(k_nt, (NOUN, EMB_DIM), jnp.float32)

    adj_params = init_head_params(k_ap, ADJ)
    noun_params = init_head_params(k_np_, NOUN)
    backbone = dict(
        visual_proj=0.02 * jax.random.normal(k_b1, (POOL_DIM, EMB_DIM), jnp.float32),
        empty_text_embed=jax.random.normal(k_b2, (1, EMB_DIM), jnp.float32),
        logit_scale=jnp.full((1, 1), jnp.log(1.0 / 0.07), jnp.float32),  # CLIP default
    )

    fwd = jax.jit(clip_text_image_concat_forward)
    classifications, logits_per_image = fwd(images, adjective_text_embeddings,
                                            noun_text_embeddings, adj_params,
                                            noun_params, backbone)
    jax.block_until_ready(classifications)
    jax.block_until_ready(logits_per_image)

    assert classifications[0].shape == (B, ADJ)    # adjective linear heads
    assert classifications[1].shape == (B, NOUN)   # noun linear heads
    assert classifications[2].shape == (B, ADJ)    # adjective classifier heads
    assert classifications[3].shape == (B, NOUN)   # noun classifier heads
    assert logits_per_image.shape == (B, 1)

    # numerical check vs the pure-JAX torch-order reference (tolerance covers bf16 weights)
    pooled = images.reshape(B, -1).astype(jnp.float32)
    ref_lin_a, ref_cls_a = reference_heads(pooled, adjective_text_embeddings, adj_params)
    ref_lin_n, ref_cls_n = reference_heads(pooled, noun_text_embeddings, noun_params)
    np.testing.assert_allclose(classifications[0], ref_lin_a, rtol=3e-2, atol=3e-2)
    np.testing.assert_allclose(classifications[1], ref_lin_n, rtol=3e-2, atol=3e-2)
    np.testing.assert_allclose(classifications[2], ref_cls_a, rtol=3e-2, atol=3e-2)
    np.testing.assert_allclose(classifications[3], ref_cls_n, rtol=3e-2, atol=3e-2)

    print("KERNEL_OK")
</pallas_src>

<mosaic_0001>
module attributes {stable_mosaic.version = 11 : i64} {
  func.func @_cls_heads_kernel(%arg0: i32, %arg1: memref<16x768xbf16, #tpu.memory_space<vmem>>, %arg2: memref<4992x768xbf16, #tpu.memory_space<vmem>>, %arg3: memref<1x1x4992xf32, #tpu.memory_space<vmem>>, %arg4: memref<4992x16xf32, #tpu.memory_space<vmem>>, %arg5: memref<1x16x16xf32, #tpu.memory_space<vmem>>) attributes {dimension_semantics = [#tpu.dimension_semantics<parallel>], iteration_bounds = array<i64: 1>, scalar_prefetch = 0 : i64, scratch_operands = 0 : i64, tpu.core_type = #tpu.core_type<tc>, window_params = [{pipeline_mode = #tpu.pipeline_mode<synchronous>, transform_indices = @transform_0, window_bounds = array<i64: 16, 768>}, {transform_indices = @transform_1, window_bounds = array<i64: 4992, 768>}, {transform_indices = @transform_2, window_bounds = array<i64: 1, 1, 4992>}, {transform_indices = @transform_3, window_bounds = array<i64: 4992, 16>}, {transform_indices = @transform_4, window_bounds = array<i64: 1, 16, 16>}]} {
    %c0 = arith.constant 0 : index
    %c0_0 = arith.constant 0 : index
    %0 = vector.load %arg1[%c0, %c0_0] : memref<16x768xbf16, #tpu.memory_space<vmem>>, vector<16x768xbf16>
    %c0_1 = arith.constant 0 : index
    %c0_2 = arith.constant 0 : index
    %1 = vector.load %arg2[%c0_1, %c0_2] : memref<4992x768xbf16, #tpu.memory_space<vmem>>, vector<4992x768xbf16>
    %cst = arith.constant dense<0.000000e+00> : vector<16x4992xf32>
    %2 = tpu.matmul %0, %1, %cst {dimension_numbers = #tpu.dot_dimension_numbers<[1], [1], [0], [0], [0, 0, 1, 0], [], []>} : vector<16x768xbf16>, vector<4992x768xbf16>, vector<16x4992xf32> -> vector<16x4992xf32>
    %c0_3 = arith.constant 0 : index
    %c0_4 = arith.constant 0 : index
    %c0_5 = arith.constant 0 : index
    %3 = vector.load %arg3[%c0_3, %c0_4, %c0_5] : memref<1x1x4992xf32, #tpu.memory_space<vmem>>, vector<1x1x4992xf32>
    %4 = vector.shape_cast %3 : vector<1x1x4992xf32> to vector<1x4992xf32>
    %5 = vector.broadcast %4 : vector<1x4992xf32> to vector<16x4992xf32>
    %6 = arith.addf %2, %5 : vector<16x4992xf32>
    %cst_6 = arith.constant 0.000000e+00 : f32
    %7 = vector.broadcast %cst_6 : f32 to vector<16x4992xf32>
    %8 = arith.maximumf %6, %7 : vector<16x4992xf32>
    %c0_7 = arith.constant 0 : index
    %c0_8 = arith.constant 0 : index
    %9 = vector.load %arg4[%c0_7, %c0_8] : memref<4992x16xf32, #tpu.memory_space<vmem>>, vector<4992x16xf32>
    %cst_9 = arith.constant dense<0.000000e+00> : vector<16x16xf32>
    %10 = tpu.matmul %8, %9, %cst_9 {dimension_numbers = #tpu.dot_dimension_numbers<[1], [0], [0], [1], [0, 0, 1, 1], [], []>} : vector<16x4992xf32>, vector<4992x16xf32>, vector<16x16xf32> -> vector<16x16xf32>
    %11 = vector.shape_cast %10 : vector<16x16xf32> to vector<1x16x16xf32>
    %c0_10 = arith.constant 0 : index
    %c0_11 = arith.constant 0 : index
    %c0_12 = arith.constant 0 : index
    %12 = vector.load %arg5[%c0_10, %c0_11, %c0_12] : memref<1x16x16xf32, #tpu.memory_space<vmem>>, vector<1x16x16xf32>
    tpu.vector_store %arg5[%c0_10, %c0_11, %c0_12], %11 {strides = array<i32>} : memref<1x16x16xf32, #tpu.memory_space<vmem>>, vector<1x16x16xf32>,
    return
  }
  func.func @transform_0(%arg0: i32) -> (i32, i32) {
    %c0_i32 = arith.constant 0 : i32
    %c0_i32_0 = arith.constant 0 : i32
    %c0_i32_1 = arith.constant 0 : i32
    return %c0_i32, %c0_i32_0 : i32, i32
  }
  func.func @transform_1(%arg0: i32) -> (i32, i32) {
    %c0_i32 = arith.constant 0 : i32
    %c0_i32_0 = arith.constant 0 : i32
    return %arg0, %c0_i32 : i32, i32
  }
  func.func @transform_2(%arg0: i32) -> (i32, i32, i32) {
    %c0_i32 = arith.constant 0 : i32
    %c0_i32_0 = arith.constant 0 : i32
    %c0_i32_1 = arith.constant 0 : i32
    return %arg0, %c0_i32, %c0_i32_0 : i32, i32, i32
  }
  func.func @transform_3(%arg0: i32) -> (i32, i32) {
    %c0_i32 = arith.constant 0 : i32
    %c0_i32_0 = arith.constant 0 : i32
    return %arg0, %c0_i32 : i32, i32
  }
  func.func @transform_4(%arg0: i32) -> (i32, i32, i32) {
    %c0_i32 = arith.constant 0 : i32
    %c0_i32_0 = arith.constant 0 : i32
    %c0_i32_1 = arith.constant 0 : i32
    return %arg0, %c0_i32, %c0_i32_0 : i32, i32, i32
  }
}

</mosaic_0001>

<bundles_post_ra>
// kernel: clip_text_image_concat_forward.1
= control target key start
LH: loop header
LB: loop body
LE: loop exit
PB: predicated region body
PF: predicated region fallthrough
CT: control target
= control target key end

     0   :  { %vm16267_vm0 = vcmask 130048   ;;  %s30890_s1 = inlined_call_operand.vmem [shape: bf16[4992,768], index: 1, kind: input, shape index: {}]   ;;  %s30891_s0 = inlined_call_operand.vmem [shape: bf16[16,768], index: 0, kind: input, shape index: {}]   ;;  %s30892_s3 = inlined_call_operand.vmem [shape: f32[4992,16], index: 3, kind: input, shape index: {}]   ;;  %s30893_s2 = inlined_call_operand.vmem [shape: f32[1,1,4992], index: 2, kind: input, shape index: {}]   ;;  %s30894_s4 = inlined_call_operand.vmem [shape: f32[1,16,16], index: 4, kind: output, shape index: {}]  }
   0x1   :  { %v19805_v0 = vld [vmem:[%s30890_s1 + $0x4] ss:$24 sps:$4 sm:$0xff]   ;;  %v19809_v2 = vld [vmem:[%s30890_s1] ss:$24 sps:$4 sm:$0xff]   ;;  %v19811_v4 = vld [vmem:[%s30890_s1 + $0x34] ss:$24 sps:$4 sm:$0xff]  }
   0x2   :  { %v19807_v1 = vld [vmem:[%s30890_s1 + $0x304] ss:$24 sps:$4 sm:$0xff]   ;;  %11491 = vmatprep.subr.bf16.mxu0 %v19805_v0  ;;  %v19810_v3 = vld [vmem:[%s30890_s1 + $0x300] ss:$24 sps:$4 sm:$0xff]   ;;  %v19813_v5 = vld [vmem:[%s30890_s1 + $0x334] ss:$24 sps:$4 sm:$0xff]  }
   0x3   :  { %11620 = vmatprep.subr.bf16.mxu1 %v19807_v1  ;;  %11492 = vmatpush1.bf16.xpose.msra.mxu0 %v19809_v2  ;;  %v19815_v6 = vld [vmem:[%s30890_s1 + $0x30] ss:$24 sps:$4 sm:$0xff]   ;;  %v19817_v8 = vld [vmem:[%s30890_s1 + $0x64] ss:$24 sps:$4 sm:$0xff]   ;;  %v19821_v10 = vld [vmem:[%s30890_s1 + $0x60] ss:$24 sps:$4 sm:$0xff]  }
   0x4   :  { %11621 = vmatpush1.bf16.xpose.msra.mxu1 %v19810_v3  ;;  %11493 = vmatprep.subr.bf16.mxu0 %v19811_v4  ;;  %v19816_v7 = vld [vmem:[%s30890_s1 + $0x330] ss:$24 sps:$4 sm:$0xff]   ;;  %v19819_v9 = vld [vmem:[%s30890_s1 + $0x364] ss:$24 sps:$4 sm:$0xff]   ;;  %v19822_v11 = vld [vmem:[%s30890_s1 + $0x360] ss:$24 sps:$4 sm:$0xff]  }
   0x5   :  { %11622 = vmatprep.subr.bf16.mxu1 %v19813_v5  ;;  %v19823_v12 = vld [vmem:[%s30890_s1 + $0x94] ss:$24 sps:$4 sm:$0xff]   ;;  %v19827_v14 = vld [vmem:[%s30890_s1 + $0x90] ss:$24 sps:$4 sm:$0xff]   ;;  %v19829_v16 = vld [vmem:[%s30890_s1 + $0xc4] ss:$24 sps:$4 sm:$0xff]  }
   0x6   :  { %v19825_v13 = vld [vmem:[%s30890_s1 + $0x394] ss:$24 sps:$4 sm:$0xff]   ;;  %v19828_v15 = vld [vmem:[%s30890_s1 + $0x390] ss:$24 sps:$4 sm:$0xff]   ;;  %v19831_v17 = vld [vmem:[%s30890_s1 + $0x3c4] ss:$24 sps:$4 sm:$0xff]  }
   0x7   :  { %v19833_v18 = vld [vmem:[%s30890_s1 + $0xc0] ss:$24 sps:$4 sm:$0xff]   ;;  %v19835_v20 = vld [vmem:[%s30890_s1 + $0xf4] ss:$24 sps:$4 sm:$0xff]   ;;  %v19839_v22 = vld [vmem:[%s30890_s1 + $0xf0] ss:$24 sps:$4 sm:$0xff]  }
   0x8   :  { %v19834_v19 = vld [vmem:[%s30890_s1 + $0x3c0] ss:$24 sps:$4 sm:$0xff]   ;;  %v19837_v21 = vld [vmem:[%s30890_s1 + $0x3f4] ss:$24 sps:$4 sm:$0xff]   ;;  %v19840_v23 = vld [vmem:[%s30890_s1 + $0x3f0] ss:$24 sps:$4 sm:$0xff]  }
   0x9   :  { %v19841_v24 = vld [vmem:[%s30890_s1 + $0x124] ss:$24 sps:$4 sm:$0xff]   ;;  %v19845_v27 = vld [vmem:[%s30890_s1 + $0x120] ss:$24 sps:$4 sm:$0xff]   ;;  %v19847_v29 = vld [vmem:[%s30890_s1 + $0x154] ss:$24 sps:$4 sm:$0xff]  }
   0xa   :  { %v19843_v25 = vld [vmem:[%s30890_s1 + $0x424] ss:$24 sps:$4 sm:$0xff]   ;;  %v19846_v28 = vld [vmem:[%s30890_s1 + $0x420] ss:$24 sps:$4 sm:$0xff]   ;;  %v19849_v30 = vld [vmem:[%s30890_s1 + $0x454] ss:$24 sps:$4 sm:$0xff]  }
   0xb   :  { %11494 = vmatpush1.bf16.xpose.msra.mxu0 %v19815_v6  ;;  %v19901_v26 = vld [vmem:[%s30891_s0 + $0x4] ss:$24 sps:$4 sm:$0xff]   ;;  %v19851_v31 = vld [vmem:[%s30890_s1 + $0x150] ss:$24 sps:$4 sm:$0xff]   ;;  %v19857_v35 = vld [vmem:[%s30890_s1 + $0x180] ss:$24 sps:$4 sm:$0xff]  }
   0xc   :  { %11623 = vmatpush1.bf16.xpose.msra.mxu1 %v19816_v7  ;;  %11495 = vmatprep.subr.bf16.mxu0 %v19817_v8  ;;  %v19852_v32 = vld [vmem:[%s30890_s1 + $0x450] ss:$24 sps:$4 sm:$0xff]   ;;  %v19853_v33 = vld [vmem:[%s30890_s1 + $0x184] ss:$24 sps:$4 sm:$0xff]   ;;  %v19858_v36 = vld [vmem:[%s30890_s1 + $0x480] ss:$24 sps:$4 sm:$0xff]  }
   0xd   :  { %11624 = vmatprep.subr.bf16.mxu1 %v19819_v9  ;;  %11523 = vmatprep.mubr.bf16.mxu0 %v19901_v26  ;;  %v19855_v34 = vld [vmem:[%s30890_s1 + $0x484] ss:$24 sps:$4 sm:$0xff]   ;;  %v19859_v37 = vld [vmem:[%s30890_s1 + $0x1b4] ss:$24 sps:$4 sm:$0xff]   ;;  %v19863_v39 = vld [vmem:[%s30890_s1 + $0x1b0] ss:$24 sps:$4 sm:$0xff]  }
   0xe   :  { %11652 = vmatprep.mubr.bf16.mxu1 %v19901_v26  ;;  %v19861_v38 = vld [vmem:[%s30890_s1 + $0x4b4] ss:$24 sps:$4 sm:$0xff]   ;;  %v19864_v40 = vld [vmem:[%s30890_s1 + $0x4b0] ss:$24 sps:$4 sm:$0xff]   ;;  %v19865_v41 = vld [vmem:[%s30890_s1 + $0x1e4] ss:$24 sps:$4 sm:$0xff]  }
   0xf   :  { %v19867_v42 = vld [vmem:[%s30890_s1 + $0x4e4] ss:$24 sps:$4 sm:$0xff]   ;;  %v19869_v43 = vld [vmem:[%s30890_s1 + $0x1e0] ss:$24 sps:$4 sm:$0xff]   ;;  %v19871_v45 = vld [vmem:[%s30890_s1 + $0x214] ss:$24 sps:$4 sm:$0xff]  }
  0x10   :  { %v19870_v44 = vld [vmem:[%s30890_s1 + $0x4e0] ss:$24 sps:$4 sm:$0xff]   ;;  %v19873_v46 = vld [vmem:[%s30890_s1 + $0x514] ss:$24 sps:$4 sm:$0xff]   ;;  %v19875_v47 = vld [vmem:[%s30890_s1 + $0x210] ss:$24 sps:$4 sm:$0xff]  }
  0x11   :  { %v19876_v48 = vld [vmem:[%s30890_s1 + $0x510] ss:$24 sps:$4 sm:$0xff]   ;;  %v19877_v49 = vld [vmem:[%s30890_s1 + $0x244] ss:$24 sps:$4 sm:$0xff]   ;;  %v19881_v51 = vld [vmem:[%s30890_s1 + $0x240] ss:$24 sps:$4 sm:$0xff]  }
  0x12   :  { %v19879_v50 = vld [vmem:[%s30890_s1 + $0x544] ss:$24 sps:$4 sm:$0xff]   ;;  %v19882_v52 = vld [vmem:[%s30890_s1 + $0x540] ss:$24 sps:$4 sm:$0xff]   ;;  %v19883_v53 = vld [vmem:[%s30890_s1 + $0x274] ss:$24 sps:$4 sm:$0xff]  }
  0x13   :  { %11496 = vmatpush1.bf16.xpose.msra.mxu0 %v19821_v10  ;;  %v19885_v54 = vld [vmem:[%s30890_s1 + $0x574] ss:$24 sps:$4 sm:$0xff]   ;;  %v19887_v55 = vld [vmem:[%s30890_s1 + $0x270] ss:$24 sps:$4 sm:$0xff]   ;;  %v19889_v57 = vld [vmem:[%s30890_s1 + $0x2a4] ss:$24 sps:$4 sm:$0xff]  }
  0x14   :  { %11625 = vmatpush1.bf16.xpose.msra.mxu1 %v19822_v11  ;;  %11497 = vmatprep.subr.bf16.mxu0 %v19823_v12  ;;  %v19888_v56 = vld [vmem:[%s30890_s1 + $0x570] ss:$24 sps:$4 sm:$0xff]   ;;  %v19891_v58 = vld [vmem:[%s30890_s1 + $0x5a4] ss:$24 sps:$4 sm:$0xff]   ;;  %v19893_v59 = vld [vmem:[%s30890_s1 + $0x2a0] ss:$24 sps:$4 sm:$0xff]  }
  0x15   :  { %11626 = vmatprep.subr.bf16.mxu1 %v19825_v13  ;;  %v19894_v60 = vld [vmem:[%s30890_s1 + $0x5a0] ss:$24 sps:$4 sm:$0xff]   ;;  %v19895_v61 = vld [vmem:[%s30890_s1 + $0x2d4] ss:$24 sps:$4 sm:$0xff]   ;;  %v19899_v63 = vld [vmem:[%s30890_s1 + $0x2d0] ss:$24 sps:$4 sm:$0xff]  }
  0x16   :  { %v19897_v62 = vld [vmem:[%s30890_s1 + $0x5d4] ss:$24 sps:$4 sm:$0xff]   ;;  %v19900_v0 = vld [vmem:[%s30890_s1 + $0x5d0] ss:$24 sps:$4 sm:$0xff]   ;;  %v19909_v3 = vld [vmem:[%s30891_s0] ss:$24 sps:$4 sm:$0xff]  }
  0x17   :  { %v19905_v1 = vld [vmem:[%s30890_s1 + $0xc] ss:$24 sps:$4 sm:$0xff]   ;;  %v19903_v4 = vld [vmem:[%s30890_s1 + $0x8] ss:$24 sps:$4 sm:$0xff]   ;;  %v19912_v6 = vld [vmem:[%s30890_s1 + $0x3c] ss:$24 sps:$4 sm:$0xff]  }
  0x18   :  { %v19908_v2 = vld [vmem:[%s30890_s1 + $0x30c] ss:$24 sps:$4 sm:$0xff]   ;;  %v19906_v5 = vld [vmem:[%s30890_s1 + $0x308] ss:$24 sps:$4 sm:$0xff]   ;;  %v19915_v7 = vld [vmem:[%s30890_s1 + $0x33c] ss:$24 sps:$4 sm:$0xff]  }
  0x19   :  { %v20000_v8 = vld [vmem:[%s30891_s0 + $0xc] ss:$24 sps:$4 sm:$0xff]   ;;  %v19910_v9 = vld [vmem:[%s30890_s1 + $0x38] ss:$24 sps:$4 sm:$0xff]   ;;  %v19916_v13 = vld [vmem:[%s30890_s1 + $0x68] ss:$24 sps:$4 sm:$0xff]  }
  0x1a   :  { %v19913_v10 = vld [vmem:[%s30890_s1 + $0x338] ss:$24 sps:$4 sm:$0xff]   ;;  %v19918_v11 = vld [vmem:[%s30890_s1 + $0x6c] ss:$24 sps:$4 sm:$0xff]  }
  0x1b   :  { %11498 = vmatpush1.bf16.xpose.msra.mxu0 %v19827_v14  ;;  %v19921_v12 = vld [vmem:[%s30890_s1 + $0x36c] ss:$24 sps:$4 sm:$0xff]   ;;  %v19919_v14 = vld [vmem:[%s30890_s1 + $0x368] ss:$24 sps:$4 sm:$0xff]   ;;  %v19937_v26 = vld [vmem:[%s30890_s1 + $0x3f8] ss:$24 sps:$4 sm:$0xff]  }
  0x1c   :  { %11627 = vmatpush1.bf16.xpose.msra.mxu1 %v19828_v15  ;;  %11499 = vmatprep.subr.bf16.mxu0 %v19829_v16  ;;  %v19924_v15 = vld [vmem:[%s30890_s1 + $0x9c] ss:$24 sps:$4 sm:$0xff]  }
  0x1d   :  { %11628 = vmatprep.subr.bf16.mxu1 %v19831_v17  ;;  %v19927_v16 = vld [vmem:[%s30890_s1 + $0x39c] ss:$24 sps:$4 sm:$0xff]   ;;  %v19922_v17 = vld [vmem:[%s30890_s1 + $0x98] ss:$24 sps:$4 sm:$0xff]  }
  0x23   :  { %11500 = vmatpush1.bf16.xpose.msra.mxu0 %v19833_v18  ;;  %v19925_v18 = vld [vmem:[%s30890_s1 + $0x398] ss:$24 sps:$4 sm:$0xff]  }
  0x24   :  { %11629 = vmatpush1.bf16.xpose.msra.mxu1 %v19834_v19  ;;  %11501 = vmatprep.subr.bf16.mxu0 %v19835_v20  ;;  %v19930_v19 = vld [vmem:[%s30890_s1 + $0xcc] ss:$24 sps:$4 sm:$0xff]  }
  0x25   :  { %11630 = vmatprep.subr.bf16.mxu1 %v19837_v21  ;;  %v19933_v20 = vld [vmem:[%s30890_s1 + $0x3cc] ss:$24 sps:$4 sm:$0xff]   ;;  %v19928_v21 = vld [vmem:[%s30890_s1 + $0xc8] ss:$24 sps:$4 sm:$0xff]  }
  0x2b   :  { %11502 = vmatpush1.bf16.xpose.msra.mxu0 %v19839_v22  ;;  %v19931_v22 = vld [vmem:[%s30890_s1 + $0x3c8] ss:$24 sps:$4 sm:$0xff]  }
  0x2c   :  { %11631 = vmatpush1.bf16.xpose.msra.mxu1 %v19840_v23  ;;  %11503 = vmatprep.subr.bf16.mxu0 %v19841_v24  ;;  %v19936_v23 = vld [vmem:[%s30890_s1 + $0xfc] ss:$24 sps:$4 sm:$0xff]  }
  0x2d   :  { %11632 = vmatprep.subr.bf16.mxu1 %v19843_v25  ;;  %v19939_v24 = vld [vmem:[%s30890_s1 + $0x3fc] ss:$24 sps:$4 sm:$0xff]   ;;  %v19934_v25 = vld [vmem:[%s30890_s1 + $0xf8] ss:$24 sps:$4 sm:$0xff]  }
  0x33   :  { %11504 = vmatpush1.bf16.xpose.msra.mxu0 %v19845_v27  ;;  %v19942_v27 = vld [vmem:[%s30890_s1 + $0x12c] ss:$24 sps:$4 sm:$0xff]  }
  0x34   :  { %11633 = vmatpush1.bf16.xpose.msra.mxu1 %v19846_v28  ;;  %11505 = vmatprep.subr.bf16.mxu0 %v19847_v29  ;;  %v19945_v28 = vld [vmem:[%s30890_s1 + $0x42c] ss:$24 sps:$4 sm:$0xff]   ;;  %v19940_v29 = vld [vmem:[%s30890_s1 + $0x128] ss:$24 sps:$4 sm:$0xff]  }
  0x35   :  { %11634 = vmatprep.subr.bf16.mxu1 %v19849_v30  ;;  %v19943_v30 = vld [vmem:[%s30890_s1 + $0x428] ss:$24 sps:$4 sm:$0xff]  }
  0x3b   :  { %11506 = vmatpush1.bf16.xpose.msra.mxu0 %v19851_v31  ;;  %v19948_v31 = vld [vmem:[%s30890_s1 + $0x15c] ss:$24 sps:$4 sm:$0xff]  }
  0x3c   :  { %11635 = vmatpush1.bf16.xpose.msra.mxu1 %v19852_v32  ;;  %11507 = vmatprep.subr.bf16.mxu0 %v19853_v33  ;;  %v19951_v32 = vld [vmem:[%s30890_s1 + $0x45c] ss:$24 sps:$4 sm:$0xff]   ;;  %v19946_v33 = vld [vmem:[%s30890_s1 + $0x158] ss:$24 sps:$4 sm:$0xff]  }
  0x3d   :  { %11636 = vmatprep.subr.bf16.mxu1 %v19855_v34  ;;  %v19949_v34 = vld [vmem:[%s30890_s1 + $0x458] ss:$24 sps:$4 sm:$0xff]  }
  0x43   :  { %11508 = vmatpush1.bf16.xpose.msra.mxu0 %v19857_v35  ;;  %v19954_v35 = vld [vmem:[%s30890_s1 + $0x18c] ss:$24 sps:$4 sm:$0xff]  }
  0x44   :  { %11637 = vmatpush1.bf16.xpose.msra.mxu1 %v19858_v36  ;;  %11509 = vmatprep.subr.bf16.mxu0 %v19859_v37  ;;  %v19957_v36 = vld [vmem:[%s30890_s1 + $0x48c] ss:$24 sps:$4 sm:$0xff]   ;;  %v19952_v37 = vld [vmem:[%s30890_s1 + $0x188] ss:$24 sps:$4 sm:$0xff]  }
  0x45   :  { %11638 = vmatprep.subr.bf16.mxu1 %v19861_v38  ;;  %v19955_v38 = vld [vmem:[%s30890_s1 + $0x488] ss:$24 sps:$4 sm:$0xff]  }
  0x4b   :  { %11510 = vmatpush1.bf16.xpose.msra.mxu0 %v19863_v39  ;;  %v19960_v39 = vld [vmem:[%s30890_s1 + $0x1bc] ss:$24 sps:$4 sm:$0xff]  }
  0x4c   :  { %11639 = vmatpush1.bf16.xpose.msra.mxu1 %v19864_v40  ;;  %11511 = vmatprep.subr.bf16.mxu0 %v19865_v41  ;;  %v19963_v40 = vld [vmem:[%s30890_s1 + $0x4bc] ss:$24 sps:$4 sm:$0xff]   ;;  %v19958_v41 = vld [vmem:[%s30890_s1 + $0x1b8] ss:$24 sps:$4 sm:$0xff]  }
  0x4d   :  { %11640 = vmatprep.subr.bf16.mxu1 %v19867_v42  ;;  %v19961_v42 = vld [vmem:[%s30890_s1 + $0x4b8] ss:$24 sps:$4 sm:$0xff]  }
  0x53   :  { %11512 = vmatpush1.bf16.xpose.msra.mxu0 %v19869_v43  ;;  %v19966_v43 = vld [vmem:[%s30890_s1 + $0x1ec] ss:$24 sps:$4 sm:$0xff]  }
  0x54   :  { %11641 = vmatpush1.bf16.xpose.msra.mxu1 %v19870_v44  ;;  %11513 = vmatprep.subr.bf16.mxu0 %v19871_v45  ;;  %v19969_v44 = vld [vmem:[%s30890_s1 + $0x4ec] ss:$24 sps:$4 sm:$0xff]   ;;  %v19964_v45 = vld [vmem:[%s30890_s1 + $0x1e8] ss:$24 sps:$4 sm:$0xff]  }
  0x55   :  { %11642 = vmatprep.subr.bf16.mxu1 %v19873_v46  ;;  %v19967_v46 = vld [vmem:[%s30890_s1 + $0x4e8] ss:$24 sps:$4 sm:$0xff]  }
  0x5b   :  { %11514 = vmatpush1.bf16.xpose.msra.mxu0 %v19875_v47  ;;  %v19972_v47 = vld [vmem:[%s30890_s1 + $0x21c] ss:$24 sps:$4 sm:$0xff]  }
  0x5c   :  { %11643 = vmatpush1.bf16.xpose.msra.mxu1 %v19876_v48  ;;  %11515 = vmatprep.subr.bf16.mxu0 %v19877_v49  ;;  %v19975_v48 = vld [vmem:[%s30890_s1 + $0x51c] ss:$24 sps:$4 sm:$0xff]   ;;  %v19970_v49 = vld [vmem:[%s30890_s1 + $0x218] ss:$24 sps:$4 sm:$0xff]  }
  0x5d   :  { %11644 = vmatprep.subr.bf16.mxu1 %v19879_v50  ;;  %v19973_v50 = vld [vmem:[%s30890_s1 + $0x518] ss:$24 sps:$4 sm:$0xff]  }
  0x63   :  { %11516 = vmatpush1.bf16.xpose.msra.mxu0 %v19881_v51  ;;  %v19978_v51 = vld [vmem:[%s30890_s1 + $0x24c] ss:$24 sps:$4 sm:$0xff]  }
  0x64   :  { %11645 = vmatpush1.bf16.xpose.msra.mxu1 %v19882_v52  ;;  %11517 = vmatprep.subr.bf16.mxu0 %v19883_v53  ;;  %v19981_v52 = vld [vmem:[%s30890_s1 + $0x54c] ss:$24 sps:$4 sm:$0xff]   ;;  %v19976_v53 = vld [vmem:[%s30890_s1 + $0x248] ss:$24 sps:$4 sm:$0xff]  }
  0x65   :  { %11646 = vmatprep.subr.bf16.mxu1 %v19885_v54  ;;  %v19979_v54 = vld [vmem:[%s30890_s1 + $0x548] ss:$24 sps:$4 sm:$0xff]  }
  0x6b   :  { %11518 = vmatpush1.bf16.xpose.msra.mxu0 %v19887_v55  ;;  %v19984_v55 = vld [vmem:[%s30890_s1 + $0x27c] ss:$24 sps:$4 sm:$0xff]  }
  0x6c   :  { %11647 = vmatpush1.bf16.xpose.msra.mxu1 %v19888_v56  ;;  %11519 = vmatprep.subr.bf16.mxu0 %v19889_v57  ;;  %v19987_v56 = vld [vmem:[%s30890_s1 + $0x57c] ss:$24 sps:$4 sm:$0xff]   ;;  %v19982_v57 = vld [vmem:[%s30890_s1 + $0x278] ss:$24 sps:$4 sm:$0xff]  }
  0x6d   :  { %11648 = vmatprep.subr.bf16.mxu1 %v19891_v58  ;;  %v19985_v58 = vld [vmem:[%s30890_s1 + $0x578] ss:$24 sps:$4 sm:$0xff]  }
  0x73   :  { %11520 = vmatpush1.bf16.xpose.msra.mxu0 %v19893_v59  ;;  %v19990_v59 = vld [vmem:[%s30890_s1 + $0x2ac] ss:$24 sps:$4 sm:$0xff]  }
  0x74   :  { %11649 = vmatpush1.bf16.xpose.msra.mxu1 %v19894_v60  ;;  %11521 = vmatprep.subr.bf16.mxu0 %v19895_v61  ;;  %v19993_v60 = vld [vmem:[%s30890_s1 + $0x5ac] ss:$24 sps:$4 sm:$0xff]   ;;  %v19988_v61 = vld [vmem:[%s30890_s1 + $0x2a8] ss:$24 sps:$4 sm:$0xff]  }
  0x75   :  { %11650 = vmatprep.subr.bf16.mxu1 %v19897_v62  ;;  %v19991_v62 = vld [vmem:[%s30890_s1 + $0x5a8] ss:$24 sps:$4 sm:$0xff]  }
  0x7b   :  { %11522 = vmatpush1.bf16.xpose.msra.mxu0 %v19899_v63  ;;  %v19996_v63 = vld [vmem:[%s30890_s1 + $0x2dc] ss:$24 sps:$4 sm:$0xff]  }
  0x7c   :  { %11651 = vmatpush1.bf16.xpose.msra.mxu1 %v19900_v0  ;;  %11534 = vmatprep.subr.bf16.mxu0 %v19905_v1  ;;  %v19999_v0 = vld [vmem:[%s30890_s1 + $0x5dc] ss:$24 sps:$4 sm:$0xff]   ;;  %v19994_v1 = vld [vmem:[%s30890_s1 + $0x2d8] ss:$24 sps:$4 sm:$0xff]  }
  0x7d   :  { %11663 = vmatprep.subr.bf16.mxu1 %v19908_v2  ;;  %v19997_v2 = vld [vmem:[%s30890_s1 + $0x5d8] ss:$24 sps:$4 sm:$0xff]  }
  0x82   :  { %11524 = vmatmul.mubr.bf16.vlgmr.msra.gmra.mrb[0].mxu0 %v19909_v3 }
  0x83   :  { %11653 = vmatmul.mubr.bf16.vlgmr.msra.gmra.mrb[0].mxu1 %v19909_v3  ;;  %11535 = vmatpush1.bf16.xpose.msra.mxu0 %v19903_v4  ;;  %v20004_v3 = vld [vmem:[%s30890_s1 + $0x14] ss:$24 sps:$4 sm:$0xff]  }
  0x84   :  { %11664 = vmatpush1.bf16.xpose.msra.mxu1 %v19906_v5  ;;  %11536 = vmatprep.subr.bf16.mxu0 %v19912_v6  ;;  %v20007_v4 = vld [vmem:[%s30890_s1 + $0x314] ss:$24 sps:$4 sm:$0xff]   ;;  %v20008_v5 = vld [vmem:[%s30891_s0 + $0x8] ss:$24 sps:$4 sm:$0xff]  }
  0x85   :  { %11665 = vmatprep.subr.bf16.mxu1 %v19915_v7  ;;  %11566 = vmatprep.mubr.bf16.mxu0 %v20000_v8  ;;  %v20002_v6 = vld [vmem:[%s30890_s1 + $0x10] ss:$24 sps:$4 sm:$0xff]  }
  0x86   :  { %11695 = vmatprep.mubr.bf16.mxu1 %v20000_v8  ;;  %v20005_v7 = vld [vmem:[%s30890_s1 + $0x310] ss:$24 sps:$4 sm:$0xff]   ;;  %v20011_v8 = vld [vmem:[%s30890_s1 + $0x44] ss:$24 sps:$4 sm:$0xff]  }
  0x8b   :  { %11537 = vmatpush1.bf16.xpose.msra.mxu0 %v19910_v9  ;;  %v20014_v9 = vld [vmem:[%s30890_s1 + $0x344] ss:$24 sps:$4 sm:$0xff]  }
  0x8c   :  { %11666 = vmatpush1.bf16.xpose.msra.mxu1 %v19913_v10  ;;  %11538 = vmatprep.subr.bf16.mxu0 %v19918_v11  ;;  %v20099_v10 = vld [vmem:[%s30891_s0 + $0x14] ss:$24 sps:$4 sm:$0xff]   ;;  %v20009_v11 = vld [vmem:[%s30890_s1 + $0x40] ss:$24 sps:$4 sm:$0xff]  }
  0x8d   :  { %11667 = vmatprep.subr.bf16.mxu1 %v19921_v12  ;;  %v20012_v12 = vld [vmem:[%s30890_s1 + $0x340] ss:$24 sps:$4 sm:$0xff]  }
  0x93   :  { %11539 = vmatpush1.bf16.xpose.msra.mxu0 %v19916_v13  ;;  %v20017_v13 = vld [vmem:[%s30890_s1 + $0x74] ss:$24 sps:$4 sm:$0xff]  }
  0x94   :  { %11668 = vmatpush1.bf16.xpose.msra.mxu1 %v19919_v14  ;;  %11540 = vmatprep.subr.bf16.mxu0 %v19924_v15  ;;  %v20020_v14 = vld [vmem:[%s30890_s1 + $0x374] ss:$24 sps:$4 sm:$0xff]   ;;  %v20015_v15 = vld [vmem:[%s30890_s1 + $0x70] ss:$24 sps:$4 sm:$0xff]  }
  0x95   :  { %11669 = vmatprep.subr.bf16.mxu1 %v19927_v16  ;;  %v20018_v16 = vld [vmem:[%s30890_s1 + $0x370] ss:$24 sps:$4 sm:$0xff]  }
  0x9b   :  { %11541 = vmatpush1.bf16.xpose.msra.mxu0 %v19922_v17  ;;  %v20023_v17 = vld [vmem:[%s30890_s1 + $0xa4] ss:$24 sps:$4 sm:$0xff]  }
  0x9c   :  { %11670 = vmatpush1.bf16.xpose.msra.mxu1 %v19925_v18  ;;  %11542 = vmatprep.subr.bf16.mxu0 %v19930_v19  ;;  %v20026_v18 = vld [vmem:[%s30890_s1 + $0x3a4] ss:$24 sps:$4 sm:$0xff]   ;;  %v20021_v19 = vld [vmem:[%s30890_s1 + $0xa0] ss:$24 sps:$4 sm:$0xff]  }
  0x9d   :  { %11671 = vmatprep.subr.bf16.mxu1 %v19933_v20  ;;  %v20024_v20 = vld [vmem:[%s30890_s1 + $0x3a0] ss:$24 sps:$4 sm:$0xff]  }
  0xa3   :  { %11543 = vmatpush1.bf16.xpose.msra.mxu0 %v19928_v21  ;;  %v20029_v21 = vld [vmem:[%s30890_s1 + $0xd4] ss:$24 sps:$4 sm:$0xff]  }
  0xa4   :  { %11672 = vmatpush1.bf16.xpose.msra.mxu1 %v19931_v22  ;;  %11544 = vmatprep.subr.bf16.mxu0 %v19936_v23  ;;  %v20032_v22 = vld [vmem:[%s30890_s1 + $0x3d4] ss:$24 sps:$4 sm:$0xff]   ;;  %v20027_v23 = vld [vmem:[%s30890_s1 + $0xd0] ss:$24 sps:$4 sm:$0xff]  }
  0xa5   :  { %11673 = vmatprep.subr.bf16.mxu1 %v19939_v24  ;;  %v20030_v24 = vld [vmem:[%s30890_s1 + $0x3d0] ss:$24 sps:$4 sm:$0xff]  }
  0xab   :  { %11545 = vmatpush1.bf16.xpose.msra.mxu0 %v19934_v25  ;;  %v20035_v25 = vld [vmem:[%s30890_s1 + $0x104] ss:$24 sps:$4 sm:$0xff]  }
  0xac   :  { %11674 = vmatpush1.bf16.xpose.msra.mxu1 %v19937_v26  ;;  %11546 = vmatprep.subr.bf16.mxu0 %v19942_v27  ;;  %v20038_v26 = vld [vmem:[%s30890_s1 + $0x404] ss:$24 sps:$4 sm:$0xff]   ;;  %v20033_v27 = vld [vmem:[%s30890_s1 + $0x100] ss:$24 sps:$4 sm:$0xff]  }
  0xad   :  { %11675 = vmatprep.subr.bf16.mxu1 %v19945_v28  ;;  %v20036_v28 = vld [vmem:[%s30890_s1 + $0x400] ss:$24 sps:$4 sm:$0xff]  }
  0xb3   :  { %11547 = vmatpush1.bf16.xpose.msra.mxu0 %v19940_v29  ;;  %v20041_v29 = vld [vmem:[%s30890_s1 + $0x134] ss:$24 sps:$4 sm:$0xff]  }
  0xb4   :  { %11676 = vmatpush1.bf16.xpose.msra.mxu1 %v19943_v30  ;;  %11548 = vmatprep.subr.bf16.mxu0 %v19948_v31  ;;  %v20044_v30 = vld [vmem:[%s30890_s1 + $0x434] ss:$24 sps:$4 sm:$0xff]   ;;  %v20039_v31 = vld [vmem:[%s30890_s1 + $0x130] ss:$24 sps:$4 sm:$0xff]  }
  0xb5   :  { %11677 = vmatprep.subr.bf16.mxu1 %v19951_v32  ;;  %v20042_v32 = vld [vmem:[%s30890_s1 + $0x430] ss:$24 sps:$4 sm:$0xff]  }
  0xbb   :  { %11549 = vmatpush1.bf16.xpose.msra.mxu0 %v19946_v33  ;;  %v20047_v33 = vld [vmem:[%s30890_s1 + $0x164] ss:$24 sps:$4 sm:$0xff]  }
  0xbc   :  { %11678 = vmatpush1.bf16.xpose.msra.mxu1 %v19949_v34  ;;  %11550 = vmatprep.subr.bf16.mxu0 %v19954_v35  ;;  %v20050_v34 = vld [vmem:[%s30890_s1 + $0x464] ss:$24 sps:$4 sm:$0xff]   ;;  %v20045_v35 = vld [vmem:[%s30890_s1 + $0x160] ss:$24 sps:$4 sm:$0xff]  }
  0xbd   :  { %11679 = vmatprep.subr.bf16.mxu1 %v19957_v36  ;;  %v20048_v36 = vld [vmem:[%s30890_s1 + $0x460] ss:$24 sps:$4 sm:$0xff]  }
  0xc3   :  { %11551 = vmatpush1.bf16.xpose.msra.mxu0 %v19952_v37  ;;  %v20053_v37 = vld [vmem:[%s30890_s1 + $0x194] ss:$24 sps:$4 sm:$0xff]  }
  0xc4   :  { %11680 = vmatpush1.bf16.xpose.msra.mxu1 %v19955_v38  ;;  %11552 = vmatprep.subr.bf16.mxu0 %v19960_v39  ;;  %v20056_v38 = vld [vmem:[%s30890_s1 + $0x494] ss:$24 sps:$4 sm:$0xff]   ;;  %v20051_v39 = vld [vmem:[%s30890_s1 + $0x190] ss:$24 sps:$4 sm:$0xff]  }
  0xc5   :  { %11681 = vmatprep.subr.bf16.mxu1 %v19963_v40  ;;  %v20054_v40 = vld [vmem:[%s30890_s1 + $0x490] ss:$24 sps:$4 sm:$0xff]  }
  0xcb   :  { %11553 = vmatpush1.bf16.xpose.msra.mxu0 %v19958_v41  ;;  %v20059_v41 = vld [vmem:[%s30890_s1 + $0x1c4] ss:$24 sps:$4 sm:$0xff]  }
  0xcc   :  { %11682 = vmatpush1.bf16.xpose.msra.mxu1 %v19961_v42  ;;  %11554 = vmatprep.subr.bf16.mxu0 %v19966_v43  ;;  %v20062_v42 = vld [vmem:[%s30890_s1 + $0x4c4] ss:$24 sps:$4 sm:$0xff]   ;;  %v20057_v43 = vld [vmem:[%s30890_s1 + $0x1c0] ss:$24 sps:$4 sm:$0xff]  }
  0xcd   :  { %11683 = vmatprep.subr.bf16.mxu1 %v19969_v44  ;;  %v20060_v44 = vld [vmem:[%s30890_s1 + $0x4c0] ss:$24 sps:$4 sm:$0xff]  }
  0xd3   :  { %11555 = vmatpush1.bf16.xpose.msra.mxu0 %v19964_v45  ;;  %v20065_v45 = vld [vmem:[%s30890_s1 + $0x1f4] ss:$24 sps:$4 sm:$0xff]  }
  0xd4   :  { %11684 = vmatpush1.bf16.xpose.msra.mxu1 %v19967_v46  ;;  %11556 = vmatprep.subr.bf16.mxu0 %v19972_v47  ;;  %v20068_v46 = vld [vmem:[%s30890_s1 + $0x4f4] ss:$24 sps:$4 sm:$0xff]   ;;  %v20063_v47 = vld [vmem:[%s30890_s1 + $0x1f0] ss:$24 sps:$4 sm:$0xff]  }
  0xd5   :  { %11685 = vmatprep.subr.bf16.mxu1 %v19975_v48  ;;  %v20066_v48 = vld [vmem:[%s30890_s1 + $0x4f0] ss:$24 sps:$4 sm:$0xff]  }
  0xdb   :  { %11557 = vmatpush1.bf16.xpose.msra.mxu0 %v19970_v49  ;;  %v20071_v49 = vld [vmem:[%s30890_s1 + $0x224] ss:$24 sps:$4 sm:$0xff]  }
  0xdc   :  { %11686 = vmatpush1.bf16.xpose.msra.mxu1 %v19973_v50  ;;  %11558 = vmatprep.subr.bf16.mxu0 %v19978_v51  ;;  %v20074_v50 = vld [vmem:[%s30890_s1 + $0x524] ss:$24 sps:$4 sm:$0xff]   ;;  %v20069_v51 = vld [vmem:[%s30890_s1 + $0x220] ss:$24 sps:$4 sm:$0xff]  }
  0xdd   :  { %11687 = vmatprep.subr.bf16.mxu1 %v19981_v52  ;;  %v20072_v52 = vld [vmem:[%s30890_s1 + $0x520] ss:$24 sps:$4 sm:$0xff]  }
  0xe3   :  { %11559 = vmatpush1.bf16.xpose.msra.mxu0 %v19976_v53  ;;  %v20077_v53 = vld [vmem:[%s30890_s1 + $0x254] ss:$24 sps:$4 sm:$0xff]  }
  0xe4   :  { %11688 = vmatpush1.bf16.xpose.msra.mxu1 %v19979_v54  ;;  %11560 = vmatprep.subr.bf16.mxu0 %v19984_v55  ;;  %v20080_v54 = vld [vmem:[%s30890_s1 + $0x554] ss:$24 sps:$4 sm:$0xff]   ;;  %v20075_v55 = vld [vmem:[%s30890_s1 + $0x250] ss:$24 sps:$4 sm:$0xff]  }
  0xe5   :  { %11689 = vmatprep.subr.bf16.mxu1 %v19987_v56  ;;  %v20078_v56 = vld [vmem:[%s30890_s1 + $0x550] ss:$24 sps:$4 sm:$0xff]  }
  0xeb   :  { %11561 = vmatpush1.bf16.xpose.msra.mxu0 %v19982_v57  ;;  %v20083_v57 = vld [vmem:[%s30890_s1 + $0x284] ss:$24 sps:$4 sm:$0xff]  }
  0xec   :  { %11690 = vmatpush1.bf16.xpose.msra.mxu1 %v19985_v58  ;;  %11562 = vmatprep.subr.bf16.mxu0 %v19990_v59  ;;  %v20086_v58 = vld [vmem:[%s30890_s1 + $0x584] ss:$24 sps:$4 sm:$0xff]   ;;  %v20081_v59 = vld [vmem:[%s30890_s1 + $0x280] ss:$24 sps:$4 sm:$0xff]  }
  0xed   :  { %11691 = vmatprep.subr.bf16.mxu1 %v19993_v60  ;;  %v20084_v60 = vld [vmem:[%s30890_s1 + $0x580] ss:$24 sps:$4 sm:$0xff]  }
  0xf3   :  { %11563 = vmatpush1.bf16.xpose.msra.mxu0 %v19988_v61  ;;  %v20089_v61 = vld [vmem:[%s30890_s1 + $0x2b4] ss:$24 sps:$4 sm:$0xff]  }
  0xf4   :  { %11692 = vmatpush1.bf16.xpose.msra.mxu1 %v19991_v62  ;;  %11564 = vmatprep.subr.bf16.mxu0 %v19996_v63  ;;  %v20092_v62 = vld [vmem:[%s30890_s1 + $0x5b4] ss:$24 sps:$4 sm:$0xff]   ;;  %v20087_v63 = vld [vmem:[%s30890_s1 + $0x2b0] ss:$24 sps:$4 sm:$0xff]  }
  0xf5   :  { %11693 = vmatprep.subr.bf16.mxu1 %v19999_v0  ;;  %v20090_v0 = vld [vmem:[%s30890_s1 + $0x5b0] ss:$24 sps:$4 sm:$0xff]  }
  0xfb   :  { %11565 = vmatpush1.bf16.xpose.msra.mxu0 %v19994_v1  ;;  %v20095_v1 = vld [vmem:[%s30890_s1 + $0x2e4] ss:$24 sps:$4 sm:$0xff]  }
  0xfc   :  { %11694 = vmatpush1.bf16.xpose.msra.mxu1 %v19997_v2  ;;  %11577 = vmatprep.subr.bf16.mxu0 %v20004_v3  ;;  %v20098_v2 = vld [vmem:[%s30890_s1 + $0x5e4] ss:$24 sps:$4 sm:$0xff]   ;;  %v20093_v3 = vld [vmem:[%s30890_s1 + $0x2e0] ss:$24 sps:$4 sm:$0xff]  }
  0xfd   :  { %11706 = vmatprep.subr.bf16.mxu1 %v20007_v4  ;;  %v20096_v4 = vld [vmem:[%s30890_s1 + $0x5e0] ss:$24 sps:$4 sm:$0xff]  }
 0x102   :  { %11567 = vmatmul.mubr.bf16.vlgmr.msra.gmra.mrb[0].mxu0 %v20008_v5 }
 0x103   :  { %11696 = vmatmul.mubr.bf16.vlgmr.msra.gmra.mrb[0].mxu1 %v20008_v5  ;;  %11578 = vmatpush1.bf16.xpose.msra.mxu0 %v20002_v6  ;;  %v20104_v5 = vld [vmem:[%s30890_s1 + $0x604] ss:$24 sps:$4 sm:$0xff]  }
 0x104   :  { %11707 = vmatpush1.bf16.xpose.msra.mxu1 %v20005_v7  ;;  %11579 = vmatprep.subr.bf16.mxu0 %v20011_v8  ;;  %v20107_v6 = vld [vmem:[%s30890_s1 + $0x904] ss:$24 sps:$4 sm:$0xff]   ;;  %v20101_v7 = vld [vmem:[%s30891_s0 + $0x10] ss:$24 sps:$4 sm:$0xff]   ;;  %v20102_v8 = vld [vmem:[%s30890_s1 + $0x600] ss:$24 sps:$4 sm:$0xff]  }
 0x105   :  { %11708 = vmatprep.subr.bf16.mxu1 %v20014_v9  ;;  %11609 = vmatprep.mubr.bf16.mxu0 %v20099_v10  ;;  %v20105_v9 = vld [vmem:[%s30890_s1 + $0x900] ss:$24 sps:$4 sm:$0xff]  }
 0x106   :  { %11738 = vmatprep.mubr.bf16.mxu1 %v20099_v10  ;;  %v20110_v10 = vld [vmem:[%s30890_s1 + $0x634] ss:$24 sps:$4 sm:$0xff]  }
 0x10b   :  { %11580 = vmatpush1.bf16.xpose.msra.mxu0 %v20009_v11  ;;  %v20113_v11 = vld [vmem:[%s30890_s1 + $0x934] ss:$24 sps:$4 sm:$0xff]  }
 0x10c   :  { %11709 = vmatpush1.bf16.xpose.msra.mxu1 %v20012_v12  ;;  %11581 = vmatprep.subr.bf16.mxu0 %v20017_v13  ;;  %v20108_v12 = vld [vmem:[%s30890_s1 + $0x630] ss:$24 sps:$4 sm:$0xff]  }
 0x10d   :  { %11710 = vmatprep.subr.bf16.mxu1 %v20020_v14  ;;  %v20111_v13 = vld [vmem:[%s30890_s1 + $0x930] ss:$24 sps:$4 sm:$0xff]   ;;  %v22622_v14 = vld [vmem:[%s30891_s0 + $0x4] ss:$24 sps:$4 sm:$0xff]  }
 0x113   :  { %11582 = vmatpush1.bf16.xpose.msra.mxu0 %v20015_v15  ;;  %v20116_v15 = vld [vmem:[%s30890_s1 + $0x664] ss:$24 sps:$4 sm:$0xff]  }
 0x114   :  { %11711 = vmatpush1.bf16.xpose.msra.mxu1 %v20018_v16  ;;  %11583 = vmatprep.subr.bf16.mxu0 %v20023_v17  ;;  %v20119_v16 = vld [vmem:[%s30890_s1 + $0x964] ss:$24 sps:$4 sm:$0xff]   ;;  %v20114_v17 = vld [vmem:[%s30890_s1 + $0x660] ss:$24 sps:$4 sm:$0xff]  }
 0x115   :  { %11712 = vmatprep.subr.bf16.mxu1 %v20026_v18  ;;  %v20117_v18 = vld [vmem:[%s30890_s1 + $0x960] ss:$24 sps:$4 sm:$0xff]  }
 0x11b   :  { %11584 = vmatpush1.bf16.xpose.msra.mxu0 %v20021_v19  ;;  %v20122_v19 = vld [vmem:[%s30890_s1 + $0x694] ss:$24 sps:$4 sm:$0xff]  }
 0x11c   :  { %11713 = vmatpush1.bf16.xpose.msra.mxu1 %v20024_v20  ;;  %11585 = vmatprep.subr.bf16.mxu0 %v20029_v21  ;;  %v20125_v20 = vld [vmem:[%s30890_s1 + $0x994] ss:$24 sps:$4 sm:$0xff]   ;;  %v20120_v21 = vld [vmem:[%s30890_s1 + $0x690] ss:$24 sps:$4 sm:$0xff]  }
 0x11d   :  { %11714 = vmatprep.subr.bf16.mxu1 %v20032_v22  ;;  %v20123_v22 = vld [vmem:[%s30890_s1 + $0x990] ss:$24 sps:$4 sm:$0xff]  }
 0x123   :  { %11586 = vmatpush1.bf16.xpose.msra.mxu0 %v20027_v23  ;;  %v20128_v23 = vld [vmem:[%s30890_s1 + $0x6c4] ss:$24 sps:$4 sm:$0xff]  }
 0x124   :  { %11715 = vmatpush1.bf16.xpose.msra.mxu1 %v20030_v24  ;;  %11587 = vmatprep.subr.bf16.mxu0 %v20035_v25  ;;  %v20131_v24 = vld [vmem:[%s30890_s1 + $0x9c4] ss:$24 sps:$4 sm:$0xff]   ;;  %v20126_v25 = vld [vmem:[%s30890_s1 + $0x6c0] ss:$24 sps:$4 sm:$0xff]  }
 0x125   :  { %11716 = vmatprep.subr.bf16.mxu1 %v20038_v26  ;;  %v20129_v26 = vld [vmem:[%s30890_s1 + $0x9c0] ss:$24 sps:$4 sm:$0xff]  }
 0x12b   :  { %11588 = vmatpush1.bf16.xpose.msra.mxu0 %v20033_v27  ;;  %v20134_v27 = vld [vmem:[%s30890_s1 + $0x6f4] ss:$24 sps:$4 sm:$0xff]  }
 0x12c   :  { %11717 = vmatpush1.bf16.xpose.msra.mxu1 %v20036_v28  ;;  %11589 = vmatprep.subr.bf16.mxu0 %v20041_v29  ;;  %v20137_v28 = vld [vmem:[%s30890_s1 + $0x9f4] ss:$24 sps:$4 sm:$0xff]   ;;  %v20132_v29 = vld [vmem:[%s30890_s1 + $0x6f0] ss:$24 sps:$4 sm:$0xff]  }
 0x12d   :  { %11718 = vmatprep.subr.bf16.mxu1 %v20044_v30  ;;  %v20135_v30 = vld [vmem:[%s30890_s1 + $0x9f0] ss:$24 sps:$4 sm:$0xff]  }
 0x133   :  { %11590 = vmatpush1.bf16.xpose.msra.mxu0 %v20039_v31  ;;  %v20140_v31 = vld [vmem:[%s30890_s1 + $0x724] ss:$24 sps:$4 sm:$0xff]  }
 0x134   :  { %11719 = vmatpush1.bf16.xpose.msra.mxu1 %v20042_v32  ;;  %11591 = vmatprep.subr.bf16.mxu0 %v20047_v33  ;;  %v20143_v32 = vld [vmem:[%s30890_s1 + $0xa24] ss:$24 sps:$4 sm:$0xff]   ;;  %v20138_v33 = vld [vmem:[%s30890_s1 + $0x720] ss:$24 sps:$4 sm:$0xff]  }
 0x135   :  { %11720 = vmatprep.subr.bf16.mxu1 %v20050_v34  ;;  %v20141_v34 = vld [vmem:[%s30890_s1 + $0xa20] ss:$24 sps:$4 sm:$0xff]  }
 0x13b   :  { %11592 = vmatpush1.bf16.xpose.msra.mxu0 %v20045_v35  ;;  %v20146_v35 = vld [vmem:[%s30890_s1 + $0x754] ss:$24 sps:$4 sm:$0xff]  }
 0x13c   :  { %11721 = vmatpush1.bf16.xpose.msra.mxu1 %v20048_v36  ;;  %11593 = vmatprep.subr.bf16.mxu0 %v20053_v37  ;;  %v20149_v36 = vld [vmem:[%s30890_s1 + $0xa54] ss:$24 sps:$4 sm:$0xff]   ;;  %v20144_v37 = vld [vmem:[%s30890_s1 + $0x750] ss:$24 sps:$4 sm:$0xff]  }
 0x13d   :  { %11722 = vmatprep.subr.bf16.mxu1 %v20056_v38  ;;  %v20147_v38 = vld [vmem:[%s30890_s1 + $0xa50] ss:$24 sps:$4 sm:$0xff]  }
 0x143   :  { %11594 = vmatpush1.bf16.xpose.msra.mxu0 %v20051_v39  ;;  %v20152_v39 = vld [vmem:[%s30890_s1 + $0x784] ss:$24 sps:$4 sm:$0xff]  }
 0x144   :  { %11723 = vmatpush1.bf16.xpose.msra.mxu1 %v20054_v40  ;;  %11595 = vmatprep.subr.bf16.mxu0 %v20059_v41  ;;  %v20155_v40 = vld [vmem:[%s30890_s1 + $0xa84] ss:$24 sps:$4 sm:$0xff]   ;;  %v20150_v41 = vld [vmem:[%s30890_s1 + $0x780] ss:$24 sps:$4 sm:$0xff]  }
 0x145   :  { %11724 = vmatprep.subr.bf16.mxu1 %v20062_v42  ;;  %v20153_v42 = vld [vmem:[%s30890_s1 + $0xa80] ss:$24 sps:$4 sm:$0xff]  }
 0x14b   :  { %11596 = vmatpush1.bf16.xpose.msra.mxu0 %v20057_v43  ;;  %v20158_v43 = vld [vmem:[%s30890_s1 + $0x7b4] ss:$24 sps:$4 sm:$0xff]  }
 0x14c   :  { %11725 = vmatpush1.bf16.xpose.msra.mxu1 %v20060_v44  ;;  %11597 = vmatprep.subr.bf16.mxu0 %v20065_v45  ;;  %v20161_v44 = vld [vmem:[%s30890_s1 + $0xab4] ss:$24 sps:$4 sm:$0xff]   ;;  %v20156_v45 = vld [vmem:[%s30890_s1 + $0x7b0] ss:$24 sps:$4 sm:$0xff]  }
 0x14d   :  { %11726 = vmatprep.subr.bf16.mxu1 %v20068_v46  ;;  %v20159_v46 = vld [vmem:[%s30890_s1 + $0xab0] ss:$24 sps:$4 sm:$0xff]  }
 0x153   :  { %11598 = vmatpush1.bf16.xpose.msra.mxu0 %v20063_v47  ;;  %v20164_v47 = vld [vmem:[%s30890_s1 + $0x7e4] ss:$24 sps:$4 sm:$0xff]  }
 0x154   :  { %11727 = vmatpush1.bf16.xpose.msra.mxu1 %v20066_v48  ;;  %11599 = vmatprep.subr.bf16.mxu0 %v20071_v49  ;;  %v20167_v48 = vld [vmem:[%s30890_s1 + $0xae4] ss:$24 sps:$4 sm:$0xff]   ;;  %v20162_v49 = vld [vmem:[%s30890_s1 + $0x7e0] ss:$24 sps:$4 sm:$0xff]  }
 0x155   :  { %11728 = vmatprep.subr.bf16.mxu1 %v20074_v50  ;;  %v20165_v50 = vld [vmem:[%s30890_s1 + $0xae0] ss:$24 sps:$4 sm:$0xff]  }
 0x15b   :  { %11600 = vmatpush1.bf16.xpose.msra.mxu0 %v20069_v51  ;;  %v20170_v51 = vld [vmem:[%s30890_s1 + $0x814] ss:$24 sps:$4 sm:$0xff]  }
 0x15c   :  { %11729 = vmatpush1.bf16.xpose.msra.mxu1 %v20072_v52  ;;  %11601 = vmatprep.subr.bf16.mxu0 %v20077_v53  ;;  %v20173_v52 = vld [vmem:[%s30890_s1 + $0xb14] ss:$24 sps:$4 sm:$0xff]   ;;  %v20168_v53 = vld [vmem:[%s30890_s1 + $0x810] ss:$24 sps:$4 sm:$0xff]  }
 0x15d   :  { %11730 = vmatprep.subr.bf16.mxu1 %v20080_v54  ;;  %v20171_v54 = vld [vmem:[%s30890_s1 + $0xb10] ss:$24 sps:$4 sm:$0xff]  }
 0x163   :  { %11602 = vmatpush1.bf16.xpose.msra.mxu0 %v20075_v55  ;;  %v20176_v55 = vld [vmem:[%s30890_s1 + $0x844] ss:$24 sps:$4 sm:$0xff]  }
 0x164   :  { %11731 = vmatpush1.bf16.xpose.msra.mxu1 %v20078_v56  ;;  %11603 = vmatprep.subr.bf16.mxu0 %v20083_v57  ;;  %v20179_v56 = vld [vmem:[%s30890_s1 + $0xb44] ss:$24 sps:$4 sm:$0xff]   ;;  %v20174_v57 = vld [vmem:[%s30890_s1 + $0x840] ss:$24 sps:$4 sm:$0xff]  }
 0x165   :  { %11732 = vmatprep.subr.bf16.mxu1 %v20086_v58  ;;  %v20177_v58 = vld [vmem:[%s30890_s1 + $0xb40] ss:$24 sps:$4 sm:$0xff]  }
 0x16b   :  { %11604 = vmatpush1.bf16.xpose.msra.mxu0 %v20081_v59  ;;  %v20182_v59 = vld [vmem:[%s30890_s1 + $0x874] ss:$24 sps:$4 sm:$0xff]  }
 0x16c   :  { %11733 = vmatpush1.bf16.xpose.msra.mxu1 %v20084_v60  ;;  %11605 = vmatprep.subr.bf16.mxu0 %v20089_v61  ;;  %v20185_v60 = vld [vmem:[%s30890_s1 + $0xb74] ss:$24 sps:$4 sm:$0xff]   ;;  %v20180_v61 = vld [vmem:[%s30890_s1 + $0x870] ss:$24 sps:$4 sm:$0xff]  }
 0x16d   :  { %11734 = vmatprep.subr.bf16.mxu1 %v20092_v62  ;;  %v20183_v62 = vld [vmem:[%s30890_s1 + $0xb70] ss:$24 sps:$4 sm:$0xff]  }
 0x173   :  { %11606 = vmatpush1.bf16.xpose.msra.mxu0 %v20087_v63  ;;  %v20188_v63 = vld [vmem:[%s30890_s1 + $0x8a4] ss:$24 sps:$4 sm:$0xff]  }
 0x174   :  { %11735 = vmatpush1.bf16.xpose.msra.mxu1 %v20090_v0  ;;  %11607 = vmatprep.subr.bf16.mxu0 %v20095_v1  ;;  %v20191_v0 = vld [vmem:[%s30890_s1 + $0xba4] ss:$24 sps:$4 sm:$0xff]   ;;  %v20186_v1 = vld [vmem:[%s30890_s1 + $0x8a0] ss:$24 sps:$4 sm:$0xff]  }
 0x175   :  { %11736 = vmatprep.subr.bf16.mxu1 %v20098_v2  ;;  %v20189_v2 = vld [vmem:[%s30890_s1 + $0xba0] ss:$24 sps:$4 sm:$0xff]  }
 0x17b   :  { %11608 = vmatpush1.bf16.xpose.msra.mxu0 %v20093_v3  ;;  %v20194_v3 = vld [vmem:[%s30890_s1 + $0x8d4] ss:$24 sps:$4 sm:$0xff]  }
 0x17c   :  { %11737 = vmatpush1.bf16.xpose.msra.mxu1 %v20096_v4  ;;  %11749 = vmatprep.subr.bf16.mxu0 %v20104_v5  ;;  %v20197_v4 = vld [vmem:[%s30890_s1 + $0xbd4] ss:$24 sps:$4 sm:$0xff]   ;;  %v20192_v5 = vld [vmem:[%s30890_s1 + $0x8d0] ss:$24 sps:$4 sm:$0xff]  }
 0x17d   :  { %11878 = vmatprep.subr.bf16.mxu1 %v20107_v6  ;;  %v20195_v6 = vld [vmem:[%s30890_s1 + $0xbd0] ss:$24 sps:$4 sm:$0xff]  }
 0x182   :  { %11610 = vmatmul.mubr.bf16.vlgmr.msra.gmra.mrb[0].mxu0 %v20101_v7 }
 0x183   :  { %11739 = vmatmul.mubr.bf16.vlgmr.msra.gmra.mrb[0].mxu1 %v20101_v7  ;;  %11750 = vmatpush1.bf16.xpose.msra.mxu0 %v20102_v8  ;;  %v20200_v7 = vld [vmem:[%s30890_s1 + $0x60c] ss:$24 sps:$4 sm:$0xff]  }
 0x184   :  { %11879 = vmatpush1.bf16.xpose.msra.mxu1 %v20105_v9  ;;  %11751 = vmatprep.subr.bf16.mxu0 %v20110_v10  ;;  %v20203_v8 = vld [vmem:[%s30890_s1 + $0x90c] ss:$24 sps:$4 sm:$0xff]   ;;  %v20198_v9 = vld [vmem:[%s30890_s1 + $0x608] ss:$24 sps:$4 sm:$0xff]  }
 0x185   :  { %11880 = vmatprep.subr.bf16.mxu1 %v20113_v11  ;;  %11781 = vmatprep.mubr.bf16.mxu0 %v22622_v14  ;;  %v20201_v10 = vld [vmem:[%s30890_s1 + $0x908] ss:$24 sps:$4 sm:$0xff]   ;;  %v20206_v11 = vld [vmem:[%s30890_s1 + $0x63c] ss:$24 sps:$4 sm:$0xff]  }
 0x186   :  { %11910 = vmatprep.mubr.bf16.mxu1 %v22622_v14  ;;  %v20204_v14 = vld [vmem:[%s30890_s1 + $0x638] ss:$24 sps:$4 sm:$0xff]  }
 0x18b   :  { %11752 = vmatpush1.bf16.xpose.msra.mxu0 %v20108_v12  ;;  %v20209_v12 = vld [vmem:[%s30890_s1 + $0x93c] ss:$24 sps:$4 sm:$0xff]  }
 0x18c   :  { %11881 = vmatpush1.bf16.xpose.msra.mxu1 %v20111_v13  ;;  %11753 = vmatprep.subr.bf16.mxu0 %v20116_v15  ;;  %v22623_v13 = vld [vmem:[%s30891_s0] ss:$24 sps:$4 sm:$0xff]  }
 0x18d   :  { %11882 = vmatprep.subr.bf16.mxu1 %v20119_v16  ;;  %v20207_v15 = vld [vmem:[%s30890_s1 + $0x938] ss:$24 sps:$4 sm:$0xff]   ;;  %v22624_v16 = vld [vmem:[%s30891_s0 + $0xc] ss:$24 sps:$4 sm:$0xff]  }
 0x193   :  { %11754 = vmatpush1.bf16.xpose.msra.mxu0 %v20114_v17  ;;  %v20212_v17 = vld [vmem:[%s30890_s1 + $0x66c] ss:$24 sps:$4 sm:$0xff]  }
 0x194   :  { %11883 = vmatpush1.bf16.xpose.msra.mxu1 %v20117_v18  ;;  %11755 = vmatprep.subr.bf16.mxu0 %v20122_v19  ;;  %v20215_v18 = vld [vmem:[%s30890_s1 + $0x96c] ss:$24 sps:$4 sm:$0xff]   ;;  %v20210_v19 = vld [vmem:[%s30890_s1 + $0x668] ss:$24 sps:$4 sm:$0xff]  }
 0x195   :  { %11884 = vmatprep.subr.bf16.mxu1 %v20125_v20  ;;  %v20213_v20 = vld [vmem:[%s30890_s1 + $0x968] ss:$24 sps:$4 sm:$0xff]  }
 0x19b   :  { %11756 = vmatpush1.bf16.xpose.msra.mxu0 %v20120_v21  ;;  %v20218_v21 = vld [vmem:[%s30890_s1 + $0x69c] ss:$24 sps:$4 sm:$0xff]  }
 0x19c   :  { %11885 = vmatpush1.bf16.xpose.msra.mxu1 %v20123_v22  ;;  %11757 = vmatprep.subr.bf16.mxu0 %v20128_v23  ;;  %v20221_v22 = vld [vmem:[%s30890_s1 + $0x99c] ss:$24 sps:$4 sm:$0xff]   ;;  %v20216_v23 = vld [vmem:[%s30890_s1 + $0x698] ss:$24 sps:$4 sm:$0xff]  }
 0x19d   :  { %11886 = vmatprep.subr.bf16.mxu1 %v20131_v24  ;;  %v20219_v24 = vld [vmem:[%s30890_s1 + $0x998] ss:$24 sps:$4 sm:$0xff]  }
 0x1a3   :  { %11758 = vmatpush1.bf16.xpose.msra.mxu0 %v20126_v25  ;;  %v20224_v25 = vld [vmem:[%s30890_s1 + $0x6cc] ss:$24 sps:$4 sm:$0xff]  }
 0x1a4   :  { %11887 = vmatpush1.bf16.xpose.msra.mxu1 %v20129_v26  ;;  %11759 = vmatprep.subr.bf16.mxu0 %v20134_v27  ;;  %v20227_v26 = vld [vmem:[%s30890_s1 + $0x9cc] ss:$24 sps:$4 sm:$0xff]   ;;  %v20222_v27 = vld [vmem:[%s30890_s1 + $0x6c8] ss:$24 sps:$4 sm:$0xff]  }
 0x1a5   :  { %11888 = vmatprep.subr.bf16.mxu1 %v20137_v28  ;;  %v20225_v28 = vld [vmem:[%s30890_s1 + $0x9c8] ss:$24 sps:$4 sm:$0xff]  }
 0x1ab   :  { %11760 = vmatpush1.bf16.xpose.msra.mxu0 %v20132_v29  ;;  %v20230_v29 = vld [vmem:[%s30890_s1 + $0x6fc] ss:$24 sps:$4 sm:$0xff]  }
 0x1ac   :  { %11889 = vmatpush1.bf16.xpose.msra.mxu1 %v20135_v30  ;;  %11761 = vmatprep.subr.bf16.mxu0 %v20140_v31  ;;  %v20233_v30 = vld [vmem:[%s30890_s1 + $0x9fc] ss:$24 sps:$4 sm:$0xff]   ;;  %v20228_v31 = vld [vmem:[%s30890_s1 + $0x6f8] ss:$24 sps:$4 sm:$0xff]  }
 0x1ad   :  { %11890 = vmatprep.subr.bf16.mxu1 %v20143_v32  ;;  %v20231_v32 = vld [vmem:[%s30890_s1 + $0x9f8] ss:$24 sps:$4 sm:$0xff]  }
 0x1b3   :  { %11762 = vmatpush1.bf16.xpose.msra.mxu0 %v20138_v33  ;;  %v20236_v33 = vld [vmem:[%s30890_s1 + $0x72c] ss:$24 sps:$4 sm:$0xff]  }
 0x1b4   :  { %11891 = vmatpush1.bf16.xpose.msra.mxu1 %v20141_v34  ;;  %11763 = vmatprep.subr.bf16.mxu0 %v20146_v35  ;;  %v20239_v34 = vld [vmem:[%s30890_s1 + $0xa2c] ss:$24 sps:$4 sm:$0xff]   ;;  %v20234_v35 = vld [vmem:[%s30890_s1 + $0x728] ss:$24 sps:$4 sm:$0xff]  }
 0x1b5   :  { %11892 = vmatprep.subr.bf16.mxu1 %v20149_v36  ;;  %v20237_v36 = vld [vmem:[%s30890_s1 + $0xa28] ss:$24 sps:$4 sm:$0xff]  }
 0x1bb   :  { %11764 = vmatpush1.bf16.xpose.msra.mxu0 %v20144_v37  ;;  %v20242_v37 = vld [vmem:[%s30890_s1 + $0x75c] ss:$24 sps:$4 sm:$0xff]  }
 0x1bc   :  { %11893 = vmatpush1.bf16.xpose.msra.mxu1 %v20147_v38  ;;  %11765 = vmatprep.subr.bf16.mxu0 %v20152_v39  ;;  %v20245_v38 = vld [vmem:[%s30890_s1 + $0xa5c] ss:$24 sps:$4 sm:$0xff]   ;;  %v20240_v39 = vld [vmem:[%s30890_s1 + $0x758] ss:$24 sps:$4 sm:$0xff]  }
 0x1bd   :  { %11894 = vmatprep.subr.bf16.mxu1 %v20155_v40  ;;  %v20243_v40 = vld [vmem:[%s30890_s1 + $0xa58] ss:$24 sps:$4 sm:$0xff]  }
 0x1c3   :  { %11766 = vmatpush1.bf16.xpose.msra.mxu0 %v20150_v41  ;;  %v20248_v41 = vld [vmem:[%s30890_s1 + $0x78c] ss:$24 sps:$4 sm:$0xff]  }
 0x1c4   :  { %11895 = vmatpush1.bf16.xpose.msra.mxu1 %v20153_v42  ;;  %11767 = vmatprep.subr.bf16.mxu0 %v20158_v43  ;;  %v20251_v42 = vld [vmem:[%s30890_s1 + $0xa8c] ss:$24 sps:$4 sm:$0xff]   ;;  %v20246_v43 = vld [vmem:[%s30890_s1 + $0x788] ss:$24 sps:$4 sm:$0xff]  }
 0x1c5   :  { %11896 = vmatprep.subr.bf16.mxu1 %v20161_v44  ;;  %v20249_v44 = vld [vmem:[%s30890_s1 + $0xa88] ss:$24 sps:$4 sm:$0xff]  }
 0x1cb   :  { %11768 = vmatpush1.bf16.xpose.msra.mxu0 %v20156_v45  ;;  %v20254_v45 = vld [vmem:[%s30890_s1 + $0x7bc] ss:$24 sps:$4 sm:$0xff]  }
 0x1cc   :  { %11897 = vmatpush1.bf16.xpose.msra.mxu1 %v20159_v46  ;;  %11769 = vmatprep.subr.bf16.mxu0 %v20164_v47  ;;  %v20257_v46 = vld [vmem:[%s30890_s1 + $0xabc] ss:$24 sps:$4 sm:$0xff]   ;;  %v20252_v47 = vld [vmem:[%s30890_s1 + $0x7b8] ss:$24 sps:$4 sm:$0xff]  }
 0x1cd   :  { %11898 = vmatprep.subr.bf16.mxu1 %v20167_v48  ;;  %v20255_v48 = vld [vmem:[%s30890_s1 + $0xab8] ss:$24 sps:$4 sm:$0xff]  }
 0x1d3   :  { %11770 = vmatpush1.bf16.xpose.msra.mxu0 %v20162_v49  ;;  %v20260_v49 = vld [vmem:[%s30890_s1 + $0x7ec] ss:$24 sps:$4 sm:$0xff]  }
 0x1d4   :  { %11899 = vmatpush1.bf16.xpose.msra.mxu1 %v20165_v50  ;;  %11771 = vmatprep.subr.bf16.mxu0 %v20170_v51  ;;  %v20263_v50 = vld [vmem:[%s30890_s1 + $0xaec] ss:$24 sps:$4 sm:$0xff]   ;;  %v20258_v51 = vld [vmem:[%s30890_s1 + $0x7e8] ss:$24 sps:$4 sm:$0xff]  }
 0x1d5   :  { %11900 = vmatprep.subr.bf16.mxu1 %v20173_v52  ;;  %v20261_v52 = vld [vmem:[%s30890_s1 + $0xae8] ss:$24 sps:$4 sm:$0xff]  }
 0x1db   :  { %11772 = vmatpush1.bf16.xpose.msra.mxu0 %v20168_v53  ;;  %v20266_v53 = vld [vmem:[%s30890_s1 + $0x81c] ss:$24 sps:$4 sm:$0xff]  }
 0x1dc   :  { %11901 = vmatpush1.bf16.xpose.msra.mxu1 %v20171_v54  ;;  %11773 = vmatprep.subr.bf16.mxu0 %v20176_v55  ;;  %v20269_v54 = vld [vmem:[%s30890_s1 + $0xb1c] ss:$24 sps:$4 sm:$0xff]  }
 0x1dd   :  { %11902 = vmatprep.subr.bf16.mxu1 %v20179_v56 }
 0x1e3   :  { %11774 = vmatpush1.bf16.xpose.msra.mxu0 %v20174_v57  ;;  %v20264_v57 = vld [vmem:[%s30890_s1 + $0x818] ss:$24 sps:$4 sm:$0xff]  }
 0x1e4   :  { %11903 = vmatpush1.bf16.xpose.msra.mxu1 %v20177_v58  ;;  %11775 = vmatprep.subr.bf16.mxu0 %v20182_v59  ;;  %v20267_v58 = vld [vmem:[%s30890_s1 + $0xb18] ss:$24 sps:$4 sm:$0xff]  }
 0x1e5   :  { %11904 = vmatprep.subr.bf16.mxu1 %v20185_v60 }
 0x1eb   :  { %11776 = vmatpush1.bf16.xpose.msra.mxu0 %v20180_v61  ;;  %v20272_v61 = vld [vmem:[%s30890_s1 + $0x84c] ss:$24 sps:$4 sm:$0xff]  }
 0x1ec   :  { %11905 = vmatpush1.bf16.xpose.msra.mxu1 %v20183_v62  ;;  %11777 = vmatprep.subr.bf16.mxu0 %v20188_v63 }
 0x1ed   :  { %11906 = vmatprep.subr.bf16.mxu1 %v20191_v0 }
 0x1f3   :  { %11778 = vmatpush1.bf16.xpose.msra.mxu0 %v20186_v1 }
 0x1f4   :  { %11907 = vmatpush1.bf16.xpose.msra.mxu1 %v20189_v2  ;;  %11779 = vmatprep.subr.bf16.mxu0 %v20194_v3  ;;  %v20275_v2 = vld [vmem:[%s30890_s1 + $0xb4c] ss:$24 sps:$4 sm:$0xff]   ;;  %v20270_v3 = vld [vmem:[%s30890_s1 + $0x848] ss:$24 sps:$4 sm:$0xff]  }
 0x1f5   :  { %11908 = vmatprep.subr.bf16.mxu1 %v20197_v4  ;;  %v20273_v4 = vld [vmem:[%s30890_s1 + $0xb48] ss:$24 sps:$4 sm:$0xff]  }
 0x1fb   :  { %11780 = vmatpush1.bf16.xpose.msra.mxu0 %v20192_v5  ;;  %v20278_v5 = vld [vmem:[%s30890_s1 + $0x87c] ss:$24 sps:$4 sm:$0xff]  }
 0x1fc   :  { %11909 = vmatpush1.bf16.xpose.msra.mxu1 %v20195_v6  ;;  %11792 = vmatprep.subr.bf16.mxu0 %v20200_v7  ;;  %v20281_v6 = vld [vmem:[%s30890_s1 + $0xb7c] ss:$24 sps:$4 sm:$0xff]   ;;  %v20276_v7 = vld [vmem:[%s30890_s1 + $0x878] ss:$24 sps:$4 sm:$0xff]  }
 0x1fd   :  { %11921 = vmatprep.subr.bf16.mxu1 %v20203_v8  ;;  %v20279_v8 = vld [vmem:[%s30890_s1 + $0xb78] ss:$24 sps:$4 sm:$0xff]  }
 0x202   :  { %11782 = vmatmul.mubr.bf16.vlgmr.msra.gmra.mrb[4].mxu0 %v22623_v13 }
 0x203   :  { %11911 = vmatmul.mubr.bf16.vlgmr.msra.gmra.mrb[4].mxu1 %v22623_v13  ;;  %11793 = vmatpush1.bf16.xpose.msra.mxu0 %v20198_v9  ;;  %v20284_v9 = vld [vmem:[%s30890_s1 + $0x8ac] ss:$24 sps:$4 sm:$0xff]   ;;  %v20290_v13 = vld [vmem:[%s30890_s1 + $0x8dc] ss:$24 sps:$4 sm:$0xff]  }
 0x204   :  { %11922 = vmatpush1.bf16.xpose.msra.mxu1 %v20201_v10  ;;  %11794 = vmatprep.subr.bf16.mxu0 %v20206_v11  ;;  %v20287_v10 = vld [vmem:[%s30890_s1 + $0xbac] ss:$24 sps:$4 sm:$0xff]   ;;  %v20282_v11 = vld [vmem:[%s30890_s1 + $0x8a8] ss:$24 sps:$4 sm:$0xff]  }
 0x205   :  { %11923 = vmatprep.subr.bf16.mxu1 %v20209_v12  ;;  %11824 = vmatprep.mubr.bf16.mxu0 %v22624_v16  ;;  %v20285_v12 = vld [vmem:[%s30890_s1 + $0xba8] ss:$24 sps:$4 sm:$0xff]  }
 0x206   :  { %11953 = vmatprep.mubr.bf16.mxu1 %v22624_v16  ;;  %v20291_v16 = vld [vmem:[%s30890_s1 + $0xbd8] ss:$24 sps:$4 sm:$0xff]  }
 0x20b   :  { %11795 = vmatpush1.bf16.xpose.msra.mxu0 %v20204_v14  ;;  %v20293_v14 = vld [vmem:[%s30890_s1 + $0xbdc] ss:$24 sps:$4 sm:$0xff]  }
 0x20c   :  { %11924 = vmatpush1.bf16.xpose.msra.mxu1 %v20207_v15  ;;  %11796 = vmatprep.subr.bf16.mxu0 %v20212_v17  ;;  %v20288_v15 = vld [vmem:[%s30890_s1 + $0x8d8] ss:$24 sps:$4 sm:$0xff]   ;;  %v20296_v17 = vld [vmem:[%s30890_s1 + $0x614] ss:$24 sps:$4 sm:$0xff]  }
 0x20d   :  { %11925 = vmatprep.subr.bf16.mxu1 %v20215_v18  ;;  %v20299_v18 = vld [vmem:[%s30890_s1 + $0x914] ss:$24 sps:$4 sm:$0xff]  }
 0x213   :  { %11797 = vmatpush1.bf16.xpose.msra.mxu0 %v20210_v19  ;;  %v20294_v19 = vld [vmem:[%s30890_s1 + $0x610] ss:$24 sps:$4 sm:$0xff]  }
 0x214   :  { %11926 = vmatpush1.bf16.xpose.msra.mxu1 %v20213_v20  ;;  %11798 = vmatprep.subr.bf16.mxu0 %v20218_v21  ;;  %v20297_v20 = vld [vmem:[%s30890_s1 + $0x910] ss:$24 sps:$4 sm:$0xff]   ;;  %v20302_v21 = vld [vmem:[%s30890_s1 + $0x644] ss:$24 sps:$4 sm:$0xff]  }
 0x215   :  { %11927 = vmatprep.subr.bf16.mxu1 %v20221_v22  ;;  %v20305_v22 = vld [vmem:[%s30890_s1 + $0x944] ss:$24 sps:$4 sm:$0xff]  }
 0x21b   :  { %11799 = vmatpush1.bf16.xpose.msra.mxu0 %v20216_v23  ;;  %v22625_v23 = vld [vmem:[%s30891_s0 + $0x8] ss:$24 sps:$4 sm:$0xff]  }
 0x21c   :  { %11928 = vmatpush1.bf16.xpose.msra.mxu1 %v20219_v24  ;;  %11800 = vmatprep.subr.bf16.mxu0 %v20224_v25  ;;  %v20300_v24 = vld [vmem:[%s30890_s1 + $0x640] ss:$24 sps:$4 sm:$0xff]  }
 0x21d   :  { %11929 = vmatprep.subr.bf16.mxu1 %v20227_v26  ;;  %v20303_v25 = vld [vmem:[%s30890_s1 + $0x940] ss:$24 sps:$4 sm:$0xff]   ;;  %v22626_v26 = vld [vmem:[%s30891_s0 + $0x14] ss:$24 sps:$4 sm:$0xff]  }
 0x223   :  { %11801 = vmatpush1.bf16.xpose.msra.mxu0 %v20222_v27  ;;  %v20308_v27 = vld [vmem:[%s30890_s1 + $0x674] ss:$24 sps:$4 sm:$0xff]  }
 0x224   :  { %11930 = vmatpush1.bf16.xpose.msra.mxu1 %v20225_v28  ;;  %11802 = vmatprep.subr.bf16.mxu0 %v20230_v29  ;;  %v20311_v28 = vld [vmem:[%s30890_s1 + $0x974] ss:$24 sps:$4 sm:$0xff]   ;;  %v20306_v29 = vld [vmem:[%s30890_s1 + $0x670] ss:$24 sps:$4 sm:$0xff]  }
 0x225   :  { %11931 = vmatprep.subr.bf16.mxu1 %v20233_v30  ;;  %v20309_v30 = vld [vmem:[%s30890_s1 + $0x970] ss:$24 sps:$4 sm:$0xff]  }
 0x22b   :  { %11803 = vmatpush1.bf16.xpose.msra.mxu0 %v20228_v31  ;;  %v20314_v31 = vld [vmem:[%s30890_s1 + $0x6a4] ss:$24 sps:$4 sm:$0xff]  }
 0x22c   :  { %11932 = vmatpush1.bf16.xpose.msra.mxu1 %v20231_v32  ;;  %11804 = vmatprep.subr.bf16.mxu0 %v20236_v33  ;;  %v20317_v32 = vld [vmem:[%s30890_s1 + $0x9a4] ss:$24 sps:$4 sm:$0xff]   ;;  %v20312_v33 = vld [vmem:[%s30890_s1 + $0x6a0] ss:$24 sps:$4 sm:$0xff]  }
 0x22d   :  { %11933 = vmatprep.subr.bf16.mxu1 %v20239_v34  ;;  %v20315_v34 = vld [vmem:[%s30890_s1 + $0x9a0] ss:$24 sps:$4 sm:$0xff]  }
 0x233   :  { %11805 = vmatpush1.bf16.xpose.msra.mxu0 %v20234_v35  ;;  %v20320_v35 = vld [vmem:[%s30890_s1 + $0x6d4] ss:$24 sps:$4 sm:$0xff]  }
 0x234   :  { %11934 = vmatpush1.bf16.xpose.msra.mxu1 %v20237_v36  ;;  %11806 = vmatprep.subr.bf16.mxu0 %v20242_v37  ;;  %v20323_v36 = vld [vmem:[%s30890_s1 + $0x9d4] ss:$24 sps:$4 sm:$0xff]   ;;  %v20318_v37 = vld [vmem:[%s30890_s1 + $0x6d0] ss:$24 sps:$4 sm:$0xff]  }
 0x235   :  { %11935 = vmatprep.subr.bf16.mxu1 %v20245_v38  ;;  %v20321_v38 = vld [vmem:[%s30890_s1 + $0x9d0] ss:$24 sps:$4 sm:$0xff]  }
 0x23b   :  { %11807 = vmatpush1.bf16.xpose.msra.mxu0 %v20240_v39  ;;  %v20326_v39 = vld [vmem:[%s30890_s1 + $0x704] ss:$24 sps:$4 sm:$0xff]  }
 0x23c   :  { %11936 = vmatpush1.bf16.xpose.msra.mxu1 %v20243_v40  ;;  %11808 = vmatprep.subr.bf16.mxu0 %v20248_v41  ;;  %v20329_v40 = vld [vmem:[%s30890_s1 + $0xa04] ss:$24 sps:$4 sm:$0xff]   ;;  %v20324_v41 = vld [vmem:[%s30890_s1 + $0x700] ss:$24 sps:$4 sm:$0xff]  }
 0x23d   :  { %11937 = vmatprep.subr.bf16.mxu1 %v20251_v42  ;;  %v20327_v42 = vld [vmem:[%s30890_s1 + $0xa00] ss:$24 sps:$4 sm:$0xff]  }
 0x243   :  { %11809 = vmatpush1.bf16.xpose.msra.mxu0 %v20246_v43  ;;  %v20332_v43 = vld [vmem:[%s30890_s1 + $0x734] ss:$24 sps:$4 sm:$0xff]  }
 0x244   :  { %11938 = vmatpush1.bf16.xpose.msra.mxu1 %v20249_v44  ;;  %11810 = vmatprep.subr.bf16.mxu0 %v20254_v45  ;;  %v20335_v44 = vld [vmem:[%s30890_s1 + $0xa34] ss:$24 sps:$4 sm:$0xff]   ;;  %v20330_v45 = vld [vmem:[%s30890_s1 + $0x730] ss:$24 sps:$4 sm:$0xff]  }
 0x245   :  { %11939 = vmatprep.subr.bf16.mxu1 %v20257_v46  ;;  %v20333_v46 = vld [vmem:[%s30890_s1 + $0xa30] ss:$24 sps:$4 sm:$0xff]  }
 0x24b   :  { %11811 = vmatpush1.bf16.xpose.msra.mxu0 %v20252_v47  ;;  %v20338_v47 = vld [vmem:[%s30890_s1 + $0x764] ss:$24 sps:$4 sm:$0xff]  }
 0x24c   :  { %11940 = vmatpush1.bf16.xpose.msra.mxu1 %v20255_v48  ;;  %11812 = vmatprep.subr.bf16.mxu0 %v20260_v49  ;;  %v20341_v48 = vld [vmem:[%s30890_s1 + $0xa64] ss:$24 sps:$4 sm:$0xff]   ;;  %v20336_v49 = vld [vmem:[%s30890_s1 + $0x760] ss:$24 sps:$4 sm:$0xff]  }
 0x24d   :  { %11941 = vmatprep.subr.bf16.mxu1 %v20263_v50  ;;  %v20339_v50 = vld [vmem:[%s30890_s1 + $0xa60] ss:$24 sps:$4 sm:$0xff]  }
 0x253   :  { %11813 = vmatpush1.bf16.xpose.msra.mxu0 %v20258_v51  ;;  %v20344_v51 = vld [vmem:[%s30890_s1 + $0x794] ss:$24 sps:$4 sm:$0xff]  }
 0x254   :  { %11942 = vmatpush1.bf16.xpose.msra.mxu1 %v20261_v52  ;;  %11814 = vmatprep.subr.bf16.mxu0 %v20266_v53  ;;  %v20347_v52 = vld [vmem:[%s30890_s1 + $0xa94] ss:$24 sps:$4 sm:$0xff]   ;;  %v20342_v53 = vld [vmem:[%s30890_s1 + $0x790] ss:$24 sps:$4 sm:$0xff]  }
 0x255   :  { %11943 = vmatprep.subr.bf16.mxu1 %v20269_v54  ;;  %v23613_v55 = vpop.f32.mrb[0].mxu0  ;;  %v20345_v54 = vld [vmem:[%s30890_s1 + $0xa90] ss:$24 sps:$4 sm:$0xff]  }
 0x256   :  { %v23615_v56 = vpop.f32.mrb[0].mxu1  ;;  %v23623_v59 = vpop.f32.mrb[1].mxu0 }
 0x257   :  { %v23625_v60 = vpop.f32.mrb[1].mxu1  ;;  %v23630_v62 = vpop.f32.mrb[2].mxu0 }
 0x258   :  { %v23632_v63 = vpop.f32.mrb[2].mxu1  ;;  %v23634_v0 = vpop.f32.mrb[3].mxu0 }
 0x259   :  { %v23636_v1 = vpop.f32.mrb[3].mxu1 }
 0x25b   :  { %11815 = vmatpush1.bf16.xpose.msra.mxu0 %v20264_v57  ;;  %v20350_v57 = vld [vmem:[%s30890_s1 + $0x7c4] ss:$24 sps:$4 sm:$0xff]  }
 0x25c   :  { %11944 = vmatpush1.bf16.xpose.msra.mxu1 %v20267_v58  ;;  %11816 = vmatprep.subr.bf16.mxu0 %v20272_v61  ;;  %v20353_v58 = vld [vmem:[%s30890_s1 + $0xac4] ss:$24 sps:$4 sm:$0xff]   ;;  %v20348_v61 = vld [vmem:[%s30890_s1 + $0x7c0] ss:$24 sps:$4 sm:$0xff]  }
 0x25d   :  { %11945 = vmatprep.subr.bf16.mxu1 %v20275_v2  ;;  %v20351_v2 = vld [vmem:[%s30890_s1 + $0xac0] ss:$24 sps:$4 sm:$0xff]  }
 0x263   :  { %11817 = vmatpush1.bf16.xpose.msra.mxu0 %v20270_v3  ;;  %v20356_v3 = vld [vmem:[%s30890_s1 + $0x7f4] ss:$24 sps:$4 sm:$0xff]  }
 0x264   :  { %11946 = vmatpush1.bf16.xpose.msra.mxu1 %v20273_v4  ;;  %11818 = vmatprep.subr.bf16.mxu0 %v20278_v5  ;;  %v20359_v4 = vld [vmem:[%s30890_s1 + $0xaf4] ss:$24 sps:$4 sm:$0xff]   ;;  %v20354_v5 = vld [vmem:[%s30890_s1 + $0x7f0] ss:$24 sps:$4 sm:$0xff]  }
 0x265   :  { %11947 = vmatprep.subr.bf16.mxu1 %v20281_v6  ;;  %v20357_v6 = vld [vmem:[%s30890_s1 + $0xaf0] ss:$24 sps:$4 sm:$0xff]  }
 0x26b   :  { %11819 = vmatpush1.bf16.xpose.msra.mxu0 %v20276_v7  ;;  %v20362_v7 = vld [vmem:[%s30890_s1 + $0x824] ss:$24 sps:$4 sm:$0xff]  }
 0x26c   :  { %11948 = vmatpush1.bf16.xpose.msra.mxu1 %v20279_v8  ;;  %11820 = vmatprep.subr.bf16.mxu0 %v20284_v9  ;;  %v20365_v8 = vld [vmem:[%s30890_s1 + $0xb24] ss:$24 sps:$4 sm:$0xff]   ;;  %v20360_v9 = vld [vmem:[%s30890_s1 + $0x820] ss:$24 sps:$4 sm:$0xff]  }
 0x26d   :  { %11949 = vmatprep.subr.bf16.mxu1 %v20287_v10  ;;  %v20363_v10 = vld [vmem:[%s30890_s1 + $0xb20] ss:$24 sps:$4 sm:$0xff]  }
 0x273   :  { %11821 = vmatpush1.bf16.xpose.msra.mxu0 %v20282_v11  ;;  %v20368_v11 = vld [vmem:[%s30890_s1 + $0x854] ss:$24 sps:$4 sm:$0xff]  }
 0x274   :  { %11950 = vmatpush1.bf16.xpose.msra.mxu1 %v20285_v12  ;;  %11822 = vmatprep.subr.bf16.mxu0 %v20290_v13  ;;  %v20371_v12 = vld [vmem:[%s30890_s1 + $0xb54] ss:$24 sps:$4 sm:$0xff]   ;;  %v20366_v13 = vld [vmem:[%s30890_s1 + $0x850] ss:$24 sps:$4 sm:$0xff]  }
 0x275   :  { %11951 = vmatprep.subr.bf16.mxu1 %v20293_v14  ;;  %v20369_v14 = vld [vmem:[%s30890_s1 + $0xb50] ss:$24 sps:$4 sm:$0xff]  }
 0x27b   :  { %11823 = vmatpush1.bf16.xpose.msra.mxu0 %v20288_v15  ;;  %v20374_v15 = vld [vmem:[%s30890_s1 + $0x884] ss:$24 sps:$4 sm:$0xff]  }
 0x27c   :  { %11952 = vmatpush1.bf16.xpose.msra.mxu1 %v20291_v16  ;;  %11835 = vmatprep.subr.bf16.mxu0 %v20296_v17  ;;  %v20377_v16 = vld [vmem:[%s30890_s1 + $0xb84] ss:$24 sps:$4 sm:$0xff]   ;;  %v20372_v17 = vld [vmem:[%s30890_s1 + $0x880] ss:$24 sps:$4 sm:$0xff]  }
 0x27d   :  { %11964 = vmatprep.subr.bf16.mxu1 %v20299_v18  ;;  %v20375_v18 = vld [vmem:[%s30890_s1 + $0xb80] ss:$24 sps:$4 sm:$0xff]  }
 0x282   :  { %11825 = vmatmul.mubr.bf16.vlgmr.msra.gmra.mrb[4].mxu0 %v22625_v23 }
 0x283   :  { %11954 = vmatmul.mubr.bf16.vlgmr.msra.gmra.mrb[4].mxu1 %v22625_v23  ;;  %11836 = vmatpush1.bf16.xpose.msra.mxu0 %v20294_v19  ;;  %v20380_v19 = vld [vmem:[%s30890_s1 + $0x8b4] ss:$24 sps:$4 sm:$0xff]   ;;  %v20386_v23 = vld [vmem:[%s30890_s1 + $0x8e4] ss:$24 sps:$4 sm:$0xff]  }
 0x284   :  { %11965 = vmatpush1.bf16.xpose.msra.mxu1 %v20297_v20  ;;  %11837 = vmatprep.subr.bf16.mxu0 %v20302_v21  ;;  %v20383_v20 = vld [vmem:[%s30890_s1 + $0xbb4] ss:$24 sps:$4 sm:$0xff]   ;;  %v20378_v21 = vld [vmem:[%s30890_s1 + $0x8b0] ss:$24 sps:$4 sm:$0xff]  }
 0x285   :  { %11966 = vmatprep.subr.bf16.mxu1 %v20305_v22  ;;  %11867 = vmatprep.mubr.bf16.mxu0 %v22626_v26  ;;  %v20381_v22 = vld [vmem:[%s30890_s1 + $0xbb0] ss:$24 sps:$4 sm:$0xff]  }
 0x286   :  { %11996 = vmatprep.mubr.bf16.mxu1 %v22626_v26  ;;  %v20387_v26 = vld [vmem:[%s30890_s1 + $0xbe0] ss:$24 sps:$4 sm:$0xff]  }
 0x28b   :  { %11838 = vmatpush1.bf16.xpose.msra.mxu0 %v20300_v24  ;;  %v20389_v24 = vld [vmem:[%s30890_s1 + $0xbe4] ss:$24 sps:$4 sm:$0xff]  }
 0x28c   :  { %11967 = vmatpush1.bf16.xpose.msra.mxu1 %v20303_v25  ;;  %11839 = vmatprep.subr.bf16.mxu0 %v20308_v27  ;;  %v20384_v25 = vld [vmem:[%s30890_s1 + $0x8e0] ss:$24 sps:$4 sm:$0xff]   ;;  %v20392_v27 = vld [vmem:[%s30890_s1 + $0xc04] ss:$24 sps:$4 sm:$0xff]  }
 0x28d   :  { %11968 = vmatprep.subr.bf16.mxu1 %v20311_v28  ;;  %v20395_v28 = vld [vmem:[%s30890_s1 + $0xf04] ss:$24 sps:$4 sm:$0xff]  }
 0x293   :  { %11840 = vmatpush1.bf16.xpose.msra.mxu0 %v20306_v29  ;;  %v20390_v29 = vld [vmem:[%s30890_s1 + $0xc00] ss:$24 sps:$4 sm:$0xff]  }
 0x294   :  { %11969 = vmatpush1.bf16.xpose.msra.mxu1 %v20309_v30  ;;  %11841 = vmatprep.subr.bf16.mxu0 %v20314_v31  ;;  %v20393_v30 = vld [vmem:[%s30890_s1 + $0xf00] ss:$24 sps:$4 sm:$0xff]   ;;  %v20398_v31 = vld [vmem:[%s30890_s1 + $0xc34] ss:$24 sps:$4 sm:$0xff]  }
 0x295   :  { %11970 = vmatprep.subr.bf16.mxu1 %v20317_v32  ;;  %v20401_v32 = vld [vmem:[%s30890_s1 + $0xf34] ss:$24 sps:$4 sm:$0xff]  }
 0x29b   :  { %11842 = vmatpush1.bf16.xpose.msra.mxu0 %v20312_v33  ;;  %v23902_v33 = vld [vmem:[%s30891_s0 + $0x10] ss:$24 sps:$4 sm:$0xff]  }
 0x29c   :  { %11971 = vmatpush1.bf16.xpose.msra.mxu1 %v20315_v34  ;;  %11843 = vmatprep.subr.bf16.mxu0 %v20320_v35  ;;  %v20396_v34 = vld [vmem:[%s30890_s1 + $0xc30] ss:$24 sps:$4 sm:$0xff]  }
 0x29d   :  { %11972 = vmatprep.subr.bf16.mxu1 %v20323_v36  ;;  %v20399_v35 = vld [vmem:[%s30890_s1 + $0xf30] ss:$24 sps:$4 sm:$0xff]   ;;  %v23915_v36 = vld [vmem:[%s30891_s0 + $0x4] ss:$24 sps:$4 sm:$0xff]  }
 0x2a3   :  { %11844 = vmatpush1.bf16.xpose.msra.mxu0 %v20318_v37  ;;  %v20404_v37 = vld [vmem:[%s30890_s1 + $0xc64] ss:$24 sps:$4 sm:$0xff]  }
 0x2a4   :  { %11973 = vmatpush1.bf16.xpose.msra.mxu1 %v20321_v38  ;;  %11845 = vmatprep.subr.bf16.mxu0 %v20326_v39  ;;  %v20407_v38 = vld [vmem:[%s30890_s1 + $0xf64] ss:$24 sps:$4 sm:$0xff]   ;;  %v20402_v39 = vld [vmem:[%s30890_s1 + $0xc60] ss:$24 sps:$4 sm:$0xff]  }
 0x2a5   :  { %11974 = vmatprep.subr.bf16.mxu1 %v20329_v40  ;;  %v20405_v40 = vld [vmem:[%s30890_s1 + $0xf60] ss:$24 sps:$4 sm:$0xff]  }
 0x2ab   :  { %11846 = vmatpush1.bf16.xpose.msra.mxu0 %v20324_v41  ;;  %v20410_v41 = vld [vmem:[%s30890_s1 + $0xc94] ss:$24 sps:$4 sm:$0xff]  }
 0x2ac   :  { %11975 = vmatpush1.bf16.xpose.msra.mxu1 %v20327_v42  ;;  %11847 = vmatprep.subr.bf16.mxu0 %v20332_v43  ;;  %v20413_v42 = vld [vmem:[%s30890_s1 + $0xf94] ss:$24 sps:$4 sm:$0xff]   ;;  %v20408_v43 = vld [vmem:[%s30890_s1 + $0xc90] ss:$24 sps:$4 sm:$0xff]  }
 0x2ad   :  { %11976 = vmatprep.subr.bf16.mxu1 %v20335_v44  ;;  %v20411_v44 = vld [vmem:[%s30890_s1 + $0xf90] ss:$24 sps:$4 sm:$0xff]  }
 0x2b3   :  { %11848 = vmatpush1.bf16.xpose.msra.mxu0 %v20330_v45  ;;  %v20416_v45 = vld [vmem:[%s30890_s1 + $0xcc4] ss:$24 sps:$4 sm:$0xff]  }
 0x2b4   :  { %11977 = vmatpush1.bf16.xpose.msra.mxu1 %v20333_v46  ;;  %11849 = vmatprep.subr.bf16.mxu0 %v20338_v47  ;;  %v20419_v46 = vld [vmem:[%s30890_s1 + $0xfc4] ss:$24 sps:$4 sm:$0xff]   ;;  %v20414_v47 = vld [vmem:[%s30890_s1 + $0xcc0] ss:$24 sps:$4 sm:$0xff]  }
 0x2b5   :  { %11978 = vmatprep.subr.bf16.mxu1 %v20341_v48  ;;  %v20417_v48 = vld [vmem:[%s30890_s1 + $0xfc0] ss:$24 sps:$4 sm:$0xff]  }
 0x2bb   :  { %11850 = vmatpush1.bf16.xpose.msra.mxu0 %v20336_v49  ;;  %v20422_v49 = vld [vmem:[%s30890_s1 + $0xcf4] ss:$24 sps:$4 sm:$0xff]  }
 0x2bc   :  { %11979 = vmatpush1.bf16.xpose.msra.mxu1 %v20339_v50  ;;  %11851 = vmatprep.subr.bf16.mxu0 %v20344_v51  ;;  %v20425_v50 = vld [vmem:[%s30890_s1 + $0xff4] ss:$24 sps:$4 sm:$0xff]   ;;  %v20420_v51 = vld [vmem:[%s30890_s1 + $0xcf0] ss:$24 sps:$4 sm:$0xff]  }
 0x2bd   :  { %11980 = vmatprep.subr.bf16.mxu1 %v20347_v52  ;;  %v20423_v52 = vld [vmem:[%s30890_s1 + $0xff0] ss:$24 sps:$4 sm:$0xff]  }
 0x2c3   :  { %11852 = vmatpush1.bf16.xpose.msra.mxu0 %v20342_v53  ;;  %v20428_v53 = vld [vmem:[%s30890_s1 + $0xd24] ss:$24 sps:$4 sm:$0xff]  }
 0x2c4   :  { %11981 = vmatpush1.bf16.xpose.msra.mxu1 %v20345_v54  ;;  %11853 = vmatprep.subr.bf16.mxu0 %v20350_v57  ;;  %v20431_v54 = vld [vmem:[%s30890_s1 + $0x1024] ss:$24 sps:$4 sm:$0xff]   ;;  %v20426_v57 = vld [vmem:[%s30890_s1 + $0xd20] ss:$24 sps:$4 sm:$0xff]  }
 0x2c5   :  { %11982 = vmatprep.subr.bf16.mxu1 %v20353_v58  ;;  %v20429_v58 = vld [vmem:[%s30890_s1 + $0x1020] ss:$24 sps:$4 sm:$0xff]  }
 0x2cb   :  { %11854 = vmatpush1.bf16.xpose.msra.mxu0 %v20348_v61  ;;  %v20434_v61 = vld [vmem:[%s30890_s1 + $0xd54] ss:$24 sps:$4 sm:$0xff]  }
 0x2cc   :  { %11983 = vmatpush1.bf16.xpose.msra.mxu1 %v20351_v2  ;;  %11855 = vmatprep.subr.bf16.mxu0 %v20356_v3  ;;  %v20437_v2 = vld [vmem:[%s30890_s1 + $0x1054] ss:$24 sps:$4 sm:$0xff]   ;;  %v20432_v3 = vld [vmem:[%s30890_s1 + $0xd50] ss:$24 sps:$4 sm:$0xff]  }
 0x2cd   :  { %11984 = vmatprep.subr.bf16.mxu1 %v20359_v4  ;;  %v20435_v4 = vld [vmem:[%s30890_s1 + $0x1050] ss:$24 sps:$4 sm:$0xff]  }
 0x2d3   :  { %11856 = vmatpush1.bf16.xpose.msra.mxu0 %v20354_v5  ;;  %v20440_v5 = vld [vmem:[%s30890_s1 + $0xd84] ss:$24 sps:$4 sm:$0xff]  }
 0x2d4   :  { %11985 = vmatpush1.bf16.xpose.msra.mxu1 %v20357_v6  ;;  %11857 = vmatprep.subr.bf16.mxu0 %v20362_v7  ;;  %v20443_v6 = vld [vmem:[%s30890_s1 + $0x1084] ss:$24 sps:$4 sm:$0xff]   ;;  %v20438_v7 = vld [vmem:[%s30890_s1 + $0xd80] ss:$24 sps:$4 sm:$0xff]  }
 0x2d5   :  { %11986 = vmatprep.subr.bf16.mxu1 %v20365_v8  ;;  %v20441_v8 = vld [vmem:[%s30890_s1 + $0x1080] ss:$24 sps:$4 sm:$0xff]  }
 0x2db   :  { %11858 = vmatpush1.bf16.xpose.msra.mxu0 %v20360_v9  ;;  %v20446_v9 = vld [vmem:[%s30890_s1 + $0xdb4] ss:$24 sps:$4 sm:$0xff]  }
 0x2dc   :  { %11987 = vmatpush1.bf16.xpose.msra.mxu1 %v20363_v10  ;;  %11859 = vmatprep.subr.bf16.mxu0 %v20368_v11  ;;  %v20449_v10 = vld [vmem:[%s30890_s1 + $0x10b4] ss:$24 sps:$4 sm:$0xff]   ;;  %v20444_v11 = vld [vmem:[%s30890_s1 + $0xdb0] ss:$24 sps:$4 sm:$0xff]  }
 0x2dd   :  { %11988 = vmatprep.subr.bf16.mxu1 %v20371_v12  ;;  %v20447_v12 = vld [vmem:[%s30890_s1 + $0x10b0] ss:$24 sps:$4 sm:$0xff]  }
 0x2e3   :  { %11860 = vmatpush1.bf16.xpose.msra.mxu0 %v20366_v13  ;;  %v20452_v13 = vld [vmem:[%s30890_s1 + $0xde4] ss:$24 sps:$4 sm:$0xff]  }
 0x2e4   :  { %11989 = vmatpush1.bf16.xpose.msra.mxu1 %v20369_v14  ;;  %11861 = vmatprep.subr.bf16.mxu0 %v20374_v15  ;;  %v20455_v14 = vld [vmem:[%s30890_s1 + $0x10e4] ss:$24 sps:$4 sm:$0xff]   ;;  %v20450_v15 = vld [vmem:[%s30890_s1 + $0xde0] ss:$24 sps:$4 sm:$0xff]  }
 0x2e5   :  { %11990 = vmatprep.subr.bf16.mxu1 %v20377_v16  ;;  %v20453_v16 = vld [vmem:[%s30890_s1 + $0x10e0] ss:$24 sps:$4 sm:$0xff]  }
 0x2eb   :  { %11862 = vmatpush1.bf16.xpose.msra.mxu0 %v20372_v17  ;;  %v20458_v17 = vld [vmem:[%s30890_s1 + $0xe14] ss:$24 sps:$4 sm:$0xff]  }
 0x2ec   :  { %11991 = vmatpush1.bf16.xpose.msra.mxu1 %v20375_v18  ;;  %11863 = vmatprep.subr.bf16.mxu0 %v20380_v19  ;;  %v20461_v18 = vld [vmem:[%s30890_s1 + $0x1114] ss:$24 sps:$4 sm:$0xff]   ;;  %v20456_v19 = vld [vmem:[%s30890_s1 + $0xe10] ss:$24 sps:$4 sm:$0xff]  }
 0x2ed   :  { %11992 = vmatprep.subr.bf16.mxu1 %v20383_v20  ;;  %v20459_v20 = vld [vmem:[%s30890_s1 + $0x1110] ss:$24 sps:$4 sm:$0xff]  }
 0x2f3   :  { %11864 = vmatpush1.bf16.xpose.msra.mxu0 %v20378_v21  ;;  %v20464_v21 = vld [vmem:[%s30890_s1 + $0xe44] ss:$24 sps:$4 sm:$0xff]  }
 0x2f4   :  { %11993 = vmatpush1.bf16.xpose.msra.mxu1 %v20381_v22  ;;  %11865 = vmatprep.subr.bf16.mxu0 %v20386_v23  ;;  %v20467_v22 = vld [vmem:[%s30890_s1 + $0x1144] ss:$24 sps:$4 sm:$0xff]   ;;  %v20462_v23 = vld [vmem:[%s30890_s1 + $0xe40] ss:$24 sps:$4 sm:$0xff]  }
 0x2f5   :  { %11994 = vmatprep.subr.bf16.mxu1 %v20389_v24  ;;  %v20465_v24 = vld [vmem:[%s30890_s1 + $0x1140] ss:$24 sps:$4 sm:$0xff]  }
 0x2fb   :  { %11866 = vmatpush1.bf16.xpose.msra.mxu0 %v20384_v25  ;;  %v20470_v25 = vld [vmem:[%s30890_s1 + $0xe74] ss:$24 sps:$4 sm:$0xff]  }
 0x2fc   :  { %11995 = vmatpush1.bf16.xpose.msra.mxu1 %v20387_v26  ;;  %12007 = vmatprep.subr.bf16.mxu0 %v20392_v27  ;;  %v20473_v26 = vld [vmem:[%s30890_s1 + $0x1174] ss:$24 sps:$4 sm:$0xff]   ;;  %v20468_v27 = vld [vmem:[%s30890_s1 + $0xe70] ss:$24 sps:$4 sm:$0xff]  }
 0x2fd   :  { %12136 = vmatprep.subr.bf16.mxu1 %v20395_v28  ;;  %v20471_v28 = vld [vmem:[%s30890_s1 + $0x1170] ss:$24 sps:$4 sm:$0xff]  }
 0x302   :  { %11868 = vmatmul.mubr.bf16.vlgmr.msra.gmra.mrb[4].mxu0 %v23902_v33 }
 0x303   :  { %11997 = vmatmul.mubr.bf16.vlgmr.msra.gmra.mrb[4].mxu1 %v23902_v33  ;;  %12008 = vmatpush1.bf16.xpose.msra.mxu0 %v20390_v29  ;;  %v20476_v29 = vld [vmem:[%s30890_s1 + $0xea4] ss:$24 sps:$4 sm:$0xff]  }
 0x304   :  { %12137 = vmatpush1.bf16.xpose.msra.mxu1 %v20393_v30  ;;  %12009 = vmatprep.subr.bf16.mxu0 %v20398_v31  ;;  %v20479_v30 = vld [vmem:[%s30890_s1 + $0x11a4] ss:$24 sps:$4 sm:$0xff]   ;;  %v20474_v31 = vld [vmem:[%s30890_s1 + $0xea0] ss:$24 sps:$4 sm:$0xff]  }
 0x305   :  { %12138 = vmatprep.subr.bf16.mxu1 %v20401_v32  ;;  %12039 = vmatprep.mubr.bf16.mxu0 %v23915_v36  ;;  %v20477_v32 = vld [vmem:[%s30890_s1 + $0x11a0] ss:$24 sps:$4 sm:$0xff]  }
 0x306   :  { %12168 = vmatprep.mubr.bf16.mxu1 %v23915_v36 }
 0x30b   :  { %12010 = vmatpush1.bf16.xpose.msra.mxu0 %v20396_v34  ;;  %v20482_v34 = vld [vmem:[%s30890_s1 + $0xed4] ss:$24 sps:$4 sm:$0xff]  }
 0x30c   :  { %12139 = vmatpush1.bf16.xpose.msra.mxu1 %v20399_v35  ;;  %12011 = vmatprep.subr.bf16.mxu0 %v20404_v37  ;;  %v20485_v35 = vld [vmem:[%s30890_s1 + $0x11d4] ss:$24 sps:$4 sm:$0xff]   ;;  %v20480_v37 = vld [vmem:[%s30890_s1 + $0xed0] ss:$24 sps:$4 sm:$0xff]  }
 0x30d   :  { %12140 = vmatprep.subr.bf16.mxu1 %v20407_v38  ;;  %v20483_v38 = vld [vmem:[%s30890_s1 + $0x11d0] ss:$24 sps:$4 sm:$0xff]  }
 0x313   :  { %12012 = vmatpush1.bf16.xpose.msra.mxu0 %v20402_v39  ;;  %v20488_v39 = vld [vmem:[%s30890_s1 + $0xc0c] ss:$24 sps:$4 sm:$0xff]  }
 0x314   :  { %12141 = vmatpush1.bf16.xpose.msra.mxu1 %v20405_v40  ;;  %12013 = vmatprep.subr.bf16.mxu0 %v20410_v41  ;;  %v20491_v40 = vld [vmem:[%s30890_s1 + $0xf0c] ss:$24 sps:$4 sm:$0xff]   ;;  %v20486_v41 = vld [vmem:[%s30890_s1 + $0xc08] ss:$24 sps:$4 sm:$0xff]  }
 0x315   :  { %12142 = vmatprep.subr.bf16.mxu1 %v20413_v42  ;;  %v20489_v42 = vld [vmem:[%s30890_s1 + $0xf08] ss:$24 sps:$4 sm:$0xff]  }
 0x31b   :  { %12014 = vmatpush1.bf16.xpose.msra.mxu0 %v20408_v43  ;;  %v20494_v43 = vld [vmem:[%s30890_s1 + $0xc3c] ss:$24 sps:$4 sm:$0xff]  }
 0x31c   :  { %12143 = vmatpush1.bf16.xpose.msra.mxu1 %v20411_v44  ;;  %12015 = vmatprep.subr.bf16.mxu0 %v20416_v45  ;;  %v20497_v44 = vld [vmem:[%s30890_s1 + $0xf3c] ss:$24 sps:$4 sm:$0xff]   ;;  %v24108_v45 = vld [vmem:[%s30891_s0] ss:$24 sps:$4 sm:$0xff]  }
 0x31d   :  { %12144 = vmatprep.subr.bf16.mxu1 %v20419_v46  ;;  %v24115_v46 = vld [vmem:[%s30891_s0 + $0xc] ss:$24 sps:$4 sm:$0xff]  }
 0x323   :  { %12016 = vmatpush1.bf16.xpose.msra.mxu0 %v20414_v47  ;;  %v20492_v47 = vld [vmem:[%s30890_s1 + $0xc38] ss:$24 sps:$4 sm:$0xff]  }
 0x324   :  { %12145 = vmatpush1.bf16.xpose.msra.mxu1 %v20417_v48  ;;  %12017 = vmatprep.subr.bf16.mxu0 %v20422_v49  ;;  %v20495_v48 = vld [vmem:[%s30890_s1 + $0xf38] ss:$24 sps:$4 sm:$0xff]   ;;  %v20500_v49 = vld [vmem:[%s30890_s1 + $0xc6c] ss:$24 sps:$4 sm:$0xff]  }
 0x325   :  { %12146 = vmatprep.subr.bf16.mxu1 %v20425_v50  ;;  %v20503_v50 = vld [vmem:[%s30890_s1 + $0xf6c] ss:$24 sps:$4 sm:$0xff]  }
 0x32b   :  { %12018 = vmatpush1.bf16.xpose.msra.mxu0 %v20420_v51  ;;  %v20498_v51 = vld [vmem:[%s30890_s1 + $0xc68] ss:$24 sps:$4 sm:$0xff]  }
 0x32c   :  { %12147 = vmatpush1.bf16.xpose.msra.mxu1 %v20423_v52  ;;  %12019 = vmatprep.subr.bf16.mxu0 %v20428_v53  ;;  %v20501_v52 = vld [vmem:[%s30890_s1 + $0xf68] ss:$24 sps:$4 sm:$0xff]   ;;  %v20506_v53 = vld [vmem:[%s30890_s1 + $0xc9c] ss:$24 sps:$4 sm:$0xff]  }
 0x32d   :  { %12148 = vmatprep.subr.bf16.mxu1 %v20431_v54  ;;  %v20509_v54 = vld [vmem:[%s30890_s1 + $0xf9c] ss:$24 sps:$4 sm:$0xff]  }
 0x333   :  { %12020 = vmatpush1.bf16.xpose.msra.mxu0 %v20426_v57  ;;  %v20504_v57 = vld [vmem:[%s30890_s1 + $0xc98] ss:$24 sps:$4 sm:$0xff]  }
 0x334   :  { %12149 = vmatpush1.bf16.xpose.msra.mxu1 %v20429_v58  ;;  %12021 = vmatprep.subr.bf16.mxu0 %v20434_v61  ;;  %v20507_v58 = vld [vmem:[%s30890_s1 + $0xf98] ss:$24 sps:$4 sm:$0xff]   ;;  %v20512_v61 = vld [vmem:[%s30890_s1 + $0xccc] ss:$24 sps:$4 sm:$0xff]  }
 0x335   :  { %12150 = vmatprep.subr.bf16.mxu1 %v20437_v2  ;;  %v20515_v2 = vld [vmem:[%s30890_s1 + $0xfcc] ss:$24 sps:$4 sm:$0xff]  }
 0x33b   :  { %12022 = vmatpush1.bf16.xpose.msra.mxu0 %v20432_v3  ;;  %v20510_v3 = vld [vmem:[%s30890_s1 + $0xcc8] ss:$24 sps:$4 sm:$0xff]  }
 0x33c   :  { %12151 = vmatpush1.bf16.xpose.msra.mxu1 %v20435_v4  ;;  %12023 = vmatprep.subr.bf16.mxu0 %v20440_v5  ;;  %v20513_v4 = vld [vmem:[%s30890_s1 + $0xfc8] ss:$24 sps:$4 sm:$0xff]   ;;  %v20518_v5 = vld [vmem:[%s30890_s1 + $0xcfc] ss:$24 sps:$4 sm:$0xff]  }
 0x33d   :  { %12152 = vmatprep.subr.bf16.mxu1 %v20443_v6  ;;  %v20521_v6 = vld [vmem:[%s30890_s1 + $0xffc] ss:$24 sps:$4 sm:$0xff]  }
 0x343   :  { %12024 = vmatpush1.bf16.xpose.msra.mxu0 %v20438_v7  ;;  %v20516_v7 = vld [vmem:[%s30890_s1 + $0xcf8] ss:$24 sps:$4 sm:$0xff]  }
 0x344   :  { %12153 = vmatpush1.bf16.xpose.msra.mxu1 %v20441_v8  ;;  %12025 = vmatprep.subr.bf16.mxu0 %v20446_v9  ;;  %v20519_v8 = vld [vmem:[%s30890_s1 + $0xff8] ss:$24 sps:$4 sm:$0xff]   ;;  %v20524_v9 = vld [vmem:[%s30890_s1 + $0xd2c] ss:$24 sps:$4 sm:$0xff]  }
 0x345   :  { %12154 = vmatprep.subr.bf16.mxu1 %v20449_v10  ;;  %v20527_v10 = vld [vmem:[%s30890_s1 + $0x102c] ss:$24 sps:$4 sm:$0xff]  }
 0x34b   :  { %12026 = vmatpush1.bf16.xpose.msra.mxu0 %v20444_v11  ;;  %v20522_v11 = vld [vmem:[%s30890_s1 + $0xd28] ss:$24 sps:$4 sm:$0xff]  }
 0x34c   :  { %12155 = vmatpush1.bf16.xpose.msra.mxu1 %v20447_v12  ;;  %12027 = vmatprep.subr.bf16.mxu0 %v20452_v13  ;;  %v20525_v12 = vld [vmem:[%s30890_s1 + $0x1028] ss:$24 sps:$4 sm:$0xff]   ;;  %v20530_v13 = vld [vmem:[%s30890_s1 + $0xd5c] ss:$24 sps:$4 sm:$0xff]  }
 0x34d   :  { %12156 = vmatprep.subr.bf16.mxu1 %v20455_v14  ;;  %v20533_v14 = vld [vmem:[%s30890_s1 + $0x105c] ss:$24 sps:$4 sm:$0xff]  }
 0x353   :  { %12028 = vmatpush1.bf16.xpose.msra.mxu0 %v20450_v15  ;;  %v20528_v15 = vld [vmem:[%s30890_s1 + $0xd58] ss:$24 sps:$4 sm:$0xff]  }
 0x354   :  { %12157 = vmatpush1.bf16.xpose.msra.mxu1 %v20453_v16  ;;  %12029 = vmatprep.subr.bf16.mxu0 %v20458_v17  ;;  %v20531_v16 = vld [vmem:[%s30890_s1 + $0x1058] ss:$24 sps:$4 sm:$0xff]   ;;  %v20536_v17 = vld [vmem:[%s30890_s1 + $0xd8c] ss:$24 sps:$4 sm:$0xff]  }
 0x355   :  { %12158 = vmatprep.subr.bf16.mxu1 %v20461_v18  ;;  %v20539_v18 = vld [vmem:[%s30890_s1 + $0x108c] ss:$24 sps:$4 sm:$0xff]  }
 0x35b   :  { %12030 = vmatpush1.bf16.xpose.msra.mxu0 %v20456_v19  ;;  %v20534_v19 = vld [vmem:[%s30890_s1 + $0xd88] ss:$24 sps:$4 sm:$0xff]  }
 0x35c   :  { %12159 = vmatpush1.bf16.xpose.msra.mxu1 %v20459_v20  ;;  %12031 = vmatprep.subr.bf16.mxu0 %v20464_v21  ;;  %v20537_v20 = vld [vmem:[%s30890_s1 + $0x1088] ss:$24 sps:$4 sm:$0xff]   ;;  %v20542_v21 = vld [vmem:[%s30890_s1 + $0xdbc] ss:$24 sps:$4 sm:$0xff]  }
 0x35d   :  { %12160 = vmatprep.subr.bf16.mxu1 %v20467_v22  ;;  %v20545_v22 = vld [vmem:[%s30890_s1 + $0x10bc] ss:$24 sps:$4 sm:$0xff]  }
 0x363   :  { %12032 = vmatpush1.bf16.xpose.msra.mxu0 %v20462_v23  ;;  %v20540_v23 = vld [vmem:[%s30890_s1 + $0xdb8] ss:$24 sps:$4 sm:$0xff]  }
 0x364   :  { %12161 = vmatpush1.bf16.xpose.msra.mxu1 %v20465_v24  ;;  %12033 = vmatprep.subr.bf16.mxu0 %v20470_v25  ;;  %v20543_v24 = vld [vmem:[%s30890_s1 + $0x10b8] ss:$24 sps:$4 sm:$0xff]   ;;  %v20548_v25 = vld [vmem:[%s30890_s1 + $0xdec] ss:$24 sps:$4 sm:$0xff]  }
 0x365   :  { %12162 = vmatprep.subr.bf16.mxu1 %v20473_v26  ;;  %v20551_v26 = vld [vmem:[%s30890_s1 + $0x10ec] ss:$24 sps:$4 sm:$0xff]  }
 0x36b   :  { %12034 = vmatpush1.bf16.xpose.msra.mxu0 %v20468_v27  ;;  %v20546_v27 = vld [vmem:[%s30890_s1 + $0xde8] ss:$24 sps:$4 sm:$0xff]  }
 0x36c   :  { %12163 = vmatpush1.bf16.xpose.msra.mxu1 %v20471_v28  ;;  %12035 = vmatprep.subr.bf16.mxu0 %v20476_v29  ;;  %v20549_v28 = vld [vmem:[%s30890_s1 + $0x10e8] ss:$24 sps:$4 sm:$0xff]   ;;  %v20554_v29 = vld [vmem:[%s30890_s1 + $0xe1c] ss:$24 sps:$4 sm:$0xff]  }
 0x36d   :  { %12164 = vmatprep.subr.bf16.mxu1 %v20479_v30  ;;  %v20557_v30 = vld [vmem:[%s30890_s1 + $0x111c] ss:$24 sps:$4 sm:$0xff]  }
 0x373   :  { %12036 = vmatpush1.bf16.xpose.msra.mxu0 %v20474_v31 }
 0x374   :  { %12165 = vmatpush1.bf16.xpose.msra.mxu1 %v20477_v32  ;;  %12037 = vmatprep.subr.bf16.mxu0 %v20482_v34 }
 0x375   :  { %12166 = vmatprep.subr.bf16.mxu1 %v20485_v35 }
 0x37b   :  { %12038 = vmatpush1.bf16.xpose.msra.mxu0 %v20480_v37 }
 0x37c   :  { %12167 = vmatpush1.bf16.xpose.msra.mxu1 %v20483_v38  ;;  %12050 = vmatprep.subr.bf16.mxu0 %v20488_v39  ;;  %v20552_v39 = vld [vmem:[%s30890_s1 + $0xe18] ss:$24 sps:$4 sm:$0xff]  }
 0x37d   :  { %12179 = vmatprep.subr.bf16.mxu1 %v20491_v40  ;;  %v20555_v40 = vld [vmem:[%s30890_s1 + $0x1118] ss:$24 sps:$4 sm:$0xff]  }
 0x382   :  { %12040 = vmatmul.mubr.bf16.vlgmr.msra.gmra.mrb[8].mxu0 %v24108_v45 }
 0x383   :  { %12169 = vmatmul.mubr.bf16.vlgmr.msra.gmra.mrb[8].mxu1 %v24108_v45  ;;  %12051 = vmatpush1.bf16.xpose.msra.mxu0 %v20486_v41 }
 0x384   :  { %12180 = vmatpush1.bf16.xpose.msra.mxu1 %v20489_v42  ;;  %12052 = vmatprep.subr.bf16.mxu0 %v20494_v43  ;;  %v20560_v43 = vld [vmem:[%s30890_s1 + $0xe4c] ss:$24 sps:$4 sm:$0xff]  }
 0x385   :  { %12181 = vmatprep.subr.bf16.mxu1 %v20497_v44  ;;  %12082 = vmatprep.mubr.bf16.mxu0 %v24115_v46  ;;  %v20563_v44 = vld [vmem:[%s30890_s1 + $0x114c] ss:$24 sps:$4 sm:$0xff]  }
 0x386   :  { %12211 = vmatprep.mubr.bf16.mxu1 %v24115_v46 }
 0x38b   :  { %12053 = vmatpush1.bf16.xpose.msra.mxu0 %v20492_v47  ;;  %v20558_v47 = vld [vmem:[%s30890_s1 + $0xe48] ss:$24 sps:$4 sm:$0xff]  }
 0x38c   :  { %12182 = vmatpush1.bf16.xpose.msra.mxu1 %v20495_v48  ;;  %12054 = vmatprep.subr.bf16.mxu0 %v20500_v49  ;;  %v20561_v48 = vld [vmem:[%s30890_s1 + $0x1148] ss:$24 sps:$4 sm:$0xff]   ;;  %v20566_v49 = vld [vmem:[%s30890_s1 + $0xe7c] ss:$24 sps:$4 sm:$0xff]  }
 0x38d   :  { %12183 = vmatprep.subr.bf16.mxu1 %v20503_v50  ;;  %v20569_v50 = vld [vmem:[%s30890_s1 + $0x117c] ss:$24 sps:$4 sm:$0xff]  }
 0x393   :  { %12055 = vmatpush1.bf16.xpose.msra.mxu0 %v20498_v51  ;;  %v20564_v51 = vld [vmem:[%s30890_s1 + $0xe78] ss:$24 sps:$4 sm:$0xff]  }
 0x394   :  { %12184 = vmatpush1.bf16.xpose.msra.mxu1 %v20501_v52  ;;  %12056 = vmatprep.subr.bf16.mxu0 %v20506_v53  ;;  %v20567_v52 = vld [vmem:[%s30890_s1 + $0x1178] ss:$24 sps:$4 sm:$0xff]   ;;  %v20572_v53 = vld [vmem:[%s30890_s1 + $0xeac] ss:$24 sps:$4 sm:$0xff]  }
 0x395   :  { %12185 = vmatprep.subr.bf16.mxu1 %v20509_v54  ;;  %v20575_v54 = vld [vmem:[%s30890_s1 + $0x11ac] ss:$24 sps:$4 sm:$0xff]  }
 0x39b   :  { %12057 = vmatpush1.bf16.xpose.msra.mxu0 %v20504_v57  ;;  %v20570_v57 = vld [vmem:[%s30890_s1 + $0xea8] ss:$24 sps:$4 sm:$0xff]  }
 0x39c   :  { %12186 = vmatpush1.bf16.xpose.msra.mxu1 %v20507_v58  ;;  %12058 = vmatprep.subr.bf16.mxu0 %v20512_v61  ;;  %v20573_v58 = vld [vmem:[%s30890_s1 + $0x11a8] ss:$24 sps:$4 sm:$0xff]   ;;  %v20578_v61 = vld [vmem:[%s30890_s1 + $0xedc] ss:$24 sps:$4 sm:$0xff]  }
 0x39d   :  { %12187 = vmatprep.subr.bf16.mxu1 %v20515_v2  ;;  %v20581_v2 = vld [vmem:[%s30890_s1 + $0x11dc] ss:$24 sps:$4 sm:$0xff]  }
 0x3a3   :  { %12059 = vmatpush1.bf16.xpose.msra.mxu0 %v20510_v3  ;;  %v20576_v3 = vld [vmem:[%s30890_s1 + $0xed8] ss:$24 sps:$4 sm:$0xff]  }
 0x3a4   :  { %12188 = vmatpush1.bf16.xpose.msra.mxu1 %v20513_v4  ;;  %12060 = vmatprep.subr.bf16.mxu0 %v20518_v5  ;;  %v20579_v4 = vld [vmem:[%s30890_s1 + $0x11d8] ss:$24 sps:$4 sm:$0xff]   ;;  %v20584_v5 = vld [vmem:[%s30890_s1 + $0xc14] ss:$24 sps:$4 sm:$0xff]  }
 0x3a5   :  { %12189 = vmatprep.subr.bf16.mxu1 %v20521_v6  ;;  %v20587_v6 = vld [vmem:[%s30890_s1 + $0xf14] ss:$24 sps:$4 sm:$0xff]  }
 0x3ab   :  { %12061 = vmatpush1.bf16.xpose.msra.mxu0 %v20516_v7  ;;  %v20582_v7 = vld [vmem:[%s30890_s1 + $0xc10] ss:$24 sps:$4 sm:$0xff]  }
 0x3ac   :  { %12190 = vmatpush1.bf16.xpose.msra.mxu1 %v20519_v8  ;;  %12062 = vmatprep.subr.bf16.mxu0 %v20524_v9  ;;  %v20585_v8 = vld [vmem:[%s30890_s1 + $0xf10] ss:$24 sps:$4 sm:$0xff]   ;;  %v20590_v9 = vld [vmem:[%s30890_s1 + $0xc44] ss:$24 sps:$4 sm:$0xff]  }
 0x3ad   :  { %12191 = vmatprep.subr.bf16.mxu1 %v20527_v10  ;;  %v20593_v10 = vld [vmem:[%s30890_s1 + $0xf44] ss:$24 sps:$4 sm:$0xff]  }
 0x3b3   :  { %12063 = vmatpush1.bf16.xpose.msra.mxu0 %v20522_v11  ;;  %v24330_v11 = vld [vmem:[%s30891_s0 + $0x8] ss:$24 sps:$4 sm:$0xff]  }
 0x3b4   :  { %12192 = vmatpush1.bf16.xpose.msra.mxu1 %v20525_v12  ;;  %12064 = vmatprep.subr.bf16.mxu0 %v20530_v13  ;;  %v24337_v12 = vld [vmem:[%s30891_s0 + $0x14] ss:$24 sps:$4 sm:$0xff]   ;;  %v20588_v13 = vld [vmem:[%s30890_s1 + $0xc40] ss:$24 sps:$4 sm:$0xff]  }
 0x3b5   :  { %12193 = vmatprep.subr.bf16.mxu1 %v20533_v14  ;;  %v20591_v14 = vld [vmem:[%s30890_s1 + $0xf40] ss:$24 sps:$4 sm:$0xff]  }
 0x3bb   :  { %12065 = vmatpush1.bf16.xpose.msra.mxu0 %v20528_v15  ;;  %v20596_v15 = vld [vmem:[%s30890_s1 + $0xc74] ss:$24 sps:$4 sm:$0xff]  }
 0x3bc   :  { %12194 = vmatpush1.bf16.xpose.msra.mxu1 %v20531_v16  ;;  %12066 = vmatprep.subr.bf16.mxu0 %v20536_v17  ;;  %v20599_v16 = vld [vmem:[%s30890_s1 + $0xf74] ss:$24 sps:$4 sm:$0xff]   ;;  %v20594_v17 = vld [vmem:[%s30890_s1 + $0xc70] ss:$24 sps:$4 sm:$0xff]  }
 0x3bd   :  { %12195 = vmatprep.subr.bf16.mxu1 %v20539_v18  ;;  %v20597_v18 = vld [vmem:[%s30890_s1 + $0xf70] ss:$24 sps:$4 sm:$0xff]  }
 0x3c3   :  { %12067 = vmatpush1.bf16.xpose.msra.mxu0 %v20534_v19  ;;  %v20602_v19 = vld [vmem:[%s30890_s1 + $0xca4] ss:$24 sps:$4 sm:$0xff]  }
 0x3c4   :  { %12196 = vmatpush1.bf16.xpose.msra.mxu1 %v20537_v20  ;;  %12068 = vmatprep.subr.bf16.mxu0 %v20542_v21  ;;  %v20605_v20 = vld [vmem:[%s30890_s1 + $0xfa4] ss:$24 sps:$4 sm:$0xff]   ;;  %v20600_v21 = vld [vmem:[%s30890_s1 + $0xca0] ss:$24 sps:$4 sm:$0xff]  }
 0x3c5   :  { %12197 = vmatprep.subr.bf16.mxu1 %v20545_v22  ;;  %v20603_v22 = vld [vmem:[%s30890_s1 + $0xfa0] ss:$24 sps:$4 sm:$0xff]  }
 0x3cb   :  { %12069 = vmatpush1.bf16.xpose.msra.mxu0 %v20540_v23  ;;  %v20608_v23 = vld [vmem:[%s30890_s1 + $0xcd4] ss:$24 sps:$4 sm:$0xff]  }
 0x3cc   :  { %12198 = vmatpush1.bf16.xpose.msra.mxu1 %v20543_v24  ;;  %12070 = vmatprep.subr.bf16.mxu0 %v20548_v25  ;;  %v20611_v24 = vld [vmem:[%s30890_s1 + $0xfd4] ss:$24 sps:$4 sm:$0xff]   ;;  %v20606_v25 = vld [vmem:[%s30890_s1 + $0xcd0] ss:$24 sps:$4 sm:$0xff]  }
 0x3cd   :  { %12199 = vmatprep.subr.bf16.mxu1 %v20551_v26  ;;  %v20609_v26 = vld [vmem:[%s30890_s1 + $0xfd0] ss:$24 sps:$4 sm:$0xff]  }
 0x3d3   :  { %12071 = vmatpush1.bf16.xpose.msra.mxu0 %v20546_v27  ;;  %v20614_v27 = vld [vmem:[%s30890_s1 + $0xd04] ss:$24 sps:$4 sm:$0xff]  }
 0x3d4   :  { %12200 = vmatpush1.bf16.xpose.msra.mxu1 %v20549_v28  ;;  %12072 = vmatprep.subr.bf16.mxu0 %v20554_v29  ;;  %v20617_v28 = vld [vmem:[%s30890_s1 + $0x1004] ss:$24 sps:$4 sm:$0xff]   ;;  %v20612_v29 = vld [vmem:[%s30890_s1 + $0xd00] ss:$24 sps:$4 sm:$0xff]  }
 0x3d5   :  { %12201 = vmatprep.subr.bf16.mxu1 %v20557_v30  ;;  %v24239_v31 = vpop.f32.mrb[4].mxu0  ;;  %v20615_v30 = vld [vmem:[%s30890_s1 + $0x1000] ss:$24 sps:$4 sm:$0xff]  }
 0x3d6   :  { %v24241_v32 = vpop.f32.mrb[4].mxu1  ;;  %v24243_v34 = vpop.f32.mrb[5].mxu0 }
 0x3d7   :  { %v24245_v35 = vpop.f32.mrb[5].mxu1  ;;  %v24247_v37 = vpop.f32.mrb[6].mxu0 }
 0x3d8   :  { %v24249_v38 = vpop.f32.mrb[6].mxu1  ;;  %v24257_v41 = vpop.f32.mrb[7].mxu0 }
 0x3d9   :  { %v24259_v42 = vpop.f32.mrb[7].mxu1 }
 0x3db   :  { %12073 = vmatpush1.bf16.xpose.msra.mxu0 %v20552_v39  ;;  %v20620_v39 = vld [vmem:[%s30890_s1 + $0xd34] ss:$24 sps:$4 sm:$0xff]  }
 0x3dc   :  { %12202 = vmatpush1.bf16.xpose.msra.mxu1 %v20555_v40  ;;  %12074 = vmatprep.subr.bf16.mxu0 %v20560_v43  ;;  %v20623_v40 = vld [vmem:[%s30890_s1 + $0x1034] ss:$24 sps:$4 sm:$0xff]   ;;  %v20618_v43 = vld [vmem:[%s30890_s1 + $0xd30] ss:$24 sps:$4 sm:$0xff]  }
 0x3dd   :  { %12203 = vmatprep.subr.bf16.mxu1 %v20563_v44  ;;  %v20621_v44 = vld [vmem:[%s30890_s1 + $0x1030] ss:$24 sps:$4 sm:$0xff]  }
 0x3e3   :  { %12075 = vmatpush1.bf16.xpose.msra.mxu0 %v20558_v47  ;;  %v20626_v47 = vld [vmem:[%s30890_s1 + $0xd64] ss:$24 sps:$4 sm:$0xff]  }
 0x3e4   :  { %12204 = vmatpush1.bf16.xpose.msra.mxu1 %v20561_v48  ;;  %12076 = vmatprep.subr.bf16.mxu0 %v20566_v49  ;;  %v20629_v48 = vld [vmem:[%s30890_s1 + $0x1064] ss:$24 sps:$4 sm:$0xff]   ;;  %v20624_v49 = vld [vmem:[%s30890_s1 + $0xd60] ss:$24 sps:$4 sm:$0xff]  }
 0x3e5   :  { %12205 = vmatprep.subr.bf16.mxu1 %v20569_v50  ;;  %v20627_v50 = vld [vmem:[%s30890_s1 + $0x1060] ss:$24 sps:$4 sm:$0xff]  }
 0x3eb   :  { %12077 = vmatpush1.bf16.xpose.msra.mxu0 %v20564_v51  ;;  %v20632_v51 = vld [vmem:[%s30890_s1 + $0xd94] ss:$24 sps:$4 sm:$0xff]  }
 0x3ec   :  { %12206 = vmatpush1.bf16.xpose.msra.mxu1 %v20567_v52  ;;  %12078 = vmatprep.subr.bf16.mxu0 %v20572_v53  ;;  %v20635_v52 = vld [vmem:[%s30890_s1 + $0x1094] ss:$24 sps:$4 sm:$0xff]   ;;  %v20630_v53 = vld [vmem:[%s30890_s1 + $0xd90] ss:$24 sps:$4 sm:$0xff]  }
 0x3ed   :  { %12207 = vmatprep.subr.bf16.mxu1 %v20575_v54  ;;  %v20633_v54 = vld [vmem:[%s30890_s1 + $0x1090] ss:$24 sps:$4 sm:$0xff]  }
 0x3f3   :  { %12079 = vmatpush1.bf16.xpose.msra.mxu0 %v20570_v57  ;;  %v20638_v57 = vld [vmem:[%s30890_s1 + $0xdc4] ss:$24 sps:$4 sm:$0xff]  }
 0x3f4   :  { %12208 = vmatpush1.bf16.xpose.msra.mxu1 %v20573_v58  ;;  %12080 = vmatprep.subr.bf16.mxu0 %v20578_v61  ;;  %v20641_v58 = vld [vmem:[%s30890_s1 + $0x10c4] ss:$24 sps:$4 sm:$0xff]   ;;  %v20636_v61 = vld [vmem:[%s30890_s1 + $0xdc0] ss:$24 sps:$4 sm:$0xff]  }
 0x3f5   :  { %12209 = vmatprep.subr.bf16.mxu1 %v20581_v2  ;;  %v20639_v2 = vld [vmem:[%s30890_s1 + $0x10c0] ss:$24 sps:$4 sm:$0xff]  }
 0x3fb   :  { %12081 = vmatpush1.bf16.xpose.msra.mxu0 %v20576_v3  ;;  %v20644_v3 = vld [vmem:[%s30890_s1 + $0xdf4] ss:$24 sps:$4 sm:$0xff]  }
 0x3fc   :  { %12210 = vmatpush1.bf16.xpose.msra.mxu1 %v20579_v4  ;;  %12093 = vmatprep.subr.bf16.mxu0 %v20584_v5  ;;  %v20647_v4 = vld [vmem:[%s30890_s1 + $0x10f4] ss:$24 sps:$4 sm:$0xff]   ;;  %v20642_v5 = vld [vmem:[%s30890_s1 + $0xdf0] ss:$24 sps:$4 sm:$0xff]  }
 0x3fd   :  { %12222 = vmatprep.subr.bf16.mxu1 %v20587_v6  ;;  %v20645_v6 = vld [vmem:[%s30890_s1 + $0x10f0] ss:$24 sps:$4 sm:$0xff]  }
 0x402   :  { %12083 = vmatmul.mubr.bf16.vlgmr.msra.gmra.mrb[8].mxu0 %v24330_v11 }
 0x403   :  { %12212 = vmatmul.mubr.bf16.vlgmr.msra.gmra.mrb[8].mxu1 %v24330_v11  ;;  %12094 = vmatpush1.bf16.xpose.msra.mxu0 %v20582_v7  ;;  %v20650_v7 = vld [vmem:[%s30890_s1 + $0xe24] ss:$24 sps:$4 sm:$0xff]  }
 0x404   :  { %12223 = vmatpush1.bf16.xpose.msra.mxu1 %v20585_v8  ;;  %12095 = vmatprep.subr.bf16.mxu0 %v20590_v9  ;;  %v20653_v8 = vld [vmem:[%s30890_s1 + $0x1124] ss:$24 sps:$4 sm:$0xff]   ;;  %v20648_v9 = vld [vmem:[%s30890_s1 + $0xe20] ss:$24 sps:$4 sm:$0xff]  }
 0x405   :  { %12224 = vmatprep.subr.bf16.mxu1 %v20593_v10  ;;  %12125 = vmatprep.mubr.bf16.mxu0 %v24337_v12  ;;  %v20651_v10 = vld [vmem:[%s30890_s1 + $0x1120] ss:$24 sps:$4 sm:$0xff]  }
 0x406   :  { %12254 = vmatprep.mubr.bf16.mxu1 %v24337_v12 }
 0x40b   :  { %12096 = vmatpush1.bf16.xpose.msra.mxu0 %v20588_v13  ;;  %v20656_v13 = vld [vmem:[%s30890_s1 + $0xe54] ss:$24 sps:$4 sm:$0xff]  }
 0x40c   :  { %12225 = vmatpush1.bf16.xpose.msra.mxu1 %v20591_v14  ;;  %12097 = vmatprep.subr.bf16.mxu0 %v20596_v15  ;;  %v20659_v14 = vld [vmem:[%s30890_s1 + $0x1154] ss:$24 sps:$4 sm:$0xff]   ;;  %v20654_v15 = vld [vmem:[%s30890_s1 + $0xe50] ss:$24 sps:$4 sm:$0xff]  }
 0x40d   :  { %12226 = vmatprep.subr.bf16.mxu1 %v20599_v16  ;;  %v20657_v16 = vld [vmem:[%s30890_s1 + $0x1150] ss:$24 sps:$4 sm:$0xff]  }
 0x413   :  { %12098 = vmatpush1.bf16.xpose.msra.mxu0 %v20594_v17  ;;  %v20662_v17 = vld [vmem:[%s30890_s1 + $0xe84] ss:$24 sps:$4 sm:$0xff]  }
 0x414   :  { %12227 = vmatpush1.bf16.xpose.msra.mxu1 %v20597_v18  ;;  %12099 = vmatprep.subr.bf16.mxu0 %v20602_v19  ;;  %v20665_v18 = vld [vmem:[%s30890_s1 + $0x1184] ss:$24 sps:$4 sm:$0xff]   ;;  %v20660_v19 = vld [vmem:[%s30890_s1 + $0xe80] ss:$24 sps:$4 sm:$0xff]  }
 0x415   :  { %12228 = vmatprep.subr.bf16.mxu1 %v20605_v20  ;;  %v20663_v20 = vld [vmem:[%s30890_s1 + $0x1180] ss:$24 sps:$4 sm:$0xff]  }
 0x41b   :  { %12100 = vmatpush1.bf16.xpose.msra.mxu0 %v20600_v21  ;;  %v20668_v21 = vld [vmem:[%s30890_s1 + $0xeb4] ss:$24 sps:$4 sm:$0xff]  }
 0x41c   :  { %12229 = vmatpush1.bf16.xpose.msra.mxu1 %v20603_v22  ;;  %12101 = vmatprep.subr.bf16.mxu0 %v20608_v23  ;;  %v20671_v22 = vld [vmem:[%s30890_s1 + $0x11b4] ss:$24 sps:$4 sm:$0xff]   ;;  %v20666_v23 = vld [vmem:[%s30890_s1 + $0xeb0] ss:$24 sps:$4 sm:$0xff]  }
 0x41d   :  { %12230 = vmatprep.subr.bf16.mxu1 %v20611_v24  ;;  %v20669_v24 = vld [vmem:[%s30890_s1 + $0x11b0] ss:$24 sps:$4 sm:$0xff]  }
 0x423   :  { %12102 = vmatpush1.bf16.xpose.msra.mxu0 %v20606_v25  ;;  %v20674_v25 = vld [vmem:[%s30890_s1 + $0xee4] ss:$24 sps:$4 sm:$0xff]  }
 0x424   :  { %12231 = vmatpush1.bf16.xpose.msra.mxu1 %v20609_v26  ;;  %12103 = vmatprep.subr.bf16.mxu0 %v20614_v27  ;;  %v20677_v26 = vld [vmem:[%s30890_s1 + $0x11e4] ss:$24 sps:$4 sm:$0xff]   ;;  %v20672_v27 = vld [vmem:[%s30890_s1 + $0xee0] ss:$24 sps:$4 sm:$0xff]  }
 0x425   :  { %12232 = vmatprep.subr.bf16.mxu1 %v20617_v28  ;;  %v20675_v28 = vld [vmem:[%s30890_s1 + $0x11e0] ss:$24 sps:$4 sm:$0xff]  }
 0x42b   :  { %12104 = vmatpush1.bf16.xpose.msra.mxu0 %v20612_v29  ;;  %v20680_v29 = vld [vmem:[%s30890_s1 + $0x1204] ss:$24 sps:$4 sm:$0xff]  }
 0x42c   :  { %12233 = vmatpush1.bf16.xpose.msra.mxu1 %v20615_v30  ;;  %12105 = vmatprep.subr.bf16.mxu0 %v20620_v39  ;;  %v20683_v30 = vld [vmem:[%s30890_s1 + $0x1504] ss:$24 sps:$4 sm:$0xff]   ;;  %v20678_v39 = vld [vmem:[%s30890_s1 + $0x1200] ss:$24 sps:$4 sm:$0xff]  }
 0x42d   :  { %12234 = vmatprep.subr.bf16.mxu1 %v20623_v40  ;;  %v20681_v40 = vld [vmem:[%s30890_s1 + $0x1500] ss:$24 sps:$4 sm:$0xff]  }
 0x433   :  { %12106 = vmatpush1.bf16.xpose.msra.mxu0 %v20618_v43  ;;  %v20686_v43 = vld [vmem:[%s30890_s1 + $0x1234] ss:$24 sps:$4 sm:$0xff]  }
 0x434   :  { %12235 = vmatpush1.bf16.xpose.msra.mxu1 %v20621_v44  ;;  %12107 = vmatprep.subr.bf16.mxu0 %v20626_v47  ;;  %v20689_v44 = vld [vmem:[%s30890_s1 + $0x1534] ss:$24 sps:$4 sm:$0xff]   ;;  %v20684_v47 = vld [vmem:[%s30890_s1 + $0x1230] ss:$24 sps:$4 sm:$0xff]  }
 0x435   :  { %12236 = vmatprep.subr.bf16.mxu1 %v20629_v48  ;;  %v20687_v48 = vld [vmem:[%s30890_s1 + $0x1530] ss:$24 sps:$4 sm:$0xff]  }
 0x43b   :  { %12108 = vmatpush1.bf16.xpose.msra.mxu0 %v20624_v49  ;;  %v20695_v49 = vld [vmem:[%s30890_s1 + $0x1564] ss:$24 sps:$4 sm:$0xff]  }
 0x43c   :  { %12237 = vmatpush1.bf16.xpose.msra.mxu1 %v20627_v50  ;;  %12109 = vmatprep.subr.bf16.mxu0 %v20632_v51  ;;  %v20693_v50 = vld [vmem:[%s30890_s1 + $0x1560] ss:$24 sps:$4 sm:$0xff]   ;;  %v20698_v51 = vld [vmem:[%s30890_s1 + $0x1294] ss:$24 sps:$4 sm:$0xff]  }
 0x43d   :  { %12238 = vmatprep.subr.bf16.mxu1 %v20635_v52  ;;  %v20701_v52 = vld [vmem:[%s30890_s1 + $0x1594] ss:$24 sps:$4 sm:$0xff]  }
 0x443   :  { %12110 = vmatpush1.bf16.xpose.msra.mxu0 %v20630_v53  ;;  %v20696_v53 = vld [vmem:[%s30890_s1 + $0x1290] ss:$24 sps:$4 sm:$0xff]  }
 0x444   :  { %12239 = vmatpush1.bf16.xpose.msra.mxu1 %v20633_v54  ;;  %12111 = vmatprep.subr.bf16.mxu0 %v20638_v57  ;;  %v20699_v54 = vld [vmem:[%s30890_s1 + $0x1590] ss:$24 sps:$4 sm:$0xff]   ;;  %v20704_v57 = vld [vmem:[%s30890_s1 + $0x12c4] ss:$24 sps:$4 sm:$0xff]  }
 0x445   :  { %12240 = vmatprep.subr.bf16.mxu1 %v20641_v58  ;;  %v20707_v58 = vld [vmem:[%s30890_s1 + $0x15c4] ss:$24 sps:$4 sm:$0xff]  }
 0x44b   :  { %12112 = vmatpush1.bf16.xpose.msra.mxu0 %v20636_v61  ;;  %v20702_v61 = vld [vmem:[%s30890_s1 + $0x12c0] ss:$24 sps:$4 sm:$0xff]  }
 0x44c   :  { %12241 = vmatpush1.bf16.xpose.msra.mxu1 %v20639_v2  ;;  %12113 = vmatprep.subr.bf16.mxu0 %v20644_v3  ;;  %v20705_v2 = vld [vmem:[%s30890_s1 + $0x15c0] ss:$24 sps:$4 sm:$0xff]   ;;  %v20710_v3 = vld [vmem:[%s30890_s1 + $0x12f4] ss:$24 sps:$4 sm:$0xff]  }
 0x44d   :  { %12242 = vmatprep.subr.bf16.mxu1 %v20647_v4  ;;  %v20713_v4 = vld [vmem:[%s30890_s1 + $0x15f4] ss:$24 sps:$4 sm:$0xff]  }
 0x453   :  { %12114 = vmatpush1.bf16.xpose.msra.mxu0 %v20642_v5  ;;  %v20708_v5 = vld [vmem:[%s30890_s1 + $0x12f0] ss:$24 sps:$4 sm:$0xff]  }
 0x454   :  { %12243 = vmatpush1.bf16.xpose.msra.mxu1 %v20645_v6  ;;  %12115 = vmatprep.subr.bf16.mxu0 %v20650_v7  ;;  %v20711_v6 = vld [vmem:[%s30890_s1 + $0x15f0] ss:$24 sps:$4 sm:$0xff]   ;;  %v20716_v7 = vld [vmem:[%s30890_s1 + $0x1324] ss:$24 sps:$4 sm:$0xff]  }
 0x455   :  { %12244 = vmatprep.subr.bf16.mxu1 %v20653_v8  ;;  %v20719_v8 = vld [vmem:[%s30890_s1 + $0x1624] ss:$24 sps:$4 sm:$0xff]  }
 0x45b   :  { %12116 = vmatpush1.bf16.xpose.msra.mxu0 %v20648_v9  ;;  %v20714_v9 = vld [vmem:[%s30890_s1 + $0x1320] ss:$24 sps:$4 sm:$0xff]  }
 0x45c   :  { %12245 = vmatpush1.bf16.xpose.msra.mxu1 %v20651_v10  ;;  %12117 = vmatprep.subr.bf16.mxu0 %v20656_v13  ;;  %v20717_v10 = vld [vmem:[%s30890_s1 + $0x1620] ss:$24 sps:$4 sm:$0xff]   ;;  %v20722_v13 = vld [vmem:[%s30890_s1 + $0x1354] ss:$24 sps:$4 sm:$0xff]  }
 0x45d   :  { %12246 = vmatprep.subr.bf16.mxu1 %v20659_v14  ;;  %v20725_v14 = vld [vmem:[%s30890_s1 + $0x1654] ss:$24 sps:$4 sm:$0xff]  }
 0x463   :  { %12118 = vmatpush1.bf16.xpose.msra.mxu0 %v20654_v15  ;;  %v20720_v15 = vld [vmem:[%s30890_s1 + $0x1350] ss:$24 sps:$4 sm:$0xff]  }
 0x464   :  { %12247 = vmatpush1.bf16.xpose.msra.mxu1 %v20657_v16  ;;  %12119 = vmatprep.subr.bf16.mxu0 %v20662_v17  ;;  %v20723_v16 = vld [vmem:[%s30890_s1 + $0x1650] ss:$24 sps:$4 sm:$0xff]   ;;  %v20728_v17 = vld [vmem:[%s30890_s1 + $0x1384] ss:$24 sps:$4 sm:$0xff]  }
 0x465   :  { %12248 = vmatprep.subr.bf16.mxu1 %v20665_v18  ;;  %v20731_v18 = vld [vmem:[%s30890_s1 + $0x1684] ss:$24 sps:$4 sm:$0xff]  }
 0x46b   :  { %12120 = vmatpush1.bf16.xpose.msra.mxu0 %v20660_v19  ;;  %v20726_v19 = vld [vmem:[%s30890_s1 + $0x1380] ss:$24 sps:$4 sm:$0xff]  }
 0x46c   :  { %12249 = vmatpush1.bf16.xpose.msra.mxu1 %v20663_v20  ;;  %12121 = vmatprep.subr.bf16.mxu0 %v20668_v21  ;;  %v20729_v20 = vld [vmem:[%s30890_s1 + $0x1680] ss:$24 sps:$4 sm:$0xff]   ;;  %v20734_v21 = vld [vmem:[%s30890_s1 + $0x13b4] ss:$24 sps:$4 sm:$0xff]  }
 0x46d   :  { %12250 = vmatprep.subr.bf16.mxu1 %v20671_v22  ;;  %v20737_v22 = vld [vmem:[%s30890_s1 + $0x16b4] ss:$24 sps:$4 sm:$0xff]  }
 0x473   :  { %12122 = vmatpush1.bf16.xpose.msra.mxu0 %v20666_v23  ;;  %v20732_v23 = vld [vmem:[%s30890_s1 + $0x13b0] ss:$24 sps:$4 sm:$0xff]  }
 0x474   :  { %12251 = vmatpush1.bf16.xpose.msra.mxu1 %v20669_v24  ;;  %12123 = vmatprep.subr.bf16.mxu0 %v20674_v25  ;;  %v20735_v24 = vld [vmem:[%s30890_s1 + $0x16b0] ss:$24 sps:$4 sm:$0xff]   ;;  %v20740_v25 = vld [vmem:[%s30890_s1 + $0x13e4] ss:$24 sps:$4 sm:$0xff]  }
 0x475   :  { %12252 = vmatprep.subr.bf16.mxu1 %v20677_v26  ;;  %v20743_v26 = vld [vmem:[%s30890_s1 + $0x16e4] ss:$24 sps:$4 sm:$0xff]  }
 0x47b   :  { %12124 = vmatpush1.bf16.xpose.msra.mxu0 %v20672_v27  ;;  %v20738_v27 = vld [vmem:[%s30890_s1 + $0x13e0] ss:$24 sps:$4 sm:$0xff]  }
 0x47c   :  { %12253 = vmatpush1.bf16.xpose.msra.mxu1 %v20675_v28  ;;  %12265 = vmatprep.subr.bf16.mxu0 %v20680_v29  ;;  %v20741_v28 = vld [vmem:[%s30890_s1 + $0x16e0] ss:$24 sps:$4 sm:$0xff]   ;;  %v20746_v29 = vld [vmem:[%s30890_s1 + $0x1414] ss:$24 sps:$4 sm:$0xff]  }
 0x47d   :  { %12394 = vmatprep.subr.bf16.mxu1 %v20683_v30  ;;  %v20749_v30 = vld [vmem:[%s30890_s1 + $0x1714] ss:$24 sps:$4 sm:$0xff]  }
 0x482   :  { %12126 = vmatmul.mubr.bf16.vlgmr.msra.gmra.mrb[8].mxu0 %v23902_v33 }
 0x483   :  { %12255 = vmatmul.mubr.bf16.vlgmr.msra.gmra.mrb[8].mxu1 %v23902_v33  ;;  %12266 = vmatpush1.bf16.xpose.msra.mxu0 %v20678_v39  ;;  %v20692_v33 = vld [vmem:[%s30890_s1 + $0x1264] ss:$24 sps:$4 sm:$0xff]   ;;  %v20744_v39 = vld [vmem:[%s30890_s1 + $0x1410] ss:$24 sps:$4 sm:$0xff]  }
 0x484   :  { %12395 = vmatpush1.bf16.xpose.msra.mxu1 %v20681_v40  ;;  %12267 = vmatprep.subr.bf16.mxu0 %v20686_v43  ;;  %v20747_v40 = vld [vmem:[%s30890_s1 + $0x1710] ss:$24 sps:$4 sm:$0xff]   ;;  %v20752_v43 = vld [vmem:[%s30890_s1 + $0x1444] ss:$24 sps:$4 sm:$0xff]  }
 0x485   :  { %12396 = vmatprep.subr.bf16.mxu1 %v20689_v44  ;;  %12297 = vmatprep.mubr.bf16.mxu0 %v23915_v36  ;;  %v20755_v44 = vld [vmem:[%s30890_s1 + $0x1744] ss:$24 sps:$4 sm:$0xff]  }
 0x486   :  { %12426 = vmatprep.mubr.bf16.mxu1 %v23915_v36  ;;  %v20690_v36 = vld [vmem:[%s30890_s1 + $0x1260] ss:$24 sps:$4 sm:$0xff]  }
 0x48b   :  { %12268 = vmatpush1.bf16.xpose.msra.mxu0 %v20684_v47  ;;  %v20750_v47 = vld [vmem:[%s30890_s1 + $0x1440] ss:$24 sps:$4 sm:$0xff]  }
 0x48c   :  { %12397 = vmatpush1.bf16.xpose.msra.mxu1 %v20687_v48  ;;  %12269 = vmatprep.subr.bf16.mxu0 %v20692_v33  ;;  %v20753_v48 = vld [vmem:[%s30890_s1 + $0x1740] ss:$24 sps:$4 sm:$0xff]   ;;  %v20758_v33 = vld [vmem:[%s30890_s1 + $0x1474] ss:$24 sps:$4 sm:$0xff]  }
 0x48d   :  { %12398 = vmatprep.subr.bf16.mxu1 %v20695_v49  ;;  %v20761_v49 = vld [vmem:[%s30890_s1 + $0x1774] ss:$24 sps:$4 sm:$0xff]  }
 0x493   :  { %12270 = vmatpush1.bf16.xpose.msra.mxu0 %v20690_v36  ;;  %v20756_v36 = vld [vmem:[%s30890_s1 + $0x1470] ss:$24 sps:$4 sm:$0xff]  }
 0x494   :  { %12399 = vmatpush1.bf16.xpose.msra.mxu1 %v20693_v50  ;;  %12271 = vmatprep.subr.bf16.mxu0 %v20698_v51  ;;  %v20759_v50 = vld [vmem:[%s30890_s1 + $0x1770] ss:$24 sps:$4 sm:$0xff]   ;;  %v20764_v51 = vld [vmem:[%s30890_s1 + $0x14a4] ss:$24 sps:$4 sm:$0xff]  }
 0x495   :  { %12400 = vmatprep.subr.bf16.mxu1 %v20701_v52  ;;  %v20767_v52 = vld [vmem:[%s30890_s1 + $0x17a4] ss:$24 sps:$4 sm:$0xff]  }
 0x49b   :  { %12272 = vmatpush1.bf16.xpose.msra.mxu0 %v20696_v53  ;;  %v20762_v53 = vld [vmem:[%s30890_s1 + $0x14a0] ss:$24 sps:$4 sm:$0xff]  }
 0x49c   :  { %12401 = vmatpush1.bf16.xpose.msra.mxu1 %v20699_v54  ;;  %12273 = vmatprep.subr.bf16.mxu0 %v20704_v57  ;;  %v20765_v54 = vld [vmem:[%s30890_s1 + $0x17a0] ss:$24 sps:$4 sm:$0xff]   ;;  %v20770_v57 = vld [vmem:[%s30890_s1 + $0x14d4] ss:$24 sps:$4 sm:$0xff]  }
 0x49d   :  { %12402 = vmatprep.subr.bf16.mxu1 %v20707_v58  ;;  %v20773_v58 = vld [vmem:[%s30890_s1 + $0x17d4] ss:$24 sps:$4 sm:$0xff]  }
 0x4a3   :  { %12274 = vmatpush1.bf16.xpose.msra.mxu0 %v20702_v61  ;;  %v20768_v61 = vld [vmem:[%s30890_s1 + $0x14d0] ss:$24 sps:$4 sm:$0xff]  }
 0x4a4   :  { %12403 = vmatpush1.bf16.xpose.msra.mxu1 %v20705_v2  ;;  %12275 = vmatprep.subr.bf16.mxu0 %v20710_v3  ;;  %v20771_v2 = vld [vmem:[%s30890_s1 + $0x17d0] ss:$24 sps:$4 sm:$0xff]   ;;  %v20776_v3 = vld [vmem:[%s30890_s1 + $0x120c] ss:$24 sps:$4 sm:$0xff]  }
 0x4a5   :  { %12404 = vmatprep.subr.bf16.mxu1 %v20713_v4  ;;  %v20779_v4 = vld [vmem:[%s30890_s1 + $0x150c] ss:$24 sps:$4 sm:$0xff]  }
 0x4ab   :  { %12276 = vmatpush1.bf16.xpose.msra.mxu0 %v20708_v5  ;;  %v20774_v5 = vld [vmem:[%s30890_s1 + $0x1208] ss:$24 sps:$4 sm:$0xff]  }
 0x4ac   :  { %12405 = vmatpush1.bf16.xpose.msra.mxu1 %v20711_v6  ;;  %12277 = vmatprep.subr.bf16.mxu0 %v20716_v7  ;;  %v20777_v6 = vld [vmem:[%s30890_s1 + $0x1508] ss:$24 sps:$4 sm:$0xff]   ;;  %v20782_v7 = vld [vmem:[%s30890_s1 + $0x123c] ss:$24 sps:$4 sm:$0xff]  }
 0x4ad   :  { %12406 = vmatprep.subr.bf16.mxu1 %v20719_v8  ;;  %v20785_v8 = vld [vmem:[%s30890_s1 + $0x153c] ss:$24 sps:$4 sm:$0xff]  }
 0x4b3   :  { %12278 = vmatpush1.bf16.xpose.msra.mxu0 %v20714_v9  ;;  %v20780_v9 = vld [vmem:[%s30890_s1 + $0x1238] ss:$24 sps:$4 sm:$0xff]  }
 0x4b4   :  { %12407 = vmatpush1.bf16.xpose.msra.mxu1 %v20717_v10  ;;  %12279 = vmatprep.subr.bf16.mxu0 %v20722_v13  ;;  %v20783_v10 = vld [vmem:[%s30890_s1 + $0x1538] ss:$24 sps:$4 sm:$0xff]   ;;  %v20791_v13 = vld [vmem:[%s30890_s1 + $0x156c] ss:$24 sps:$4 sm:$0xff]  }
 0x4b5   :  { %12408 = vmatprep.subr.bf16.mxu1 %v20725_v14  ;;  %v20789_v14 = vld [vmem:[%s30890_s1 + $0x1568] ss:$24 sps:$4 sm:$0xff]  }
 0x4bb   :  { %12280 = vmatpush1.bf16.xpose.msra.mxu0 %v20720_v15  ;;  %v20794_v15 = vld [vmem:[%s30890_s1 + $0x129c] ss:$24 sps:$4 sm:$0xff]  }
 0x4bc   :  { %12409 = vmatpush1.bf16.xpose.msra.mxu1 %v20723_v16  ;;  %12281 = vmatprep.subr.bf16.mxu0 %v20728_v17  ;;  %v20797_v16 = vld [vmem:[%s30890_s1 + $0x159c] ss:$24 sps:$4 sm:$0xff]   ;;  %v20792_v17 = vld [vmem:[%s30890_s1 + $0x1298] ss:$24 sps:$4 sm:$0xff]  }
 0x4bd   :  { %12410 = vmatprep.subr.bf16.mxu1 %v20731_v18  ;;  %v20795_v18 = vld [vmem:[%s30890_s1 + $0x1598] ss:$24 sps:$4 sm:$0xff]  }
 0x4c3   :  { %12282 = vmatpush1.bf16.xpose.msra.mxu0 %v20726_v19  ;;  %v20800_v19 = vld [vmem:[%s30890_s1 + $0x12cc] ss:$24 sps:$4 sm:$0xff]  }
 0x4c4   :  { %12411 = vmatpush1.bf16.xpose.msra.mxu1 %v20729_v20  ;;  %12283 = vmatprep.subr.bf16.mxu0 %v20734_v21  ;;  %v20803_v20 = vld [vmem:[%s30890_s1 + $0x15cc] ss:$24 sps:$4 sm:$0xff]   ;;  %v20798_v21 = vld [vmem:[%s30890_s1 + $0x12c8] ss:$24 sps:$4 sm:$0xff]  }
 0x4c5   :  { %12412 = vmatprep.subr.bf16.mxu1 %v20737_v22  ;;  %v20801_v22 = vld [vmem:[%s30890_s1 + $0x15c8] ss:$24 sps:$4 sm:$0xff]  }
 0x4cb   :  { %12284 = vmatpush1.bf16.xpose.msra.mxu0 %v20732_v23  ;;  %v20806_v23 = vld [vmem:[%s30890_s1 + $0x12fc] ss:$24 sps:$4 sm:$0xff]  }
 0x4cc   :  { %12413 = vmatpush1.bf16.xpose.msra.mxu1 %v20735_v24  ;;  %12285 = vmatprep.subr.bf16.mxu0 %v20740_v25  ;;  %v20809_v24 = vld [vmem:[%s30890_s1 + $0x15fc] ss:$24 sps:$4 sm:$0xff]   ;;  %v20804_v25 = vld [vmem:[%s30890_s1 + $0x12f8] ss:$24 sps:$4 sm:$0xff]  }
 0x4cd   :  { %12414 = vmatprep.subr.bf16.mxu1 %v20743_v26  ;;  %v20807_v26 = vld [vmem:[%s30890_s1 + $0x15f8] ss:$24 sps:$4 sm:$0xff]  }
 0x4d3   :  { %12286 = vmatpush1.bf16.xpose.msra.mxu0 %v20738_v27  ;;  %v20812_v27 = vld [vmem:[%s30890_s1 + $0x132c] ss:$24 sps:$4 sm:$0xff]  }
 0x4d4   :  { %12415 = vmatpush1.bf16.xpose.msra.mxu1 %v20741_v28  ;;  %12287 = vmatprep.subr.bf16.mxu0 %v20746_v29  ;;  %v20815_v28 = vld [vmem:[%s30890_s1 + $0x162c] ss:$24 sps:$4 sm:$0xff]   ;;  %v20810_v29 = vld [vmem:[%s30890_s1 + $0x1328] ss:$24 sps:$4 sm:$0xff]  }
 0x4d5   :  { %12416 = vmatprep.subr.bf16.mxu1 %v20749_v30  ;;  %v20813_v30 = vld [vmem:[%s30890_s1 + $0x1628] ss:$24 sps:$4 sm:$0xff]  }
 0x4db   :  { %12288 = vmatpush1.bf16.xpose.msra.mxu0 %v20744_v39  ;;  %v20818_v39 = vld [vmem:[%s30890_s1 + $0x135c] ss:$24 sps:$4 sm:$0xff]  }
 0x4dc   :  { %12417 = vmatpush1.bf16.xpose.msra.mxu1 %v20747_v40  ;;  %12289 = vmatprep.subr.bf16.mxu0 %v20752_v43  ;;  %v20821_v40 = vld [vmem:[%s30890_s1 + $0x165c] ss:$24 sps:$4 sm:$0xff]   ;;  %v20816_v43 = vld [vmem:[%s30890_s1 + $0x1358] ss:$24 sps:$4 sm:$0xff]  }
 0x4dd   :  { %12418 = vmatprep.subr.bf16.mxu1 %v20755_v44  ;;  %v20819_v44 = vld [vmem:[%s30890_s1 + $0x1658] ss:$24 sps:$4 sm:$0xff]  }
 0x4e3   :  { %12290 = vmatpush1.bf16.xpose.msra.mxu0 %v20750_v47  ;;  %v20824_v47 = vld [vmem:[%s30890_s1 + $0x138c] ss:$24 sps:$4 sm:$0xff]  }
 0x4e4   :  { %12419 = vmatpush1.bf16.xpose.msra.mxu1 %v20753_v48  ;;  %12291 = vmatprep.subr.bf16.mxu0 %v20758_v33  ;;  %v20827_v48 = vld [vmem:[%s30890_s1 + $0x168c] ss:$24 sps:$4 sm:$0xff]   ;;  %v20822_v33 = vld [vmem:[%s30890_s1 + $0x1388] ss:$24 sps:$4 sm:$0xff]  }
 0x4e5   :  { %12420 = vmatprep.subr.bf16.mxu1 %v20761_v49  ;;  %v20825_v49 = vld [vmem:[%s30890_s1 + $0x1688] ss:$24 sps:$4 sm:$0xff]  }
 0x4eb   :  { %12292 = vmatpush1.bf16.xpose.msra.mxu0 %v20756_v36  ;;  %v20830_v36 = vld [vmem:[%s30890_s1 + $0x13bc] ss:$24 sps:$4 sm:$0xff]  }
 0x4ec   :  { %12421 = vmatpush1.bf16.xpose.msra.mxu1 %v20759_v50  ;;  %12293 = vmatprep.subr.bf16.mxu0 %v20764_v51  ;;  %v20833_v50 = vld [vmem:[%s30890_s1 + $0x16bc] ss:$24 sps:$4 sm:$0xff]   ;;  %v20828_v51 = vld [vmem:[%s30890_s1 + $0x13b8] ss:$24 sps:$4 sm:$0xff]  }
 0x4ed   :  { %12422 = vmatprep.subr.bf16.mxu1 %v20767_v52  ;;  %v20831_v52 = vld [vmem:[%s30890_s1 + $0x16b8] ss:$24 sps:$4 sm:$0xff]  }
 0x4f3   :  { %12294 = vmatpush1.bf16.xpose.msra.mxu0 %v20762_v53  ;;  %v20836_v53 = vld [vmem:[%s30890_s1 + $0x13ec] ss:$24 sps:$4 sm:$0xff]  }
 0x4f4   :  { %12423 = vmatpush1.bf16.xpose.msra.mxu1 %v20765_v54  ;;  %12295 = vmatprep.subr.bf16.mxu0 %v20770_v57  ;;  %v20839_v54 = vld [vmem:[%s30890_s1 + $0x16ec] ss:$24 sps:$4 sm:$0xff]   ;;  %v20834_v57 = vld [vmem:[%s30890_s1 + $0x13e8] ss:$24 sps:$4 sm:$0xff]  }
 0x4f5   :  { %12424 = vmatprep.subr.bf16.mxu1 %v20773_v58  ;;  %v20837_v58 = vld [vmem:[%s30890_s1 + $0x16e8] ss:$24 sps:$4 sm:$0xff]  }
 0x4fb   :  { %12296 = vmatpush1.bf16.xpose.msra.mxu0 %v20768_v61  ;;  %v20842_v61 = vld [vmem:[%s30890_s1 + $0x141c] ss:$24 sps:$4 sm:$0xff]  }
 0x4fc   :  { %12425 = vmatpush1.bf16.xpose.msra.mxu1 %v20771_v2  ;;  %12308 = vmatprep.subr.bf16.mxu0 %v20776_v3  ;;  %v20845_v2 = vld [vmem:[%s30890_s1 + $0x171c] ss:$24 sps:$4 sm:$0xff]  }
 0x4fd   :  { %12437 = vmatprep.subr.bf16.mxu1 %v20779_v4 }
 0x502   :  { %12298 = vmatmul.mubr.bf16.vlgmr.msra.gmra.mrb[12].mxu0 %v24108_v45 }
 0x503   :  { %12427 = vmatmul.mubr.bf16.vlgmr.msra.gmra.mrb[12].mxu1 %v24108_v45  ;;  %12309 = vmatpush1.bf16.xpose.msra.mxu0 %v20774_v5  ;;  %v20788_v45 = vld [vmem:[%s30890_s1 + $0x126c] ss:$24 sps:$4 sm:$0xff]  }
 0x504   :  { %12438 = vmatpush1.bf16.xpose.msra.mxu1 %v20777_v6  ;;  %12310 = vmatprep.subr.bf16.mxu0 %v20782_v7 }
 0x505   :  { %12439 = vmatprep.subr.bf16.mxu1 %v20785_v8  ;;  %12340 = vmatprep.mubr.bf16.mxu0 %v24115_v46 }
 0x506   :  { %12469 = vmatprep.mubr.bf16.mxu1 %v24115_v46  ;;  %v20786_v46 = vld [vmem:[%s30890_s1 + $0x1268] ss:$24 sps:$4 sm:$0xff]  }
 0x50b   :  { %12311 = vmatpush1.bf16.xpose.msra.mxu0 %v20780_v9  ;;  %v20840_v9 = vld [vmem:[%s30890_s1 + $0x1418] ss:$24 sps:$4 sm:$0xff]  }
 0x50c   :  { %12440 = vmatpush1.bf16.xpose.msra.mxu1 %v20783_v10  ;;  %12312 = vmatprep.subr.bf16.mxu0 %v20788_v45  ;;  %v20843_v10 = vld [vmem:[%s30890_s1 + $0x1718] ss:$24 sps:$4 sm:$0xff]  }
 0x50d   :  { %12441 = vmatprep.subr.bf16.mxu1 %v20791_v13 }
 0x513   :  { %12313 = vmatpush1.bf16.xpose.msra.mxu0 %v20786_v46  ;;  %v20848_v46 = vld [vmem:[%s30890_s1 + $0x144c] ss:$24 sps:$4 sm:$0xff]  }
 0x514   :  { %12442 = vmatpush1.bf16.xpose.msra.mxu1 %v20789_v14  ;;  %12314 = vmatprep.subr.bf16.mxu0 %v20794_v15  ;;  %v20851_v14 = vld [vmem:[%s30890_s1 + $0x174c] ss:$24 sps:$4 sm:$0xff]   ;;  %v20846_v15 = vld [vmem:[%s30890_s1 + $0x1448] ss:$24 sps:$4 sm:$0xff]  }
 0x515   :  { %12443 = vmatprep.subr.bf16.mxu1 %v20797_v16  ;;  %v20849_v16 = vld [vmem:[%s30890_s1 + $0x1748] ss:$24 sps:$4 sm:$0xff]  }
 0x51b   :  { %12315 = vmatpush1.bf16.xpose.msra.mxu0 %v20792_v17  ;;  %v20854_v17 = vld [vmem:[%s30890_s1 + $0x147c] ss:$24 sps:$4 sm:$0xff]  }
 0x51c   :  { %12444 = vmatpush1.bf16.xpose.msra.mxu1 %v20795_v18  ;;  %12316 = vmatprep.subr.bf16.mxu0 %v20800_v19  ;;  %v20857_v18 = vld [vmem:[%s30890_s1 + $0x177c] ss:$24 sps:$4 sm:$0xff]   ;;  %v20852_v19 = vld [vmem:[%s30890_s1 + $0x1478] ss:$24 sps:$4 sm:$0xff]  }
 0x51d   :  { %12445 = vmatprep.subr.bf16.mxu1 %v20803_v20  ;;  %v20855_v20 = vld [vmem:[%s30890_s1 + $0x1778] ss:$24 sps:$4 sm:$0xff]  }
 0x523   :  { %12317 = vmatpush1.bf16.xpose.msra.mxu0 %v20798_v21  ;;  %v20860_v21 = vld [vmem:[%s30890_s1 + $0x14ac] ss:$24 sps:$4 sm:$0xff]  }
 0x524   :  { %12446 = vmatpush1.bf16.xpose.msra.mxu1 %v20801_v22  ;;  %12318 = vmatprep.subr.bf16.mxu0 %v20806_v23  ;;  %v20863_v22 = vld [vmem:[%s30890_s1 + $0x17ac] ss:$24 sps:$4 sm:$0xff]   ;;  %v20858_v23 = vld [vmem:[%s30890_s1 + $0x14a8] ss:$24 sps:$4 sm:$0xff]  }
 0x525   :  { %12447 = vmatprep.subr.bf16.mxu1 %v20809_v24  ;;  %v20861_v24 = vld [vmem:[%s30890_s1 + $0x17a8] ss:$24 sps:$4 sm:$0xff]  }
 0x52b   :  { %12319 = vmatpush1.bf16.xpose.msra.mxu0 %v20804_v25  ;;  %v20866_v25 = vld [vmem:[%s30890_s1 + $0x14dc] ss:$24 sps:$4 sm:$0xff]  }
 0x52c   :  { %12448 = vmatpush1.bf16.xpose.msra.mxu1 %v20807_v26  ;;  %12320 = vmatprep.subr.bf16.mxu0 %v20812_v27  ;;  %v20869_v26 = vld [vmem:[%s30890_s1 + $0x17dc] ss:$24 sps:$4 sm:$0xff]   ;;  %v20864_v27 = vld [vmem:[%s30890_s1 + $0x14d8] ss:$24 sps:$4 sm:$0xff]  }
 0x52d   :  { %12449 = vmatprep.subr.bf16.mxu1 %v20815_v28  ;;  %v20867_v28 = vld [vmem:[%s30890_s1 + $0x17d8] ss:$24 sps:$4 sm:$0xff]  }
 0x533   :  { %12321 = vmatpush1.bf16.xpose.msra.mxu0 %v20810_v29  ;;  %v20872_v29 = vld [vmem:[%s30890_s1 + $0x1214] ss:$24 sps:$4 sm:$0xff]  }
 0x534   :  { %12450 = vmatpush1.bf16.xpose.msra.mxu1 %v20813_v30  ;;  %12322 = vmatprep.subr.bf16.mxu0 %v20818_v39  ;;  %v20875_v30 = vld [vmem:[%s30890_s1 + $0x1514] ss:$24 sps:$4 sm:$0xff]   ;;  %v20870_v39 = vld [vmem:[%s30890_s1 + $0x1210] ss:$24 sps:$4 sm:$0xff]  }
 0x535   :  { %12451 = vmatprep.subr.bf16.mxu1 %v20821_v40  ;;  %v20873_v40 = vld [vmem:[%s30890_s1 + $0x1510] ss:$24 sps:$4 sm:$0xff]  }
 0x53b   :  { %12323 = vmatpush1.bf16.xpose.msra.mxu0 %v20816_v43  ;;  %v20878_v43 = vld [vmem:[%s30890_s1 + $0x1244] ss:$24 sps:$4 sm:$0xff]  }
 0x53c   :  { %12452 = vmatpush1.bf16.xpose.msra.mxu1 %v20819_v44  ;;  %12324 = vmatprep.subr.bf16.mxu0 %v20824_v47  ;;  %v20881_v44 = vld [vmem:[%s30890_s1 + $0x1544] ss:$24 sps:$4 sm:$0xff]   ;;  %v20876_v47 = vld [vmem:[%s30890_s1 + $0x1240] ss:$24 sps:$4 sm:$0xff]  }
 0x53d   :  { %12453 = vmatprep.subr.bf16.mxu1 %v20827_v48  ;;  %v20879_v48 = vld [vmem:[%s30890_s1 + $0x1540] ss:$24 sps:$4 sm:$0xff]  }
 0x543   :  { %12325 = vmatpush1.bf16.xpose.msra.mxu0 %v20822_v33  ;;  %v20887_v33 = vld [vmem:[%s30890_s1 + $0x1574] ss:$24 sps:$4 sm:$0xff]  }
 0x544   :  { %12454 = vmatpush1.bf16.xpose.msra.mxu1 %v20825_v49  ;;  %12326 = vmatprep.subr.bf16.mxu0 %v20830_v36  ;;  %v20885_v49 = vld [vmem:[%s30890_s1 + $0x1570] ss:$24 sps:$4 sm:$0xff]   ;;  %v20890_v36 = vld [vmem:[%s30890_s1 + $0x12a4] ss:$24 sps:$4 sm:$0xff]  }
 0x545   :  { %12455 = vmatprep.subr.bf16.mxu1 %v20833_v50  ;;  %v20893_v50 = vld [vmem:[%s30890_s1 + $0x15a4] ss:$24 sps:$4 sm:$0xff]  }
 0x54b   :  { %12327 = vmatpush1.bf16.xpose.msra.mxu0 %v20828_v51  ;;  %v20888_v51 = vld [vmem:[%s30890_s1 + $0x12a0] ss:$24 sps:$4 sm:$0xff]  }
 0x54c   :  { %12456 = vmatpush1.bf16.xpose.msra.mxu1 %v20831_v52  ;;  %12328 = vmatprep.subr.bf16.mxu0 %v20836_v53  ;;  %v20891_v52 = vld [vmem:[%s30890_s1 + $0x15a0] ss:$24 sps:$4 sm:$0xff]   ;;  %v20896_v53 = vld [vmem:[%s30890_s1 + $0x12d4] ss:$24 sps:$4 sm:$0xff]  }
 0x54d   :  { %12457 = vmatprep.subr.bf16.mxu1 %v20839_v54  ;;  %v20899_v54 = vld [vmem:[%s30890_s1 + $0x15d4] ss:$24 sps:$4 sm:$0xff]  }
 0x553   :  { %12329 = vmatpush1.bf16.xpose.msra.mxu0 %v20834_v57  ;;  %v20894_v57 = vld [vmem:[%s30890_s1 + $0x12d0] ss:$24 sps:$4 sm:$0xff]  }
 0x554   :  { %12458 = vmatpush1.bf16.xpose.msra.mxu1 %v20837_v58  ;;  %12330 = vmatprep.subr.bf16.mxu0 %v20842_v61  ;;  %v20897_v58 = vld [vmem:[%s30890_s1 + $0x15d0] ss:$24 sps:$4 sm:$0xff]   ;;  %v20902_v61 = vld [vmem:[%s30890_s1 + $0x1304] ss:$24 sps:$4 sm:$0xff]  }
 0x555   :  { %12459 = vmatprep.subr.bf16.mxu1 %v20845_v2  ;;  %v24853_v3 = vpop.f32.mrb[8].mxu0  ;;  %v20905_v2 = vld [vmem:[%s30890_s1 + $0x1604] ss:$24 sps:$4 sm:$0xff]  }
 0x556   :  { %v24855_v4 = vpop.f32.mrb[8].mxu1  ;;  %v24857_v5 = vpop.f32.mrb[9].mxu0 }
 0x557   :  { %v24859_v6 = vpop.f32.mrb[9].mxu1  ;;  %v24861_v7 = vpop.f32.mrb[10].mxu0 }
 0x558   :  { %v24863_v8 = vpop.f32.mrb[10].mxu1  ;;  %v24871_v45 = vpop.f32.mrb[11].mxu0 }
 0x559   :  { %v24873_v13 = vpop.f32.mrb[11].mxu1 }
 0x55b   :  { %12331 = vmatpush1.bf16.xpose.msra.mxu0 %v20840_v9  ;;  %v20900_v9 = vld [vmem:[%s30890_s1 + $0x1300] ss:$24 sps:$4 sm:$0xff]  }
 0x55c   :  { %12460 = vmatpush1.bf16.xpose.msra.mxu1 %v20843_v10  ;;  %12332 = vmatprep.subr.bf16.mxu0 %v20848_v46  ;;  %v20903_v10 = vld [vmem:[%s30890_s1 + $0x1600] ss:$24 sps:$4 sm:$0xff]   ;;  %v20908_v46 = vld [vmem:[%s30890_s1 + $0x1334] ss:$24 sps:$4 sm:$0xff]  }
 0x55d   :  { %12461 = vmatprep.subr.bf16.mxu1 %v20851_v14  ;;  %v20911_v14 = vld [vmem:[%s30890_s1 + $0x1634] ss:$24 sps:$4 sm:$0xff]  }
 0x563   :  { %12333 = vmatpush1.bf16.xpose.msra.mxu0 %v20846_v15  ;;  %v20906_v15 = vld [vmem:[%s30890_s1 + $0x1330] ss:$24 sps:$4 sm:$0xff]  }
 0x564   :  { %12462 = vmatpush1.bf16.xpose.msra.mxu1 %v20849_v16  ;;  %12334 = vmatprep.subr.bf16.mxu0 %v20854_v17  ;;  %v20909_v16 = vld [vmem:[%s30890_s1 + $0x1630] ss:$24 sps:$4 sm:$0xff]   ;;  %v20914_v17 = vld [vmem:[%s30890_s1 + $0x1364] ss:$24 sps:$4 sm:$0xff]  }
 0x565   :  { %12463 = vmatprep.subr.bf16.mxu1 %v20857_v18  ;;  %v20917_v18 = vld [vmem:[%s30890_s1 + $0x1664] ss:$24 sps:$4 sm:$0xff]  }
 0x56b   :  { %12335 = vmatpush1.bf16.xpose.msra.mxu0 %v20852_v19  ;;  %v20912_v19 = vld [vmem:[%s30890_s1 + $0x1360] ss:$24 sps:$4 sm:$0xff]  }
 0x56c   :  { %12464 = vmatpush1.bf16.xpose.msra.mxu1 %v20855_v20  ;;  %12336 = vmatprep.subr.bf16.mxu0 %v20860_v21  ;;  %v20915_v20 = vld [vmem:[%s30890_s1 + $0x1660] ss:$24 sps:$4 sm:$0xff]   ;;  %v20920_v21 = vld [vmem:[%s30890_s1 + $0x1394] ss:$24 sps:$4 sm:$0xff]  }
 0x56d   :  { %12465 = vmatprep.subr.bf16.mxu1 %v20863_v22  ;;  %v20923_v22 = vld [vmem:[%s30890_s1 + $0x1694] ss:$24 sps:$4 sm:$0xff]  }
 0x573   :  { %12337 = vmatpush1.bf16.xpose.msra.mxu0 %v20858_v23  ;;  %v20918_v23 = vld [vmem:[%s30890_s1 + $0x1390] ss:$24 sps:$4 sm:$0xff]  }
 0x574   :  { %12466 = vmatpush1.bf16.xpose.msra.mxu1 %v20861_v24  ;;  %12338 = vmatprep.subr.bf16.mxu0 %v20866_v25  ;;  %v20921_v24 = vld [vmem:[%s30890_s1 + $0x1690] ss:$24 sps:$4 sm:$0xff]   ;;  %v20926_v25 = vld [vmem:[%s30890_s1 + $0x13c4] ss:$24 sps:$4 sm:$0xff]  }
 0x575   :  { %12467 = vmatprep.subr.bf16.mxu1 %v20869_v26  ;;  %v20929_v26 = vld [vmem:[%s30890_s1 + $0x16c4] ss:$24 sps:$4 sm:$0xff]  }
 0x57b   :  { %12339 = vmatpush1.bf16.xpose.msra.mxu0 %v20864_v27  ;;  %v20924_v27 = vld [vmem:[%s30890_s1 + $0x13c0] ss:$24 sps:$4 sm:$0xff]  }
 0x57c   :  { %12468 = vmatpush1.bf16.xpose.msra.mxu1 %v20867_v28  ;;  %12351 = vmatprep.subr.bf16.mxu0 %v20872_v29  ;;  %v20927_v28 = vld [vmem:[%s30890_s1 + $0x16c0] ss:$24 sps:$4 sm:$0xff]   ;;  %v20932_v29 = vld [vmem:[%s30890_s1 + $0x13f4] ss:$24 sps:$4 sm:$0xff]  }
 0x57d   :  { %12480 = vmatprep.subr.bf16.mxu1 %v20875_v30  ;;  %v20935_v30 = vld [vmem:[%s30890_s1 + $0x16f4] ss:$24 sps:$4 sm:$0xff]  }
 0x582   :  { %12341 = vmatmul.mubr.bf16.vlgmr.msra.gmra.mrb[12].mxu0 %v24330_v11 }
 0x583   :  { %12470 = vmatmul.mubr.bf16.vlgmr.msra.gmra.mrb[12].mxu1 %v24330_v11  ;;  %12352 = vmatpush1.bf16.xpose.msra.mxu0 %v20870_v39  ;;  %v20884_v11 = vld [vmem:[%s30890_s1 + $0x1274] ss:$24 sps:$4 sm:$0xff]   ;;  %v20930_v39 = vld [vmem:[%s30890_s1 + $0x13f0] ss:$24 sps:$4 sm:$0xff]  }
 0x584   :  { %12481 = vmatpush1.bf16.xpose.msra.mxu1 %v20873_v40  ;;  %12353 = vmatprep.subr.bf16.mxu0 %v20878_v43  ;;  %v20933_v40 = vld [vmem:[%s30890_s1 + $0x16f0] ss:$24 sps:$4 sm:$0xff]   ;;  %v20938_v43 = vld [vmem:[%s30890_s1 + $0x1424] ss:$24 sps:$4 sm:$0xff]  }
 0x585   :  { %12482 = vmatprep.subr.bf16.mxu1 %v20881_v44  ;;  %12383 = vmatprep.mubr.bf16.mxu0 %v24337_v12  ;;  %v20941_v44 = vld [vmem:[%s30890_s1 + $0x1724] ss:$24 sps:$4 sm:$0xff]  }
 0x586   :  { %12512 = vmatprep.mubr.bf16.mxu1 %v24337_v12  ;;  %v20882_v12 = vld [vmem:[%s30890_s1 + $0x1270] ss:$24 sps:$4 sm:$0xff]  }
 0x58b   :  { %12354 = vmatpush1.bf16.xpose.msra.mxu0 %v20876_v47  ;;  %v20936_v47 = vld [vmem:[%s30890_s1 + $0x1420] ss:$24 sps:$4 sm:$0xff]  }
 0x58c   :  { %12483 = vmatpush1.bf16.xpose.msra.mxu1 %v20879_v48  ;;  %12355 = vmatprep.subr.bf16.mxu0 %v20884_v11  ;;  %v20939_v48 = vld [vmem:[%s30890_s1 + $0x1720] ss:$24 sps:$4 sm:$0xff]   ;;  %v20944_v11 = vld [vmem:[%s30890_s1 + $0x1454] ss:$24 sps:$4 sm:$0xff]  }
 0x58d   :  { %12484 = vmatprep.subr.bf16.mxu1 %v20887_v33  ;;  %v20947_v33 = vld [vmem:[%s30890_s1 + $0x1754] ss:$24 sps:$4 sm:$0xff]  }
 0x593   :  { %12356 = vmatpush1.bf16.xpose.msra.mxu0 %v20882_v12  ;;  %v20942_v12 = vld [vmem:[%s30890_s1 + $0x1450] ss:$24 sps:$4 sm:$0xff]  }
 0x594   :  { %12485 = vmatpush1.bf16.xpose.msra.mxu1 %v20885_v49  ;;  %12357 = vmatprep.subr.bf16.mxu0 %v20890_v36  ;;  %v20945_v49 = vld [vmem:[%s30890_s1 + $0x1750] ss:$24 sps:$4 sm:$0xff]   ;;  %v20950_v36 = vld [vmem:[%s30890_s1 + $0x1484] ss:$24 sps:$4 sm:$0xff]  }
 0x595   :  { %12486 = vmatprep.subr.bf16.mxu1 %v20893_v50  ;;  %v20953_v50 = vld [vmem:[%s30890_s1 + $0x1784] ss:$24 sps:$4 sm:$0xff]  }
 0x59b   :  { %12358 = vmatpush1.bf16.xpose.msra.mxu0 %v20888_v51  ;;  %v20948_v51 = vld [vmem:[%s30890_s1 + $0x1480] ss:$24 sps:$4 sm:$0xff]  }
 0x59c   :  { %12487 = vmatpush1.bf16.xpose.msra.mxu1 %v20891_v52  ;;  %12359 = vmatprep.subr.bf16.mxu0 %v20896_v53  ;;  %v20951_v52 = vld [vmem:[%s30890_s1 + $0x1780] ss:$24 sps:$4 sm:$0xff]   ;;  %v20956_v53 = vld [vmem:[%s30890_s1 + $0x14b4] ss:$24 sps:$4 sm:$0xff]  }
 0x59d   :  { %12488 = vmatprep.subr.bf16.mxu1 %v20899_v54  ;;  %v20959_v54 = vld [vmem:[%s30890_s1 + $0x17b4] ss:$24 sps:$4 sm:$0xff]  }
 0x5a3   :  { %12360 = vmatpush1.bf16.xpose.msra.mxu0 %v20894_v57  ;;  %v20954_v57 = vld [vmem:[%s30890_s1 + $0x14b0] ss:$24 sps:$4 sm:$0xff]  }
 0x5a4   :  { %12489 = vmatpush1.bf16.xpose.msra.mxu1 %v20897_v58  ;;  %12361 = vmatprep.subr.bf16.mxu0 %v20902_v61  ;;  %v20957_v58 = vld [vmem:[%s30890_s1 + $0x17b0] ss:$24 sps:$4 sm:$0xff]   ;;  %v20962_v61 = vld [vmem:[%s30890_s1 + $0x14e4] ss:$24 sps:$4 sm:$0xff]  }
 0x5a5   :  { %12490 = vmatprep.subr.bf16.mxu1 %v20905_v2  ;;  %v20965_v2 = vld [vmem:[%s30890_s1 + $0x17e4] ss:$24 sps:$4 sm:$0xff]  }
 0x5ab   :  { %12362 = vmatpush1.bf16.xpose.msra.mxu0 %v20900_v9  ;;  %v20960_v9 = vld [vmem:[%s30890_s1 + $0x14e0] ss:$24 sps:$4 sm:$0xff]  }
 0x5ac   :  { %12491 = vmatpush1.bf16.xpose.msra.mxu1 %v20903_v10  ;;  %12363 = vmatprep.subr.bf16.mxu0 %v20908_v46  ;;  %v20963_v10 = vld [vmem:[%s30890_s1 + $0x17e0] ss:$24 sps:$4 sm:$0xff]   ;;  %v20968_v46 = vld [vmem:[%s30890_s1 + $0x1804] ss:$24 sps:$4 sm:$0xff]  }
 0x5ad   :  { %12492 = vmatprep.subr.bf16.mxu1 %v20911_v14  ;;  %v20971_v14 = vld [vmem:[%s30890_s1 + $0x1b04] ss:$24 sps:$4 sm:$0xff]  }
 0x5b3   :  { %12364 = vmatpush1.bf16.xpose.msra.mxu0 %v20906_v15  ;;  %v20966_v15 = vld [vmem:[%s30890_s1 + $0x1800] ss:$24 sps:$4 sm:$0xff]  }
 0x5b4   :  { %12493 = vmatpush1.bf16.xpose.msra.mxu1 %v20909_v16  ;;  %12365 = vmatprep.subr.bf16.mxu0 %v20914_v17  ;;  %v20969_v16 = vld [vmem:[%s30890_s1 + $0x1b00] ss:$24 sps:$4 sm:$0xff]   ;;  %v20974_v17 = vld [vmem:[%s30890_s1 + $0x1834] ss:$24 sps:$4 sm:$0xff]  }
 0x5b5   :  { %12494 = vmatprep.subr.bf16.mxu1 %v20917_v18  ;;  %v20977_v18 = vld [vmem:[%s30890_s1 + $0x1b34] ss:$24 sps:$4 sm:$0xff]  }
 0x5bb   :  { %12366 = vmatpush1.bf16.xpose.msra.mxu0 %v20912_v19  ;;  %v25140_v19 = vld [vmem:[%s30891_s0 + $0x10] ss:$24 sps:$4 sm:$0xff]  }
 0x5bc   :  { %12495 = vmatpush1.bf16.xpose.msra.mxu1 %v20915_v20  ;;  %12367 = vmatprep.subr.bf16.mxu0 %v20920_v21  ;;  %v25147_v20 = vld [vmem:[%s30891_s0 + $0x4] ss:$24 sps:$4 sm:$0xff]   ;;  %v20972_v21 = vld [vmem:[%s30890_s1 + $0x1830] ss:$24 sps:$4 sm:$0xff]  }
 0x5bd   :  { %12496 = vmatprep.subr.bf16.mxu1 %v20923_v22  ;;  %v20975_v22 = vld [vmem:[%s30890_s1 + $0x1b30] ss:$24 sps:$4 sm:$0xff]  }
 0x5c3   :  { %12368 = vmatpush1.bf16.xpose.msra.mxu0 %v20918_v23  ;;  %v20980_v23 = vld [vmem:[%s30890_s1 + $0x1864] ss:$24 sps:$4 sm:$0xff]  }
 0x5c4   :  { %12497 = vmatpush1.bf16.xpose.msra.mxu1 %v20921_v24  ;;  %12369 = vmatprep.subr.bf16.mxu0 %v20926_v25  ;;  %v20983_v24 = vld [vmem:[%s30890_s1 + $0x1b64] ss:$24 sps:$4 sm:$0xff]   ;;  %v20978_v25 = vld [vmem:[%s30890_s1 + $0x1860] ss:$24 sps:$4 sm:$0xff]  }
 0x5c5   :  { %12498 = vmatprep.subr.bf16.mxu1 %v20929_v26  ;;  %v20981_v26 = vld [vmem:[%s30890_s1 + $0x1b60] ss:$24 sps:$4 sm:$0xff]  }
 0x5cb   :  { %12370 = vmatpush1.bf16.xpose.msra.mxu0 %v20924_v27  ;;  %v20986_v27 = vld [vmem:[%s30890_s1 + $0x1894] ss:$24 sps:$4 sm:$0xff]  }
 0x5cc   :  { %12499 = vmatpush1.bf16.xpose.msra.mxu1 %v20927_v28  ;;  %12371 = vmatprep.subr.bf16.mxu0 %v20932_v29  ;;  %v20989_v28 = vld [vmem:[%s30890_s1 + $0x1b94] ss:$24 sps:$4 sm:$0xff]   ;;  %v20984_v29 = vld [vmem:[%s30890_s1 + $0x1890] ss:$24 sps:$4 sm:$0xff]  }
 0x5cd   :  { %12500 = vmatprep.subr.bf16.mxu1 %v20935_v30  ;;  %v20987_v30 = vld [vmem:[%s30890_s1 + $0x1b90] ss:$24 sps:$4 sm:$0xff]  }
 0x5d3   :  { %12372 = vmatpush1.bf16.xpose.msra.mxu0 %v20930_v39  ;;  %v20992_v39 = vld [vmem:[%s30890_s1 + $0x18c4] ss:$24 sps:$4 sm:$0xff]  }
 0x5d4   :  { %12501 = vmatpush1.bf16.xpose.msra.mxu1 %v20933_v40  ;;  %12373 = vmatprep.subr.bf16.mxu0 %v20938_v43  ;;  %v20995_v40 = vld [vmem:[%s30890_s1 + $0x1bc4] ss:$24 sps:$4 sm:$0xff]   ;;  %v20990_v43 = vld [vmem:[%s30890_s1 + $0x18c0] ss:$24 sps:$4 sm:$0xff]  }
 0x5d5   :  { %12502 = vmatprep.subr.bf16.mxu1 %v20941_v44  ;;  %v20993_v44 = vld [vmem:[%s30890_s1 + $0x1bc0] ss:$24 sps:$4 sm:$0xff]  }
 0x5db   :  { %12374 = vmatpush1.bf16.xpose.msra.mxu0 %v20936_v47  ;;  %v20998_v47 = vld [vmem:[%s30890_s1 + $0x18f4] ss:$24 sps:$4 sm:$0xff]  }
 0x5dc   :  { %12503 = vmatpush1.bf16.xpose.msra.mxu1 %v20939_v48  ;;  %12375 = vmatprep.subr.bf16.mxu0 %v20944_v11  ;;  %v21001_v48 = vld [vmem:[%s30890_s1 + $0x1bf4] ss:$24 sps:$4 sm:$0xff]   ;;  %v20996_v11 = vld [vmem:[%s30890_s1 + $0x18f0] ss:$24 sps:$4 sm:$0xff]  }
 0x5dd   :  { %12504 = vmatprep.subr.bf16.mxu1 %v20947_v33  ;;  %v20999_v33 = vld [vmem:[%s30890_s1 + $0x1bf0] ss:$24 sps:$4 sm:$0xff]  }
 0x5e3   :  { %12376 = vmatpush1.bf16.xpose.msra.mxu0 %v20942_v12  ;;  %v21004_v12 = vld [vmem:[%s30890_s1 + $0x1924] ss:$24 sps:$4 sm:$0xff]  }
 0x5e4   :  { %12505 = vmatpush1.bf16.xpose.msra.mxu1 %v20945_v49  ;;  %12377 = vmatprep.subr.bf16.mxu0 %v20950_v36  ;;  %v21007_v49 = vld [vmem:[%s30890_s1 + $0x1c24] ss:$24 sps:$4 sm:$0xff]   ;;  %v21002_v36 = vld [vmem:[%s30890_s1 + $0x1920] ss:$24 sps:$4 sm:$0xff]  }
 0x5e5   :  { %12506 = vmatprep.subr.bf16.mxu1 %v20953_v50  ;;  %v21005_v50 = vld [vmem:[%s30890_s1 + $0x1c20] ss:$24 sps:$4 sm:$0xff]  }
 0x5eb   :  { %12378 = vmatpush1.bf16.xpose.msra.mxu0 %v20948_v51  ;;  %v21010_v51 = vld [vmem:[%s30890_s1 + $0x1954] ss:$24 sps:$4 sm:$0xff]  }
 0x5ec   :  { %12507 = vmatpush1.bf16.xpose.msra.mxu1 %v20951_v52  ;;  %12379 = vmatprep.subr.bf16.mxu0 %v20956_v53  ;;  %v21013_v52 = vld [vmem:[%s30890_s1 + $0x1c54] ss:$24 sps:$4 sm:$0xff]   ;;  %v21008_v53 = vld [vmem:[%s30890_s1 + $0x1950] ss:$24 sps:$4 sm:$0xff]  }
 0x5ed   :  { %12508 = vmatprep.subr.bf16.mxu1 %v20959_v54  ;;  %v21011_v54 = vld [vmem:[%s30890_s1 + $0x1c50] ss:$24 sps:$4 sm:$0xff]  }
 0x5f3   :  { %12380 = vmatpush1.bf16.xpose.msra.mxu0 %v20954_v57  ;;  %v21016_v57 = vld [vmem:[%s30890_s1 + $0x1984] ss:$24 sps:$4 sm:$0xff]  }
 0x5f4   :  { %12509 = vmatpush1.bf16.xpose.msra.mxu1 %v20957_v58  ;;  %12381 = vmatprep.subr.bf16.mxu0 %v20962_v61  ;;  %v21019_v58 = vld [vmem:[%s30890_s1 + $0x1c84] ss:$24 sps:$4 sm:$0xff]   ;;  %v21014_v61 = vld [vmem:[%s30890_s1 + $0x1980] ss:$24 sps:$4 sm:$0xff]  }
 0x5f5   :  { %12510 = vmatprep.subr.bf16.mxu1 %v20965_v2  ;;  %v21017_v2 = vld [vmem:[%s30890_s1 + $0x1c80] ss:$24 sps:$4 sm:$0xff]  }
 0x5fb   :  { %12382 = vmatpush1.bf16.xpose.msra.mxu0 %v20960_v9  ;;  %v21022_v9 = vld [vmem:[%s30890_s1 + $0x19b4] ss:$24 sps:$4 sm:$0xff]  }
 0x5fc   :  { %12511 = vmatpush1.bf16.xpose.msra.mxu1 %v20963_v10  ;;  %12523 = vmatprep.subr.bf16.mxu0 %v20968_v46  ;;  %v21025_v10 = vld [vmem:[%s30890_s1 + $0x1cb4] ss:$24 sps:$4 sm:$0xff]   ;;  %v21020_v46 = vld [vmem:[%s30890_s1 + $0x19b0] ss:$24 sps:$4 sm:$0xff]  }
 0x5fd   :  { %12652 = vmatprep.subr.bf16.mxu1 %v20971_v14  ;;  %v21023_v14 = vld [vmem:[%s30890_s1 + $0x1cb0] ss:$24 sps:$4 sm:$0xff]  }
 0x602   :  { %12384 = vmatmul.mubr.bf16.vlgmr.msra.gmra.mrb[12].mxu0 %v25140_v19 }
 0x603   :  { %12513 = vmatmul.mubr.bf16.vlgmr.msra.gmra.mrb[12].mxu1 %v25140_v19  ;;  %12524 = vmatpush1.bf16.xpose.msra.mxu0 %v20966_v15  ;;  %v21028_v15 = vld [vmem:[%s30890_s1 + $0x19e4] ss:$24 sps:$4 sm:$0xff]  }
 0x604   :  { %12653 = vmatpush1.bf16.xpose.msra.mxu1 %v20969_v16  ;;  %12525 = vmatprep.subr.bf16.mxu0 %v20974_v17  ;;  %v21031_v16 = vld [vmem:[%s30890_s1 + $0x1ce4] ss:$24 sps:$4 sm:$0xff]   ;;  %v21026_v17 = vld [vmem:[%s30890_s1 + $0x19e0] ss:$24 sps:$4 sm:$0xff]  }
 0x605   :  { %12654 = vmatprep.subr.bf16.mxu1 %v20977_v18  ;;  %12555 = vmatprep.mubr.bf16.mxu0 %v25147_v20  ;;  %v21029_v18 = vld [vmem:[%s30890_s1 + $0x1ce0] ss:$24 sps:$4 sm:$0xff]  }
 0x606   :  { %12684 = vmatprep.mubr.bf16.mxu1 %v25147_v20 }
 0x60b   :  { %12526 = vmatpush1.bf16.xpose.msra.mxu0 %v20972_v21  ;;  %v21034_v21 = vld [vmem:[%s30890_s1 + $0x1a14] ss:$24 sps:$4 sm:$0xff]  }
 0x60c   :  { %12655 = vmatpush1.bf16.xpose.msra.mxu1 %v20975_v22  ;;  %12527 = vmatprep.subr.bf16.mxu0 %v20980_v23  ;;  %v21037_v22 = vld [vmem:[%s30890_s1 + $0x1d14] ss:$24 sps:$4 sm:$0xff]   ;;  %v21032_v23 = vld [vmem:[%s30890_s1 + $0x1a10] ss:$24 sps:$4 sm:$0xff]  }
 0x60d   :  { %12656 = vmatprep.subr.bf16.mxu1 %v20983_v24  ;;  %v21035_v24 = vld [vmem:[%s30890_s1 + $0x1d10] ss:$24 sps:$4 sm:$0xff]  }
 0x613   :  { %12528 = vmatpush1.bf16.xpose.msra.mxu0 %v20978_v25  ;;  %v21040_v25 = vld [vmem:[%s30890_s1 + $0x1a44] ss:$24 sps:$4 sm:$0xff]  }
 0x614   :  { %12657 = vmatpush1.bf16.xpose.msra.mxu1 %v20981_v26  ;;  %12529 = vmatprep.subr.bf16.mxu0 %v20986_v27  ;;  %v21043_v26 = vld [vmem:[%s30890_s1 + $0x1d44] ss:$24 sps:$4 sm:$0xff]   ;;  %v21038_v27 = vld [vmem:[%s30890_s1 + $0x1a40] ss:$24 sps:$4 sm:$0xff]  }
 0x615   :  { %12658 = vmatprep.subr.bf16.mxu1 %v20989_v28  ;;  %v21041_v28 = vld [vmem:[%s30890_s1 + $0x1d40] ss:$24 sps:$4 sm:$0xff]  }
 0x61b   :  { %12530 = vmatpush1.bf16.xpose.msra.mxu0 %v20984_v29  ;;  %v21046_v29 = vld [vmem:[%s30890_s1 + $0x1a74] ss:$24 sps:$4 sm:$0xff]  }
 0x61c   :  { %12659 = vmatpush1.bf16.xpose.msra.mxu1 %v20987_v30  ;;  %12531 = vmatprep.subr.bf16.mxu0 %v20992_v39  ;;  %v21049_v30 = vld [vmem:[%s30890_s1 + $0x1d74] ss:$24 sps:$4 sm:$0xff]   ;;  %v21044_v39 = vld [vmem:[%s30890_s1 + $0x1a70] ss:$24 sps:$4 sm:$0xff]  }
 0x61d   :  { %12660 = vmatprep.subr.bf16.mxu1 %v20995_v40  ;;  %v21047_v40 = vld [vmem:[%s30890_s1 + $0x1d70] ss:$24 sps:$4 sm:$0xff]  }
 0x623   :  { %12532 = vmatpush1.bf16.xpose.msra.mxu0 %v20990_v43  ;;  %v21052_v43 = vld [vmem:[%s30890_s1 + $0x1aa4] ss:$24 sps:$4 sm:$0xff]  }
 0x624   :  { %12661 = vmatpush1.bf16.xpose.msra.mxu1 %v20993_v44  ;;  %12533 = vmatprep.subr.bf16.mxu0 %v20998_v47  ;;  %v21055_v44 = vld [vmem:[%s30890_s1 + $0x1da4] ss:$24 sps:$4 sm:$0xff]   ;;  %v21050_v47 = vld [vmem:[%s30890_s1 + $0x1aa0] ss:$24 sps:$4 sm:$0xff]  }
 0x625   :  { %12662 = vmatprep.subr.bf16.mxu1 %v21001_v48  ;;  %v21053_v48 = vld [vmem:[%s30890_s1 + $0x1da0] ss:$24 sps:$4 sm:$0xff]  }
 0x62b   :  { %12534 = vmatpush1.bf16.xpose.msra.mxu0 %v20996_v11  ;;  %v21058_v11 = vld [vmem:[%s30890_s1 + $0x1ad4] ss:$24 sps:$4 sm:$0xff]  }
 0x62c   :  { %12663 = vmatpush1.bf16.xpose.msra.mxu1 %v20999_v33  ;;  %12535 = vmatprep.subr.bf16.mxu0 %v21004_v12  ;;  %v21061_v33 = vld [vmem:[%s30890_s1 + $0x1dd4] ss:$24 sps:$4 sm:$0xff]   ;;  %v21056_v12 = vld [vmem:[%s30890_s1 + $0x1ad0] ss:$24 sps:$4 sm:$0xff]  }
 0x62d   :  { %12664 = vmatprep.subr.bf16.mxu1 %v21007_v49  ;;  %v21059_v49 = vld [vmem:[%s30890_s1 + $0x1dd0] ss:$24 sps:$4 sm:$0xff]  }
 0x633   :  { %12536 = vmatpush1.bf16.xpose.msra.mxu0 %v21002_v36  ;;  %v21064_v36 = vld [vmem:[%s30890_s1 + $0x180c] ss:$24 sps:$4 sm:$0xff]  }
 0x634   :  { %12665 = vmatpush1.bf16.xpose.msra.mxu1 %v21005_v50  ;;  %12537 = vmatprep.subr.bf16.mxu0 %v21010_v51  ;;  %v21067_v50 = vld [vmem:[%s30890_s1 + $0x1b0c] ss:$24 sps:$4 sm:$0xff]   ;;  %v21062_v51 = vld [vmem:[%s30890_s1 + $0x1808] ss:$24 sps:$4 sm:$0xff]  }
 0x635   :  { %12666 = vmatprep.subr.bf16.mxu1 %v21013_v52  ;;  %v21065_v52 = vld [vmem:[%s30890_s1 + $0x1b08] ss:$24 sps:$4 sm:$0xff]  }
 0x63b   :  { %12538 = vmatpush1.bf16.xpose.msra.mxu0 %v21008_v53  ;;  %v21070_v53 = vld [vmem:[%s30890_s1 + $0x183c] ss:$24 sps:$4 sm:$0xff]  }
 0x63c   :  { %12667 = vmatpush1.bf16.xpose.msra.mxu1 %v21011_v54  ;;  %12539 = vmatprep.subr.bf16.mxu0 %v21016_v57  ;;  %v21073_v54 = vld [vmem:[%s30890_s1 + $0x1b3c] ss:$24 sps:$4 sm:$0xff]   ;;  %v25346_v57 = vld [vmem:[%s30891_s0] ss:$24 sps:$4 sm:$0xff]  }
 0x63d   :  { %12668 = vmatprep.subr.bf16.mxu1 %v21019_v58  ;;  %v25353_v58 = vld [vmem:[%s30891_s0 + $0xc] ss:$24 sps:$4 sm:$0xff]  }
 0x643   :  { %12540 = vmatpush1.bf16.xpose.msra.mxu0 %v21014_v61  ;;  %v21068_v61 = vld [vmem:[%s30890_s1 + $0x1838] ss:$24 sps:$4 sm:$0xff]  }
 0x644   :  { %12669 = vmatpush1.bf16.xpose.msra.mxu1 %v21017_v2  ;;  %12541 = vmatprep.subr.bf16.mxu0 %v21022_v9  ;;  %v21071_v2 = vld [vmem:[%s30890_s1 + $0x1b38] ss:$24 sps:$4 sm:$0xff]   ;;  %v21076_v9 = vld [vmem:[%s30890_s1 + $0x186c] ss:$24 sps:$4 sm:$0xff]  }
 0x645   :  { %12670 = vmatprep.subr.bf16.mxu1 %v21025_v10  ;;  %v21079_v10 = vld [vmem:[%s30890_s1 + $0x1b6c] ss:$24 sps:$4 sm:$0xff]  }
 0x64b   :  { %12542 = vmatpush1.bf16.xpose.msra.mxu0 %v21020_v46  ;;  %v21074_v46 = vld [vmem:[%s30890_s1 + $0x1868] ss:$24 sps:$4 sm:$0xff]  }
 0x64c   :  { %12671 = vmatpush1.bf16.xpose.msra.mxu1 %v21023_v14  ;;  %12543 = vmatprep.subr.bf16.mxu0 %v21028_v15  ;;  %v21077_v14 = vld [vmem:[%s30890_s1 + $0x1b68] ss:$24 sps:$4 sm:$0xff]   ;;  %v21082_v15 = vld [vmem:[%s30890_s1 + $0x189c] ss:$24 sps:$4 sm:$0xff]  }
 0x64d   :  { %12672 = vmatprep.subr.bf16.mxu1 %v21031_v16  ;;  %v21085_v16 = vld [vmem:[%s30890_s1 + $0x1b9c] ss:$24 sps:$4 sm:$0xff]  }
 0x653   :  { %12544 = vmatpush1.bf16.xpose.msra.mxu0 %v21026_v17  ;;  %v21080_v17 = vld [vmem:[%s30890_s1 + $0x1898] ss:$24 sps:$4 sm:$0xff]  }
 0x654   :  { %12673 = vmatpush1.bf16.xpose.msra.mxu1 %v21029_v18  ;;  %12545 = vmatprep.subr.bf16.mxu0 %v21034_v21  ;;  %v21083_v18 = vld [vmem:[%s30890_s1 + $0x1b98] ss:$24 sps:$4 sm:$0xff]   ;;  %v21088_v21 = vld [vmem:[%s30890_s1 + $0x18cc] ss:$24 sps:$4 sm:$0xff]  }
 0x655   :  { %12674 = vmatprep.subr.bf16.mxu1 %v21037_v22  ;;  %v21091_v22 = vld [vmem:[%s30890_s1 + $0x1bcc] ss:$24 sps:$4 sm:$0xff]  }
 0x65b   :  { %12546 = vmatpush1.bf16.xpose.msra.mxu0 %v21032_v23  ;;  %v21086_v23 = vld [vmem:[%s30890_s1 + $0x18c8] ss:$24 sps:$4 sm:$0xff]  }
 0x65c   :  { %12675 = vmatpush1.bf16.xpose.msra.mxu1 %v21035_v24  ;;  %12547 = vmatprep.subr.bf16.mxu0 %v21040_v25  ;;  %v21089_v24 = vld [vmem:[%s30890_s1 + $0x1bc8] ss:$24 sps:$4 sm:$0xff]   ;;  %v21094_v25 = vld [vmem:[%s30890_s1 + $0x18fc] ss:$24 sps:$4 sm:$0xff]  }
 0x65d   :  { %12676 = vmatprep.subr.bf16.mxu1 %v21043_v26  ;;  %v21097_v26 = vld [vmem:[%s30890_s1 + $0x1bfc] ss:$24 sps:$4 sm:$0xff]  }
 0x663   :  { %12548 = vmatpush1.bf16.xpose.msra.mxu0 %v21038_v27  ;;  %v21092_v27 = vld [vmem:[%s30890_s1 + $0x18f8] ss:$24 sps:$4 sm:$0xff]  }
 0x664   :  { %12677 = vmatpush1.bf16.xpose.msra.mxu1 %v21041_v28  ;;  %12549 = vmatprep.subr.bf16.mxu0 %v21046_v29  ;;  %v21095_v28 = vld [vmem:[%s30890_s1 + $0x1bf8] ss:$24 sps:$4 sm:$0xff]   ;;  %v21100_v29 = vld [vmem:[%s30890_s1 + $0x192c] ss:$24 sps:$4 sm:$0xff]  }
 0x665   :  { %12678 = vmatprep.subr.bf16.mxu1 %v21049_v30  ;;  %v21103_v30 = vld [vmem:[%s30890_s1 + $0x1c2c] ss:$24 sps:$4 sm:$0xff]  }
 0x66b   :  { %12550 = vmatpush1.bf16.xpose.msra.mxu0 %v21044_v39  ;;  %v21098_v39 = vld [vmem:[%s30890_s1 + $0x1928] ss:$24 sps:$4 sm:$0xff]  }
 0x66c   :  { %12679 = vmatpush1.bf16.xpose.msra.mxu1 %v21047_v40  ;;  %12551 = vmatprep.subr.bf16.mxu0 %v21052_v43  ;;  %v21101_v40 = vld [vmem:[%s30890_s1 + $0x1c28] ss:$24 sps:$4 sm:$0xff]   ;;  %v21106_v43 = vld [vmem:[%s30890_s1 + $0x195c] ss:$24 sps:$4 sm:$0xff]  }
 0x66d   :  { %12680 = vmatprep.subr.bf16.mxu1 %v21055_v44  ;;  %v21109_v44 = vld [vmem:[%s30890_s1 + $0x1c5c] ss:$24 sps:$4 sm:$0xff]  }
 0x673   :  { %12552 = vmatpush1.bf16.xpose.msra.mxu0 %v21050_v47  ;;  %v21104_v47 = vld [vmem:[%s30890_s1 + $0x1958] ss:$24 sps:$4 sm:$0xff]  }
 0x674   :  { %12681 = vmatpush1.bf16.xpose.msra.mxu1 %v21053_v48  ;;  %12553 = vmatprep.subr.bf16.mxu0 %v21058_v11  ;;  %v21107_v48 = vld [vmem:[%s30890_s1 + $0x1c58] ss:$24 sps:$4 sm:$0xff]   ;;  %v21112_v11 = vld [vmem:[%s30890_s1 + $0x198c] ss:$24 sps:$4 sm:$0xff]  }
 0x675   :  { %12682 = vmatprep.subr.bf16.mxu1 %v21061_v33  ;;  %v21115_v33 = vld [vmem:[%s30890_s1 + $0x1c8c] ss:$24 sps:$4 sm:$0xff]  }
 0x67b   :  { %12554 = vmatpush1.bf16.xpose.msra.mxu0 %v21056_v12  ;;  %v21110_v12 = vld [vmem:[%s30890_s1 + $0x1988] ss:$24 sps:$4 sm:$0xff]  }
 0x67c   :  { %12683 = vmatpush1.bf16.xpose.msra.mxu1 %v21059_v49  ;;  %12566 = vmatprep.subr.bf16.mxu0 %v21064_v36  ;;  %v21113_v49 = vld [vmem:[%s30890_s1 + $0x1c88] ss:$24 sps:$4 sm:$0xff]   ;;  %v21118_v36 = vld [vmem:[%s30890_s1 + $0x19bc] ss:$24 sps:$4 sm:$0xff]  }
 0x67d   :  { %12695 = vmatprep.subr.bf16.mxu1 %v21067_v50  ;;  %v21121_v50 = vld [vmem:[%s30890_s1 + $0x1cbc] ss:$24 sps:$4 sm:$0xff]  }
 0x682   :  { %12556 = vmatmul.mubr.bf16.vlgmr.msra.gmra.mrb[16].mxu0 %v25346_v57 }
 0x683   :  { %12685 = vmatmul.mubr.bf16.vlgmr.msra.gmra.mrb[16].mxu1 %v25346_v57  ;;  %12567 = vmatpush1.bf16.xpose.msra.mxu0 %v21062_v51  ;;  %v21116_v51 = vld [vmem:[%s30890_s1 + $0x19b8] ss:$24 sps:$4 sm:$0xff]  }
 0x684   :  { %12696 = vmatpush1.bf16.xpose.msra.mxu1 %v21065_v52  ;;  %12568 = vmatprep.subr.bf16.mxu0 %v21070_v53  ;;  %v21119_v52 = vld [vmem:[%s30890_s1 + $0x1cb8] ss:$24 sps:$4 sm:$0xff]   ;;  %v21124_v53 = vld [vmem:[%s30890_s1 + $0x19ec] ss:$24 sps:$4 sm:$0xff]  }
 0x685   :  { %12697 = vmatprep.subr.bf16.mxu1 %v21073_v54  ;;  %12598 = vmatprep.mubr.bf16.mxu0 %v25353_v58  ;;  %v21127_v54 = vld [vmem:[%s30890_s1 + $0x1cec] ss:$24 sps:$4 sm:$0xff]  }
 0x686   :  { %12727 = vmatprep.mubr.bf16.mxu1 %v25353_v58 }
 0x68b   :  { %12569 = vmatpush1.bf16.xpose.msra.mxu0 %v21068_v61  ;;  %v21122_v61 = vld [vmem:[%s30890_s1 + $0x19e8] ss:$24 sps:$4 sm:$0xff]  }
 0x68c   :  { %12698 = vmatpush1.bf16.xpose.msra.mxu1 %v21071_v2  ;;  %12570 = vmatprep.subr.bf16.mxu0 %v21076_v9  ;;  %v21125_v2 = vld [vmem:[%s30890_s1 + $0x1ce8] ss:$24 sps:$4 sm:$0xff]   ;;  %v21130_v9 = vld [vmem:[%s30890_s1 + $0x1a1c] ss:$24 sps:$4 sm:$0xff]  }
 0x68d   :  { %12699 = vmatprep.subr.bf16.mxu1 %v21079_v10  ;;  %v21133_v10 = vld [vmem:[%s30890_s1 + $0x1d1c] ss:$24 sps:$4 sm:$0xff]  }
 0x693   :  { %12571 = vmatpush1.bf16.xpose.msra.mxu0 %v21074_v46 }
 0x694   :  { %12700 = vmatpush1.bf16.xpose.msra.mxu1 %v21077_v14  ;;  %12572 = vmatprep.subr.bf16.mxu0 %v21082_v15 }
 0x695   :  { %12701 = vmatprep.subr.bf16.mxu1 %v21085_v16 }
 0x69b   :  { %12573 = vmatpush1.bf16.xpose.msra.mxu0 %v21080_v17 }
 0x69c   :  { %12702 = vmatpush1.bf16.xpose.msra.mxu1 %v21083_v18  ;;  %12574 = vmatprep.subr.bf16.mxu0 %v21088_v21  ;;  %v21128_v21 = vld [vmem:[%s30890_s1 + $0x1a18] ss:$24 sps:$4 sm:$0xff]  }
 0x69d   :  { %12703 = vmatprep.subr.bf16.mxu1 %v21091_v22  ;;  %v21131_v22 = vld [vmem:[%s30890_s1 + $0x1d18] ss:$24 sps:$4 sm:$0xff]  }
 0x6a3   :  { %12575 = vmatpush1.bf16.xpose.msra.mxu0 %v21086_v23 }
 0x6a4   :  { %12704 = vmatpush1.bf16.xpose.msra.mxu1 %v21089_v24  ;;  %12576 = vmatprep.subr.bf16.mxu0 %v21094_v25  ;;  %v21136_v25 = vld [vmem:[%s30890_s1 + $0x1a4c] ss:$24 sps:$4 sm:$0xff]  }
 0x6a5   :  { %12705 = vmatprep.subr.bf16.mxu1 %v21097_v26  ;;  %v21139_v26 = vld [vmem:[%s30890_s1 + $0x1d4c] ss:$24 sps:$4 sm:$0xff]  }
 0x6ab   :  { %12577 = vmatpush1.bf16.xpose.msra.mxu0 %v21092_v27  ;;  %v21134_v27 = vld [vmem:[%s30890_s1 + $0x1a48] ss:$24 sps:$4 sm:$0xff]  }
 0x6ac   :  { %12706 = vmatpush1.bf16.xpose.msra.mxu1 %v21095_v28  ;;  %12578 = vmatprep.subr.bf16.mxu0 %v21100_v29  ;;  %v21137_v28 = vld [vmem:[%s30890_s1 + $0x1d48] ss:$24 sps:$4 sm:$0xff]   ;;  %v21142_v29 = vld [vmem:[%s30890_s1 + $0x1a7c] ss:$24 sps:$4 sm:$0xff]  }
 0x6ad   :  { %12707 = vmatprep.subr.bf16.mxu1 %v21103_v30  ;;  %v21145_v30 = vld [vmem:[%s30890_s1 + $0x1d7c] ss:$24 sps:$4 sm:$0xff]  }
 0x6b3   :  { %12579 = vmatpush1.bf16.xpose.msra.mxu0 %v21098_v39  ;;  %v21140_v39 = vld [vmem:[%s30890_s1 + $0x1a78] ss:$24 sps:$4 sm:$0xff]  }
 0x6b4   :  { %12708 = vmatpush1.bf16.xpose.msra.mxu1 %v21101_v40  ;;  %12580 = vmatprep.subr.bf16.mxu0 %v21106_v43  ;;  %v21143_v40 = vld [vmem:[%s30890_s1 + $0x1d78] ss:$24 sps:$4 sm:$0xff]   ;;  %v21148_v43 = vld [vmem:[%s30890_s1 + $0x1aac] ss:$24 sps:$4 sm:$0xff]  }
 0x6b5   :  { %12709 = vmatprep.subr.bf16.mxu1 %v21109_v44  ;;  %v21151_v44 = vld [vmem:[%s30890_s1 + $0x1dac] ss:$24 sps:$4 sm:$0xff]  }
 0x6bb   :  { %12581 = vmatpush1.bf16.xpose.msra.mxu0 %v21104_v47  ;;  %v21146_v47 = vld [vmem:[%s30890_s1 + $0x1aa8] ss:$24 sps:$4 sm:$0xff]  }
 0x6bc   :  { %12710 = vmatpush1.bf16.xpose.msra.mxu1 %v21107_v48  ;;  %12582 = vmatprep.subr.bf16.mxu0 %v21112_v11  ;;  %v21149_v48 = vld [vmem:[%s30890_s1 + $0x1da8] ss:$24 sps:$4 sm:$0xff]   ;;  %v21154_v11 = vld [vmem:[%s30890_s1 + $0x1adc] ss:$24 sps:$4 sm:$0xff]  }
 0x6bd   :  { %12711 = vmatprep.subr.bf16.mxu1 %v21115_v33  ;;  %v21157_v33 = vld [vmem:[%s30890_s1 + $0x1ddc] ss:$24 sps:$4 sm:$0xff]  }
 0x6c3   :  { %12583 = vmatpush1.bf16.xpose.msra.mxu0 %v21110_v12  ;;  %v21152_v12 = vld [vmem:[%s30890_s1 + $0x1ad8] ss:$24 sps:$4 sm:$0xff]  }
 0x6c4   :  { %12712 = vmatpush1.bf16.xpose.msra.mxu1 %v21113_v49  ;;  %12584 = vmatprep.subr.bf16.mxu0 %v21118_v36  ;;  %v21155_v49 = vld [vmem:[%s30890_s1 + $0x1dd8] ss:$24 sps:$4 sm:$0xff]   ;;  %v21160_v36 = vld [vmem:[%s30890_s1 + $0x1814] ss:$24 sps:$4 sm:$0xff]  }
 0x6c5   :  { %12713 = vmatprep.subr.bf16.mxu1 %v21121_v50  ;;  %v21163_v50 = vld [vmem:[%s30890_s1 + $0x1b14] ss:$24 sps:$4 sm:$0xff]  }
 0x6cb   :  { %12585 = vmatpush1.bf16.xpose.msra.mxu0 %v21116_v51  ;;  %v21158_v51 = vld [vmem:[%s30890_s1 + $0x1810] ss:$24 sps:$4 sm:$0xff]  }
 0x6cc   :  { %12714 = vmatpush1.bf16.xpose.msra.mxu1 %v21119_v52  ;;  %12586 = vmatprep.subr.bf16.mxu0 %v21124_v53  ;;  %v21161_v52 = vld [vmem:[%s30890_s1 + $0x1b10] ss:$24 sps:$4 sm:$0xff]   ;;  %v21166_v53 = vld [vmem:[%s30890_s1 + $0x1844] ss:$24 sps:$4 sm:$0xff]  }
 0x6cd   :  { %12715 = vmatprep.subr.bf16.mxu1 %v21127_v54  ;;  %v21169_v54 = vld [vmem:[%s30890_s1 + $0x1b44] ss:$24 sps:$4 sm:$0xff]  }
 0x6d3   :  { %12587 = vmatpush1.bf16.xpose.msra.mxu0 %v21122_v61  ;;  %v25568_v61 = vld [vmem:[%s30891_s0 + $0x8] ss:$24 sps:$4 sm:$0xff]  }
 0x6d4   :  { %12716 = vmatpush1.bf16.xpose.msra.mxu1 %v21125_v2  ;;  %12588 = vmatprep.subr.bf16.mxu0 %v21130_v9  ;;  %v25575_v2 = vld [vmem:[%s30891_s0 + $0x14] ss:$24 sps:$4 sm:$0xff]   ;;  %v21164_v9 = vld [vmem:[%s30890_s1 + $0x1840] ss:$24 sps:$4 sm:$0xff]  }
 0x6d5   :  { %12717 = vmatprep.subr.bf16.mxu1 %v21133_v10  ;;  %v25477_v46 = vpop.f32.mrb[12].mxu0  ;;  %v21167_v10 = vld [vmem:[%s30890_s1 + $0x1b40] ss:$24 sps:$4 sm:$0xff]  }
 0x6d6   :  { %v25479_v14 = vpop.f32.mrb[12].mxu1  ;;  %v25481_v15 = vpop.f32.mrb[13].mxu0 }
 0x6d7   :  { %v25483_v16 = vpop.f32.mrb[13].mxu1  ;;  %v25485_v17 = vpop.f32.mrb[14].mxu0 }
 0x6d8   :  { %v25487_v18 = vpop.f32.mrb[14].mxu1  ;;  %v25495_v23 = vpop.f32.mrb[15].mxu0 }
 0x6d9   :  { %v25497_v24 = vpop.f32.mrb[15].mxu1 }
 0x6db   :  { %12589 = vmatpush1.bf16.xpose.msra.mxu0 %v21128_v21  ;;  %v21172_v21 = vld [vmem:[%s30890_s1 + $0x1874] ss:$24 sps:$4 sm:$0xff]  }
 0x6dc   :  { %12718 = vmatpush1.bf16.xpose.msra.mxu1 %v21131_v22  ;;  %12590 = vmatprep.subr.bf16.mxu0 %v21136_v25  ;;  %v21175_v22 = vld [vmem:[%s30890_s1 + $0x1b74] ss:$24 sps:$4 sm:$0xff]   ;;  %v21170_v25 = vld [vmem:[%s30890_s1 + $0x1870] ss:$24 sps:$4 sm:$0xff]  }
 0x6dd   :  { %12719 = vmatprep.subr.bf16.mxu1 %v21139_v26  ;;  %v21173_v26 = vld [vmem:[%s30890_s1 + $0x1b70] ss:$24 sps:$4 sm:$0xff]  }
 0x6e3   :  { %12591 = vmatpush1.bf16.xpose.msra.mxu0 %v21134_v27  ;;  %v21178_v27 = vld [vmem:[%s30890_s1 + $0x18a4] ss:$24 sps:$4 sm:$0xff]  }
 0x6e4   :  { %12720 = vmatpush1.bf16.xpose.msra.mxu1 %v21137_v28  ;;  %12592 = vmatprep.subr.bf16.mxu0 %v21142_v29  ;;  %v21181_v28 = vld [vmem:[%s30890_s1 + $0x1ba4] ss:$24 sps:$4 sm:$0xff]   ;;  %v21176_v29 = vld [vmem:[%s30890_s1 + $0x18a0] ss:$24 sps:$4 sm:$0xff]  }
 0x6e5   :  { %12721 = vmatprep.subr.bf16.mxu1 %v21145_v30  ;;  %v21179_v30 = vld [vmem:[%s30890_s1 + $0x1ba0] ss:$24 sps:$4 sm:$0xff]  }
 0x6eb   :  { %12593 = vmatpush1.bf16.xpose.msra.mxu0 %v21140_v39  ;;  %v21184_v39 = vld [vmem:[%s30890_s1 + $0x18d4] ss:$24 sps:$4 sm:$0xff]  }
 0x6ec   :  { %12722 = vmatpush1.bf16.xpose.msra.mxu1 %v21143_v40  ;;  %12594 = vmatprep.subr.bf16.mxu0 %v21148_v43  ;;  %v21187_v40 = vld [vmem:[%s30890_s1 + $0x1bd4] ss:$24 sps:$4 sm:$0xff]   ;;  %v21182_v43 = vld [vmem:[%s30890_s1 + $0x18d0] ss:$24 sps:$4 sm:$0xff]  }
 0x6ed   :  { %12723 = vmatprep.subr.bf16.mxu1 %v21151_v44  ;;  %v21185_v44 = vld [vmem:[%s30890_s1 + $0x1bd0] ss:$24 sps:$4 sm:$0xff]  }
 0x6f3   :  { %12595 = vmatpush1.bf16.xpose.msra.mxu0 %v21146_v47  ;;  %v21190_v47 = vld [vmem:[%s30890_s1 + $0x1904] ss:$24 sps:$4 sm:$0xff]  }
 0x6f4   :  { %12724 = vmatpush1.bf16.xpose.msra.mxu1 %v21149_v48  ;;  %12596 = vmatprep.subr.bf16.mxu0 %v21154_v11  ;;  %v21193_v48 = vld [vmem:[%s30890_s1 + $0x1c04] ss:$24 sps:$4 sm:$0xff]   ;;  %v21188_v11 = vld [vmem:[%s30890_s1 + $0x1900] ss:$24 sps:$4 sm:$0xff]  }
 0x6f5   :  { %12725 = vmatprep.subr.bf16.mxu1 %v21157_v33  ;;  %v21191_v33 = vld [vmem:[%s30890_s1 + $0x1c00] ss:$24 sps:$4 sm:$0xff]  }
 0x6fb   :  { %12597 = vmatpush1.bf16.xpose.msra.mxu0 %v21152_v12  ;;  %v21196_v12 = vld [vmem:[%s30890_s1 + $0x1934] ss:$24 sps:$4 sm:$0xff]  }
 0x6fc   :  { %12726 = vmatpush1.bf16.xpose.msra.mxu1 %v21155_v49  ;;  %12609 = vmatprep.subr.bf16.mxu0 %v21160_v36  ;;  %v21199_v49 = vld [vmem:[%s30890_s1 + $0x1c34] ss:$24 sps:$4 sm:$0xff]   ;;  %v21194_v36 = vld [vmem:[%s30890_s1 + $0x1930] ss:$24 sps:$4 sm:$0xff]  }
 0x6fd   :  { %12738 = vmatprep.subr.bf16.mxu1 %v21163_v50  ;;  %v21197_v50 = vld [vmem:[%s30890_s1 + $0x1c30] ss:$24 sps:$4 sm:$0xff]  }
 0x702   :  { %12599 = vmatmul.mubr.bf16.vlgmr.msra.gmra.mrb[16].mxu0 %v25568_v61 }
 0x703   :  { %12728 = vmatmul.mubr.bf16.vlgmr.msra.gmra.mrb[16].mxu1 %v25568_v61  ;;  %12610 = vmatpush1.bf16.xpose.msra.mxu0 %v21158_v51  ;;  %v21202_v51 = vld [vmem:[%s30890_s1 + $0x1964] ss:$24 sps:$4 sm:$0xff]  }
 0x704   :  { %12739 = vmatpush1.bf16.xpose.msra.mxu1 %v21161_v52  ;;  %12611 = vmatprep.subr.bf16.mxu0 %v21166_v53  ;;  %v21205_v52 = vld [vmem:[%s30890_s1 + $0x1c64] ss:$24 sps:$4 sm:$0xff]   ;;  %v21200_v53 = vld [vmem:[%s30890_s1 + $0x1960] ss:$24 sps:$4 sm:$0xff]  }
 0x705   :  { %12740 = vmatprep.subr.bf16.mxu1 %v21169_v54  ;;  %12641 = vmatprep.mubr.bf16.mxu0 %v25575_v2  ;;  %v21203_v54 = vld [vmem:[%s30890_s1 + $0x1c60] ss:$24 sps:$4 sm:$0xff]  }
 0x706   :  { %12770 = vmatprep.mubr.bf16.mxu1 %v25575_v2 }
 0x70b   :  { %12612 = vmatpush1.bf16.xpose.msra.mxu0 %v21164_v9  ;;  %v21208_v9 = vld [vmem:[%s30890_s1 + $0x1994] ss:$24 sps:$4 sm:$0xff]  }
 0x70c   :  { %12741 = vmatpush1.bf16.xpose.msra.mxu1 %v21167_v10  ;;  %12613 = vmatprep.subr.bf16.mxu0 %v21172_v21  ;;  %v21211_v10 = vld [vmem:[%s30890_s1 + $0x1c94] ss:$24 sps:$4 sm:$0xff]   ;;  %v21206_v21 = vld [vmem:[%s30890_s1 + $0x1990] ss:$24 sps:$4 sm:$0xff]  }
 0x70d   :  { %12742 = vmatprep.subr.bf16.mxu1 %v21175_v22  ;;  %v21209_v22 = vld [vmem:[%s30890_s1 + $0x1c90] ss:$24 sps:$4 sm:$0xff]  }
 0x713   :  { %12614 = vmatpush1.bf16.xpose.msra.mxu0 %v21170_v25  ;;  %v21214_v25 = vld [vmem:[%s30890_s1 + $0x19c4] ss:$24 sps:$4 sm:$0xff]  }
 0x714   :  { %12743 = vmatpush1.bf16.xpose.msra.mxu1 %v21173_v26  ;;  %12615 = vmatprep.subr.bf16.mxu0 %v21178_v27  ;;  %v21217_v26 = vld [vmem:[%s30890_s1 + $0x1cc4] ss:$24 sps:$4 sm:$0xff]   ;;  %v21212_v27 = vld [vmem:[%s30890_s1 + $0x19c0] ss:$24 sps:$4 sm:$0xff]  }
 0x715   :  { %12744 = vmatprep.subr.bf16.mxu1 %v21181_v28  ;;  %v21215_v28 = vld [vmem:[%s30890_s1 + $0x1cc0] ss:$24 sps:$4 sm:$0xff]  }
 0x71b   :  { %12616 = vmatpush1.bf16.xpose.msra.mxu0 %v21176_v29  ;;  %v21220_v29 = vld [vmem:[%s30890_s1 + $0x19f4] ss:$24 sps:$4 sm:$0xff]  }
 0x71c   :  { %12745 = vmatpush1.bf16.xpose.msra.mxu1 %v21179_v30  ;;  %12617 = vmatprep.subr.bf16.mxu0 %v21184_v39  ;;  %v21223_v30 = vld [vmem:[%s30890_s1 + $0x1cf4] ss:$24 sps:$4 sm:$0xff]   ;;  %v21218_v39 = vld [vmem:[%s30890_s1 + $0x19f0] ss:$24 sps:$4 sm:$0xff]  }
 0x71d   :  { %12746 = vmatprep.subr.bf16.mxu1 %v21187_v40  ;;  %v21221_v40 = vld [vmem:[%s30890_s1 + $0x1cf0] ss:$24 sps:$4 sm:$0xff]  }
 0x723   :  { %12618 = vmatpush1.bf16.xpose.msra.mxu0 %v21182_v43  ;;  %v21226_v43 = vld [vmem:[%s30890_s1 + $0x1a24] ss:$24 sps:$4 sm:$0xff]  }
 0x724   :  { %12747 = vmatpush1.bf16.xpose.msra.mxu1 %v21185_v44  ;;  %12619 = vmatprep.subr.bf16.mxu0 %v21190_v47  ;;  %v21229_v44 = vld [vmem:[%s30890_s1 + $0x1d24] ss:$24 sps:$4 sm:$0xff]   ;;  %v21224_v47 = vld [vmem:[%s30890_s1 + $0x1a20] ss:$24 sps:$4 sm:$0xff]  }
 0x725   :  { %12748 = vmatprep.subr.bf16.mxu1 %v21193_v48  ;;  %v21227_v48 = vld [vmem:[%s30890_s1 + $0x1d20] ss:$24 sps:$4 sm:$0xff]  }
 0x72b   :  { %12620 = vmatpush1.bf16.xpose.msra.mxu0 %v21188_v11  ;;  %v21232_v11 = vld [vmem:[%s30890_s1 + $0x1a54] ss:$24 sps:$4 sm:$0xff]  }
 0x72c   :  { %12749 = vmatpush1.bf16.xpose.msra.mxu1 %v21191_v33  ;;  %12621 = vmatprep.subr.bf16.mxu0 %v21196_v12  ;;  %v21235_v33 = vld [vmem:[%s30890_s1 + $0x1d54] ss:$24 sps:$4 sm:$0xff]   ;;  %v21230_v12 = vld [vmem:[%s30890_s1 + $0x1a50] ss:$24 sps:$4 sm:$0xff]  }
 0x72d   :  { %12750 = vmatprep.subr.bf16.mxu1 %v21199_v49  ;;  %v21233_v49 = vld [vmem:[%s30890_s1 + $0x1d50] ss:$24 sps:$4 sm:$0xff]  }
 0x733   :  { %12622 = vmatpush1.bf16.xpose.msra.mxu0 %v21194_v36  ;;  %v21238_v36 = vld [vmem:[%s30890_s1 + $0x1a84] ss:$24 sps:$4 sm:$0xff]  }
 0x734   :  { %12751 = vmatpush1.bf16.xpose.msra.mxu1 %v21197_v50  ;;  %12623 = vmatprep.subr.bf16.mxu0 %v21202_v51  ;;  %v21241_v50 = vld [vmem:[%s30890_s1 + $0x1d84] ss:$24 sps:$4 sm:$0xff]   ;;  %v21236_v51 = vld [vmem:[%s30890_s1 + $0x1a80] ss:$24 sps:$4 sm:$0xff]  }
 0x735   :  { %12752 = vmatprep.subr.bf16.mxu1 %v21205_v52  ;;  %v21239_v52 = vld [vmem:[%s30890_s1 + $0x1d80] ss:$24 sps:$4 sm:$0xff]  }
 0x73b   :  { %12624 = vmatpush1.bf16.xpose.msra.mxu0 %v21200_v53  ;;  %v21244_v53 = vld [vmem:[%s30890_s1 + $0x1ab4] ss:$24 sps:$4 sm:$0xff]  }
 0x73c   :  { %12753 = vmatpush1.bf16.xpose.msra.mxu1 %v21203_v54  ;;  %12625 = vmatprep.subr.bf16.mxu0 %v21208_v9  ;;  %v21247_v54 = vld [vmem:[%s30890_s1 + $0x1db4] ss:$24 sps:$4 sm:$0xff]   ;;  %v21242_v9 = vld [vmem:[%s30890_s1 + $0x1ab0] ss:$24 sps:$4 sm:$0xff]  }
 0x73d   :  { %12754 = vmatprep.subr.bf16.mxu1 %v21211_v10  ;;  %v21245_v10 = vld [vmem:[%s30890_s1 + $0x1db0] ss:$24 sps:$4 sm:$0xff]  }
 0x743   :  { %12626 = vmatpush1.bf16.xpose.msra.mxu0 %v21206_v21  ;;  %v21250_v21 = vld [vmem:[%s30890_s1 + $0x1ae4] ss:$24 sps:$4 sm:$0xff]  }
 0x744   :  { %12755 = vmatpush1.bf16.xpose.msra.mxu1 %v21209_v22  ;;  %12627 = vmatprep.subr.bf16.mxu0 %v21214_v25  ;;  %v21253_v22 = vld [vmem:[%s30890_s1 + $0x1de4] ss:$24 sps:$4 sm:$0xff]   ;;  %v21248_v25 = vld [vmem:[%s30890_s1 + $0x1ae0] ss:$24 sps:$4 sm:$0xff]  }
 0x745   :  { %12756 = vmatprep.subr.bf16.mxu1 %v21217_v26  ;;  %v21251_v26 = vld [vmem:[%s30890_s1 + $0x1de0] ss:$24 sps:$4 sm:$0xff]  }
 0x74b   :  { %12628 = vmatpush1.bf16.xpose.msra.mxu0 %v21212_v27  ;;  %v21256_v27 = vld [vmem:[%s30890_s1 + $0x1e04] ss:$24 sps:$4 sm:$0xff]  }
 0x74c   :  { %12757 = vmatpush1.bf16.xpose.msra.mxu1 %v21215_v28  ;;  %12629 = vmatprep.subr.bf16.mxu0 %v21220_v29  ;;  %v21259_v28 = vld [vmem:[%s30890_s1 + $0x2104] ss:$24 sps:$4 sm:$0xff]   ;;  %v21254_v29 = vld [vmem:[%s30890_s1 + $0x1e00] ss:$24 sps:$4 sm:$0xff]  }
 0x74d   :  { %12758 = vmatprep.subr.bf16.mxu1 %v21223_v30  ;;  %v21257_v30 = vld [vmem:[%s30890_s1 + $0x2100] ss:$24 sps:$4 sm:$0xff]  }
 0x753   :  { %12630 = vmatpush1.bf16.xpose.msra.mxu0 %v21218_v39  ;;  %v21262_v39 = vld [vmem:[%s30890_s1 + $0x1e34] ss:$24 sps:$4 sm:$0xff]  }
 0x754   :  { %12759 = vmatpush1.bf16.xpose.msra.mxu1 %v21221_v40  ;;  %12631 = vmatprep.subr.bf16.mxu0 %v21226_v43  ;;  %v21265_v40 = vld [vmem:[%s30890_s1 + $0x2134] ss:$24 sps:$4 sm:$0xff]   ;;  %v21260_v43 = vld [vmem:[%s30890_s1 + $0x1e30] ss:$24 sps:$4 sm:$0xff]  }
 0x755   :  { %12760 = vmatprep.subr.bf16.mxu1 %v21229_v44  ;;  %v21263_v44 = vld [vmem:[%s30890_s1 + $0x2130] ss:$24 sps:$4 sm:$0xff]  }
 0x75b   :  { %12632 = vmatpush1.bf16.xpose.msra.mxu0 %v21224_v47  ;;  %v21271_v47 = vld [vmem:[%s30890_s1 + $0x2164] ss:$24 sps:$4 sm:$0xff]  }
 0x75c   :  { %12761 = vmatpush1.bf16.xpose.msra.mxu1 %v21227_v48  ;;  %12633 = vmatprep.subr.bf16.mxu0 %v21232_v11  ;;  %v21269_v48 = vld [vmem:[%s30890_s1 + $0x2160] ss:$24 sps:$4 sm:$0xff]   ;;  %v21274_v11 = vld [vmem:[%s30890_s1 + $0x1e94] ss:$24 sps:$4 sm:$0xff]  }
 0x75d   :  { %12762 = vmatprep.subr.bf16.mxu1 %v21235_v33  ;;  %v21277_v33 = vld [vmem:[%s30890_s1 + $0x2194] ss:$24 sps:$4 sm:$0xff]  }
 0x763   :  { %12634 = vmatpush1.bf16.xpose.msra.mxu0 %v21230_v12  ;;  %v21272_v12 = vld [vmem:[%s30890_s1 + $0x1e90] ss:$24 sps:$4 sm:$0xff]  }
 0x764   :  { %12763 = vmatpush1.bf16.xpose.msra.mxu1 %v21233_v49  ;;  %12635 = vmatprep.subr.bf16.mxu0 %v21238_v36  ;;  %v21275_v49 = vld [vmem:[%s30890_s1 + $0x2190] ss:$24 sps:$4 sm:$0xff]   ;;  %v21280_v36 = vld [vmem:[%s30890_s1 + $0x1ec4] ss:$24 sps:$4 sm:$0xff]  }
 0x765   :  { %12764 = vmatprep.subr.bf16.mxu1 %v21241_v50  ;;  %v21283_v50 = vld [vmem:[%s30890_s1 + $0x21c4] ss:$24 sps:$4 sm:$0xff]  }
 0x76b   :  { %12636 = vmatpush1.bf16.xpose.msra.mxu0 %v21236_v51  ;;  %v21278_v51 = vld [vmem:[%s30890_s1 + $0x1ec0] ss:$24 sps:$4 sm:$0xff]  }
 0x76c   :  { %12765 = vmatpush1.bf16.xpose.msra.mxu1 %v21239_v52  ;;  %12637 = vmatprep.subr.bf16.mxu0 %v21244_v53  ;;  %v21281_v52 = vld [vmem:[%s30890_s1 + $0x21c0] ss:$24 sps:$4 sm:$0xff]   ;;  %v21286_v53 = vld [vmem:[%s30890_s1 + $0x1ef4] ss:$24 sps:$4 sm:$0xff]  }
 0x76d   :  { %12766 = vmatprep.subr.bf16.mxu1 %v21247_v54  ;;  %v21289_v54 = vld [vmem:[%s30890_s1 + $0x21f4] ss:$24 sps:$4 sm:$0xff]  }
 0x773   :  { %12638 = vmatpush1.bf16.xpose.msra.mxu0 %v21242_v9  ;;  %v21284_v9 = vld [vmem:[%s30890_s1 + $0x1ef0] ss:$24 sps:$4 sm:$0xff]  }
 0x774   :  { %12767 = vmatpush1.bf16.xpose.msra.mxu1 %v21245_v10  ;;  %12639 = vmatprep.subr.bf16.mxu0 %v21250_v21  ;;  %v21287_v10 = vld [vmem:[%s30890_s1 + $0x21f0] ss:$24 sps:$4 sm:$0xff]   ;;  %v21292_v21 = vld [vmem:[%s30890_s1 + $0x1f24] ss:$24 sps:$4 sm:$0xff]  }
 0x775   :  { %12768 = vmatprep.subr.bf16.mxu1 %v21253_v22  ;;  %v21295_v22 = vld [vmem:[%s30890_s1 + $0x2224] ss:$24 sps:$4 sm:$0xff]  }
 0x77b   :  { %12640 = vmatpush1.bf16.xpose.msra.mxu0 %v21248_v25  ;;  %v21290_v25 = vld [vmem:[%s30890_s1 + $0x1f20] ss:$24 sps:$4 sm:$0xff]  }
 0x77c   :  { %12769 = vmatpush1.bf16.xpose.msra.mxu1 %v21251_v26  ;;  %12781 = vmatprep.subr.bf16.mxu0 %v21256_v27  ;;  %v21293_v26 = vld [vmem:[%s30890_s1 + $0x2220] ss:$24 sps:$4 sm:$0xff]   ;;  %v21298_v27 = vld [vmem:[%s30890_s1 + $0x1f54] ss:$24 sps:$4 sm:$0xff]  }
 0x77d   :  { %12910 = vmatprep.subr.bf16.mxu1 %v21259_v28  ;;  %v21301_v28 = vld [vmem:[%s30890_s1 + $0x2254] ss:$24 sps:$4 sm:$0xff]  }
 0x782   :  { %12642 = vmatmul.mubr.bf16.vlgmr.msra.gmra.mrb[16].mxu0 %v25140_v19 }
 0x783   :  { %12771 = vmatmul.mubr.bf16.vlgmr.msra.gmra.mrb[16].mxu1 %v25140_v19  ;;  %12782 = vmatpush1.bf16.xpose.msra.mxu0 %v21254_v29  ;;  %v21268_v19 = vld [vmem:[%s30890_s1 + $0x1e64] ss:$24 sps:$4 sm:$0xff]   ;;  %v21296_v29 = vld [vmem:[%s30890_s1 + $0x1f50] ss:$24 sps:$4 sm:$0xff]  }
 0x784   :  { %12911 = vmatpush1.bf16.xpose.msra.mxu1 %v21257_v30  ;;  %12783 = vmatprep.subr.bf16.mxu0 %v21262_v39  ;;  %v21299_v30 = vld [vmem:[%s30890_s1 + $0x2250] ss:$24 sps:$4 sm:$0xff]   ;;  %v21304_v39 = vld [vmem:[%s30890_s1 + $0x1f84] ss:$24 sps:$4 sm:$0xff]  }
 0x785   :  { %12912 = vmatprep.subr.bf16.mxu1 %v21265_v40  ;;  %12813 = vmatprep.mubr.bf16.mxu0 %v25147_v20  ;;  %v21307_v40 = vld [vmem:[%s30890_s1 + $0x2284] ss:$24 sps:$4 sm:$0xff]  }
 0x786   :  { %12942 = vmatprep.mubr.bf16.mxu1 %v25147_v20  ;;  %v21266_v20 = vld [vmem:[%s30890_s1 + $0x1e60] ss:$24 sps:$4 sm:$0xff]  }
 0x78b   :  { %12784 = vmatpush1.bf16.xpose.msra.mxu0 %v21260_v43  ;;  %v21302_v43 = vld [vmem:[%s30890_s1 + $0x1f80] ss:$24 sps:$4 sm:$0xff]  }
 0x78c   :  { %12913 = vmatpush1.bf16.xpose.msra.mxu1 %v21263_v44  ;;  %12785 = vmatprep.subr.bf16.mxu0 %v21268_v19  ;;  %v21305_v44 = vld [vmem:[%s30890_s1 + $0x2280] ss:$24 sps:$4 sm:$0xff]   ;;  %v21310_v19 = vld [vmem:[%s30890_s1 + $0x1fb4] ss:$24 sps:$4 sm:$0xff]  }
 0x78d   :  { %12914 = vmatprep.subr.bf16.mxu1 %v21271_v47  ;;  %v21313_v47 = vld [vmem:[%s30890_s1 + $0x22b4] ss:$24 sps:$4 sm:$0xff]  }
 0x793   :  { %12786 = vmatpush1.bf16.xpose.msra.mxu0 %v21266_v20  ;;  %v21308_v20 = vld [vmem:[%s30890_s1 + $0x1fb0] ss:$24 sps:$4 sm:$0xff]  }
 0x794   :  { %12915 = vmatpush1.bf16.xpose.msra.mxu1 %v21269_v48  ;;  %12787 = vmatprep.subr.bf16.mxu0 %v21274_v11  ;;  %v21311_v48 = vld [vmem:[%s30890_s1 + $0x22b0] ss:$24 sps:$4 sm:$0xff]   ;;  %v21316_v11 = vld [vmem:[%s30890_s1 + $0x1fe4] ss:$24 sps:$4 sm:$0xff]  }
 0x795   :  { %12916 = vmatprep.subr.bf16.mxu1 %v21277_v33  ;;  %v21319_v33 = vld [vmem:[%s30890_s1 + $0x22e4] ss:$24 sps:$4 sm:$0xff]  }
 0x79b   :  { %12788 = vmatpush1.bf16.xpose.msra.mxu0 %v21272_v12  ;;  %v21314_v12 = vld [vmem:[%s30890_s1 + $0x1fe0] ss:$24 sps:$4 sm:$0xff]  }
 0x79c   :  { %12917 = vmatpush1.bf16.xpose.msra.mxu1 %v21275_v49  ;;  %12789 = vmatprep.subr.bf16.mxu0 %v21280_v36  ;;  %v21317_v49 = vld [vmem:[%s30890_s1 + $0x22e0] ss:$24 sps:$4 sm:$0xff]   ;;  %v21322_v36 = vld [vmem:[%s30890_s1 + $0x2014] ss:$24 sps:$4 sm:$0xff]  }
 0x79d   :  { %12918 = vmatprep.subr.bf16.mxu1 %v21283_v50  ;;  %v21325_v50 = vld [vmem:[%s30890_s1 + $0x2314] ss:$24 sps:$4 sm:$0xff]  }
 0x7a3   :  { %12790 = vmatpush1.bf16.xpose.msra.mxu0 %v21278_v51  ;;  %v21320_v51 = vld [vmem:[%s30890_s1 + $0x2010] ss:$24 sps:$4 sm:$0xff]  }
 0x7a4   :  { %12919 = vmatpush1.bf16.xpose.msra.mxu1 %v21281_v52  ;;  %12791 = vmatprep.subr.bf16.mxu0 %v21286_v53  ;;  %v21323_v52 = vld [vmem:[%s30890_s1 + $0x2310] ss:$24 sps:$4 sm:$0xff]   ;;  %v21328_v53 = vld [vmem:[%s30890_s1 + $0x2044] ss:$24 sps:$4 sm:$0xff]  }
 0x7a5   :  { %12920 = vmatprep.subr.bf16.mxu1 %v21289_v54  ;;  %v21331_v54 = vld [vmem:[%s30890_s1 + $0x2344] ss:$24 sps:$4 sm:$0xff]  }
 0x7ab   :  { %12792 = vmatpush1.bf16.xpose.msra.mxu0 %v21284_v9  ;;  %v21326_v9 = vld [vmem:[%s30890_s1 + $0x2040] ss:$24 sps:$4 sm:$0xff]  }
 0x7ac   :  { %12921 = vmatpush1.bf16.xpose.msra.mxu1 %v21287_v10  ;;  %12793 = vmatprep.subr.bf16.mxu0 %v21292_v21  ;;  %v21329_v10 = vld [vmem:[%s30890_s1 + $0x2340] ss:$24 sps:$4 sm:$0xff]   ;;  %v21334_v21 = vld [vmem:[%s30890_s1 + $0x2074] ss:$24 sps:$4 sm:$0xff]  }
 0x7ad   :  { %12922 = vmatprep.subr.bf16.mxu1 %v21295_v22  ;;  %v21337_v22 = vld [vmem:[%s30890_s1 + $0x2374] ss:$24 sps:$4 sm:$0xff]  }
 0x7b3   :  { %12794 = vmatpush1.bf16.xpose.msra.mxu0 %v21290_v25  ;;  %v21332_v25 = vld [vmem:[%s30890_s1 + $0x2070] ss:$24 sps:$4 sm:$0xff]  }
 0x7b4   :  { %12923 = vmatpush1.bf16.xpose.msra.mxu1 %v21293_v26  ;;  %12795 = vmatprep.subr.bf16.mxu0 %v21298_v27  ;;  %v21335_v26 = vld [vmem:[%s30890_s1 + $0x2370] ss:$24 sps:$4 sm:$0xff]   ;;  %v21340_v27 = vld [vmem:[%s30890_s1 + $0x20a4] ss:$24 sps:$4 sm:$0xff]  }
 0x7b5   :  { %12924 = vmatprep.subr.bf16.mxu1 %v21301_v28  ;;  %v21343_v28 = vld [vmem:[%s30890_s1 + $0x23a4] ss:$24 sps:$4 sm:$0xff]  }
 0x7bb   :  { %12796 = vmatpush1.bf16.xpose.msra.mxu0 %v21296_v29  ;;  %v21338_v29 = vld [vmem:[%s30890_s1 + $0x20a0] ss:$24 sps:$4 sm:$0xff]  }
 0x7bc   :  { %12925 = vmatpush1.bf16.xpose.msra.mxu1 %v21299_v30  ;;  %12797 = vmatprep.subr.bf16.mxu0 %v21304_v39  ;;  %v21341_v30 = vld [vmem:[%s30890_s1 + $0x23a0] ss:$24 sps:$4 sm:$0xff]   ;;  %v21346_v39 = vld [vmem:[%s30890_s1 + $0x20d4] ss:$24 sps:$4 sm:$0xff]  }
 0x7bd   :  { %12926 = vmatprep.subr.bf16.mxu1 %v21307_v40  ;;  %v21349_v40 = vld [vmem:[%s30890_s1 + $0x23d4] ss:$24 sps:$4 sm:$0xff]  }
 0x7c3   :  { %12798 = vmatpush1.bf16.xpose.msra.mxu0 %v21302_v43  ;;  %v21344_v43 = vld [vmem:[%s30890_s1 + $0x20d0] ss:$24 sps:$4 sm:$0xff]  }
 0x7c4   :  { %12927 = vmatpush1.bf16.xpose.msra.mxu1 %v21305_v44  ;;  %12799 = vmatprep.subr.bf16.mxu0 %v21310_v19  ;;  %v21347_v44 = vld [vmem:[%s30890_s1 + $0x23d0] ss:$24 sps:$4 sm:$0xff]   ;;  %v21352_v19 = vld [vmem:[%s30890_s1 + $0x1e0c] ss:$24 sps:$4 sm:$0xff]  }
 0x7c5   :  { %12928 = vmatprep.subr.bf16.mxu1 %v21313_v47  ;;  %v21355_v47 = vld [vmem:[%s30890_s1 + $0x210c] ss:$24 sps:$4 sm:$0xff]  }
 0x7cb   :  { %12800 = vmatpush1.bf16.xpose.msra.mxu0 %v21308_v20  ;;  %v21350_v20 = vld [vmem:[%s30890_s1 + $0x1e08] ss:$24 sps:$4 sm:$0xff]  }
 0x7cc   :  { %12929 = vmatpush1.bf16.xpose.msra.mxu1 %v21311_v48  ;;  %12801 = vmatprep.subr.bf16.mxu0 %v21316_v11  ;;  %v21353_v48 = vld [vmem:[%s30890_s1 + $0x2108] ss:$24 sps:$4 sm:$0xff]   ;;  %v21358_v11 = vld [vmem:[%s30890_s1 + $0x1e3c] ss:$24 sps:$4 sm:$0xff]  }
 0x7cd   :  { %12930 = vmatprep.subr.bf16.mxu1 %v21319_v33  ;;  %v21361_v33 = vld [vmem:[%s30890_s1 + $0x213c] ss:$24 sps:$4 sm:$0xff]  }
 0x7d3   :  { %12802 = vmatpush1.bf16.xpose.msra.mxu0 %v21314_v12  ;;  %v21356_v12 = vld [vmem:[%s30890_s1 + $0x1e38] ss:$24 sps:$4 sm:$0xff]  }
 0x7d4   :  { %12931 = vmatpush1.bf16.xpose.msra.mxu1 %v21317_v49  ;;  %12803 = vmatprep.subr.bf16.mxu0 %v21322_v36  ;;  %v21359_v49 = vld [vmem:[%s30890_s1 + $0x2138] ss:$24 sps:$4 sm:$0xff]   ;;  %v21367_v36 = vld [vmem:[%s30890_s1 + $0x216c] ss:$24 sps:$4 sm:$0xff]  }
 0x7d5   :  { %12932 = vmatprep.subr.bf16.mxu1 %v21325_v50  ;;  %v21365_v50 = vld [vmem:[%s30890_s1 + $0x2168] ss:$24 sps:$4 sm:$0xff]  }
 0x7db   :  { %12804 = vmatpush1.bf16.xpose.msra.mxu0 %v21320_v51  ;;  %v21370_v51 = vld [vmem:[%s30890_s1 + $0x1e9c] ss:$24 sps:$4 sm:$0xff]  }
 0x7dc   :  { %12933 = vmatpush1.bf16.xpose.msra.mxu1 %v21323_v52  ;;  %12805 = vmatprep.subr.bf16.mxu0 %v21328_v53  ;;  %v21373_v52 = vld [vmem:[%s30890_s1 + $0x219c] ss:$24 sps:$4 sm:$0xff]   ;;  %v21368_v53 = vld [vmem:[%s30890_s1 + $0x1e98] ss:$24 sps:$4 sm:$0xff]  }
 0x7dd   :  { %12934 = vmatprep.subr.bf16.mxu1 %v21331_v54  ;;  %v21371_v54 = vld [vmem:[%s30890_s1 + $0x2198] ss:$24 sps:$4 sm:$0xff]  }
 0x7e3   :  { %12806 = vmatpush1.bf16.xpose.msra.mxu0 %v21326_v9  ;;  %v21376_v9 = vld [vmem:[%s30890_s1 + $0x1ecc] ss:$24 sps:$4 sm:$0xff]  }
 0x7e4   :  { %12935 = vmatpush1.bf16.xpose.msra.mxu1 %v21329_v10  ;;  %12807 = vmatprep.subr.bf16.mxu0 %v21334_v21  ;;  %v21379_v10 = vld [vmem:[%s30890_s1 + $0x21cc] ss:$24 sps:$4 sm:$0xff]   ;;  %v21374_v21 = vld [vmem:[%s30890_s1 + $0x1ec8] ss:$24 sps:$4 sm:$0xff]  }
 0x7e5   :  { %12936 = vmatprep.subr.bf16.mxu1 %v21337_v22  ;;  %v21377_v22 = vld [vmem:[%s30890_s1 + $0x21c8] ss:$24 sps:$4 sm:$0xff]  }
 0x7eb   :  { %12808 = vmatpush1.bf16.xpose.msra.mxu0 %v21332_v25  ;;  %v21382_v25 = vld [vmem:[%s30890_s1 + $0x1efc] ss:$24 sps:$4 sm:$0xff]  }
 0x7ec   :  { %12937 = vmatpush1.bf16.xpose.msra.mxu1 %v21335_v26  ;;  %12809 = vmatprep.subr.bf16.mxu0 %v21340_v27  ;;  %v21385_v26 = vld [vmem:[%s30890_s1 + $0x21fc] ss:$24 sps:$4 sm:$0xff]   ;;  %v21380_v27 = vld [vmem:[%s30890_s1 + $0x1ef8] ss:$24 sps:$4 sm:$0xff]  }
 0x7ed   :  { %12938 = vmatprep.subr.bf16.mxu1 %v21343_v28  ;;  %v21383_v28 = vld [vmem:[%s30890_s1 + $0x21f8] ss:$24 sps:$4 sm:$0xff]  }
 0x7f3   :  { %12810 = vmatpush1.bf16.xpose.msra.mxu0 %v21338_v29  ;;  %v21388_v29 = vld [vmem:[%s30890_s1 + $0x1f2c] ss:$24 sps:$4 sm:$0xff]  }
 0x7f4   :  { %12939 = vmatpush1.bf16.xpose.msra.mxu1 %v21341_v30  ;;  %12811 = vmatprep.subr.bf16.mxu0 %v21346_v39  ;;  %v21391_v30 = vld [vmem:[%s30890_s1 + $0x222c] ss:$24 sps:$4 sm:$0xff]   ;;  %v21386_v39 = vld [vmem:[%s30890_s1 + $0x1f28] ss:$24 sps:$4 sm:$0xff]  }
 0x7f5   :  { %12940 = vmatprep.subr.bf16.mxu1 %v21349_v40  ;;  %v21389_v40 = vld [vmem:[%s30890_s1 + $0x2228] ss:$24 sps:$4 sm:$0xff]  }
 0x7fb   :  { %12812 = vmatpush1.bf16.xpose.msra.mxu0 %v21344_v43  ;;  %v21394_v43 = vld [vmem:[%s30890_s1 + $0x1f5c] ss:$24 sps:$4 sm:$0xff]  }
 0x7fc   :  { %12941 = vmatpush1.bf16.xpose.msra.mxu1 %v21347_v44  ;;  %12824 = vmatprep.subr.bf16.mxu0 %v21352_v19  ;;  %v21397_v44 = vld [vmem:[%s30890_s1 + $0x225c] ss:$24 sps:$4 sm:$0xff]   ;;  %v21392_v19 = vld [vmem:[%s30890_s1 + $0x1f58] ss:$24 sps:$4 sm:$0xff]  }
 0x7fd   :  { %12953 = vmatprep.subr.bf16.mxu1 %v21355_v47  ;;  %v21395_v47 = vld [vmem:[%s30890_s1 + $0x2258] ss:$24 sps:$4 sm:$0xff]  }
 0x802   :  { %12814 = vmatmul.mubr.bf16.vlgmr.msra.gmra.mrb[20].mxu0 %v25346_v57 }
 0x803   :  { %12943 = vmatmul.mubr.bf16.vlgmr.msra.gmra.mrb[20].mxu1 %v25346_v57  ;;  %12825 = vmatpush1.bf16.xpose.msra.mxu0 %v21350_v20  ;;  %v21364_v57 = vld [vmem:[%s30890_s1 + $0x1e6c] ss:$24 sps:$4 sm:$0xff]  }
 0x804   :  { %12954 = vmatpush1.bf16.xpose.msra.mxu1 %v21353_v48  ;;  %12826 = vmatprep.subr.bf16.mxu0 %v21358_v11  ;;  %v21400_v20 = vld [vmem:[%s30890_s1 + $0x1f8c] ss:$24 sps:$4 sm:$0xff]   ;;  %v21398_v11 = vld [vmem:[%s30890_s1 + $0x1f88] ss:$24 sps:$4 sm:$0xff]  }
 0x805   :  { %12955 = vmatprep.subr.bf16.mxu1 %v21361_v33  ;;  %12856 = vmatprep.mubr.bf16.mxu0 %v25353_v58  ;;  %v21403_v48 = vld [vmem:[%s30890_s1 + $0x228c] ss:$24 sps:$4 sm:$0xff]   ;;  %v21401_v33 = vld [vmem:[%s30890_s1 + $0x2288] ss:$24 sps:$4 sm:$0xff]  }
 0x806   :  { %12985 = vmatprep.mubr.bf16.mxu1 %v25353_v58  ;;  %v21362_v58 = vld [vmem:[%s30890_s1 + $0x1e68] ss:$24 sps:$4 sm:$0xff]  }
 0x80b   :  { %12827 = vmatpush1.bf16.xpose.msra.mxu0 %v21356_v12  ;;  %v21406_v12 = vld [vmem:[%s30890_s1 + $0x1fbc] ss:$24 sps:$4 sm:$0xff]  }
 0x80c   :  { %12956 = vmatpush1.bf16.xpose.msra.mxu1 %v21359_v49  ;;  %12828 = vmatprep.subr.bf16.mxu0 %v21364_v57  ;;  %v21409_v49 = vld [vmem:[%s30890_s1 + $0x22bc] ss:$24 sps:$4 sm:$0xff]   ;;  %v21404_v57 = vld [vmem:[%s30890_s1 + $0x1fb8] ss:$24 sps:$4 sm:$0xff]  }
 0x80d   :  { %12957 = vmatprep.subr.bf16.mxu1 %v21367_v36  ;;  %v21407_v36 = vld [vmem:[%s30890_s1 + $0x22b8] ss:$24 sps:$4 sm:$0xff]  }
 0x813   :  { %12829 = vmatpush1.bf16.xpose.msra.mxu0 %v21362_v58  ;;  %v21412_v58 = vld [vmem:[%s30890_s1 + $0x1fec] ss:$24 sps:$4 sm:$0xff]  }
 0x814   :  { %12958 = vmatpush1.bf16.xpose.msra.mxu1 %v21365_v50  ;;  %12830 = vmatprep.subr.bf16.mxu0 %v21370_v51  ;;  %v21415_v50 = vld [vmem:[%s30890_s1 + $0x22ec] ss:$24 sps:$4 sm:$0xff]   ;;  %v21410_v51 = vld [vmem:[%s30890_s1 + $0x1fe8] ss:$24 sps:$4 sm:$0xff]  }
 0x815   :  { %12959 = vmatprep.subr.bf16.mxu1 %v21373_v52  ;;  %v21413_v52 = vld [vmem:[%s30890_s1 + $0x22e8] ss:$24 sps:$4 sm:$0xff]  }
 0x81b   :  { %12831 = vmatpush1.bf16.xpose.msra.mxu0 %v21368_v53  ;;  %v21418_v53 = vld [vmem:[%s30890_s1 + $0x201c] ss:$24 sps:$4 sm:$0xff]  }
 0x81c   :  { %12960 = vmatpush1.bf16.xpose.msra.mxu1 %v21371_v54  ;;  %12832 = vmatprep.subr.bf16.mxu0 %v21376_v9  ;;  %v21421_v54 = vld [vmem:[%s30890_s1 + $0x231c] ss:$24 sps:$4 sm:$0xff]  }
 0x81d   :  { %12961 = vmatprep.subr.bf16.mxu1 %v21379_v10 }
 0x823   :  { %12833 = vmatpush1.bf16.xpose.msra.mxu0 %v21374_v21 }
 0x824   :  { %12962 = vmatpush1.bf16.xpose.msra.mxu1 %v21377_v22  ;;  %12834 = vmatprep.subr.bf16.mxu0 %v21382_v25 }
 0x825   :  { %12963 = vmatprep.subr.bf16.mxu1 %v21385_v26 }
 0x82b   :  { %12835 = vmatpush1.bf16.xpose.msra.mxu0 %v21380_v27  ;;  %v21416_v27 = vld [vmem:[%s30890_s1 + $0x2018] ss:$24 sps:$4 sm:$0xff]  }
 0x82c   :  { %12964 = vmatpush1.bf16.xpose.msra.mxu1 %v21383_v28  ;;  %12836 = vmatprep.subr.bf16.mxu0 %v21388_v29  ;;  %v21419_v28 = vld [vmem:[%s30890_s1 + $0x2318] ss:$24 sps:$4 sm:$0xff]  }
 0x82d   :  { %12965 = vmatprep.subr.bf16.mxu1 %v21391_v30 }
 0x833   :  { %12837 = vmatpush1.bf16.xpose.msra.mxu0 %v21386_v39  ;;  %v21424_v39 = vld [vmem:[%s30890_s1 + $0x204c] ss:$24 sps:$4 sm:$0xff]  }
 0x834   :  { %12966 = vmatpush1.bf16.xpose.msra.mxu1 %v21389_v40  ;;  %12838 = vmatprep.subr.bf16.mxu0 %v21394_v43  ;;  %v21427_v40 = vld [vmem:[%s30890_s1 + $0x234c] ss:$24 sps:$4 sm:$0xff]   ;;  %v21422_v43 = vld [vmem:[%s30890_s1 + $0x2048] ss:$24 sps:$4 sm:$0xff]  }
 0x835   :  { %12967 = vmatprep.subr.bf16.mxu1 %v21397_v44  ;;  %v21425_v44 = vld [vmem:[%s30890_s1 + $0x2348] ss:$24 sps:$4 sm:$0xff]  }
 0x83b   :  { %12839 = vmatpush1.bf16.xpose.msra.mxu0 %v21392_v19  ;;  %v21430_v19 = vld [vmem:[%s30890_s1 + $0x207c] ss:$24 sps:$4 sm:$0xff]  }
 0x83c   :  { %12968 = vmatpush1.bf16.xpose.msra.mxu1 %v21395_v47  ;;  %12840 = vmatprep.subr.bf16.mxu0 %v21400_v20  ;;  %v21433_v47 = vld [vmem:[%s30890_s1 + $0x237c] ss:$24 sps:$4 sm:$0xff]   ;;  %v21428_v20 = vld [vmem:[%s30890_s1 + $0x2078] ss:$24 sps:$4 sm:$0xff]  }
 0x83d   :  { %12969 = vmatprep.subr.bf16.mxu1 %v21403_v48  ;;  %v21431_v48 = vld [vmem:[%s30890_s1 + $0x2378] ss:$24 sps:$4 sm:$0xff]  }
 0x843   :  { %12841 = vmatpush1.bf16.xpose.msra.mxu0 %v21398_v11  ;;  %v21436_v11 = vld [vmem:[%s30890_s1 + $0x20ac] ss:$24 sps:$4 sm:$0xff]  }
 0x844   :  { %12970 = vmatpush1.bf16.xpose.msra.mxu1 %v21401_v33  ;;  %12842 = vmatprep.subr.bf16.mxu0 %v21406_v12  ;;  %v21439_v33 = vld [vmem:[%s30890_s1 + $0x23ac] ss:$24 sps:$4 sm:$0xff]   ;;  %v21434_v12 = vld [vmem:[%s30890_s1 + $0x20a8] ss:$24 sps:$4 sm:$0xff]  }
 0x845   :  { %12971 = vmatprep.subr.bf16.mxu1 %v21409_v49  ;;  %v21437_v49 = vld [vmem:[%s30890_s1 + $0x23a8] ss:$24 sps:$4 sm:$0xff]  }
 0x84b   :  { %12843 = vmatpush1.bf16.xpose.msra.mxu0 %v21404_v57  ;;  %v21442_v57 = vld [vmem:[%s30890_s1 + $0x20dc] ss:$24 sps:$4 sm:$0xff]  }
 0x84c   :  { %12972 = vmatpush1.bf16.xpose.msra.mxu1 %v21407_v36  ;;  %12844 = vmatprep.subr.bf16.mxu0 %v21412_v58  ;;  %v21445_v36 = vld [vmem:[%s30890_s1 + $0x23dc] ss:$24 sps:$4 sm:$0xff]   ;;  %v21440_v58 = vld [vmem:[%s30890_s1 + $0x20d8] ss:$24 sps:$4 sm:$0xff]  }
 0x84d   :  { %12973 = vmatprep.subr.bf16.mxu1 %v21415_v50  ;;  %v21443_v50 = vld [vmem:[%s30890_s1 + $0x23d8] ss:$24 sps:$4 sm:$0xff]  }
 0x853   :  { %12845 = vmatpush1.bf16.xpose.msra.mxu0 %v21410_v51  ;;  %v21448_v51 = vld [vmem:[%s30890_s1 + $0x1e14] ss:$24 sps:$4 sm:$0xff]  }
 0x854   :  { %12974 = vmatpush1.bf16.xpose.msra.mxu1 %v21413_v52  ;;  %12846 = vmatprep.subr.bf16.mxu0 %v21418_v53  ;;  %v21451_v52 = vld [vmem:[%s30890_s1 + $0x2114] ss:$24 sps:$4 sm:$0xff]   ;;  %v21446_v53 = vld [vmem:[%s30890_s1 + $0x1e10] ss:$24 sps:$4 sm:$0xff]  }
 0x855   :  { %12975 = vmatprep.subr.bf16.mxu1 %v21421_v54  ;;  %v26091_v9 = vpop.f32.mrb[16].mxu0  ;;  %v21449_v54 = vld [vmem:[%s30890_s1 + $0x2110] ss:$24 sps:$4 sm:$0xff]  }
 0x856   :  { %v26093_v10 = vpop.f32.mrb[16].mxu1  ;;  %v26095_v21 = vpop.f32.mrb[17].mxu0 }
 0x857   :  { %v26097_v22 = vpop.f32.mrb[17].mxu1  ;;  %v26099_v25 = vpop.f32.mrb[18].mxu0 }
 0x858   :  { %v26101_v26 = vpop.f32.mrb[18].mxu1  ;;  %v26109_v29 = vpop.f32.mrb[19].mxu0 }
 0x859   :  { %v26111_v30 = vpop.f32.mrb[19].mxu1 }
 0x85b   :  { %12847 = vmatpush1.bf16.xpose.msra.mxu0 %v21416_v27  ;;  %v21454_v27 = vld [vmem:[%s30890_s1 + $0x1e44] ss:$24 sps:$4 sm:$0xff]  }
 0x85c   :  { %12976 = vmatpush1.bf16.xpose.msra.mxu1 %v21419_v28  ;;  %12848 = vmatprep.subr.bf16.mxu0 %v21424_v39  ;;  %v21457_v28 = vld [vmem:[%s30890_s1 + $0x2144] ss:$24 sps:$4 sm:$0xff]   ;;  %v21452_v39 = vld [vmem:[%s30890_s1 + $0x1e40] ss:$24 sps:$4 sm:$0xff]  }
 0x85d   :  { %12977 = vmatprep.subr.bf16.mxu1 %v21427_v40  ;;  %v21455_v40 = vld [vmem:[%s30890_s1 + $0x2140] ss:$24 sps:$4 sm:$0xff]  }
 0x863   :  { %12849 = vmatpush1.bf16.xpose.msra.mxu0 %v21422_v43  ;;  %v21463_v43 = vld [vmem:[%s30890_s1 + $0x2174] ss:$24 sps:$4 sm:$0xff]  }
 0x864   :  { %12978 = vmatpush1.bf16.xpose.msra.mxu1 %v21425_v44  ;;  %12850 = vmatprep.subr.bf16.mxu0 %v21430_v19  ;;  %v21461_v44 = vld [vmem:[%s30890_s1 + $0x2170] ss:$24 sps:$4 sm:$0xff]   ;;  %v21466_v19 = vld [vmem:[%s30890_s1 + $0x1ea4] ss:$24 sps:$4 sm:$0xff]  }
 0x865   :  { %12979 = vmatprep.subr.bf16.mxu1 %v21433_v47  ;;  %v21469_v47 = vld [vmem:[%s30890_s1 + $0x21a4] ss:$24 sps:$4 sm:$0xff]  }
 0x86b   :  { %12851 = vmatpush1.bf16.xpose.msra.mxu0 %v21428_v20  ;;  %v21464_v20 = vld [vmem:[%s30890_s1 + $0x1ea0] ss:$24 sps:$4 sm:$0xff]  }
 0x86c   :  { %12980 = vmatpush1.bf16.xpose.msra.mxu1 %v21431_v48  ;;  %12852 = vmatprep.subr.bf16.mxu0 %v21436_v11  ;;  %v21467_v48 = vld [vmem:[%s30890_s1 + $0x21a0] ss:$24 sps:$4 sm:$0xff]   ;;  %v21472_v11 = vld [vmem:[%s30890_s1 + $0x1ed4] ss:$24 sps:$4 sm:$0xff]  }
 0x86d   :  { %12981 = vmatprep.subr.bf16.mxu1 %v21439_v33  ;;  %v21475_v33 = vld [vmem:[%s30890_s1 + $0x21d4] ss:$24 sps:$4 sm:$0xff]  }
 0x873   :  { %12853 = vmatpush1.bf16.xpose.msra.mxu0 %v21434_v12  ;;  %v21470_v12 = vld [vmem:[%s30890_s1 + $0x1ed0] ss:$24 sps:$4 sm:$0xff]  }
 0x874   :  { %12982 = vmatpush1.bf16.xpose.msra.mxu1 %v21437_v49  ;;  %12854 = vmatprep.subr.bf16.mxu0 %v21442_v57  ;;  %v21473_v49 = vld [vmem:[%s30890_s1 + $0x21d0] ss:$24 sps:$4 sm:$0xff]   ;;  %v21478_v57 = vld [vmem:[%s30890_s1 + $0x1f04] ss:$24 sps:$4 sm:$0xff]  }
 0x875   :  { %12983 = vmatprep.subr.bf16.mxu1 %v21445_v36  ;;  %v21481_v36 = vld [vmem:[%s30890_s1 + $0x2204] ss:$24 sps:$4 sm:$0xff]  }
 0x87b   :  { %12855 = vmatpush1.bf16.xpose.msra.mxu0 %v21440_v58  ;;  %v21476_v58 = vld [vmem:[%s30890_s1 + $0x1f00] ss:$24 sps:$4 sm:$0xff]  }
 0x87c   :  { %12984 = vmatpush1.bf16.xpose.msra.mxu1 %v21443_v50  ;;  %12867 = vmatprep.subr.bf16.mxu0 %v21448_v51  ;;  %v21479_v50 = vld [vmem:[%s30890_s1 + $0x2200] ss:$24 sps:$4 sm:$0xff]   ;;  %v21484_v51 = vld [vmem:[%s30890_s1 + $0x1f34] ss:$24 sps:$4 sm:$0xff]  }
 0x87d   :  { %12996 = vmatprep.subr.bf16.mxu1 %v21451_v52  ;;  %v21487_v52 = vld [vmem:[%s30890_s1 + $0x2234] ss:$24 sps:$4 sm:$0xff]  }
 0x882   :  { %12857 = vmatmul.mubr.bf16.vlgmr.msra.gmra.mrb[20].mxu0 %v25568_v61 }
 0x883   :  { %12986 = vmatmul.mubr.bf16.vlgmr.msra.gmra.mrb[20].mxu1 %v25568_v61  ;;  %12868 = vmatpush1.bf16.xpose.msra.mxu0 %v21446_v53  ;;  %v21460_v61 = vld [vmem:[%s30890_s1 + $0x1e74] ss:$24 sps:$4 sm:$0xff]   ;;  %v21482_v53 = vld [vmem:[%s30890_s1 + $0x1f30] ss:$24 sps:$4 sm:$0xff]  }
 0x884   :  { %12997 = vmatpush1.bf16.xpose.msra.mxu1 %v21449_v54  ;;  %12869 = vmatprep.subr.bf16.mxu0 %v21454_v27  ;;  %v21485_v54 = vld [vmem:[%s30890_s1 + $0x2230] ss:$24 sps:$4 sm:$0xff]   ;;  %v21490_v27 = vld [vmem:[%s30890_s1 + $0x1f64] ss:$24 sps:$4 sm:$0xff]  }
 0x885   :  { %12998 = vmatprep.subr.bf16.mxu1 %v21457_v28  ;;  %12899 = vmatprep.mubr.bf16.mxu0 %v25575_v2  ;;  %v21493_v28 = vld [vmem:[%s30890_s1 + $0x2264] ss:$24 sps:$4 sm:$0xff]  }
 0x886   :  { %13028 = vmatprep.mubr.bf16.mxu1 %v25575_v2  ;;  %v21458_v2 = vld [vmem:[%s30890_s1 + $0x1e70] ss:$24 sps:$4 sm:$0xff]  }
 0x88b   :  { %12870 = vmatpush1.bf16.xpose.msra.mxu0 %v21452_v39  ;;  %v21488_v39 = vld [vmem:[%s30890_s1 + $0x1f60] ss:$24 sps:$4 sm:$0xff]  }
 0x88c   :  { %12999 = vmatpush1.bf16.xpose.msra.mxu1 %v21455_v40  ;;  %12871 = vmatprep.subr.bf16.mxu0 %v21460_v61  ;;  %v21491_v40 = vld [vmem:[%s30890_s1 + $0x2260] ss:$24 sps:$4 sm:$0xff]   ;;  %v21496_v61 = vld [vmem:[%s30890_s1 + $0x1f94] ss:$24 sps:$4 sm:$0xff]  }
 0x88d   :  { %13000 = vmatprep.subr.bf16.mxu1 %v21463_v43  ;;  %v21499_v43 = vld [vmem:[%s30890_s1 + $0x2294] ss:$24 sps:$4 sm:$0xff]  }
 0x893   :  { %12872 = vmatpush1.bf16.xpose.msra.mxu0 %v21458_v2  ;;  %v21494_v2 = vld [vmem:[%s30890_s1 + $0x1f90] ss:$24 sps:$4 sm:$0xff]  }
 0x894   :  { %13001 = vmatpush1.bf16.xpose.msra.mxu1 %v21461_v44  ;;  %12873 = vmatprep.subr.bf16.mxu0 %v21466_v19  ;;  %v21497_v44 = vld [vmem:[%s30890_s1 + $0x2290] ss:$24 sps:$4 sm:$0xff]   ;;  %v21502_v19 = vld [vmem:[%s30890_s1 + $0x1fc4] ss:$24 sps:$4 sm:$0xff]  }
 0x895   :  { %13002 = vmatprep.subr.bf16.mxu1 %v21469_v47  ;;  %v21505_v47 = vld [vmem:[%s30890_s1 + $0x22c4] ss:$24 sps:$4 sm:$0xff]  }
 0x89b   :  { %12874 = vmatpush1.bf16.xpose.msra.mxu0 %v21464_v20  ;;  %v21500_v20 = vld [vmem:[%s30890_s1 + $0x1fc0] ss:$24 sps:$4 sm:$0xff]  }
 0x89c   :  { %13003 = vmatpush1.bf16.xpose.msra.mxu1 %v21467_v48  ;;  %12875 = vmatprep.subr.bf16.mxu0 %v21472_v11  ;;  %v21503_v48 = vld [vmem:[%s30890_s1 + $0x22c0] ss:$24 sps:$4 sm:$0xff]   ;;  %v21508_v11 = vld [vmem:[%s30890_s1 + $0x1ff4] ss:$24 sps:$4 sm:$0xff]  }
 0x89d   :  { %13004 = vmatprep.subr.bf16.mxu1 %v21475_v33  ;;  %v21511_v33 = vld [vmem:[%s30890_s1 + $0x22f4] ss:$24 sps:$4 sm:$0xff]  }
 0x8a3   :  { %12876 = vmatpush1.bf16.xpose.msra.mxu0 %v21470_v12  ;;  %v21506_v12 = vld [vmem:[%s30890_s1 + $0x1ff0] ss:$24 sps:$4 sm:$0xff]  }
 0x8a4   :  { %13005 = vmatpush1.bf16.xpose.msra.mxu1 %v21473_v49  ;;  %12877 = vmatprep.subr.bf16.mxu0 %v21478_v57  ;;  %v21509_v49 = vld [vmem:[%s30890_s1 + $0x22f0] ss:$24 sps:$4 sm:$0xff]   ;;  %v21514_v57 = vld [vmem:[%s30890_s1 + $0x2024] ss:$24 sps:$4 sm:$0xff]  }
 0x8a5   :  { %13006 = vmatprep.subr.bf16.mxu1 %v21481_v36  ;;  %v21517_v36 = vld [vmem:[%s30890_s1 + $0x2324] ss:$24 sps:$4 sm:$0xff]  }
 0x8ab   :  { %12878 = vmatpush1.bf16.xpose.msra.mxu0 %v21476_v58  ;;  %v21512_v58 = vld [vmem:[%s30890_s1 + $0x2020] ss:$24 sps:$4 sm:$0xff]  }
 0x8ac   :  { %13007 = vmatpush1.bf16.xpose.msra.mxu1 %v21479_v50  ;;  %12879 = vmatprep.subr.bf16.mxu0 %v21484_v51  ;;  %v21515_v50 = vld [vmem:[%s30890_s1 + $0x2320] ss:$24 sps:$4 sm:$0xff]   ;;  %v21520_v51 = vld [vmem:[%s30890_s1 + $0x2054] ss:$24 sps:$4 sm:$0xff]  }
 0x8ad   :  { %13008 = vmatprep.subr.bf16.mxu1 %v21487_v52  ;;  %v21523_v52 = vld [vmem:[%s30890_s1 + $0x2354] ss:$24 sps:$4 sm:$0xff]  }
 0x8b3   :  { %12880 = vmatpush1.bf16.xpose.msra.mxu0 %v21482_v53  ;;  %v21518_v53 = vld [vmem:[%s30890_s1 + $0x2050] ss:$24 sps:$4 sm:$0xff]  }
 0x8b4   :  { %13009 = vmatpush1.bf16.xpose.msra.mxu1 %v21485_v54  ;;  %12881 = vmatprep.subr.bf16.mxu0 %v21490_v27  ;;  %v21521_v54 = vld [vmem:[%s30890_s1 + $0x2350] ss:$24 sps:$4 sm:$0xff]   ;;  %v21526_v27 = vld [vmem:[%s30890_s1 + $0x2084] ss:$24 sps:$4 sm:$0xff]  }
 0x8b5   :  { %13010 = vmatprep.subr.bf16.mxu1 %v21493_v28  ;;  %v21529_v28 = vld [vmem:[%s30890_s1 + $0x2384] ss:$24 sps:$4 sm:$0xff]  }
 0x8bb   :  { %12882 = vmatpush1.bf16.xpose.msra.mxu0 %v21488_v39  ;;  %v21524_v39 = vld [vmem:[%s30890_s1 + $0x2080] ss:$24 sps:$4 sm:$0xff]  }
 0x8bc   :  { %13011 = vmatpush1.bf16.xpose.msra.mxu1 %v21491_v40  ;;  %12883 = vmatprep.subr.bf16.mxu0 %v21496_v61  ;;  %v21527_v40 = vld [vmem:[%s30890_s1 + $0x2380] ss:$24 sps:$4 sm:$0xff]   ;;  %v21532_v61 = vld [vmem:[%s30890_s1 + $0x20b4] ss:$24 sps:$4 sm:$0xff]  }
 0x8bd   :  { %13012 = vmatprep.subr.bf16.mxu1 %v21499_v43  ;;  %v21535_v43 = vld [vmem:[%s30890_s1 + $0x23b4] ss:$24 sps:$4 sm:$0xff]  }
 0x8c3   :  { %12884 = vmatpush1.bf16.xpose.msra.mxu0 %v21494_v2  ;;  %v21530_v2 = vld [vmem:[%s30890_s1 + $0x20b0] ss:$24 sps:$4 sm:$0xff]  }
 0x8c4   :  { %13013 = vmatpush1.bf16.xpose.msra.mxu1 %v21497_v44  ;;  %12885 = vmatprep.subr.bf16.mxu0 %v21502_v19  ;;  %v21533_v44 = vld [vmem:[%s30890_s1 + $0x23b0] ss:$24 sps:$4 sm:$0xff]   ;;  %v21538_v19 = vld [vmem:[%s30890_s1 + $0x20e4] ss:$24 sps:$4 sm:$0xff]  }
 0x8c5   :  { %13014 = vmatprep.subr.bf16.mxu1 %v21505_v47  ;;  %v21541_v47 = vld [vmem:[%s30890_s1 + $0x23e4] ss:$24 sps:$4 sm:$0xff]  }
 0x8cb   :  { %12886 = vmatpush1.bf16.xpose.msra.mxu0 %v21500_v20  ;;  %v21536_v20 = vld [vmem:[%s30890_s1 + $0x20e0] ss:$24 sps:$4 sm:$0xff]  }
 0x8cc   :  { %13015 = vmatpush1.bf16.xpose.msra.mxu1 %v21503_v48  ;;  %12887 = vmatprep.subr.bf16.mxu0 %v21508_v11  ;;  %v21539_v48 = vld [vmem:[%s30890_s1 + $0x23e0] ss:$24 sps:$4 sm:$0xff]   ;;  %v21544_v11 = vld [vmem:[%s30890_s1 + $0x2404] ss:$24 sps:$4 sm:$0xff]  }
 0x8cd   :  { %13016 = vmatprep.subr.bf16.mxu1 %v21511_v33  ;;  %v21547_v33 = vld [vmem:[%s30890_s1 + $0x2704] ss:$24 sps:$4 sm:$0xff]  }
 0x8d3   :  { %12888 = vmatpush1.bf16.xpose.msra.mxu0 %v21506_v12  ;;  %v21542_v12 = vld [vmem:[%s30890_s1 + $0x2400] ss:$24 sps:$4 sm:$0xff]  }
 0x8d4   :  { %13017 = vmatpush1.bf16.xpose.msra.mxu1 %v21509_v49  ;;  %12889 = vmatprep.subr.bf16.mxu0 %v21514_v57  ;;  %v21545_v49 = vld [vmem:[%s30890_s1 + $0x2700] ss:$24 sps:$4 sm:$0xff]   ;;  %v21550_v57 = vld [vmem:[%s30890_s1 + $0x2434] ss:$24 sps:$4 sm:$0xff]  }
 0x8d5   :  { %13018 = vmatprep.subr.bf16.mxu1 %v21517_v36  ;;  %v21553_v36 = vld [vmem:[%s30890_s1 + $0x2734] ss:$24 sps:$4 sm:$0xff]  }
 0x8db   :  { %12890 = vmatpush1.bf16.xpose.msra.mxu0 %v21512_v58  ;;  %v26378_v58 = vld [vmem:[%s30891_s0 + $0x10] ss:$24 sps:$4 sm:$0xff]  }
 0x8dc   :  { %13019 = vmatpush1.bf16.xpose.msra.mxu1 %v21515_v50  ;;  %12891 = vmatprep.subr.bf16.mxu0 %v21520_v51  ;;  %v26385_v50 = vld [vmem:[%s30891_s0 + $0x4] ss:$24 sps:$4 sm:$0xff]   ;;  %v21548_v51 = vld [vmem:[%s30890_s1 + $0x2430] ss:$24 sps:$4 sm:$0xff]  }
 0x8dd   :  { %13020 = vmatprep.subr.bf16.mxu1 %v21523_v52  ;;  %v21551_v52 = vld [vmem:[%s30890_s1 + $0x2730] ss:$24 sps:$4 sm:$0xff]  }
 0x8e3   :  { %12892 = vmatpush1.bf16.xpose.msra.mxu0 %v21518_v53  ;;  %v21556_v53 = vld [vmem:[%s30890_s1 + $0x2464] ss:$24 sps:$4 sm:$0xff]  }
 0x8e4   :  { %13021 = vmatpush1.bf16.xpose.msra.mxu1 %v21521_v54  ;;  %12893 = vmatprep.subr.bf16.mxu0 %v21526_v27  ;;  %v21559_v54 = vld [vmem:[%s30890_s1 + $0x2764] ss:$24 sps:$4 sm:$0xff]   ;;  %v21554_v27 = vld [vmem:[%s30890_s1 + $0x2460] ss:$24 sps:$4 sm:$0xff]  }
 0x8e5   :  { %13022 = vmatprep.subr.bf16.mxu1 %v21529_v28  ;;  %v21557_v28 = vld [vmem:[%s30890_s1 + $0x2760] ss:$24 sps:$4 sm:$0xff]  }
 0x8eb   :  { %12894 = vmatpush1.bf16.xpose.msra.mxu0 %v21524_v39  ;;  %v21562_v39 = vld [vmem:[%s30890_s1 + $0x2494] ss:$24 sps:$4 sm:$0xff]  }
 0x8ec   :  { %13023 = vmatpush1.bf16.xpose.msra.mxu1 %v21527_v40  ;;  %12895 = vmatprep.subr.bf16.mxu0 %v21532_v61  ;;  %v21565_v40 = vld [vmem:[%s30890_s1 + $0x2794] ss:$24 sps:$4 sm:$0xff]   ;;  %v21560_v61 = vld [vmem:[%s30890_s1 + $0x2490] ss:$24 sps:$4 sm:$0xff]  }
 0x8ed   :  { %13024 = vmatprep.subr.bf16.mxu1 %v21535_v43  ;;  %v21563_v43 = vld [vmem:[%s30890_s1 + $0x2790] ss:$24 sps:$4 sm:$0xff]  }
 0x8f3   :  { %12896 = vmatpush1.bf16.xpose.msra.mxu0 %v21530_v2  ;;  %v21568_v2 = vld [vmem:[%s30890_s1 + $0x24c4] ss:$24 sps:$4 sm:$0xff]  }
 0x8f4   :  { %13025 = vmatpush1.bf16.xpose.msra.mxu1 %v21533_v44  ;;  %12897 = vmatprep.subr.bf16.mxu0 %v21538_v19  ;;  %v21571_v44 = vld [vmem:[%s30890_s1 + $0x27c4] ss:$24 sps:$4 sm:$0xff]   ;;  %v21566_v19 = vld [vmem:[%s30890_s1 + $0x24c0] ss:$24 sps:$4 sm:$0xff]  }
 0x8f5   :  { %13026 = vmatprep.subr.bf16.mxu1 %v21541_v47  ;;  %v21569_v47 = vld [vmem:[%s30890_s1 + $0x27c0] ss:$24 sps:$4 sm:$0xff]  }
 0x8fb   :  { %12898 = vmatpush1.bf16.xpose.msra.mxu0 %v21536_v20  ;;  %v21574_v20 = vld [vmem:[%s30890_s1 + $0x24f4] ss:$24 sps:$4 sm:$0xff]  }
 0x8fc   :  { %13027 = vmatpush1.bf16.xpose.msra.mxu1 %v21539_v48  ;;  %13039 = vmatprep.subr.bf16.mxu0 %v21544_v11  ;;  %v21577_v48 = vld [vmem:[%s30890_s1 + $0x27f4] ss:$24 sps:$4 sm:$0xff]   ;;  %v21572_v11 = vld [vmem:[%s30890_s1 + $0x24f0] ss:$24 sps:$4 sm:$0xff]  }
 0x8fd   :  { %13168 = vmatprep.subr.bf16.mxu1 %v21547_v33  ;;  %v21575_v33 = vld [vmem:[%s30890_s1 + $0x27f0] ss:$24 sps:$4 sm:$0xff]  }
 0x902   :  { %12900 = vmatmul.mubr.bf16.vlgmr.msra.gmra.mrb[20].mxu0 %v26378_v58 }
 0x903   :  { %13029 = vmatmul.mubr.bf16.vlgmr.msra.gmra.mrb[20].mxu1 %v26378_v58  ;;  %13040 = vmatpush1.bf16.xpose.msra.mxu0 %v21542_v12  ;;  %v21580_v12 = vld [vmem:[%s30890_s1 + $0x2524] ss:$24 sps:$4 sm:$0xff]  }
 0x904   :  { %13169 = vmatpush1.bf16.xpose.msra.mxu1 %v21545_v49  ;;  %13041 = vmatprep.subr.bf16.mxu0 %v21550_v57  ;;  %v21583_v49 = vld [vmem:[%s30890_s1 + $0x2824] ss:$24 sps:$4 sm:$0xff]   ;;  %v21578_v57 = vld [vmem:[%s30890_s1 + $0x2520] ss:$24 sps:$4 sm:$0xff]  }
 0x905   :  { %13170 = vmatprep.subr.bf16.mxu1 %v21553_v36  ;;  %13071 = vmatprep.mubr.bf16.mxu0 %v26385_v50  ;;  %v21581_v36 = vld [vmem:[%s30890_s1 + $0x2820] ss:$24 sps:$4 sm:$0xff]  }
 0x906   :  { %13200 = vmatprep.mubr.bf16.mxu1 %v26385_v50 }
 0x90b   :  { %13042 = vmatpush1.bf16.xpose.msra.mxu0 %v21548_v51  ;;  %v21586_v51 = vld [vmem:[%s30890_s1 + $0x2554] ss:$24 sps:$4 sm:$0xff]  }
 0x90c   :  { %13171 = vmatpush1.bf16.xpose.msra.mxu1 %v21551_v52  ;;  %13043 = vmatprep.subr.bf16.mxu0 %v21556_v53  ;;  %v21589_v52 = vld [vmem:[%s30890_s1 + $0x2854] ss:$24 sps:$4 sm:$0xff]   ;;  %v21584_v53 = vld [vmem:[%s30890_s1 + $0x2550] ss:$24 sps:$4 sm:$0xff]  }
 0x90d   :  { %13172 = vmatprep.subr.bf16.mxu1 %v21559_v54  ;;  %v21587_v54 = vld [vmem:[%s30890_s1 + $0x2850] ss:$24 sps:$4 sm:$0xff]  }
 0x913   :  { %13044 = vmatpush1.bf16.xpose.msra.mxu0 %v21554_v27  ;;  %v21592_v27 = vld [vmem:[%s30890_s1 + $0x2584] ss:$24 sps:$4 sm:$0xff]  }
 0x914   :  { %13173 = vmatpush1.bf16.xpose.msra.mxu1 %v21557_v28  ;;  %13045 = vmatprep.subr.bf16.mxu0 %v21562_v39  ;;  %v21595_v28 = vld [vmem:[%s30890_s1 + $0x2884] ss:$24 sps:$4 sm:$0xff]   ;;  %v21590_v39 = vld [vmem:[%s30890_s1 + $0x2580] ss:$24 sps:$4 sm:$0xff]  }
 0x915   :  { %13174 = vmatprep.subr.bf16.mxu1 %v21565_v40  ;;  %v21593_v40 = vld [vmem:[%s30890_s1 + $0x2880] ss:$24 sps:$4 sm:$0xff]  }
 0x91b   :  { %13046 = vmatpush1.bf16.xpose.msra.mxu0 %v21560_v61  ;;  %v21598_v61 = vld [vmem:[%s30890_s1 + $0x25b4] ss:$24 sps:$4 sm:$0xff]  }
 0x91c   :  { %13175 = vmatpush1.bf16.xpose.msra.mxu1 %v21563_v43  ;;  %13047 = vmatprep.subr.bf16.mxu0 %v21568_v2  ;;  %v21601_v43 = vld [vmem:[%s30890_s1 + $0x28b4] ss:$24 sps:$4 sm:$0xff]   ;;  %v21596_v2 = vld [vmem:[%s30890_s1 + $0x25b0] ss:$24 sps:$4 sm:$0xff]  }
 0x91d   :  { %13176 = vmatprep.subr.bf16.mxu1 %v21571_v44  ;;  %v21599_v44 = vld [vmem:[%s30890_s1 + $0x28b0] ss:$24 sps:$4 sm:$0xff]  }
 0x923   :  { %13048 = vmatpush1.bf16.xpose.msra.mxu0 %v21566_v19  ;;  %v21604_v19 = vld [vmem:[%s30890_s1 + $0x25e4] ss:$24 sps:$4 sm:$0xff]  }
 0x924   :  { %13177 = vmatpush1.bf16.xpose.msra.mxu1 %v21569_v47  ;;  %13049 = vmatprep.subr.bf16.mxu0 %v21574_v20  ;;  %v21607_v47 = vld [vmem:[%s30890_s1 + $0x28e4] ss:$24 sps:$4 sm:$0xff]   ;;  %v21602_v20 = vld [vmem:[%s30890_s1 + $0x25e0] ss:$24 sps:$4 sm:$0xff]  }
 0x925   :  { %13178 = vmatprep.subr.bf16.mxu1 %v21577_v48  ;;  %v21605_v48 = vld [vmem:[%s30890_s1 + $0x28e0] ss:$24 sps:$4 sm:$0xff]  }
 0x92b   :  { %13050 = vmatpush1.bf16.xpose.msra.mxu0 %v21572_v11  ;;  %v21610_v11 = vld [vmem:[%s30890_s1 + $0x2614] ss:$24 sps:$4 sm:$0xff]  }
 0x92c   :  { %13179 = vmatpush1.bf16.xpose.msra.mxu1 %v21575_v33  ;;  %13051 = vmatprep.subr.bf16.mxu0 %v21580_v12  ;;  %v21613_v33 = vld [vmem:[%s30890_s1 + $0x2914] ss:$24 sps:$4 sm:$0xff]   ;;  %v21608_v12 = vld [vmem:[%s30890_s1 + $0x2610] ss:$24 sps:$4 sm:$0xff]  }
 0x92d   :  { %13180 = vmatprep.subr.bf16.mxu1 %v21583_v49  ;;  %v21611_v49 = vld [vmem:[%s30890_s1 + $0x2910] ss:$24 sps:$4 sm:$0xff]  }
 0x933   :  { %13052 = vmatpush1.bf16.xpose.msra.mxu0 %v21578_v57  ;;  %v21616_v57 = vld [vmem:[%s30890_s1 + $0x2644] ss:$24 sps:$4 sm:$0xff]  }
 0x934   :  { %13181 = vmatpush1.bf16.xpose.msra.mxu1 %v21581_v36  ;;  %13053 = vmatprep.subr.bf16.mxu0 %v21586_v51  ;;  %v21619_v36 = vld [vmem:[%s30890_s1 + $0x2944] ss:$24 sps:$4 sm:$0xff]   ;;  %v21614_v51 = vld [vmem:[%s30890_s1 + $0x2640] ss:$24 sps:$4 sm:$0xff]  }
 0x935   :  { %13182 = vmatprep.subr.bf16.mxu1 %v21589_v52  ;;  %v21617_v52 = vld [vmem:[%s30890_s1 + $0x2940] ss:$24 sps:$4 sm:$0xff]  }
 0x93b   :  { %13054 = vmatpush1.bf16.xpose.msra.mxu0 %v21584_v53  ;;  %v21622_v53 = vld [vmem:[%s30890_s1 + $0x2674] ss:$24 sps:$4 sm:$0xff]  }
 0x93c   :  { %13183 = vmatpush1.bf16.xpose.msra.mxu1 %v21587_v54  ;;  %13055 = vmatprep.subr.bf16.mxu0 %v21592_v27  ;;  %v21625_v54 = vld [vmem:[%s30890_s1 + $0x2974] ss:$24 sps:$4 sm:$0xff]   ;;  %v21620_v27 = vld [vmem:[%s30890_s1 + $0x2670] ss:$24 sps:$4 sm:$0xff]  }
 0x93d   :  { %13184 = vmatprep.subr.bf16.mxu1 %v21595_v28  ;;  %v21623_v28 = vld [vmem:[%s30890_s1 + $0x2970] ss:$24 sps:$4 sm:$0xff]  }
 0x943   :  { %13056 = vmatpush1.bf16.xpose.msra.mxu0 %v21590_v39  ;;  %v21628_v39 = vld [vmem:[%s30890_s1 + $0x26a4] ss:$24 sps:$4 sm:$0xff]  }
 0x944   :  { %13185 = vmatpush1.bf16.xpose.msra.mxu1 %v21593_v40  ;;  %13057 = vmatprep.subr.bf16.mxu0 %v21598_v61  ;;  %v21631_v40 = vld [vmem:[%s30890_s1 + $0x29a4] ss:$24 sps:$4 sm:$0xff]   ;;  %v21626_v61 = vld [vmem:[%s30890_s1 + $0x26a0] ss:$24 sps:$4 sm:$0xff]  }
 0x945   :  { %13186 = vmatprep.subr.bf16.mxu1 %v21601_v43  ;;  %v21629_v43 = vld [vmem:[%s30890_s1 + $0x29a0] ss:$24 sps:$4 sm:$0xff]  }
 0x94b   :  { %13058 = vmatpush1.bf16.xpose.msra.mxu0 %v21596_v2  ;;  %v21634_v2 = vld [vmem:[%s30890_s1 + $0x26d4] ss:$24 sps:$4 sm:$0xff]  }
 0x94c   :  { %13187 = vmatpush1.bf16.xpose.msra.mxu1 %v21599_v44  ;;  %13059 = vmatprep.subr.bf16.mxu0 %v21604_v19  ;;  %v21637_v44 = vld [vmem:[%s30890_s1 + $0x29d4] ss:$24 sps:$4 sm:$0xff]   ;;  %v21632_v19 = vld [vmem:[%s30890_s1 + $0x26d0] ss:$24 sps:$4 sm:$0xff]  }
 0x94d   :  { %13188 = vmatprep.subr.bf16.mxu1 %v21607_v47  ;;  %v21635_v47 = vld [vmem:[%s30890_s1 + $0x29d0] ss:$24 sps:$4 sm:$0xff]  }
 0x953   :  { %13060 = vmatpush1.bf16.xpose.msra.mxu0 %v21602_v20  ;;  %v21640_v20 = vld [vmem:[%s30890_s1 + $0x240c] ss:$24 sps:$4 sm:$0xff]  }
 0x954   :  { %13189 = vmatpush1.bf16.xpose.msra.mxu1 %v21605_v48  ;;  %13061 = vmatprep.subr.bf16.mxu0 %v21610_v11  ;;  %v21643_v48 = vld [vmem:[%s30890_s1 + $0x270c] ss:$24 sps:$4 sm:$0xff]   ;;  %v21638_v11 = vld [vmem:[%s30890_s1 + $0x2408] ss:$24 sps:$4 sm:$0xff]  }
 0x955   :  { %13190 = vmatprep.subr.bf16.mxu1 %v21613_v33  ;;  %v21641_v33 = vld [vmem:[%s30890_s1 + $0x2708] ss:$24 sps:$4 sm:$0xff]  }
 0x95b   :  { %13062 = vmatpush1.bf16.xpose.msra.mxu0 %v21608_v12  ;;  %v21646_v12 = vld [vmem:[%s30890_s1 + $0x243c] ss:$24 sps:$4 sm:$0xff]  }
 0x95c   :  { %13191 = vmatpush1.bf16.xpose.msra.mxu1 %v21611_v49  ;;  %13063 = vmatprep.subr.bf16.mxu0 %v21616_v57  ;;  %v21649_v49 = vld [vmem:[%s30890_s1 + $0x273c] ss:$24 sps:$4 sm:$0xff]   ;;  %v26584_v57 = vld [vmem:[%s30891_s0] ss:$24 sps:$4 sm:$0xff]  }
 0x95d   :  { %13192 = vmatprep.subr.bf16.mxu1 %v21619_v36  ;;  %v26591_v36 = vld [vmem:[%s30891_s0 + $0xc] ss:$24 sps:$4 sm:$0xff]  }
 0x963   :  { %13064 = vmatpush1.bf16.xpose.msra.mxu0 %v21614_v51  ;;  %v21644_v51 = vld [vmem:[%s30890_s1 + $0x2438] ss:$24 sps:$4 sm:$0xff]  }
 0x964   :  { %13193 = vmatpush1.bf16.xpose.msra.mxu1 %v21617_v52  ;;  %13065 = vmatprep.subr.bf16.mxu0 %v21622_v53  ;;  %v21647_v52 = vld [vmem:[%s30890_s1 + $0x2738] ss:$24 sps:$4 sm:$0xff]   ;;  %v21652_v53 = vld [vmem:[%s30890_s1 + $0x246c] ss:$24 sps:$4 sm:$0xff]  }
 0x965   :  { %13194 = vmatprep.subr.bf16.mxu1 %v21625_v54  ;;  %v21655_v54 = vld [vmem:[%s30890_s1 + $0x276c] ss:$24 sps:$4 sm:$0xff]  }
 0x96b   :  { %13066 = vmatpush1.bf16.xpose.msra.mxu0 %v21620_v27  ;;  %v21650_v27 = vld [vmem:[%s30890_s1 + $0x2468] ss:$24 sps:$4 sm:$0xff]  }
 0x96c   :  { %13195 = vmatpush1.bf16.xpose.msra.mxu1 %v21623_v28  ;;  %13067 = vmatprep.subr.bf16.mxu0 %v21628_v39  ;;  %v21653_v28 = vld [vmem:[%s30890_s1 + $0x2768] ss:$24 sps:$4 sm:$0xff]   ;;  %v21658_v39 = vld [vmem:[%s30890_s1 + $0x249c] ss:$24 sps:$4 sm:$0xff]  }
 0x96d   :  { %13196 = vmatprep.subr.bf16.mxu1 %v21631_v40  ;;  %v21661_v40 = vld [vmem:[%s30890_s1 + $0x279c] ss:$24 sps:$4 sm:$0xff]  }
 0x973   :  { %13068 = vmatpush1.bf16.xpose.msra.mxu0 %v21626_v61  ;;  %v21656_v61 = vld [vmem:[%s30890_s1 + $0x2498] ss:$24 sps:$4 sm:$0xff]  }
 0x974   :  { %13197 = vmatpush1.bf16.xpose.msra.mxu1 %v21629_v43  ;;  %13069 = vmatprep.subr.bf16.mxu0 %v21634_v2  ;;  %v21659_v43 = vld [vmem:[%s30890_s1 + $0x2798] ss:$24 sps:$4 sm:$0xff]   ;;  %v21664_v2 = vld [vmem:[%s30890_s1 + $0x24cc] ss:$24 sps:$4 sm:$0xff]  }
 0x975   :  { %13198 = vmatprep.subr.bf16.mxu1 %v21637_v44  ;;  %v21667_v44 = vld [vmem:[%s30890_s1 + $0x27cc] ss:$24 sps:$4 sm:$0xff]  }
 0x97b   :  { %13070 = vmatpush1.bf16.xpose.msra.mxu0 %v21632_v19  ;;  %v21662_v19 = vld [vmem:[%s30890_s1 + $0x24c8] ss:$24 sps:$4 sm:$0xff]  }
 0x97c   :  { %13199 = vmatpush1.bf16.xpose.msra.mxu1 %v21635_v47  ;;  %13082 = vmatprep.subr.bf16.mxu0 %v21640_v20  ;;  %v21665_v47 = vld [vmem:[%s30890_s1 + $0x27c8] ss:$24 sps:$4 sm:$0xff]   ;;  %v21670_v20 = vld [vmem:[%s30890_s1 + $0x24fc] ss:$24 sps:$4 sm:$0xff]  }
 0x97d   :  { %13211 = vmatprep.subr.bf16.mxu1 %v21643_v48  ;;  %v21673_v48 = vld [vmem:[%s30890_s1 + $0x27fc] ss:$24 sps:$4 sm:$0xff]  }
 0x982   :  { %13072 = vmatmul.mubr.bf16.vlgmr.msra.gmra.mrb[24].mxu0 %v26584_v57 }
 0x983   :  { %13201 = vmatmul.mubr.bf16.vlgmr.msra.gmra.mrb[24].mxu1 %v26584_v57  ;;  %13083 = vmatpush1.bf16.xpose.msra.mxu0 %v21638_v11  ;;  %v21668_v11 = vld [vmem:[%s30890_s1 + $0x24f8] ss:$24 sps:$4 sm:$0xff]  }
 0x984   :  { %13212 = vmatpush1.bf16.xpose.msra.mxu1 %v21641_v33  ;;  %13084 = vmatprep.subr.bf16.mxu0 %v21646_v12  ;;  %v21671_v33 = vld [vmem:[%s30890_s1 + $0x27f8] ss:$24 sps:$4 sm:$0xff]   ;;  %v21676_v12 = vld [vmem:[%s30890_s1 + $0x252c] ss:$24 sps:$4 sm:$0xff]  }
 0x985   :  { %13213 = vmatprep.subr.bf16.mxu1 %v21649_v49  ;;  %13114 = vmatprep.mubr.bf16.mxu0 %v26591_v36  ;;  %v21679_v49 = vld [vmem:[%s30890_s1 + $0x282c] ss:$24 sps:$4 sm:$0xff]  }
 0x986   :  { %13243 = vmatprep.mubr.bf16.mxu1 %v26591_v36 }
 0x98b   :  { %13085 = vmatpush1.bf16.xpose.msra.mxu0 %v21644_v51  ;;  %v21674_v51 = vld [vmem:[%s30890_s1 + $0x2528] ss:$24 sps:$4 sm:$0xff]  }
 0x98c   :  { %13214 = vmatpush1.bf16.xpose.msra.mxu1 %v21647_v52  ;;  %13086 = vmatprep.subr.bf16.mxu0 %v21652_v53  ;;  %v21677_v52 = vld [vmem:[%s30890_s1 + $0x2828] ss:$24 sps:$4 sm:$0xff]   ;;  %v21682_v53 = vld [vmem:[%s30890_s1 + $0x255c] ss:$24 sps:$4 sm:$0xff]  }
 0x98d   :  { %13215 = vmatprep.subr.bf16.mxu1 %v21655_v54  ;;  %v21685_v54 = vld [vmem:[%s30890_s1 + $0x285c] ss:$24 sps:$4 sm:$0xff]  }
 0x993   :  { %13087 = vmatpush1.bf16.xpose.msra.mxu0 %v21650_v27  ;;  %v21680_v27 = vld [vmem:[%s30890_s1 + $0x2558] ss:$24 sps:$4 sm:$0xff]  }
 0x994   :  { %13216 = vmatpush1.bf16.xpose.msra.mxu1 %v21653_v28  ;;  %13088 = vmatprep.subr.bf16.mxu0 %v21658_v39  ;;  %v21683_v28 = vld [vmem:[%s30890_s1 + $0x2858] ss:$24 sps:$4 sm:$0xff]   ;;  %v21688_v39 = vld [vmem:[%s30890_s1 + $0x258c] ss:$24 sps:$4 sm:$0xff]  }
 0x995   :  { %13217 = vmatprep.subr.bf16.mxu1 %v21661_v40  ;;  %v21691_v40 = vld [vmem:[%s30890_s1 + $0x288c] ss:$24 sps:$4 sm:$0xff]  }
 0x99b   :  { %13089 = vmatpush1.bf16.xpose.msra.mxu0 %v21656_v61  ;;  %v21686_v61 = vld [vmem:[%s30890_s1 + $0x2588] ss:$24 sps:$4 sm:$0xff]  }
 0x99c   :  { %13218 = vmatpush1.bf16.xpose.msra.mxu1 %v21659_v43  ;;  %13090 = vmatprep.subr.bf16.mxu0 %v21664_v2  ;;  %v21689_v43 = vld [vmem:[%s30890_s1 + $0x2888] ss:$24 sps:$4 sm:$0xff]   ;;  %v21694_v2 = vld [vmem:[%s30890_s1 + $0x25bc] ss:$24 sps:$4 sm:$0xff]  }
 0x99d   :  { %13219 = vmatprep.subr.bf16.mxu1 %v21667_v44  ;;  %v21697_v44 = vld [vmem:[%s30890_s1 + $0x28bc] ss:$24 sps:$4 sm:$0xff]  }
 0x9a3   :  { %13091 = vmatpush1.bf16.xpose.msra.mxu0 %v21662_v19  ;;  %v21692_v19 = vld [vmem:[%s30890_s1 + $0x25b8] ss:$24 sps:$4 sm:$0xff]  }
 0x9a4   :  { %13220 = vmatpush1.bf16.xpose.msra.mxu1 %v21665_v47  ;;  %13092 = vmatprep.subr.bf16.mxu0 %v21670_v20  ;;  %v21695_v47 = vld [vmem:[%s30890_s1 + $0x28b8] ss:$24 sps:$4 sm:$0xff]   ;;  %v21700_v20 = vld [vmem:[%s30890_s1 + $0x25ec] ss:$24 sps:$4 sm:$0xff]  }
 0x9a5   :  { %13221 = vmatprep.subr.bf16.mxu1 %v21673_v48  ;;  %v21703_v48 = vld [vmem:[%s30890_s1 + $0x28ec] ss:$24 sps:$4 sm:$0xff]  }
 0x9ab   :  { %13093 = vmatpush1.bf16.xpose.msra.mxu0 %v21668_v11  ;;  %v21698_v11 = vld [vmem:[%s30890_s1 + $0x25e8] ss:$24 sps:$4 sm:$0xff]  }
 0x9ac   :  { %13222 = vmatpush1.bf16.xpose.msra.mxu1 %v21671_v33  ;;  %13094 = vmatprep.subr.bf16.mxu0 %v21676_v12  ;;  %v21701_v33 = vld [vmem:[%s30890_s1 + $0x28e8] ss:$24 sps:$4 sm:$0xff]   ;;  %v21706_v12 = vld [vmem:[%s30890_s1 + $0x261c] ss:$24 sps:$4 sm:$0xff]  }
 0x9ad   :  { %13223 = vmatprep.subr.bf16.mxu1 %v21679_v49  ;;  %v21709_v49 = vld [vmem:[%s30890_s1 + $0x291c] ss:$24 sps:$4 sm:$0xff]  }
 0x9b3   :  { %13095 = vmatpush1.bf16.xpose.msra.mxu0 %v21674_v51 }
 0x9b4   :  { %13224 = vmatpush1.bf16.xpose.msra.mxu1 %v21677_v52  ;;  %13096 = vmatprep.subr.bf16.mxu0 %v21682_v53 }
 0x9b5   :  { %13225 = vmatprep.subr.bf16.mxu1 %v21685_v54 }
 0x9bb   :  { %13097 = vmatpush1.bf16.xpose.msra.mxu0 %v21680_v27 }
 0x9bc   :  { %13226 = vmatpush1.bf16.xpose.msra.mxu1 %v21683_v28  ;;  %13098 = vmatprep.subr.bf16.mxu0 %v21688_v39  ;;  %v21704_v39 = vld [vmem:[%s30890_s1 + $0x2618] ss:$24 sps:$4 sm:$0xff]  }
 0x9bd   :  { %13227 = vmatprep.subr.bf16.mxu1 %v21691_v40  ;;  %v21707_v40 = vld [vmem:[%s30890_s1 + $0x2918] ss:$24 sps:$4 sm:$0xff]  }
 0x9c3   :  { %13099 = vmatpush1.bf16.xpose.msra.mxu0 %v21686_v61 }
 0x9c4   :  { %13228 = vmatpush1.bf16.xpose.msra.mxu1 %v21689_v43  ;;  %13100 = vmatprep.subr.bf16.mxu0 %v21694_v2  ;;  %v21712_v2 = vld [vmem:[%s30890_s1 + $0x264c] ss:$24 sps:$4 sm:$0xff]  }
 0x9c5   :  { %13229 = vmatprep.subr.bf16.mxu1 %v21697_v44  ;;  %v21715_v44 = vld [vmem:[%s30890_s1 + $0x294c] ss:$24 sps:$4 sm:$0xff]  }
 0x9cb   :  { %13101 = vmatpush1.bf16.xpose.msra.mxu0 %v21692_v19  ;;  %v21710_v19 = vld [vmem:[%s30890_s1 + $0x2648] ss:$24 sps:$4 sm:$0xff]  }
 0x9cc   :  { %13230 = vmatpush1.bf16.xpose.msra.mxu1 %v21695_v47  ;;  %13102 = vmatprep.subr.bf16.mxu0 %v21700_v20  ;;  %v21713_v47 = vld [vmem:[%s30890_s1 + $0x2948] ss:$24 sps:$4 sm:$0xff]   ;;  %v21718_v20 = vld [vmem:[%s30890_s1 + $0x267c] ss:$24 sps:$4 sm:$0xff]  }
 0x9cd   :  { %13231 = vmatprep.subr.bf16.mxu1 %v21703_v48  ;;  %v21721_v48 = vld [vmem:[%s30890_s1 + $0x297c] ss:$24 sps:$4 sm:$0xff]  }
 0x9d3   :  { %13103 = vmatpush1.bf16.xpose.msra.mxu0 %v21698_v11  ;;  %v21716_v11 = vld [vmem:[%s30890_s1 + $0x2678] ss:$24 sps:$4 sm:$0xff]  }
 0x9d4   :  { %13232 = vmatpush1.bf16.xpose.msra.mxu1 %v21701_v33  ;;  %13104 = vmatprep.subr.bf16.mxu0 %v21706_v12  ;;  %v21719_v33 = vld [vmem:[%s30890_s1 + $0x2978] ss:$24 sps:$4 sm:$0xff]   ;;  %v21724_v12 = vld [vmem:[%s30890_s1 + $0x26ac] ss:$24 sps:$4 sm:$0xff]  }
 0x9d5   :  { %13233 = vmatprep.subr.bf16.mxu1 %v21709_v49  ;;  %v26715_v51 = vpop.f32.mrb[20].mxu0  ;;  %v21727_v49 = vld [vmem:[%s30890_s1 + $0x29ac] ss:$24 sps:$4 sm:$0xff]  }
 0x9d6   :  { %v26717_v52 = vpop.f32.mrb[20].mxu1  ;;  %v26719_v53 = vpop.f32.mrb[21].mxu0 }
 0x9d7   :  { %30895 = vst [vmem:[#allocation2_spill] sm:$0xff] %v26717_v52  ;;  %v26721_v54 = vpop.f32.mrb[21].mxu1  ;;  %v26723_v27 = vpop.f32.mrb[22].mxu0  ;;  %v14175_v52 = vld [vmem:[%s30892_s3 + $0x100] sm:$0xff] }
 0x9d8   :  { %30896 = vst [vmem:[#allocation3_spill] sm:$0xff] %v26723_v27  ;;  %v26725_v28 = vpop.f32.mrb[22].mxu1  ;;  %v26733_v61 = vpop.f32.mrb[23].mxu0  ;;  %v14148_v27 = vld [vmem:[%s30892_s3 + $0x28] sm:$0xff] }
 0x9d9   :  { %30897 = vst [vmem:[#allocation4_spill] sm:$0xff] %v26725_v28  ;;  %v26735_v43 = vpop.f32.mrb[23].mxu1 }
 0x9da   :  { %30898 = vst [vmem:[#allocation5_spill] sm:$0xff] %v26735_v43 }
 0x9db   :  { %13105 = vmatpush1.bf16.xpose.msra.mxu0 %v21704_v39  ;;  %v21722_v39 = vld [vmem:[%s30890_s1 + $0x26a8] ss:$24 sps:$4 sm:$0xff]  }
 0x9dc   :  { %13234 = vmatpush1.bf16.xpose.msra.mxu1 %v21707_v40  ;;  %13106 = vmatprep.subr.bf16.mxu0 %v21712_v2  ;;  %v21725_v40 = vld [vmem:[%s30890_s1 + $0x29a8] ss:$24 sps:$4 sm:$0xff]   ;;  %v21730_v2 = vld [vmem:[%s30890_s1 + $0x26dc] ss:$24 sps:$4 sm:$0xff]  }
 0x9dd   :  { %13235 = vmatprep.subr.bf16.mxu1 %v21715_v44  ;;  %v21733_v44 = vld [vmem:[%s30890_s1 + $0x29dc] ss:$24 sps:$4 sm:$0xff]  }
 0x9e3   :  { %13107 = vmatpush1.bf16.xpose.msra.mxu0 %v21710_v19  ;;  %v21728_v19 = vld [vmem:[%s30890_s1 + $0x26d8] ss:$24 sps:$4 sm:$0xff]  }
 0x9e4   :  { %13236 = vmatpush1.bf16.xpose.msra.mxu1 %v21713_v47  ;;  %13108 = vmatprep.subr.bf16.mxu0 %v21718_v20  ;;  %v21731_v47 = vld [vmem:[%s30890_s1 + $0x29d8] ss:$24 sps:$4 sm:$0xff]   ;;  %v21736_v20 = vld [vmem:[%s30890_s1 + $0x2414] ss:$24 sps:$4 sm:$0xff]  }
 0x9e5   :  { %13237 = vmatprep.subr.bf16.mxu1 %v21721_v48  ;;  %v21739_v48 = vld [vmem:[%s30890_s1 + $0x2714] ss:$24 sps:$4 sm:$0xff]  }
 0x9eb   :  { %13109 = vmatpush1.bf16.xpose.msra.mxu0 %v21716_v11  ;;  %v21734_v11 = vld [vmem:[%s30890_s1 + $0x2410] ss:$24 sps:$4 sm:$0xff]  }
 0x9ec   :  { %13238 = vmatpush1.bf16.xpose.msra.mxu1 %v21719_v33  ;;  %13110 = vmatprep.subr.bf16.mxu0 %v21724_v12  ;;  %v21737_v33 = vld [vmem:[%s30890_s1 + $0x2710] ss:$24 sps:$4 sm:$0xff]   ;;  %v21742_v12 = vld [vmem:[%s30890_s1 + $0x2444] ss:$24 sps:$4 sm:$0xff]  }
 0x9ed   :  { %13239 = vmatprep.subr.bf16.mxu1 %v21727_v49  ;;  %v21745_v49 = vld [vmem:[%s30890_s1 + $0x2744] ss:$24 sps:$4 sm:$0xff]  }
 0x9f3   :  { %13111 = vmatpush1.bf16.xpose.msra.mxu0 %v21722_v39  ;;  %v26806_v39 = vld [vmem:[%s30891_s0 + $0x8] ss:$24 sps:$4 sm:$0xff]  }
 0x9f4   :  { %13240 = vmatpush1.bf16.xpose.msra.mxu1 %v21725_v40  ;;  %13112 = vmatprep.subr.bf16.mxu0 %v21730_v2  ;;  %v26813_v40 = vld [vmem:[%s30891_s0 + $0x14] ss:$24 sps:$4 sm:$0xff]   ;;  %v21740_v2 = vld [vmem:[%s30890_s1 + $0x2440] ss:$24 sps:$4 sm:$0xff]  }
 0x9f5   :  { %13241 = vmatprep.subr.bf16.mxu1 %v21733_v44  ;;  %v21743_v44 = vld [vmem:[%s30890_s1 + $0x2740] ss:$24 sps:$4 sm:$0xff]  }
 0x9fb   :  { %13113 = vmatpush1.bf16.xpose.msra.mxu0 %v21728_v19  ;;  %v21748_v19 = vld [vmem:[%s30890_s1 + $0x2474] ss:$24 sps:$4 sm:$0xff]  }
 0x9fc   :  { %13242 = vmatpush1.bf16.xpose.msra.mxu1 %v21731_v47  ;;  %13125 = vmatprep.subr.bf16.mxu0 %v21736_v20  ;;  %v21751_v47 = vld [vmem:[%s30890_s1 + $0x2774] ss:$24 sps:$4 sm:$0xff]   ;;  %v21746_v20 = vld [vmem:[%s30890_s1 + $0x2470] ss:$24 sps:$4 sm:$0xff]  }
 0x9fd   :  { %13254 = vmatprep.subr.bf16.mxu1 %v21739_v48  ;;  %v21749_v48 = vld [vmem:[%s30890_s1 + $0x2770] ss:$24 sps:$4 sm:$0xff]  }
 0xa02   :  { %13115 = vmatmul.mubr.bf16.vlgmr.msra.gmra.mrb[24].mxu0 %v26806_v39 }
 0xa03   :  { %13244 = vmatmul.mubr.bf16.vlgmr.msra.gmra.mrb[24].mxu1 %v26806_v39  ;;  %13126 = vmatpush1.bf16.xpose.msra.mxu0 %v21734_v11  ;;  %v21754_v11 = vld [vmem:[%s30890_s1 + $0x24a4] ss:$24 sps:$4 sm:$0xff]  }
 0xa04   :  { %13255 = vmatpush1.bf16.xpose.msra.mxu1 %v21737_v33  ;;  %13127 = vmatprep.subr.bf16.mxu0 %v21742_v12  ;;  %v21757_v33 = vld [vmem:[%s30890_s1 + $0x27a4] ss:$24 sps:$4 sm:$0xff]   ;;  %v21752_v12 = vld [vmem:[%s30890_s1 + $0x24a0] ss:$24 sps:$4 sm:$0xff]  }
 0xa05   :  { %13256 = vmatprep.subr.bf16.mxu1 %v21745_v49  ;;  %13157 = vmatprep.mubr.bf16.mxu0 %v26813_v40  ;;  %v21755_v49 = vld [vmem:[%s30890_s1 + $0x27a0] ss:$24 sps:$4 sm:$0xff]  }
 0xa06   :  { %13286 = vmatprep.mubr.bf16.mxu1 %v26813_v40 }
 0xa0b   :  { %13128 = vmatpush1.bf16.xpose.msra.mxu0 %v21740_v2  ;;  %v21760_v2 = vld [vmem:[%s30890_s1 + $0x24d4] ss:$24 sps:$4 sm:$0xff]  }
 0xa0c   :  { %13257 = vmatpush1.bf16.xpose.msra.mxu1 %v21743_v44  ;;  %13129 = vmatprep.subr.bf16.mxu0 %v21748_v19  ;;  %v21763_v44 = vld [vmem:[%s30890_s1 + $0x27d4] ss:$24 sps:$4 sm:$0xff]   ;;  %v21758_v19 = vld [vmem:[%s30890_s1 + $0x24d0] ss:$24 sps:$4 sm:$0xff]  }
 0xa0d   :  { %13258 = vmatprep.subr.bf16.mxu1 %v21751_v47  ;;  %v21761_v47 = vld [vmem:[%s30890_s1 + $0x27d0] ss:$24 sps:$4 sm:$0xff]  }
 0xa13   :  { %13130 = vmatpush1.bf16.xpose.msra.mxu0 %v21746_v20  ;;  %v21766_v20 = vld [vmem:[%s30890_s1 + $0x2504] ss:$24 sps:$4 sm:$0xff]  }
 0xa14   :  { %13259 = vmatpush1.bf16.xpose.msra.mxu1 %v21749_v48  ;;  %13131 = vmatprep.subr.bf16.mxu0 %v21754_v11  ;;  %v21769_v48 = vld [vmem:[%s30890_s1 + $0x2804] ss:$24 sps:$4 sm:$0xff]   ;;  %v21764_v11 = vld [vmem:[%s30890_s1 + $0x2500] ss:$24 sps:$4 sm:$0xff]  }
 0xa15   :  { %13260 = vmatprep.subr.bf16.mxu1 %v21757_v33  ;;  %v21767_v33 = vld [vmem:[%s30890_s1 + $0x2800] ss:$24 sps:$4 sm:$0xff]  }
 0xa1b   :  { %13132 = vmatpush1.bf16.xpose.msra.mxu0 %v21752_v12  ;;  %v21772_v12 = vld [vmem:[%s30890_s1 + $0x2534] ss:$24 sps:$4 sm:$0xff]  }
 0xa1c   :  { %13261 = vmatpush1.bf16.xpose.msra.mxu1 %v21755_v49  ;;  %13133 = vmatprep.subr.bf16.mxu0 %v21760_v2  ;;  %v21775_v49 = vld [vmem:[%s30890_s1 + $0x2834] ss:$24 sps:$4 sm:$0xff]   ;;  %v21770_v2 = vld [vmem:[%s30890_s1 + $0x2530] ss:$24 sps:$4 sm:$0xff]  }
 0xa1d   :  { %13262 = vmatprep.subr.bf16.mxu1 %v21763_v44  ;;  %v21773_v44 = vld [vmem:[%s30890_s1 + $0x2830] ss:$24 sps:$4 sm:$0xff]  }
 0xa23   :  { %13134 = vmatpush1.bf16.xpose.msra.mxu0 %v21758_v19  ;;  %v21778_v19 = vld [vmem:[%s30890_s1 + $0x2564] ss:$24 sps:$4 sm:$0xff]  }
 0xa24   :  { %13263 = vmatpush1.bf16.xpose.msra.mxu1 %v21761_v47  ;;  %13135 = vmatprep.subr.bf16.mxu0 %v21766_v20  ;;  %v21781_v47 = vld [vmem:[%s30890_s1 + $0x2864] ss:$24 sps:$4 sm:$0xff]   ;;  %v21776_v20 = vld [vmem:[%s30890_s1 + $0x2560] ss:$24 sps:$4 sm:$0xff]  }
 0xa25   :  { %13264 = vmatprep.subr.bf16.mxu1 %v21769_v48  ;;  %v21779_v48 = vld [vmem:[%s30890_s1 + $0x2860] ss:$24 sps:$4 sm:$0xff]  }
 0xa2b   :  { %13136 = vmatpush1.bf16.xpose.msra.mxu0 %v21764_v11  ;;  %v21784_v11 = vld [vmem:[%s30890_s1 + $0x2594] ss:$24 sps:$4 sm:$0xff]  }
 0xa2c   :  { %13265 = vmatpush1.bf16.xpose.msra.mxu1 %v21767_v33  ;;  %13137 = vmatprep.subr.bf16.mxu0 %v21772_v12  ;;  %v21787_v33 = vld [vmem:[%s30890_s1 + $0x2894] ss:$24 sps:$4 sm:$0xff]   ;;  %v21782_v12 = vld [vmem:[%s30890_s1 + $0x2590] ss:$24 sps:$4 sm:$0xff]  }
 0xa2d   :  { %13266 = vmatprep.subr.bf16.mxu1 %v21775_v49  ;;  %v21785_v49 = vld [vmem:[%s30890_s1 + $0x2890] ss:$24 sps:$4 sm:$0xff]  }
 0xa33   :  { %13138 = vmatpush1.bf16.xpose.msra.mxu0 %v21770_v2  ;;  %v21790_v2 = vld [vmem:[%s30890_s1 + $0x25c4] ss:$24 sps:$4 sm:$0xff]  }
 0xa34   :  { %13267 = vmatpush1.bf16.xpose.msra.mxu1 %v21773_v44  ;;  %13139 = vmatprep.subr.bf16.mxu0 %v21778_v19  ;;  %v21793_v44 = vld [vmem:[%s30890_s1 + $0x28c4] ss:$24 sps:$4 sm:$0xff]   ;;  %v21788_v19 = vld [vmem:[%s30890_s1 + $0x25c0] ss:$24 sps:$4 sm:$0xff]  }
 0xa35   :  { %13268 = vmatprep.subr.bf16.mxu1 %v21781_v47  ;;  %v21791_v47 = vld [vmem:[%s30890_s1 + $0x28c0] ss:$24 sps:$4 sm:$0xff]  }
 0xa3b   :  { %13140 = vmatpush1.bf16.xpose.msra.mxu0 %v21776_v20  ;;  %v21796_v20 = vld [vmem:[%s30890_s1 + $0x25f4] ss:$24 sps:$4 sm:$0xff]  }
 0xa3c   :  { %13269 = vmatpush1.bf16.xpose.msra.mxu1 %v21779_v48  ;;  %13141 = vmatprep.subr.bf16.mxu0 %v21784_v11  ;;  %v21799_v48 = vld [vmem:[%s30890_s1 + $0x28f4] ss:$24 sps:$4 sm:$0xff]   ;;  %v21794_v11 = vld [vmem:[%s30890_s1 + $0x25f0] ss:$24 sps:$4 sm:$0xff]  }
 0xa3d   :  { %13270 = vmatprep.subr.bf16.mxu1 %v21787_v33  ;;  %v21797_v33 = vld [vmem:[%s30890_s1 + $0x28f0] ss:$24 sps:$4 sm:$0xff]  }
 0xa43   :  { %13142 = vmatpush1.bf16.xpose.msra.mxu0 %v21782_v12  ;;  %v21802_v12 = vld [vmem:[%s30890_s1 + $0x2624] ss:$24 sps:$4 sm:$0xff]  }
 0xa44   :  { %13271 = vmatpush1.bf16.xpose.msra.mxu1 %v21785_v49  ;;  %13143 = vmatprep.subr.bf16.mxu0 %v21790_v2  ;;  %v21805_v49 = vld [vmem:[%s30890_s1 + $0x2924] ss:$24 sps:$4 sm:$0xff]   ;;  %v21800_v2 = vld [vmem:[%s30890_s1 + $0x2620] ss:$24 sps:$4 sm:$0xff]  }
 0xa45   :  { %13272 = vmatprep.subr.bf16.mxu1 %v21793_v44  ;;  %v21803_v44 = vld [vmem:[%s30890_s1 + $0x2920] ss:$24 sps:$4 sm:$0xff]  }
 0xa4b   :  { %13144 = vmatpush1.bf16.xpose.msra.mxu0 %v21788_v19  ;;  %v21808_v19 = vld [vmem:[%s30890_s1 + $0x2654] ss:$24 sps:$4 sm:$0xff]  }
 0xa4c   :  { %13273 = vmatpush1.bf16.xpose.msra.mxu1 %v21791_v47  ;;  %13145 = vmatprep.subr.bf16.mxu0 %v21796_v20  ;;  %v21811_v47 = vld [vmem:[%s30890_s1 + $0x2954] ss:$24 sps:$4 sm:$0xff]   ;;  %v21806_v20 = vld [vmem:[%s30890_s1 + $0x2650] ss:$24 sps:$4 sm:$0xff]  }
 0xa4d   :  { %13274 = vmatprep.subr.bf16.mxu1 %v21799_v48  ;;  %v21809_v48 = vld [vmem:[%s30890_s1 + $0x2950] ss:$24 sps:$4 sm:$0xff]  }
 0xa53   :  { %13146 = vmatpush1.bf16.xpose.msra.mxu0 %v21794_v11  ;;  %v21814_v11 = vld [vmem:[%s30890_s1 + $0x2684] ss:$24 sps:$4 sm:$0xff]  }
 0xa54   :  { %13275 = vmatpush1.bf16.xpose.msra.mxu1 %v21797_v33  ;;  %13147 = vmatprep.subr.bf16.mxu0 %v21802_v12  ;;  %v21817_v33 = vld [vmem:[%s30890_s1 + $0x2984] ss:$24 sps:$4 sm:$0xff]   ;;  %v21812_v12 = vld [vmem:[%s30890_s1 + $0x2680] ss:$24 sps:$4 sm:$0xff]  }
 0xa55   :  { %13276 = vmatprep.subr.bf16.mxu1 %v21805_v49  ;;  %v21815_v49 = vld [vmem:[%s30890_s1 + $0x2980] ss:$24 sps:$4 sm:$0xff]  }
 0xa5b   :  { %13148 = vmatpush1.bf16.xpose.msra.mxu0 %v21800_v2  ;;  %v21820_v2 = vld [vmem:[%s30890_s1 + $0x26b4] ss:$24 sps:$4 sm:$0xff]  }
 0xa5c   :  { %13277 = vmatpush1.bf16.xpose.msra.mxu1 %v21803_v44  ;;  %13149 = vmatprep.subr.bf16.mxu0 %v21808_v19  ;;  %v21823_v44 = vld [vmem:[%s30890_s1 + $0x29b4] ss:$24 sps:$4 sm:$0xff]   ;;  %v21818_v19 = vld [vmem:[%s30890_s1 + $0x26b0] ss:$24 sps:$4 sm:$0xff]  }
 0xa5d   :  { %13278 = vmatprep.subr.bf16.mxu1 %v21811_v47  ;;  %v21821_v47 = vld [vmem:[%s30890_s1 + $0x29b0] ss:$24 sps:$4 sm:$0xff]  }
 0xa63   :  { %13150 = vmatpush1.bf16.xpose.msra.mxu0 %v21806_v20  ;;  %v21826_v20 = vld [vmem:[%s30890_s1 + $0x26e4] ss:$24 sps:$4 sm:$0xff]  }
 0xa64   :  { %13279 = vmatpush1.bf16.xpose.msra.mxu1 %v21809_v48  ;;  %13151 = vmatprep.subr.bf16.mxu0 %v21814_v11  ;;  %v21829_v48 = vld [vmem:[%s30890_s1 + $0x29e4] ss:$24 sps:$4 sm:$0xff]   ;;  %v21824_v11 = vld [vmem:[%s30890_s1 + $0x26e0] ss:$24 sps:$4 sm:$0xff]  }
 0xa65   :  { %13280 = vmatprep.subr.bf16.mxu1 %v21817_v33  ;;  %v21827_v33 = vld [vmem:[%s30890_s1 + $0x29e0] ss:$24 sps:$4 sm:$0xff]  }
 0xa6b   :  { %13152 = vmatpush1.bf16.xpose.msra.mxu0 %v21812_v12  ;;  %v21832_v12 = vld [vmem:[%s30890_s1 + $0x2a04] ss:$24 sps:$4 sm:$0xff]  }
 0xa6c   :  { %13281 = vmatpush1.bf16.xpose.msra.mxu1 %v21815_v49  ;;  %13153 = vmatprep.subr.bf16.mxu0 %v21820_v2  ;;  %v21835_v49 = vld [vmem:[%s30890_s1 + $0x2d04] ss:$24 sps:$4 sm:$0xff]   ;;  %v21830_v2 = vld [vmem:[%s30890_s1 + $0x2a00] ss:$24 sps:$4 sm:$0xff]  }
 0xa6d   :  { %13282 = vmatprep.subr.bf16.mxu1 %v21823_v44  ;;  %v21833_v44 = vld [vmem:[%s30890_s1 + $0x2d00] ss:$24 sps:$4 sm:$0xff]  }
 0xa73   :  { %13154 = vmatpush1.bf16.xpose.msra.mxu0 %v21818_v19  ;;  %v21838_v19 = vld [vmem:[%s30890_s1 + $0x2a34] ss:$24 sps:$4 sm:$0xff]  }
 0xa74   :  { %13283 = vmatpush1.bf16.xpose.msra.mxu1 %v21821_v47  ;;  %13155 = vmatprep.subr.bf16.mxu0 %v21826_v20  ;;  %v21841_v47 = vld [vmem:[%s30890_s1 + $0x2d34] ss:$24 sps:$4 sm:$0xff]   ;;  %v21836_v20 = vld [vmem:[%s30890_s1 + $0x2a30] ss:$24 sps:$4 sm:$0xff]  }
 0xa75   :  { %13284 = vmatprep.subr.bf16.mxu1 %v21829_v48  ;;  %v21839_v48 = vld [vmem:[%s30890_s1 + $0x2d30] ss:$24 sps:$4 sm:$0xff]  }
 0xa7b   :  { %13156 = vmatpush1.bf16.xpose.msra.mxu0 %v21824_v11  ;;  %v21847_v11 = vld [vmem:[%s30890_s1 + $0x2d64] ss:$24 sps:$4 sm:$0xff]  }
 0xa7c   :  { %13285 = vmatpush1.bf16.xpose.msra.mxu1 %v21827_v33  ;;  %13297 = vmatprep.subr.bf16.mxu0 %v21832_v12  ;;  %v21845_v33 = vld [vmem:[%s30890_s1 + $0x2d60] ss:$24 sps:$4 sm:$0xff]   ;;  %v21850_v12 = vld [vmem:[%s30890_s1 + $0x2a94] ss:$24 sps:$4 sm:$0xff]  }
 0xa7d   :  { %13426 = vmatprep.subr.bf16.mxu1 %v21835_v49  ;;  %v21853_v49 = vld [vmem:[%s30890_s1 + $0x2d94] ss:$24 sps:$4 sm:$0xff]  }
 0xa82   :  { %13158 = vmatmul.mubr.bf16.vlgmr.msra.gmra.mrb[24].mxu0 %v26378_v58 }
 0xa83   :  { %13287 = vmatmul.mubr.bf16.vlgmr.msra.gmra.mrb[24].mxu1 %v26378_v58  ;;  %13298 = vmatpush1.bf16.xpose.msra.mxu0 %v21830_v2  ;;  %v21844_v58 = vld [vmem:[%s30890_s1 + $0x2a64] ss:$24 sps:$4 sm:$0xff]   ;;  %v21848_v2 = vld [vmem:[%s30890_s1 + $0x2a90] ss:$24 sps:$4 sm:$0xff]  }
 0xa84   :  { %13427 = vmatpush1.bf16.xpose.msra.mxu1 %v21833_v44  ;;  %13299 = vmatprep.subr.bf16.mxu0 %v21838_v19  ;;  %v21851_v44 = vld [vmem:[%s30890_s1 + $0x2d90] ss:$24 sps:$4 sm:$0xff]   ;;  %v21856_v19 = vld [vmem:[%s30890_s1 + $0x2ac4] ss:$24 sps:$4 sm:$0xff]  }
 0xa85   :  { %13428 = vmatprep.subr.bf16.mxu1 %v21841_v47  ;;  %13329 = vmatprep.mubr.bf16.mxu0 %v26385_v50  ;;  %v21859_v47 = vld [vmem:[%s30890_s1 + $0x2dc4] ss:$24 sps:$4 sm:$0xff]  }
 0xa86   :  { %13458 = vmatprep.mubr.bf16.mxu1 %v26385_v50  ;;  %v21842_v50 = vld [vmem:[%s30890_s1 + $0x2a60] ss:$24 sps:$4 sm:$0xff]  }
 0xa8b   :  { %13300 = vmatpush1.bf16.xpose.msra.mxu0 %v21836_v20  ;;  %v21854_v20 = vld [vmem:[%s30890_s1 + $0x2ac0] ss:$24 sps:$4 sm:$0xff]  }
 0xa8c   :  { %13429 = vmatpush1.bf16.xpose.msra.mxu1 %v21839_v48  ;;  %13301 = vmatprep.subr.bf16.mxu0 %v21844_v58  ;;  %v21857_v48 = vld [vmem:[%s30890_s1 + $0x2dc0] ss:$24 sps:$4 sm:$0xff]   ;;  %v21862_v58 = vld [vmem:[%s30890_s1 + $0x2af4] ss:$24 sps:$4 sm:$0xff]  }
 0xa8d   :  { %13430 = vmatprep.subr.bf16.mxu1 %v21847_v11  ;;  %v21865_v11 = vld [vmem:[%s30890_s1 + $0x2df4] ss:$24 sps:$4 sm:$0xff]  }
 0xa93   :  { %13302 = vmatpush1.bf16.xpose.msra.mxu0 %v21842_v50  ;;  %v21860_v50 = vld [vmem:[%s30890_s1 + $0x2af0] ss:$24 sps:$4 sm:$0xff]  }
 0xa94   :  { %13431 = vmatpush1.bf16.xpose.msra.mxu1 %v21845_v33  ;;  %13303 = vmatprep.subr.bf16.mxu0 %v21850_v12  ;;  %v21863_v33 = vld [vmem:[%s30890_s1 + $0x2df0] ss:$24 sps:$4 sm:$0xff]   ;;  %v21868_v12 = vld [vmem:[%s30890_s1 + $0x2b24] ss:$24 sps:$4 sm:$0xff]  }
 0xa95   :  { %13432 = vmatprep.subr.bf16.mxu1 %v21853_v49  ;;  %v21871_v49 = vld [vmem:[%s30890_s1 + $0x2e24] ss:$24 sps:$4 sm:$0xff]  }
 0xa9b   :  { %13304 = vmatpush1.bf16.xpose.msra.mxu0 %v21848_v2  ;;  %v21866_v2 = vld [vmem:[%s30890_s1 + $0x2b20] ss:$24 sps:$4 sm:$0xff]  }
 0xa9c   :  { %13433 = vmatpush1.bf16.xpose.msra.mxu1 %v21851_v44  ;;  %13305 = vmatprep.subr.bf16.mxu0 %v21856_v19  ;;  %v21869_v44 = vld [vmem:[%s30890_s1 + $0x2e20] ss:$24 sps:$4 sm:$0xff]   ;;  %v21874_v19 = vld [vmem:[%s30890_s1 + $0x2b54] ss:$24 sps:$4 sm:$0xff]  }
 0xa9d   :  { %13434 = vmatprep.subr.bf16.mxu1 %v21859_v47  ;;  %v21877_v47 = vld [vmem:[%s30890_s1 + $0x2e54] ss:$24 sps:$4 sm:$0xff]  }
 0xaa3   :  { %13306 = vmatpush1.bf16.xpose.msra.mxu0 %v21854_v20  ;;  %v21872_v20 = vld [vmem:[%s30890_s1 + $0x2b50] ss:$24 sps:$4 sm:$0xff]  }
 0xaa4   :  { %13435 = vmatpush1.bf16.xpose.msra.mxu1 %v21857_v48  ;;  %13307 = vmatprep.subr.bf16.mxu0 %v21862_v58  ;;  %v21875_v48 = vld [vmem:[%s30890_s1 + $0x2e50] ss:$24 sps:$4 sm:$0xff]   ;;  %v21880_v58 = vld [vmem:[%s30890_s1 + $0x2b84] ss:$24 sps:$4 sm:$0xff]  }
 0xaa5   :  { %13436 = vmatprep.subr.bf16.mxu1 %v21865_v11  ;;  %v21883_v11 = vld [vmem:[%s30890_s1 + $0x2e84] ss:$24 sps:$4 sm:$0xff]  }
 0xaab   :  { %13308 = vmatpush1.bf16.xpose.msra.mxu0 %v21860_v50  ;;  %v21878_v50 = vld [vmem:[%s30890_s1 + $0x2b80] ss:$24 sps:$4 sm:$0xff]  }
 0xaac   :  { %13437 = vmatpush1.bf16.xpose.msra.mxu1 %v21863_v33  ;;  %13309 = vmatprep.subr.bf16.mxu0 %v21868_v12  ;;  %v21881_v33 = vld [vmem:[%s30890_s1 + $0x2e80] ss:$24 sps:$4 sm:$0xff]   ;;  %v21886_v12 = vld [vmem:[%s30890_s1 + $0x2bb4] ss:$24 sps:$4 sm:$0xff]  }
 0xaad   :  { %13438 = vmatprep.subr.bf16.mxu1 %v21871_v49  ;;  %v21889_v49 = vld [vmem:[%s30890_s1 + $0x2eb4] ss:$24 sps:$4 sm:$0xff]  }
 0xab3   :  { %13310 = vmatpush1.bf16.xpose.msra.mxu0 %v21866_v2  ;;  %v21884_v2 = vld [vmem:[%s30890_s1 + $0x2bb0] ss:$24 sps:$4 sm:$0xff]  }
 0xab4   :  { %13439 = vmatpush1.bf16.xpose.msra.mxu1 %v21869_v44  ;;  %13311 = vmatprep.subr.bf16.mxu0 %v21874_v19  ;;  %v21887_v44 = vld [vmem:[%s30890_s1 + $0x2eb0] ss:$24 sps:$4 sm:$0xff]   ;;  %v21892_v19 = vld [vmem:[%s30890_s1 + $0x2be4] ss:$24 sps:$4 sm:$0xff]  }
 0xab5   :  { %13440 = vmatprep.subr.bf16.mxu1 %v21877_v47  ;;  %v21895_v47 = vld [vmem:[%s30890_s1 + $0x2ee4] ss:$24 sps:$4 sm:$0xff]  }
 0xabb   :  { %13312 = vmatpush1.bf16.xpose.msra.mxu0 %v21872_v20  ;;  %v21890_v20 = vld [vmem:[%s30890_s1 + $0x2be0] ss:$24 sps:$4 sm:$0xff]  }
 0xabc   :  { %13441 = vmatpush1.bf16.xpose.msra.mxu1 %v21875_v48  ;;  %13313 = vmatprep.subr.bf16.mxu0 %v21880_v58  ;;  %v21893_v48 = vld [vmem:[%s30890_s1 + $0x2ee0] ss:$24 sps:$4 sm:$0xff]   ;;  %v21898_v58 = vld [vmem:[%s30890_s1 + $0x2c14] ss:$24 sps:$4 sm:$0xff]  }
 0xabd   :  { %13442 = vmatprep.subr.bf16.mxu1 %v21883_v11  ;;  %v21901_v11 = vld [vmem:[%s30890_s1 + $0x2f14] ss:$24 sps:$4 sm:$0xff]  }
 0xac3   :  { %13314 = vmatpush1.bf16.xpose.msra.mxu0 %v21878_v50  ;;  %v21896_v50 = vld [vmem:[%s30890_s1 + $0x2c10] ss:$24 sps:$4 sm:$0xff]  }
 0xac4   :  { %13443 = vmatpush1.bf16.xpose.msra.mxu1 %v21881_v33  ;;  %13315 = vmatprep.subr.bf16.mxu0 %v21886_v12  ;;  %v21899_v33 = vld [vmem:[%s30890_s1 + $0x2f10] ss:$24 sps:$4 sm:$0xff]   ;;  %v21904_v12 = vld [vmem:[%s30890_s1 + $0x2c44] ss:$24 sps:$4 sm:$0xff]  }
 0xac5   :  { %13444 = vmatprep.subr.bf16.mxu1 %v21889_v49  ;;  %v21907_v49 = vld [vmem:[%s30890_s1 + $0x2f44] ss:$24 sps:$4 sm:$0xff]  }
 0xacb   :  { %13316 = vmatpush1.bf16.xpose.msra.mxu0 %v21884_v2  ;;  %v21902_v2 = vld [vmem:[%s30890_s1 + $0x2c40] ss:$24 sps:$4 sm:$0xff]  }
 0xacc   :  { %13445 = vmatpush1.bf16.xpose.msra.mxu1 %v21887_v44  ;;  %13317 = vmatprep.subr.bf16.mxu0 %v21892_v19  ;;  %v21905_v44 = vld [vmem:[%s30890_s1 + $0x2f40] ss:$24 sps:$4 sm:$0xff]   ;;  %v21910_v19 = vld [vmem:[%s30890_s1 + $0x2c74] ss:$24 sps:$4 sm:$0xff]  }
 0xacd   :  { %13446 = vmatprep.subr.bf16.mxu1 %v21895_v47  ;;  %v21913_v47 = vld [vmem:[%s30890_s1 + $0x2f74] ss:$24 sps:$4 sm:$0xff]  }
 0xad3   :  { %13318 = vmatpush1.bf16.xpose.msra.mxu0 %v21890_v20  ;;  %v21908_v20 = vld [vmem:[%s30890_s1 + $0x2c70] ss:$24 sps:$4 sm:$0xff]  }
 0xad4   :  { %13447 = vmatpush1.bf16.xpose.msra.mxu1 %v21893_v48  ;;  %13319 = vmatprep.subr.bf16.mxu0 %v21898_v58  ;;  %v21911_v48 = vld [vmem:[%s30890_s1 + $0x2f70] ss:$24 sps:$4 sm:$0xff]   ;;  %v21916_v58 = vld [vmem:[%s30890_s1 + $0x2ca4] ss:$24 sps:$4 sm:$0xff]  }
 0xad5   :  { %13448 = vmatprep.subr.bf16.mxu1 %v21901_v11  ;;  %v21919_v11 = vld [vmem:[%s30890_s1 + $0x2fa4] ss:$24 sps:$4 sm:$0xff]  }
 0xadb   :  { %13320 = vmatpush1.bf16.xpose.msra.mxu0 %v21896_v50  ;;  %v21914_v50 = vld [vmem:[%s30890_s1 + $0x2ca0] ss:$24 sps:$4 sm:$0xff]  }
 0xadc   :  { %13449 = vmatpush1.bf16.xpose.msra.mxu1 %v21899_v33  ;;  %13321 = vmatprep.subr.bf16.mxu0 %v21904_v12  ;;  %v21917_v33 = vld [vmem:[%s30890_s1 + $0x2fa0] ss:$24 sps:$4 sm:$0xff]   ;;  %v21922_v12 = vld [vmem:[%s30890_s1 + $0x2cd4] ss:$24 sps:$4 sm:$0xff]  }
 0xadd   :  { %13450 = vmatprep.subr.bf16.mxu1 %v21907_v49  ;;  %v21925_v49 = vld [vmem:[%s30890_s1 + $0x2fd4] ss:$24 sps:$4 sm:$0xff]  }
 0xae3   :  { %13322 = vmatpush1.bf16.xpose.msra.mxu0 %v21902_v2  ;;  %v21920_v2 = vld [vmem:[%s30890_s1 + $0x2cd0] ss:$24 sps:$4 sm:$0xff]  }
 0xae4   :  { %13451 = vmatpush1.bf16.xpose.msra.mxu1 %v21905_v44  ;;  %13323 = vmatprep.subr.bf16.mxu0 %v21910_v19  ;;  %v21923_v44 = vld [vmem:[%s30890_s1 + $0x2fd0] ss:$24 sps:$4 sm:$0xff]   ;;  %v21928_v19 = vld [vmem:[%s30890_s1 + $0x2a0c] ss:$24 sps:$4 sm:$0xff]  }
 0xae5   :  { %13452 = vmatprep.subr.bf16.mxu1 %v21913_v47  ;;  %v21931_v47 = vld [vmem:[%s30890_s1 + $0x2d0c] ss:$24 sps:$4 sm:$0xff]  }
 0xaeb   :  { %13324 = vmatpush1.bf16.xpose.msra.mxu0 %v21908_v20  ;;  %v21926_v20 = vld [vmem:[%s30890_s1 + $0x2a08] ss:$24 sps:$4 sm:$0xff]  }
 0xaec   :  { %13453 = vmatpush1.bf16.xpose.msra.mxu1 %v21911_v48  ;;  %13325 = vmatprep.subr.bf16.mxu0 %v21916_v58  ;;  %v21929_v48 = vld [vmem:[%s30890_s1 + $0x2d08] ss:$24 sps:$4 sm:$0xff]   ;;  %v21934_v58 = vld [vmem:[%s30890_s1 + $0x2a3c] ss:$24 sps:$4 sm:$0xff]  }
 0xaed   :  { %13454 = vmatprep.subr.bf16.mxu1 %v21919_v11  ;;  %v21937_v11 = vld [vmem:[%s30890_s1 + $0x2d3c] ss:$24 sps:$4 sm:$0xff]  }
 0xaf3   :  { %13326 = vmatpush1.bf16.xpose.msra.mxu0 %v21914_v50  ;;  %v21932_v50 = vld [vmem:[%s30890_s1 + $0x2a38] ss:$24 sps:$4 sm:$0xff]  }
 0xaf4   :  { %13455 = vmatpush1.bf16.xpose.msra.mxu1 %v21917_v33  ;;  %13327 = vmatprep.subr.bf16.mxu0 %v21922_v12  ;;  %v21935_v33 = vld [vmem:[%s30890_s1 + $0x2d38] ss:$24 sps:$4 sm:$0xff]   ;;  %v21943_v12 = vld [vmem:[%s30890_s1 + $0x2d6c] ss:$24 sps:$4 sm:$0xff]  }
 0xaf5   :  { %13456 = vmatprep.subr.bf16.mxu1 %v21925_v49  ;;  %v21941_v49 = vld [vmem:[%s30890_s1 + $0x2d68] ss:$24 sps:$4 sm:$0xff]  }
 0xafb   :  { %13328 = vmatpush1.bf16.xpose.msra.mxu0 %v21920_v2  ;;  %v21946_v2 = vld [vmem:[%s30890_s1 + $0x2a9c] ss:$24 sps:$4 sm:$0xff]  }
 0xafc   :  { %13457 = vmatpush1.bf16.xpose.msra.mxu1 %v21923_v44  ;;  %13340 = vmatprep.subr.bf16.mxu0 %v21928_v19  ;;  %v21949_v44 = vld [vmem:[%s30890_s1 + $0x2d9c] ss:$24 sps:$4 sm:$0xff]   ;;  %v21944_v19 = vld [vmem:[%s30890_s1 + $0x2a98] ss:$24 sps:$4 sm:$0xff]  }
 0xafd   :  { %13469 = vmatprep.subr.bf16.mxu1 %v21931_v47  ;;  %v21947_v47 = vld [vmem:[%s30890_s1 + $0x2d98] ss:$24 sps:$4 sm:$0xff]  }
 0xb02   :  { %13330 = vmatmul.mubr.bf16.vlgmr.msra.gmra.mrb[28].mxu0 %v26584_v57 }
 0xb03   :  { %13459 = vmatmul.mubr.bf16.vlgmr.msra.gmra.mrb[28].mxu1 %v26584_v57  ;;  %13341 = vmatpush1.bf16.xpose.msra.mxu0 %v21926_v20  ;;  %v21940_v57 = vld [vmem:[%s30890_s1 + $0x2a6c] ss:$24 sps:$4 sm:$0xff]  }
 0xb04   :  { %13470 = vmatpush1.bf16.xpose.msra.mxu1 %v21929_v48  ;;  %13342 = vmatprep.subr.bf16.mxu0 %v21934_v58  ;;  %v21952_v20 = vld [vmem:[%s30890_s1 + $0x2acc] ss:$24 sps:$4 sm:$0xff]   ;;  %v21950_v58 = vld [vmem:[%s30890_s1 + $0x2ac8] ss:$24 sps:$4 sm:$0xff]  }
 0xb05   :  { %13471 = vmatprep.subr.bf16.mxu1 %v21937_v11  ;;  %13372 = vmatprep.mubr.bf16.mxu0 %v26591_v36  ;;  %v21955_v48 = vld [vmem:[%s30890_s1 + $0x2dcc] ss:$24 sps:$4 sm:$0xff]   ;;  %v21953_v11 = vld [vmem:[%s30890_s1 + $0x2dc8] ss:$24 sps:$4 sm:$0xff]  }
 0xb06   :  { %13501 = vmatprep.mubr.bf16.mxu1 %v26591_v36  ;;  %v21938_v36 = vld [vmem:[%s30890_s1 + $0x2a68] ss:$24 sps:$4 sm:$0xff]  }
 0xb0b   :  { %13343 = vmatpush1.bf16.xpose.msra.mxu0 %v21932_v50  ;;  %v21958_v50 = vld [vmem:[%s30890_s1 + $0x2afc] ss:$24 sps:$4 sm:$0xff]  }
 0xb0c   :  { %13472 = vmatpush1.bf16.xpose.msra.mxu1 %v21935_v33  ;;  %13344 = vmatprep.subr.bf16.mxu0 %v21940_v57  ;;  %v21961_v33 = vld [vmem:[%s30890_s1 + $0x2dfc] ss:$24 sps:$4 sm:$0xff]   ;;  %v21956_v57 = vld [vmem:[%s30890_s1 + $0x2af8] ss:$24 sps:$4 sm:$0xff]  }
 0xb0d   :  { %13473 = vmatprep.subr.bf16.mxu1 %v21943_v12  ;;  %v21959_v12 = vld [vmem:[%s30890_s1 + $0x2df8] ss:$24 sps:$4 sm:$0xff]  }
 0xb13   :  { %13345 = vmatpush1.bf16.xpose.msra.mxu0 %v21938_v36  ;;  %v21964_v36 = vld [vmem:[%s30890_s1 + $0x2b2c] ss:$24 sps:$4 sm:$0xff]  }
 0xb14   :  { %13474 = vmatpush1.bf16.xpose.msra.mxu1 %v21941_v49  ;;  %13346 = vmatprep.subr.bf16.mxu0 %v21946_v2  ;;  %v21967_v49 = vld [vmem:[%s30890_s1 + $0x2e2c] ss:$24 sps:$4 sm:$0xff]   ;;  %v21962_v2 = vld [vmem:[%s30890_s1 + $0x2b28] ss:$24 sps:$4 sm:$0xff]  }
 0xb15   :  { %13475 = vmatprep.subr.bf16.mxu1 %v21949_v44  ;;  %v21965_v44 = vld [vmem:[%s30890_s1 + $0x2e28] ss:$24 sps:$4 sm:$0xff]  }
 0xb1b   :  { %13347 = vmatpush1.bf16.xpose.msra.mxu0 %v21944_v19  ;;  %v21970_v19 = vld [vmem:[%s30890_s1 + $0x2b5c] ss:$24 sps:$4 sm:$0xff]  }
 0xb1c   :  { %13476 = vmatpush1.bf16.xpose.msra.mxu1 %v21947_v47  ;;  %13348 = vmatprep.subr.bf16.mxu0 %v21952_v20  ;;  %v21973_v47 = vld [vmem:[%s30890_s1 + $0x2e5c] ss:$24 sps:$4 sm:$0xff]   ;;  %v21968_v20 = vld [vmem:[%s30890_s1 + $0x2b58] ss:$24 sps:$4 sm:$0xff]  }
 0xb1d   :  { %13477 = vmatprep.subr.bf16.mxu1 %v21955_v48  ;;  %v21971_v48 = vld [vmem:[%s30890_s1 + $0x2e58] ss:$24 sps:$4 sm:$0xff]  }
 0xb23   :  { %13349 = vmatpush1.bf16.xpose.msra.mxu0 %v21950_v58  ;;  %v21976_v58 = vld [vmem:[%s30890_s1 + $0x2b8c] ss:$24 sps:$4 sm:$0xff]  }
 0xb24   :  { %13478 = vmatpush1.bf16.xpose.msra.mxu1 %v21953_v11  ;;  %13350 = vmatprep.subr.bf16.mxu0 %v21958_v50  ;;  %v21979_v11 = vld [vmem:[%s30890_s1 + $0x2e8c] ss:$24 sps:$4 sm:$0xff]   ;;  %v21974_v50 = vld [vmem:[%s30890_s1 + $0x2b88] ss:$24 sps:$4 sm:$0xff]  }
 0xb25   :  { %13479 = vmatprep.subr.bf16.mxu1 %v21961_v33  ;;  %v21977_v33 = vld [vmem:[%s30890_s1 + $0x2e88] ss:$24 sps:$4 sm:$0xff]  }
 0xb2b   :  { %13351 = vmatpush1.bf16.xpose.msra.mxu0 %v21956_v57  ;;  %v21982_v57 = vld [vmem:[%s30890_s1 + $0x2bbc] ss:$24 sps:$4 sm:$0xff]  }
 0xb2c   :  { %13480 = vmatpush1.bf16.xpose.msra.mxu1 %v21959_v12  ;;  %13352 = vmatprep.subr.bf16.mxu0 %v21964_v36  ;;  %v21985_v12 = vld [vmem:[%s30890_s1 + $0x2ebc] ss:$24 sps:$4 sm:$0xff]   ;;  %v21980_v36 = vld [vmem:[%s30890_s1 + $0x2bb8] ss:$24 sps:$4 sm:$0xff]  }
 0xb2d   :  { %13481 = vmatprep.subr.bf16.mxu1 %v21967_v49  ;;  %v21983_v49 = vld [vmem:[%s30890_s1 + $0x2eb8] ss:$24 sps:$4 sm:$0xff]  }
 0xb33   :  { %13353 = vmatpush1.bf16.xpose.msra.mxu0 %v21962_v2  ;;  %v21988_v2 = vld [vmem:[%s30890_s1 + $0x2bec] ss:$24 sps:$4 sm:$0xff]  }
 0xb34   :  { %13482 = vmatpush1.bf16.xpose.msra.mxu1 %v21965_v44  ;;  %13354 = vmatprep.subr.bf16.mxu0 %v21970_v19  ;;  %v21991_v44 = vld [vmem:[%s30890_s1 + $0x2eec] ss:$24 sps:$4 sm:$0xff]   ;;  %v21986_v19 = vld [vmem:[%s30890_s1 + $0x2be8] ss:$24 sps:$4 sm:$0xff]  }
 0xb35   :  { %13483 = vmatprep.subr.bf16.mxu1 %v21973_v47  ;;  %v21989_v47 = vld [vmem:[%s30890_s1 + $0x2ee8] ss:$24 sps:$4 sm:$0xff]  }
 0xb3b   :  { %13355 = vmatpush1.bf16.xpose.msra.mxu0 %v21968_v20  ;;  %v21994_v20 = vld [vmem:[%s30890_s1 + $0x2c1c] ss:$24 sps:$4 sm:$0xff]  }
 0xb3c   :  { %13484 = vmatpush1.bf16.xpose.msra.mxu1 %v21971_v48  ;;  %13356 = vmatprep.subr.bf16.mxu0 %v21976_v58  ;;  %v21997_v48 = vld [vmem:[%s30890_s1 + $0x2f1c] ss:$24 sps:$4 sm:$0xff]  }
 0xb3d   :  { %13485 = vmatprep.subr.bf16.mxu1 %v21979_v11 }
 0xb43   :  { %13357 = vmatpush1.bf16.xpose.msra.mxu0 %v21974_v50 }
 0xb44   :  { %13486 = vmatpush1.bf16.xpose.msra.mxu1 %v21977_v33  ;;  %13358 = vmatprep.subr.bf16.mxu0 %v21982_v57 }
 0xb45   :  { %13487 = vmatprep.subr.bf16.mxu1 %v21985_v12 }
 0xb4b   :  { %13359 = vmatpush1.bf16.xpose.msra.mxu0 %v21980_v36  ;;  %v21992_v36 = vld [vmem:[%s30890_s1 + $0x2c18] ss:$24 sps:$4 sm:$0xff]  }
 0xb4c   :  { %13488 = vmatpush1.bf16.xpose.msra.mxu1 %v21983_v49  ;;  %13360 = vmatprep.subr.bf16.mxu0 %v21988_v2  ;;  %v21995_v49 = vld [vmem:[%s30890_s1 + $0x2f18] ss:$24 sps:$4 sm:$0xff]  }
 0xb4d   :  { %13489 = vmatprep.subr.bf16.mxu1 %v21991_v44 }
 0xb53   :  { %13361 = vmatpush1.bf16.xpose.msra.mxu0 %v21986_v19  ;;  %v22000_v19 = vld [vmem:[%s30890_s1 + $0x2c4c] ss:$24 sps:$4 sm:$0xff]  }
 0xb54   :  { %13490 = vmatpush1.bf16.xpose.msra.mxu1 %v21989_v47  ;;  %13362 = vmatprep.subr.bf16.mxu0 %v21994_v20  ;;  %v22003_v47 = vld [vmem:[%s30890_s1 + $0x2f4c] ss:$24 sps:$4 sm:$0xff]   ;;  %v21998_v20 = vld [vmem:[%s30890_s1 + $0x2c48] ss:$24 sps:$4 sm:$0xff]  }
 0xb55   :  { %13491 = vmatprep.subr.bf16.mxu1 %v21997_v48  ;;  %v27329_v58 = vpop.f32.mrb[24].mxu0  ;;  %v22001_v48 = vld [vmem:[%s30890_s1 + $0x2f48] ss:$24 sps:$4 sm:$0xff]  }
 0xb56   :  { %30899 = vst [vmem:[#allocation6_spill] sm:$0xff] %v27329_v58  ;;  %v27331_v11 = vpop.f32.mrb[24].mxu1  ;;  %v27333_v50 = vpop.f32.mrb[25].mxu0 }
 0xb57   :  { %30900 = vst [vmem:[#allocation7_spill] sm:$0xff] %v27331_v11  ;;  %30901 = vst [vmem:[#allocation8_spill] sm:$0xff] %v27333_v50  ;;  %v27335_v33 = vpop.f32.mrb[25].mxu1  ;;  %v27337_v57 = vpop.f32.mrb[26].mxu0  ;;  %v22237_v11 = vld [vmem:[%s30890_s1 + $0x339c] ss:$24 sps:$4 sm:$0xff]  }
 0xb58   :  { %30902 = vst [vmem:[#allocation9_spill] sm:$0xff] %v27335_v33  ;;  %30903 = vst [vmem:[#allocation10_spill] sm:$0xff] %v27337_v57  ;;  %v27339_v12 = vpop.f32.mrb[26].mxu1  ;;  %v27347_v2 = vpop.f32.mrb[27].mxu0  ;;  %v22009_v57 = vld [vmem:[%s30890_s1 + $0x2f7c] ss:$24 sps:$4 sm:$0xff]  }
 0xb59   :  { %30904 = vst [vmem:[#allocation11_spill] sm:$0xff] %v27339_v12  ;;  %30905 = vst [vmem:[#allocation12_spill] sm:$0xff] %v27347_v2  ;;  %v27349_v44 = vpop.f32.mrb[27].mxu1  ;;  %v22006_v12 = vld [vmem:[%s30890_s1 + $0x2c7c] ss:$24 sps:$4 sm:$0xff]   ;;  %v14147_v50 = vld [vmem:[%s30892_s3 + $0x20] sm:$0xff] }
 0xb5a   :  { %30906 = vst [vmem:[#allocation13_spill] sm:$0xff] %v27349_v44  ;;  %v22234_v44 = vld [vmem:[%s30890_s1 + $0x309c] ss:$24 sps:$4 sm:$0xff]   ;;  %v22280_v33 = vld [vmem:[%s30890_s1 + $0x3218] ss:$24 sps:$4 sm:$0xff]  }
 0xb5b   :  { %13363 = vmatpush1.bf16.xpose.msra.mxu0 %v21992_v36  ;;  %v22004_v36 = vld [vmem:[%s30890_s1 + $0x2c78] ss:$24 sps:$4 sm:$0xff]  }
 0xb5c   :  { %13492 = vmatpush1.bf16.xpose.msra.mxu1 %v21995_v49  ;;  %13364 = vmatprep.subr.bf16.mxu0 %v22000_v19  ;;  %v22007_v49 = vld [vmem:[%s30890_s1 + $0x2f78] ss:$24 sps:$4 sm:$0xff]   ;;  %v22012_v19 = vld [vmem:[%s30890_s1 + $0x2cac] ss:$24 sps:$4 sm:$0xff]  }
 0xb5d   :  { %13493 = vmatprep.subr.bf16.mxu1 %v22003_v47  ;;  %v22015_v47 = vld [vmem:[%s30890_s1 + $0x2fac] ss:$24 sps:$4 sm:$0xff]  }
 0xb63   :  { %13365 = vmatpush1.bf16.xpose.msra.mxu0 %v21998_v20  ;;  %v22018_v20 = vld [vmem:[%s30890_s1 + $0x2cdc] ss:$24 sps:$4 sm:$0xff]  }
 0xb64   :  { %13494 = vmatpush1.bf16.xpose.msra.mxu1 %v22001_v48  ;;  %13366 = vmatprep.subr.bf16.mxu0 %v22006_v12  ;;  %v22013_v12 = vld [vmem:[%s30890_s1 + $0x2fa8] ss:$24 sps:$4 sm:$0xff]   ;;  %v22021_v48 = vld [vmem:[%s30890_s1 + $0x2fdc] ss:$24 sps:$4 sm:$0xff]  }
 0xb65   :  { %13495 = vmatprep.subr.bf16.mxu1 %v22009_v57  ;;  %v22010_v57 = vld [vmem:[%s30890_s1 + $0x2ca8] ss:$24 sps:$4 sm:$0xff]  }
 0xb6b   :  { %13367 = vmatpush1.bf16.xpose.msra.mxu0 %v22004_v36  ;;  %v22016_v36 = vld [vmem:[%s30890_s1 + $0x2cd8] ss:$24 sps:$4 sm:$0xff]  }
 0xb6c   :  { %13496 = vmatpush1.bf16.xpose.msra.mxu1 %v22007_v49  ;;  %13368 = vmatprep.subr.bf16.mxu0 %v22012_v19  ;;  %v22019_v49 = vld [vmem:[%s30890_s1 + $0x2fd8] ss:$24 sps:$4 sm:$0xff]   ;;  %v22024_v19 = vld [vmem:[%s30890_s1 + $0x2a14] ss:$24 sps:$4 sm:$0xff]  }
 0xb6d   :  { %13497 = vmatprep.subr.bf16.mxu1 %v22015_v47  ;;  %v22027_v47 = vld [vmem:[%s30890_s1 + $0x2d14] ss:$24 sps:$4 sm:$0xff]  }
 0xb73   :  { %13369 = vmatpush1.bf16.xpose.msra.mxu0 %v22010_v57  ;;  %v22022_v57 = vld [vmem:[%s30890_s1 + $0x2a10] ss:$24 sps:$4 sm:$0xff]  }
 0xb74   :  { %13498 = vmatpush1.bf16.xpose.msra.mxu1 %v22013_v12  ;;  %13370 = vmatprep.subr.bf16.mxu0 %v22018_v20  ;;  %v22025_v12 = vld [vmem:[%s30890_s1 + $0x2d10] ss:$24 sps:$4 sm:$0xff]   ;;  %v22030_v20 = vld [vmem:[%s30890_s1 + $0x2a44] ss:$24 sps:$4 sm:$0xff]  }
 0xb75   :  { %13499 = vmatprep.subr.bf16.mxu1 %v22021_v48  ;;  %v22033_v48 = vld [vmem:[%s30890_s1 + $0x2d44] ss:$24 sps:$4 sm:$0xff]  }
 0xb7b   :  { %13371 = vmatpush1.bf16.xpose.msra.mxu0 %v22016_v36  ;;  %v22028_v36 = vld [vmem:[%s30890_s1 + $0x2a40] ss:$24 sps:$4 sm:$0xff]  }
 0xb7c   :  { %13500 = vmatpush1.bf16.xpose.msra.mxu1 %v22019_v49  ;;  %13383 = vmatprep.subr.bf16.mxu0 %v22024_v19  ;;  %v22031_v49 = vld [vmem:[%s30890_s1 + $0x2d40] ss:$24 sps:$4 sm:$0xff]   ;;  %v22039_v19 = vld [vmem:[%s30890_s1 + $0x2d74] ss:$24 sps:$4 sm:$0xff]  }
 0xb7d   :  { %13512 = vmatprep.subr.bf16.mxu1 %v22027_v47  ;;  %v22037_v47 = vld [vmem:[%s30890_s1 + $0x2d70] ss:$24 sps:$4 sm:$0xff]  }
 0xb82   :  { %13373 = vmatmul.mubr.bf16.vlgmr.msra.gmra.mrb[28].mxu0 %v26806_v39 }
 0xb83   :  { %13502 = vmatmul.mubr.bf16.vlgmr.msra.gmra.mrb[28].mxu1 %v26806_v39  ;;  %13384 = vmatpush1.bf16.xpose.msra.mxu0 %v22022_v57  ;;  %v22036_v39 = vld [vmem:[%s30890_s1 + $0x2a74] ss:$24 sps:$4 sm:$0xff]   ;;  %v22042_v57 = vld [vmem:[%s30890_s1 + $0x2aa4] ss:$24 sps:$4 sm:$0xff]  }
 0xb84   :  { %13513 = vmatpush1.bf16.xpose.msra.mxu1 %v22025_v12  ;;  %13385 = vmatprep.subr.bf16.mxu0 %v22030_v20  ;;  %v22045_v12 = vld [vmem:[%s30890_s1 + $0x2da4] ss:$24 sps:$4 sm:$0xff]   ;;  %v22040_v20 = vld [vmem:[%s30890_s1 + $0x2aa0] ss:$24 sps:$4 sm:$0xff]  }
 0xb85   :  { %13514 = vmatprep.subr.bf16.mxu1 %v22033_v48  ;;  %13415 = vmatprep.mubr.bf16.mxu0 %v26813_v40  ;;  %v22043_v48 = vld [vmem:[%s30890_s1 + $0x2da0] ss:$24 sps:$4 sm:$0xff]  }
 0xb86   :  { %13544 = vmatprep.mubr.bf16.mxu1 %v26813_v40  ;;  %v22034_v40 = vld [vmem:[%s30890_s1 + $0x2a70] ss:$24 sps:$4 sm:$0xff]  }
 0xb8b   :  { %13386 = vmatpush1.bf16.xpose.msra.mxu0 %v22028_v36  ;;  %v22048_v36 = vld [vmem:[%s30890_s1 + $0x2ad4] ss:$24 sps:$4 sm:$0xff]  }
 0xb8c   :  { %13515 = vmatpush1.bf16.xpose.msra.mxu1 %v22031_v49  ;;  %13387 = vmatprep.subr.bf16.mxu0 %v22036_v39  ;;  %v22051_v49 = vld [vmem:[%s30890_s1 + $0x2dd4] ss:$24 sps:$4 sm:$0xff]   ;;  %v22046_v39 = vld [vmem:[%s30890_s1 + $0x2ad0] ss:$24 sps:$4 sm:$0xff]  }
 0xb8d   :  { %13516 = vmatprep.subr.bf16.mxu1 %v22039_v19  ;;  %v22049_v19 = vld [vmem:[%s30890_s1 + $0x2dd0] ss:$24 sps:$4 sm:$0xff]  }
 0xb93   :  { %13388 = vmatpush1.bf16.xpose.msra.mxu0 %v22034_v40  ;;  %v22054_v40 = vld [vmem:[%s30890_s1 + $0x2b04] ss:$24 sps:$4 sm:$0xff]  }
 0xb94   :  { %13517 = vmatpush1.bf16.xpose.msra.mxu1 %v22037_v47  ;;  %13389 = vmatprep.subr.bf16.mxu0 %v22042_v57  ;;  %v22057_v47 = vld [vmem:[%s30890_s1 + $0x2e04] ss:$24 sps:$4 sm:$0xff]   ;;  %v22052_v57 = vld [vmem:[%s30890_s1 + $0x2b00] ss:$24 sps:$4 sm:$0xff]  }
 0xb95   :  { %13518 = vmatprep.subr.bf16.mxu1 %v22045_v12  ;;  %v22055_v12 = vld [vmem:[%s30890_s1 + $0x2e00] ss:$24 sps:$4 sm:$0xff]  }
 0xb9b   :  { %13390 = vmatpush1.bf16.xpose.msra.mxu0 %v22040_v20  ;;  %v22060_v20 = vld [vmem:[%s30890_s1 + $0x2b34] ss:$24 sps:$4 sm:$0xff]  }
 0xb9c   :  { %13519 = vmatpush1.bf16.xpose.msra.mxu1 %v22043_v48  ;;  %13391 = vmatprep.subr.bf16.mxu0 %v22048_v36  ;;  %v22063_v48 = vld [vmem:[%s30890_s1 + $0x2e34] ss:$24 sps:$4 sm:$0xff]   ;;  %v22058_v36 = vld [vmem:[%s30890_s1 + $0x2b30] ss:$24 sps:$4 sm:$0xff]  }
 0xb9d   :  { %13520 = vmatprep.subr.bf16.mxu1 %v22051_v49  ;;  %v22061_v49 = vld [vmem:[%s30890_s1 + $0x2e30] ss:$24 sps:$4 sm:$0xff]  }
 0xba3   :  { %13392 = vmatpush1.bf16.xpose.msra.mxu0 %v22046_v39  ;;  %v22066_v39 = vld [vmem:[%s30890_s1 + $0x2b64] ss:$24 sps:$4 sm:$0xff]  }
 0xba4   :  { %13521 = vmatpush1.bf16.xpose.msra.mxu1 %v22049_v19  ;;  %13393 = vmatprep.subr.bf16.mxu0 %v22054_v40  ;;  %v22069_v19 = vld [vmem:[%s30890_s1 + $0x2e64] ss:$24 sps:$4 sm:$0xff]   ;;  %v22064_v40 = vld [vmem:[%s30890_s1 + $0x2b60] ss:$24 sps:$4 sm:$0xff]  }
 0xba5   :  { %13522 = vmatprep.subr.bf16.mxu1 %v22057_v47  ;;  %v22067_v47 = vld [vmem:[%s30890_s1 + $0x2e60] ss:$24 sps:$4 sm:$0xff]  }
 0xbab   :  { %13394 = vmatpush1.bf16.xpose.msra.mxu0 %v22052_v57  ;;  %v22072_v57 = vld [vmem:[%s30890_s1 + $0x2b94] ss:$24 sps:$4 sm:$0xff]  }
 0xbac   :  { %13523 = vmatpush1.bf16.xpose.msra.mxu1 %v22055_v12  ;;  %13395 = vmatprep.subr.bf16.mxu0 %v22060_v20  ;;  %v22075_v12 = vld [vmem:[%s30890_s1 + $0x2e94] ss:$24 sps:$4 sm:$0xff]   ;;  %v22070_v20 = vld [vmem:[%s30890_s1 + $0x2b90] ss:$24 sps:$4 sm:$0xff]  }
 0xbad   :  { %13524 = vmatprep.subr.bf16.mxu1 %v22063_v48  ;;  %v22073_v48 = vld [vmem:[%s30890_s1 + $0x2e90] ss:$24 sps:$4 sm:$0xff]  }
 0xbb3   :  { %13396 = vmatpush1.bf16.xpose.msra.mxu0 %v22058_v36  ;;  %v22078_v36 = vld [vmem:[%s30890_s1 + $0x2bc4] ss:$24 sps:$4 sm:$0xff]  }
 0xbb4   :  { %13525 = vmatpush1.bf16.xpose.msra.mxu1 %v22061_v49  ;;  %13397 = vmatprep.subr.bf16.mxu0 %v22066_v39  ;;  %v22081_v49 = vld [vmem:[%s30890_s1 + $0x2ec4] ss:$24 sps:$4 sm:$0xff]   ;;  %v22076_v39 = vld [vmem:[%s30890_s1 + $0x2bc0] ss:$24 sps:$4 sm:$0xff]  }
 0xbb5   :  { %13526 = vmatprep.subr.bf16.mxu1 %v22069_v19  ;;  %v22079_v19 = vld [vmem:[%s30890_s1 + $0x2ec0] ss:$24 sps:$4 sm:$0xff]  }
 0xbbb   :  { %13398 = vmatpush1.bf16.xpose.msra.mxu0 %v22064_v40  ;;  %v22084_v40 = vld [vmem:[%s30890_s1 + $0x2bf4] ss:$24 sps:$4 sm:$0xff]  }
 0xbbc   :  { %13527 = vmatpush1.bf16.xpose.msra.mxu1 %v22067_v47  ;;  %13399 = vmatprep.subr.bf16.mxu0 %v22072_v57  ;;  %v22087_v47 = vld [vmem:[%s30890_s1 + $0x2ef4] ss:$24 sps:$4 sm:$0xff]   ;;  %v22082_v57 = vld [vmem:[%s30890_s1 + $0x2bf0] ss:$24 sps:$4 sm:$0xff]  }
 0xbbd   :  { %13528 = vmatprep.subr.bf16.mxu1 %v22075_v12  ;;  %v22085_v12 = vld [vmem:[%s30890_s1 + $0x2ef0] ss:$24 sps:$4 sm:$0xff]  }
 0xbc3   :  { %13400 = vmatpush1.bf16.xpose.msra.mxu0 %v22070_v20  ;;  %v22090_v20 = vld [vmem:[%s30890_s1 + $0x2c24] ss:$24 sps:$4 sm:$0xff]  }
 0xbc4   :  { %13529 = vmatpush1.bf16.xpose.msra.mxu1 %v22073_v48  ;;  %13401 = vmatprep.subr.bf16.mxu0 %v22078_v36  ;;  %v22093_v48 = vld [vmem:[%s30890_s1 + $0x2f24] ss:$24 sps:$4 sm:$0xff]   ;;  %v22088_v36 = vld [vmem:[%s30890_s1 + $0x2c20] ss:$24 sps:$4 sm:$0xff]  }
 0xbc5   :  { %13530 = vmatprep.subr.bf16.mxu1 %v22081_v49  ;;  %v22091_v49 = vld [vmem:[%s30890_s1 + $0x2f20] ss:$24 sps:$4 sm:$0xff]  }
 0xbcb   :  { %13402 = vmatpush1.bf16.xpose.msra.mxu0 %v22076_v39  ;;  %v22096_v39 = vld [vmem:[%s30890_s1 + $0x2c54] ss:$24 sps:$4 sm:$0xff]  }
 0xbcc   :  { %13531 = vmatpush1.bf16.xpose.msra.mxu1 %v22079_v19  ;;  %13403 = vmatprep.subr.bf16.mxu0 %v22084_v40  ;;  %v22099_v19 = vld [vmem:[%s30890_s1 + $0x2f54] ss:$24 sps:$4 sm:$0xff]   ;;  %v22094_v40 = vld [vmem:[%s30890_s1 + $0x2c50] ss:$24 sps:$4 sm:$0xff]  }
 0xbcd   :  { %13532 = vmatprep.subr.bf16.mxu1 %v22087_v47  ;;  %v22097_v47 = vld [vmem:[%s30890_s1 + $0x2f50] ss:$24 sps:$4 sm:$0xff]  }
 0xbd3   :  { %13404 = vmatpush1.bf16.xpose.msra.mxu0 %v22082_v57  ;;  %v22102_v57 = vld [vmem:[%s30890_s1 + $0x2c84] ss:$24 sps:$4 sm:$0xff]  }
 0xbd4   :  { %13533 = vmatpush1.bf16.xpose.msra.mxu1 %v22085_v12  ;;  %13405 = vmatprep.subr.bf16.mxu0 %v22090_v20  ;;  %v22105_v12 = vld [vmem:[%s30890_s1 + $0x2f84] ss:$24 sps:$4 sm:$0xff]   ;;  %v22100_v20 = vld [vmem:[%s30890_s1 + $0x2c80] ss:$24 sps:$4 sm:$0xff]  }
 0xbd5   :  { %13534 = vmatprep.subr.bf16.mxu1 %v22093_v48  ;;  %v22103_v48 = vld [vmem:[%s30890_s1 + $0x2f80] ss:$24 sps:$4 sm:$0xff]  }
 0xbdb   :  { %13406 = vmatpush1.bf16.xpose.msra.mxu0 %v22088_v36  ;;  %v22108_v36 = vld [vmem:[%s30890_s1 + $0x2cb4] ss:$24 sps:$4 sm:$0xff]  }
 0xbdc   :  { %13535 = vmatpush1.bf16.xpose.msra.mxu1 %v22091_v49  ;;  %13407 = vmatprep.subr.bf16.mxu0 %v22096_v39  ;;  %v22111_v49 = vld [vmem:[%s30890_s1 + $0x2fb4] ss:$24 sps:$4 sm:$0xff]   ;;  %v22106_v39 = vld [vmem:[%s30890_s1 + $0x2cb0] ss:$24 sps:$4 sm:$0xff]  }
 0xbdd   :  { %13536 = vmatprep.subr.bf16.mxu1 %v22099_v19  ;;  %v22109_v19 = vld [vmem:[%s30890_s1 + $0x2fb0] ss:$24 sps:$4 sm:$0xff]  }
 0xbe3   :  { %13408 = vmatpush1.bf16.xpose.msra.mxu0 %v22094_v40  ;;  %v22114_v40 = vld [vmem:[%s30890_s1 + $0x2ce4] ss:$24 sps:$4 sm:$0xff]  }
 0xbe4   :  { %13537 = vmatpush1.bf16.xpose.msra.mxu1 %v22097_v47  ;;  %13409 = vmatprep.subr.bf16.mxu0 %v22102_v57  ;;  %v22117_v47 = vld [vmem:[%s30890_s1 + $0x2fe4] ss:$24 sps:$4 sm:$0xff]   ;;  %v22112_v57 = vld [vmem:[%s30890_s1 + $0x2ce0] ss:$24 sps:$4 sm:$0xff]  }
 0xbe5   :  { %13538 = vmatprep.subr.bf16.mxu1 %v22105_v12  ;;  %v22115_v12 = vld [vmem:[%s30890_s1 + $0x2fe0] ss:$24 sps:$4 sm:$0xff]  }
 0xbeb   :  { %13410 = vmatpush1.bf16.xpose.msra.mxu0 %v22100_v20  ;;  %v22120_v20 = vld [vmem:[%s30890_s1 + $0x3004] ss:$24 sps:$4 sm:$0xff]  }
 0xbec   :  { %13539 = vmatpush1.bf16.xpose.msra.mxu1 %v22103_v48  ;;  %13411 = vmatprep.subr.bf16.mxu0 %v22108_v36  ;;  %v22123_v48 = vld [vmem:[%s30890_s1 + $0x3304] ss:$24 sps:$4 sm:$0xff]   ;;  %v22118_v36 = vld [vmem:[%s30890_s1 + $0x3000] ss:$24 sps:$4 sm:$0xff]  }
 0xbed   :  { %13540 = vmatprep.subr.bf16.mxu1 %v22111_v49  ;;  %v22121_v49 = vld [vmem:[%s30890_s1 + $0x3300] ss:$24 sps:$4 sm:$0xff]  }
 0xbf3   :  { %13412 = vmatpush1.bf16.xpose.msra.mxu0 %v22106_v39  ;;  %v22126_v39 = vld [vmem:[%s30890_s1 + $0x3034] ss:$24 sps:$4 sm:$0xff]  }
 0xbf4   :  { %13541 = vmatpush1.bf16.xpose.msra.mxu1 %v22109_v19  ;;  %13413 = vmatprep.subr.bf16.mxu0 %v22114_v40  ;;  %v22129_v19 = vld [vmem:[%s30890_s1 + $0x3334] ss:$24 sps:$4 sm:$0xff]   ;;  %v27616_v40 = vld [vmem:[%s30891_s0 + $0x10] ss:$24 sps:$4 sm:$0xff]  }
 0xbf5   :  { %13542 = vmatprep.subr.bf16.mxu1 %v22117_v47  ;;  %v27623_v47 = vld [vmem:[%s30891_s0 + $0x4] ss:$24 sps:$4 sm:$0xff]  }
 0xbfb   :  { %13414 = vmatpush1.bf16.xpose.msra.mxu0 %v22112_v57  ;;  %v22124_v57 = vld [vmem:[%s30890_s1 + $0x3030] ss:$24 sps:$4 sm:$0xff]  }
 0xbfc   :  { %13543 = vmatpush1.bf16.xpose.msra.mxu1 %v22115_v12  ;;  %13555 = vmatprep.subr.bf16.mxu0 %v22120_v20  ;;  %v22127_v12 = vld [vmem:[%s30890_s1 + $0x3330] ss:$24 sps:$4 sm:$0xff]   ;;  %v22132_v20 = vld [vmem:[%s30890_s1 + $0x3064] ss:$24 sps:$4 sm:$0xff]  }
 0xbfd   :  { %13684 = vmatprep.subr.bf16.mxu1 %v22123_v48  ;;  %v22135_v48 = vld [vmem:[%s30890_s1 + $0x3364] ss:$24 sps:$4 sm:$0xff]  }
 0xc02   :  { %13416 = vmatmul.mubr.bf16.vlgmr.msra.gmra.mrb[28].mxu0 %v27616_v40 }
 0xc03   :  { %13545 = vmatmul.mubr.bf16.vlgmr.msra.gmra.mrb[28].mxu1 %v27616_v40  ;;  %13556 = vmatpush1.bf16.xpose.msra.mxu0 %v22118_v36  ;;  %v22130_v36 = vld [vmem:[%s30890_s1 + $0x3060] ss:$24 sps:$4 sm:$0xff]  }
 0xc04   :  { %13685 = vmatpush1.bf16.xpose.msra.mxu1 %v22121_v49  ;;  %13557 = vmatprep.subr.bf16.mxu0 %v22126_v39  ;;  %v22133_v49 = vld [vmem:[%s30890_s1 + $0x3360] ss:$24 sps:$4 sm:$0xff]   ;;  %v22138_v39 = vld [vmem:[%s30890_s1 + $0x3094] ss:$24 sps:$4 sm:$0xff]  }
 0xc05   :  { %13686 = vmatprep.subr.bf16.mxu1 %v22129_v19  ;;  %13587 = vmatprep.mubr.bf16.mxu0 %v27623_v47  ;;  %v22141_v19 = vld [vmem:[%s30890_s1 + $0x3394] ss:$24 sps:$4 sm:$0xff]  }
 0xc06   :  { %13716 = vmatprep.mubr.bf16.mxu1 %v27623_v47 }
 0xc0b   :  { %13558 = vmatpush1.bf16.xpose.msra.mxu0 %v22124_v57  ;;  %v22136_v57 = vld [vmem:[%s30890_s1 + $0x3090] ss:$24 sps:$4 sm:$0xff]  }
 0xc0c   :  { %13687 = vmatpush1.bf16.xpose.msra.mxu1 %v22127_v12  ;;  %13559 = vmatprep.subr.bf16.mxu0 %v22132_v20  ;;  %v22139_v12 = vld [vmem:[%s30890_s1 + $0x3390] ss:$24 sps:$4 sm:$0xff]   ;;  %v22144_v20 = vld [vmem:[%s30890_s1 + $0x30c4] ss:$24 sps:$4 sm:$0xff]  }
 0xc0d   :  { %13688 = vmatprep.subr.bf16.mxu1 %v22135_v48  ;;  %v22147_v48 = vld [vmem:[%s30890_s1 + $0x33c4] ss:$24 sps:$4 sm:$0xff]  }
 0xc13   :  { %13560 = vmatpush1.bf16.xpose.msra.mxu0 %v22130_v36  ;;  %v22142_v36 = vld [vmem:[%s30890_s1 + $0x30c0] ss:$24 sps:$4 sm:$0xff]  }
 0xc14   :  { %13689 = vmatpush1.bf16.xpose.msra.mxu1 %v22133_v49  ;;  %13561 = vmatprep.subr.bf16.mxu0 %v22138_v39  ;;  %v22145_v49 = vld [vmem:[%s30890_s1 + $0x33c0] ss:$24 sps:$4 sm:$0xff]   ;;  %v22150_v39 = vld [vmem:[%s30890_s1 + $0x30f4] ss:$24 sps:$4 sm:$0xff]  }
 0xc15   :  { %13690 = vmatprep.subr.bf16.mxu1 %v22141_v19  ;;  %v22153_v19 = vld [vmem:[%s30890_s1 + $0x33f4] ss:$24 sps:$4 sm:$0xff]  }
 0xc1b   :  { %13562 = vmatpush1.bf16.xpose.msra.mxu0 %v22136_v57  ;;  %v22148_v57 = vld [vmem:[%s30890_s1 + $0x30f0] ss:$24 sps:$4 sm:$0xff]  }
 0xc1c   :  { %13691 = vmatpush1.bf16.xpose.msra.mxu1 %v22139_v12  ;;  %13563 = vmatprep.subr.bf16.mxu0 %v22144_v20  ;;  %v22151_v12 = vld [vmem:[%s30890_s1 + $0x33f0] ss:$24 sps:$4 sm:$0xff]   ;;  %v22156_v20 = vld [vmem:[%s30890_s1 + $0x3124] ss:$24 sps:$4 sm:$0xff]  }
 0xc1d   :  { %13692 = vmatprep.subr.bf16.mxu1 %v22147_v48  ;;  %v22159_v48 = vld [vmem:[%s30890_s1 + $0x3424] ss:$24 sps:$4 sm:$0xff]  }
 0xc23   :  { %13564 = vmatpush1.bf16.xpose.msra.mxu0 %v22142_v36  ;;  %v22154_v36 = vld [vmem:[%s30890_s1 + $0x3120] ss:$24 sps:$4 sm:$0xff]  }
 0xc24   :  { %13693 = vmatpush1.bf16.xpose.msra.mxu1 %v22145_v49  ;;  %13565 = vmatprep.subr.bf16.mxu0 %v22150_v39  ;;  %v22157_v49 = vld [vmem:[%s30890_s1 + $0x3420] ss:$24 sps:$4 sm:$0xff]   ;;  %v22162_v39 = vld [vmem:[%s30890_s1 + $0x3154] ss:$24 sps:$4 sm:$0xff]  }
 0xc25   :  { %13694 = vmatprep.subr.bf16.mxu1 %v22153_v19  ;;  %v22165_v19 = vld [vmem:[%s30890_s1 + $0x3454] ss:$24 sps:$4 sm:$0xff]  }
 0xc2b   :  { %13566 = vmatpush1.bf16.xpose.msra.mxu0 %v22148_v57  ;;  %v22160_v57 = vld [vmem:[%s30890_s1 + $0x3150] ss:$24 sps:$4 sm:$0xff]  }
 0xc2c   :  { %13695 = vmatpush1.bf16.xpose.msra.mxu1 %v22151_v12  ;;  %13567 = vmatprep.subr.bf16.mxu0 %v22156_v20  ;;  %v22163_v12 = vld [vmem:[%s30890_s1 + $0x3450] ss:$24 sps:$4 sm:$0xff]   ;;  %v22168_v20 = vld [vmem:[%s30890_s1 + $0x3184] ss:$24 sps:$4 sm:$0xff]  }
 0xc2d   :  { %13696 = vmatprep.subr.bf16.mxu1 %v22159_v48  ;;  %v22171_v48 = vld [vmem:[%s30890_s1 + $0x3484] ss:$24 sps:$4 sm:$0xff]  }
 0xc33   :  { %13568 = vmatpush1.bf16.xpose.msra.mxu0 %v22154_v36  ;;  %v22166_v36 = vld [vmem:[%s30890_s1 + $0x3180] ss:$24 sps:$4 sm:$0xff]  }
 0xc34   :  { %13697 = vmatpush1.bf16.xpose.msra.mxu1 %v22157_v49  ;;  %13569 = vmatprep.subr.bf16.mxu0 %v22162_v39  ;;  %v22169_v49 = vld [vmem:[%s30890_s1 + $0x3480] ss:$24 sps:$4 sm:$0xff]   ;;  %v22174_v39 = vld [vmem:[%s30890_s1 + $0x31b4] ss:$24 sps:$4 sm:$0xff]  }
 0xc35   :  { %13698 = vmatprep.subr.bf16.mxu1 %v22165_v19  ;;  %v22177_v19 = vld [vmem:[%s30890_s1 + $0x34b4] ss:$24 sps:$4 sm:$0xff]  }
 0xc3b   :  { %13570 = vmatpush1.bf16.xpose.msra.mxu0 %v22160_v57  ;;  %v22172_v57 = vld [vmem:[%s30890_s1 + $0x31b0] ss:$24 sps:$4 sm:$0xff]  }
 0xc3c   :  { %13699 = vmatpush1.bf16.xpose.msra.mxu1 %v22163_v12  ;;  %13571 = vmatprep.subr.bf16.mxu0 %v22168_v20  ;;  %v22175_v12 = vld [vmem:[%s30890_s1 + $0x34b0] ss:$24 sps:$4 sm:$0xff]   ;;  %v22180_v20 = vld [vmem:[%s30890_s1 + $0x31e4] ss:$24 sps:$4 sm:$0xff]  }
 0xc3d   :  { %13700 = vmatprep.subr.bf16.mxu1 %v22171_v48  ;;  %v22183_v48 = vld [vmem:[%s30890_s1 + $0x34e4] ss:$24 sps:$4 sm:$0xff]  }
 0xc43   :  { %13572 = vmatpush1.bf16.xpose.msra.mxu0 %v22166_v36  ;;  %v22178_v36 = vld [vmem:[%s30890_s1 + $0x31e0] ss:$24 sps:$4 sm:$0xff]  }
 0xc44   :  { %13701 = vmatpush1.bf16.xpose.msra.mxu1 %v22169_v49  ;;  %13573 = vmatprep.subr.bf16.mxu0 %v22174_v39  ;;  %v22181_v49 = vld [vmem:[%s30890_s1 + $0x34e0] ss:$24 sps:$4 sm:$0xff]   ;;  %v22186_v39 = vld [vmem:[%s30890_s1 + $0x3214] ss:$24 sps:$4 sm:$0xff]  }
 0xc45   :  { %13702 = vmatprep.subr.bf16.mxu1 %v22177_v19  ;;  %v22189_v19 = vld [vmem:[%s30890_s1 + $0x3514] ss:$24 sps:$4 sm:$0xff]  }
 0xc4b   :  { %13574 = vmatpush1.bf16.xpose.msra.mxu0 %v22172_v57  ;;  %v22184_v57 = vld [vmem:[%s30890_s1 + $0x3210] ss:$24 sps:$4 sm:$0xff]  }
 0xc4c   :  { %13703 = vmatpush1.bf16.xpose.msra.mxu1 %v22175_v12  ;;  %13575 = vmatprep.subr.bf16.mxu0 %v22180_v20  ;;  %v22187_v12 = vld [vmem:[%s30890_s1 + $0x3510] ss:$24 sps:$4 sm:$0xff]   ;;  %v22192_v20 = vld [vmem:[%s30890_s1 + $0x3244] ss:$24 sps:$4 sm:$0xff]  }
 0xc4d   :  { %13704 = vmatprep.subr.bf16.mxu1 %v22183_v48  ;;  %v22195_v48 = vld [vmem:[%s30890_s1 + $0x3544] ss:$24 sps:$4 sm:$0xff]  }
 0xc53   :  { %13576 = vmatpush1.bf16.xpose.msra.mxu0 %v22178_v36  ;;  %v22190_v36 = vld [vmem:[%s30890_s1 + $0x3240] ss:$24 sps:$4 sm:$0xff]  }
 0xc54   :  { %13705 = vmatpush1.bf16.xpose.msra.mxu1 %v22181_v49  ;;  %13577 = vmatprep.subr.bf16.mxu0 %v22186_v39  ;;  %v22193_v49 = vld [vmem:[%s30890_s1 + $0x3540] ss:$24 sps:$4 sm:$0xff]   ;;  %v22198_v39 = vld [vmem:[%s30890_s1 + $0x3274] ss:$24 sps:$4 sm:$0xff]  }
 0xc55   :  { %13706 = vmatprep.subr.bf16.mxu1 %v22189_v19  ;;  %v22201_v19 = vld [vmem:[%s30890_s1 + $0x3574] ss:$24 sps:$4 sm:$0xff]  }
 0xc5b   :  { %13578 = vmatpush1.bf16.xpose.msra.mxu0 %v22184_v57  ;;  %v22196_v57 = vld [vmem:[%s30890_s1 + $0x3270] ss:$24 sps:$4 sm:$0xff]  }
 0xc5c   :  { %13707 = vmatpush1.bf16.xpose.msra.mxu1 %v22187_v12  ;;  %13579 = vmatprep.subr.bf16.mxu0 %v22192_v20  ;;  %v22199_v12 = vld [vmem:[%s30890_s1 + $0x3570] ss:$24 sps:$4 sm:$0xff]   ;;  %v22204_v20 = vld [vmem:[%s30890_s1 + $0x32a4] ss:$24 sps:$4 sm:$0xff]  }
 0xc5d   :  { %13708 = vmatprep.subr.bf16.mxu1 %v22195_v48  ;;  %v22207_v48 = vld [vmem:[%s30890_s1 + $0x35a4] ss:$24 sps:$4 sm:$0xff]  }
 0xc63   :  { %13580 = vmatpush1.bf16.xpose.msra.mxu0 %v22190_v36  ;;  %v22202_v36 = vld [vmem:[%s30890_s1 + $0x32a0] ss:$24 sps:$4 sm:$0xff]  }
 0xc64   :  { %13709 = vmatpush1.bf16.xpose.msra.mxu1 %v22193_v49  ;;  %13581 = vmatprep.subr.bf16.mxu0 %v22198_v39  ;;  %v22205_v49 = vld [vmem:[%s30890_s1 + $0x35a0] ss:$24 sps:$4 sm:$0xff]   ;;  %v22210_v39 = vld [vmem:[%s30890_s1 + $0x32d4] ss:$24 sps:$4 sm:$0xff]  }
 0xc65   :  { %13710 = vmatprep.subr.bf16.mxu1 %v22201_v19  ;;  %v22213_v19 = vld [vmem:[%s30890_s1 + $0x35d4] ss:$24 sps:$4 sm:$0xff]  }
 0xc6b   :  { %13582 = vmatpush1.bf16.xpose.msra.mxu0 %v22196_v57  ;;  %v22208_v57 = vld [vmem:[%s30890_s1 + $0x32d0] ss:$24 sps:$4 sm:$0xff]  }
 0xc6c   :  { %13711 = vmatpush1.bf16.xpose.msra.mxu1 %v22199_v12  ;;  %13583 = vmatprep.subr.bf16.mxu0 %v22204_v20  ;;  %v22211_v12 = vld [vmem:[%s30890_s1 + $0x35d0] ss:$24 sps:$4 sm:$0xff]   ;;  %v22216_v20 = vld [vmem:[%s30890_s1 + $0x300c] ss:$24 sps:$4 sm:$0xff]  }
 0xc6d   :  { %13712 = vmatprep.subr.bf16.mxu1 %v22207_v48  ;;  %v22219_v48 = vld [vmem:[%s30890_s1 + $0x330c] ss:$24 sps:$4 sm:$0xff]  }
 0xc73   :  { %13584 = vmatpush1.bf16.xpose.msra.mxu0 %v22202_v36  ;;  %v22214_v36 = vld [vmem:[%s30890_s1 + $0x3008] ss:$24 sps:$4 sm:$0xff]  }
 0xc74   :  { %13713 = vmatpush1.bf16.xpose.msra.mxu1 %v22205_v49  ;;  %13585 = vmatprep.subr.bf16.mxu0 %v22210_v39  ;;  %v22217_v49 = vld [vmem:[%s30890_s1 + $0x3308] ss:$24 sps:$4 sm:$0xff]   ;;  %v22222_v39 = vld [vmem:[%s30890_s1 + $0x303c] ss:$24 sps:$4 sm:$0xff]  }
 0xc75   :  { %13714 = vmatprep.subr.bf16.mxu1 %v22213_v19  ;;  %v22225_v19 = vld [vmem:[%s30890_s1 + $0x333c] ss:$24 sps:$4 sm:$0xff]  }
 0xc7b   :  { %13586 = vmatpush1.bf16.xpose.msra.mxu0 %v22208_v57  ;;  %v27822_v57 = vld [vmem:[%s30891_s0] ss:$24 sps:$4 sm:$0xff]  }
 0xc7c   :  { %13715 = vmatpush1.bf16.xpose.msra.mxu1 %v22211_v12  ;;  %13598 = vmatprep.subr.bf16.mxu0 %v22216_v20  ;;  %v27829_v12 = vld [vmem:[%s30891_s0 + $0xc] ss:$24 sps:$4 sm:$0xff]   ;;  %v22220_v20 = vld [vmem:[%s30890_s1 + $0x3038] ss:$24 sps:$4 sm:$0xff]  }
 0xc7d   :  { %13727 = vmatprep.subr.bf16.mxu1 %v22219_v48  ;;  %v22223_v48 = vld [vmem:[%s30890_s1 + $0x3338] ss:$24 sps:$4 sm:$0xff]  }
 0xc82   :  { %13588 = vmatmul.mubr.bf16.vlgmr.msra.gmra.mrb[32].mxu0 %v27822_v57 }
 0xc83   :  { %13717 = vmatmul.mubr.bf16.vlgmr.msra.gmra.mrb[32].mxu1 %v27822_v57  ;;  %13599 = vmatpush1.bf16.xpose.msra.mxu0 %v22214_v36  ;;  %v22228_v36 = vld [vmem:[%s30890_s1 + $0x306c] ss:$24 sps:$4 sm:$0xff]  }
 0xc84   :  { %13728 = vmatpush1.bf16.xpose.msra.mxu1 %v22217_v49  ;;  %13600 = vmatprep.subr.bf16.mxu0 %v22222_v39  ;;  %v22231_v49 = vld [vmem:[%s30890_s1 + $0x336c] ss:$24 sps:$4 sm:$0xff]   ;;  %v22226_v39 = vld [vmem:[%s30890_s1 + $0x3068] ss:$24 sps:$4 sm:$0xff]  }
 0xc85   :  { %13729 = vmatprep.subr.bf16.mxu1 %v22225_v19  ;;  %13630 = vmatprep.mubr.bf16.mxu0 %v27829_v12  ;;  %v22229_v19 = vld [vmem:[%s30890_s1 + $0x3368] ss:$24 sps:$4 sm:$0xff]  }
 0xc86   :  { %13759 = vmatprep.mubr.bf16.mxu1 %v27829_v12 }
 0xc8b   :  { %13601 = vmatpush1.bf16.xpose.msra.mxu0 %v22220_v20  ;;  %v22232_v20 = vld [vmem:[%s30890_s1 + $0x3098] ss:$24 sps:$4 sm:$0xff]  }
 0xc8c   :  { %13730 = vmatpush1.bf16.xpose.msra.mxu1 %v22223_v48  ;;  %13602 = vmatprep.subr.bf16.mxu0 %v22228_v36  ;;  %v22235_v48 = vld [vmem:[%s30890_s1 + $0x3398] ss:$24 sps:$4 sm:$0xff]   ;;  %v22240_v36 = vld [vmem:[%s30890_s1 + $0x30cc] ss:$24 sps:$4 sm:$0xff]  }
 0xc8d   :  { %13731 = vmatprep.subr.bf16.mxu1 %v22231_v49  ;;  %v22243_v49 = vld [vmem:[%s30890_s1 + $0x33cc] ss:$24 sps:$4 sm:$0xff]  }
 0xc93   :  { %13603 = vmatpush1.bf16.xpose.msra.mxu0 %v22226_v39  ;;  %v22246_v39 = vld [vmem:[%s30890_s1 + $0x30fc] ss:$24 sps:$4 sm:$0xff]  }
 0xc94   :  { %13732 = vmatpush1.bf16.xpose.msra.mxu1 %v22229_v19  ;;  %13604 = vmatprep.subr.bf16.mxu0 %v22234_v44  ;;  %v22241_v44 = vld [vmem:[%s30890_s1 + $0x33c8] ss:$24 sps:$4 sm:$0xff]   ;;  %v22249_v19 = vld [vmem:[%s30890_s1 + $0x33fc] ss:$24 sps:$4 sm:$0xff]  }
 0xc95   :  { %13733 = vmatprep.subr.bf16.mxu1 %v22237_v11  ;;  %v22238_v11 = vld [vmem:[%s30890_s1 + $0x30c8] ss:$24 sps:$4 sm:$0xff]  }
 0xc9b   :  { %13605 = vmatpush1.bf16.xpose.msra.mxu0 %v22232_v20  ;;  %v22244_v20 = vld [vmem:[%s30890_s1 + $0x30f8] ss:$24 sps:$4 sm:$0xff]  }
 0xc9c   :  { %13734 = vmatpush1.bf16.xpose.msra.mxu1 %v22235_v48  ;;  %13606 = vmatprep.subr.bf16.mxu0 %v22240_v36  ;;  %v22247_v48 = vld [vmem:[%s30890_s1 + $0x33f8] ss:$24 sps:$4 sm:$0xff]   ;;  %v22252_v36 = vld [vmem:[%s30890_s1 + $0x312c] ss:$24 sps:$4 sm:$0xff]  }
 0xc9d   :  { %13735 = vmatprep.subr.bf16.mxu1 %v22243_v49  ;;  %v22255_v49 = vld [vmem:[%s30890_s1 + $0x342c] ss:$24 sps:$4 sm:$0xff]  }
 0xca3   :  { %13607 = vmatpush1.bf16.xpose.msra.mxu0 %v22238_v11  ;;  %v22250_v11 = vld [vmem:[%s30890_s1 + $0x3128] ss:$24 sps:$4 sm:$0xff]  }
 0xca4   :  { %13736 = vmatpush1.bf16.xpose.msra.mxu1 %v22241_v44  ;;  %13608 = vmatprep.subr.bf16.mxu0 %v22246_v39  ;;  %v22253_v44 = vld [vmem:[%s30890_s1 + $0x3428] ss:$24 sps:$4 sm:$0xff]   ;;  %v22258_v39 = vld [vmem:[%s30890_s1 + $0x315c] ss:$24 sps:$4 sm:$0xff]  }
 0xca5   :  { %13737 = vmatprep.subr.bf16.mxu1 %v22249_v19  ;;  %v22261_v19 = vld [vmem:[%s30890_s1 + $0x345c] ss:$24 sps:$4 sm:$0xff]  }
 0xcab   :  { %13609 = vmatpush1.bf16.xpose.msra.mxu0 %v22244_v20  ;;  %v22256_v20 = vld [vmem:[%s30890_s1 + $0x3158] ss:$24 sps:$4 sm:$0xff]  }
 0xcac   :  { %13738 = vmatpush1.bf16.xpose.msra.mxu1 %v22247_v48  ;;  %13610 = vmatprep.subr.bf16.mxu0 %v22252_v36  ;;  %v22259_v48 = vld [vmem:[%s30890_s1 + $0x3458] ss:$24 sps:$4 sm:$0xff]   ;;  %v22264_v36 = vld [vmem:[%s30890_s1 + $0x318c] ss:$24 sps:$4 sm:$0xff]  }
 0xcad   :  { %13739 = vmatprep.subr.bf16.mxu1 %v22255_v49  ;;  %v22267_v49 = vld [vmem:[%s30890_s1 + $0x348c] ss:$24 sps:$4 sm:$0xff]  }
 0xcb3   :  { %13611 = vmatpush1.bf16.xpose.msra.mxu0 %v22250_v11  ;;  %v22262_v11 = vld [vmem:[%s30890_s1 + $0x3188] ss:$24 sps:$4 sm:$0xff]  }
 0xcb4   :  { %13740 = vmatpush1.bf16.xpose.msra.mxu1 %v22253_v44  ;;  %13612 = vmatprep.subr.bf16.mxu0 %v22258_v39  ;;  %v22265_v44 = vld [vmem:[%s30890_s1 + $0x3488] ss:$24 sps:$4 sm:$0xff]   ;;  %v22270_v39 = vld [vmem:[%s30890_s1 + $0x31bc] ss:$24 sps:$4 sm:$0xff]  }
 0xcb5   :  { %13741 = vmatprep.subr.bf16.mxu1 %v22261_v19  ;;  %v22273_v19 = vld [vmem:[%s30890_s1 + $0x34bc] ss:$24 sps:$4 sm:$0xff]  }
 0xcbb   :  { %13613 = vmatpush1.bf16.xpose.msra.mxu0 %v22256_v20  ;;  %v22268_v20 = vld [vmem:[%s30890_s1 + $0x31b8] ss:$24 sps:$4 sm:$0xff]  }
 0xcbc   :  { %13742 = vmatpush1.bf16.xpose.msra.mxu1 %v22259_v48  ;;  %13614 = vmatprep.subr.bf16.mxu0 %v22264_v36  ;;  %v22271_v48 = vld [vmem:[%s30890_s1 + $0x34b8] ss:$24 sps:$4 sm:$0xff]   ;;  %v22276_v36 = vld [vmem:[%s30890_s1 + $0x31ec] ss:$24 sps:$4 sm:$0xff]  }
 0xcbd   :  { %13743 = vmatprep.subr.bf16.mxu1 %v22267_v49  ;;  %v22279_v49 = vld [vmem:[%s30890_s1 + $0x34ec] ss:$24 sps:$4 sm:$0xff]  }
 0xcc3   :  { %13615 = vmatpush1.bf16.xpose.msra.mxu0 %v22262_v11  ;;  %v22274_v11 = vld [vmem:[%s30890_s1 + $0x31e8] ss:$24 sps:$4 sm:$0xff]  }
 0xcc4   :  { %13744 = vmatpush1.bf16.xpose.msra.mxu1 %v22265_v44  ;;  %13616 = vmatprep.subr.bf16.mxu0 %v22270_v39  ;;  %v22277_v44 = vld [vmem:[%s30890_s1 + $0x34e8] ss:$24 sps:$4 sm:$0xff]   ;;  %v22282_v39 = vld [vmem:[%s30890_s1 + $0x321c] ss:$24 sps:$4 sm:$0xff]  }
 0xcc5   :  { %13745 = vmatprep.subr.bf16.mxu1 %v22273_v19  ;;  %v22285_v19 = vld [vmem:[%s30890_s1 + $0x351c] ss:$24 sps:$4 sm:$0xff]  }
 0xccb   :  { %13617 = vmatpush1.bf16.xpose.msra.mxu0 %v22268_v20 }
 0xccc   :  { %13746 = vmatpush1.bf16.xpose.msra.mxu1 %v22271_v48  ;;  %13618 = vmatprep.subr.bf16.mxu0 %v22276_v36 }
 0xccd   :  { %13747 = vmatprep.subr.bf16.mxu1 %v22279_v49 }
 0xcd3   :  { %13619 = vmatpush1.bf16.xpose.msra.mxu0 %v22274_v11  ;;  %v22283_v11 = vld [vmem:[%s30890_s1 + $0x3518] ss:$24 sps:$4 sm:$0xff]  }
 0xcd4   :  { %13748 = vmatpush1.bf16.xpose.msra.mxu1 %v22277_v44  ;;  %13620 = vmatprep.subr.bf16.mxu0 %v22282_v39 }
 0xcd5   :  { %13749 = vmatprep.subr.bf16.mxu1 %v22285_v19  ;;  %v27953_v20 = vpop.f32.mrb[28].mxu0  ;;  %v22288_v19 = vld [vmem:[%s30890_s1 + $0x324c] ss:$24 sps:$4 sm:$0xff]  }
 0xcd6   :  { %30907 = vst [vmem:[#allocation14_spill] sm:$0xff] %v27953_v20  ;;  %v27955_v48 = vpop.f32.mrb[28].mxu1  ;;  %v27957_v36 = vpop.f32.mrb[29].mxu0  ;;  %v22330_v20 = vld [vmem:[%s30890_s1 + $0x30a4] ss:$24 sps:$4 sm:$0xff]  }
 0xcd7   :  { %30908 = vst [vmem:[#allocation15_spill] sm:$0xff] %v27955_v48  ;;  %30909 = vst [vmem:[#allocation16_spill] sm:$0xff] %v27957_v36  ;;  %v27959_v49 = vpop.f32.mrb[29].mxu1  ;;  %v27961_v2 = vpop.f32.mrb[30].mxu0  ;;  %v22294_v48 = vld [vmem:[%s30890_s1 + $0x327c] ss:$24 sps:$4 sm:$0xff]  }
 0xcd8   :  { %30910 = vst [vmem:[#allocation17_spill] sm:$0xff] %v27959_v49  ;;  %30911 = vst [vmem:[#allocation18_spill] sm:$0xff] %v27961_v2  ;;  %v27963_v58 = vpop.f32.mrb[30].mxu1  ;;  %v27971_v44 = vpop.f32.mrb[31].mxu0  ;;  %v22286_v2 = vld [vmem:[%s30890_s1 + $0x3248] ss:$24 sps:$4 sm:$0xff]  }
 0xcd9   :  { %30912 = vst [vmem:[#allocation19_spill] sm:$0xff] %v27963_v58  ;;  %30913 = vst [vmem:[#allocation20_spill] sm:$0xff] %v27971_v44  ;;  %v27973_v39 = vpop.f32.mrb[31].mxu1  ;;  %v22291_v58 = vld [vmem:[%s30890_s1 + $0x354c] ss:$24 sps:$4 sm:$0xff]  }
 0xcda   :  { %30914 = vst [vmem:[#allocation21_spill] sm:$0xff] %v27973_v39  ;;  %v22289_v39 = vld [vmem:[%s30890_s1 + $0x3548] ss:$24 sps:$4 sm:$0xff]   ;;  %v22297_v44 = vld [vmem:[%s30890_s1 + $0x357c] ss:$24 sps:$4 sm:$0xff]  }
 0xcdb   :  { %13621 = vmatpush1.bf16.xpose.msra.mxu0 %v22280_v33  ;;  %v22295_v33 = vld [vmem:[%s30890_s1 + $0x3578] ss:$24 sps:$4 sm:$0xff]   ;;  %v22333_v49 = vld [vmem:[%s30890_s1 + $0x33a4] ss:$24 sps:$4 sm:$0xff]  }
 0xcdc   :  { %13750 = vmatpush1.bf16.xpose.msra.mxu1 %v22283_v11  ;;  %13622 = vmatprep.subr.bf16.mxu0 %v22288_v19  ;;  %v22300_v11 = vld [vmem:[%s30890_s1 + $0x32ac] ss:$24 sps:$4 sm:$0xff]   ;;  %v22555_v36 = vld [vmem:[%s30890_s1 + $0x37bc] ss:$24 sps:$4 sm:$0xff]  }
 0xcdd   :  { %13751 = vmatprep.subr.bf16.mxu1 %v22291_v58  ;;  %v22292_v58 = vld [vmem:[%s30890_s1 + $0x3278] ss:$24 sps:$4 sm:$0xff]   ;;  %v22303_v19 = vld [vmem:[%s30890_s1 + $0x35ac] ss:$24 sps:$4 sm:$0xff]  }
 0xce3   :  { %13623 = vmatpush1.bf16.xpose.msra.mxu0 %v22286_v2  ;;  %v22298_v2 = vld [vmem:[%s30890_s1 + $0x32a8] ss:$24 sps:$4 sm:$0xff]  }
 0xce4   :  { %13752 = vmatpush1.bf16.xpose.msra.mxu1 %v22289_v39  ;;  %13624 = vmatprep.subr.bf16.mxu0 %v22294_v48  ;;  %v22301_v48 = vld [vmem:[%s30890_s1 + $0x35a8] ss:$24 sps:$4 sm:$0xff]   ;;  %v22309_v39 = vld [vmem:[%s30890_s1 + $0x35dc] ss:$24 sps:$4 sm:$0xff]  }
 0xce5   :  { %13753 = vmatprep.subr.bf16.mxu1 %v22297_v44  ;;  %v22306_v44 = vld [vmem:[%s30890_s1 + $0x32dc] ss:$24 sps:$4 sm:$0xff]  }
 0xceb   :  { %13625 = vmatpush1.bf16.xpose.msra.mxu0 %v22292_v58  ;;  %v22304_v58 = vld [vmem:[%s30890_s1 + $0x32d8] ss:$24 sps:$4 sm:$0xff]  }
 0xcec   :  { %13754 = vmatpush1.bf16.xpose.msra.mxu1 %v22295_v33  ;;  %13626 = vmatprep.subr.bf16.mxu0 %v22300_v11  ;;  %v22307_v33 = vld [vmem:[%s30890_s1 + $0x35d8] ss:$24 sps:$4 sm:$0xff]   ;;  %v22312_v11 = vld [vmem:[%s30890_s1 + $0x3014] ss:$24 sps:$4 sm:$0xff]  }
 0xced   :  { %13755 = vmatprep.subr.bf16.mxu1 %v22303_v19  ;;  %v22315_v19 = vld [vmem:[%s30890_s1 + $0x3314] ss:$24 sps:$4 sm:$0xff]  }
 0xcf3   :  { %13627 = vmatpush1.bf16.xpose.msra.mxu0 %v22298_v2  ;;  %v22310_v2 = vld [vmem:[%s30890_s1 + $0x3010] ss:$24 sps:$4 sm:$0xff]  }
 0xcf4   :  { %13756 = vmatpush1.bf16.xpose.msra.mxu1 %v22301_v48  ;;  %13628 = vmatprep.subr.bf16.mxu0 %v22306_v44  ;;  %v22313_v48 = vld [vmem:[%s30890_s1 + $0x3310] ss:$24 sps:$4 sm:$0xff]   ;;  %v22318_v44 = vld [vmem:[%s30890_s1 + $0x3044] ss:$24 sps:$4 sm:$0xff]  }
 0xcf5   :  { %13757 = vmatprep.subr.bf16.mxu1 %v22309_v39  ;;  %v22321_v39 = vld [vmem:[%s30890_s1 + $0x3344] ss:$24 sps:$4 sm:$0xff]  }
 0xcfb   :  { %13629 = vmatpush1.bf16.xpose.msra.mxu0 %v22304_v58  ;;  %v28044_v58 = vld [vmem:[%s30891_s0 + $0x8] ss:$24 sps:$4 sm:$0xff]  }
 0xcfc   :  { %13758 = vmatpush1.bf16.xpose.msra.mxu1 %v22307_v33  ;;  %13641 = vmatprep.subr.bf16.mxu0 %v22312_v11  ;;  %v28051_v33 = vld [vmem:[%s30891_s0 + $0x14] ss:$24 sps:$4 sm:$0xff]   ;;  %v22316_v11 = vld [vmem:[%s30890_s1 + $0x3040] ss:$24 sps:$4 sm:$0xff]  }
 0xcfd   :  { %13770 = vmatprep.subr.bf16.mxu1 %v22315_v19  ;;  %v22319_v19 = vld [vmem:[%s30890_s1 + $0x3340] ss:$24 sps:$4 sm:$0xff]  }
 0xd02   :  { %13631 = vmatmul.mubr.bf16.vlgmr.msra.gmra.mrb[32].mxu0 %v28044_v58 }
 0xd03   :  { %13760 = vmatmul.mubr.bf16.vlgmr.msra.gmra.mrb[32].mxu1 %v28044_v58  ;;  %13642 = vmatpush1.bf16.xpose.msra.mxu0 %v22310_v2  ;;  %v22324_v2 = vld [vmem:[%s30890_s1 + $0x3074] ss:$24 sps:$4 sm:$0xff]  }
 0xd04   :  { %13771 = vmatpush1.bf16.xpose.msra.mxu1 %v22313_v48  ;;  %13643 = vmatprep.subr.bf16.mxu0 %v22318_v44  ;;  %v22327_v48 = vld [vmem:[%s30890_s1 + $0x3374] ss:$24 sps:$4 sm:$0xff]   ;;  %v22322_v44 = vld [vmem:[%s30890_s1 + $0x3070] ss:$24 sps:$4 sm:$0xff]  }
 0xd05   :  { %13772 = vmatprep.subr.bf16.mxu1 %v22321_v39  ;;  %13673 = vmatprep.mubr.bf16.mxu0 %v28051_v33  ;;  %v22325_v39 = vld [vmem:[%s30890_s1 + $0x3370] ss:$24 sps:$4 sm:$0xff]  }
 0xd06   :  { %13802 = vmatprep.mubr.bf16.mxu1 %v28051_v33 }
 0xd0b   :  { %13644 = vmatpush1.bf16.xpose.msra.mxu0 %v22316_v11  ;;  %v22328_v11 = vld [vmem:[%s30890_s1 + $0x30a0] ss:$24 sps:$4 sm:$0xff]  }
 0xd0c   :  { %13773 = vmatpush1.bf16.xpose.msra.mxu1 %v22319_v19  ;;  %13645 = vmatprep.subr.bf16.mxu0 %v22324_v2  ;;  %v22331_v19 = vld [vmem:[%s30890_s1 + $0x33a0] ss:$24 sps:$4 sm:$0xff]   ;;  %v22336_v2 = vld [vmem:[%s30890_s1 + $0x30d4] ss:$24 sps:$4 sm:$0xff]  }
 0xd0d   :  { %13774 = vmatprep.subr.bf16.mxu1 %v22327_v48  ;;  %v22339_v48 = vld [vmem:[%s30890_s1 + $0x33d4] ss:$24 sps:$4 sm:$0xff]  }
 0xd13   :  { %13646 = vmatpush1.bf16.xpose.msra.mxu0 %v22322_v44  ;;  %v22342_v44 = vld [vmem:[%s30890_s1 + $0x3104] ss:$24 sps:$4 sm:$0xff]  }
 0xd14   :  { %13775 = vmatpush1.bf16.xpose.msra.mxu1 %v22325_v39  ;;  %13647 = vmatprep.subr.bf16.mxu0 %v22330_v20  ;;  %v22334_v20 = vld [vmem:[%s30890_s1 + $0x30d0] ss:$24 sps:$4 sm:$0xff]   ;;  %v22345_v39 = vld [vmem:[%s30890_s1 + $0x3404] ss:$24 sps:$4 sm:$0xff]  }
 0xd15   :  { %13776 = vmatprep.subr.bf16.mxu1 %v22333_v49  ;;  %v22337_v49 = vld [vmem:[%s30890_s1 + $0x33d0] ss:$24 sps:$4 sm:$0xff]  }
 0xd1b   :  { %13648 = vmatpush1.bf16.xpose.msra.mxu0 %v22328_v11  ;;  %v22340_v11 = vld [vmem:[%s30890_s1 + $0x3100] ss:$24 sps:$4 sm:$0xff]  }
 0xd1c   :  { %13777 = vmatpush1.bf16.xpose.msra.mxu1 %v22331_v19  ;;  %13649 = vmatprep.subr.bf16.mxu0 %v22336_v2  ;;  %v22343_v19 = vld [vmem:[%s30890_s1 + $0x3400] ss:$24 sps:$4 sm:$0xff]   ;;  %v22348_v2 = vld [vmem:[%s30890_s1 + $0x3134] ss:$24 sps:$4 sm:$0xff]  }
 0xd1d   :  { %13778 = vmatprep.subr.bf16.mxu1 %v22339_v48  ;;  %v22351_v48 = vld [vmem:[%s30890_s1 + $0x3434] ss:$24 sps:$4 sm:$0xff]  }
 0xd23   :  { %13650 = vmatpush1.bf16.xpose.msra.mxu0 %v22334_v20  ;;  %v22346_v20 = vld [vmem:[%s30890_s1 + $0x3130] ss:$24 sps:$4 sm:$0xff]  }
 0xd24   :  { %13779 = vmatpush1.bf16.xpose.msra.mxu1 %v22337_v49  ;;  %13651 = vmatprep.subr.bf16.mxu0 %v22342_v44  ;;  %v22349_v49 = vld [vmem:[%s30890_s1 + $0x3430] ss:$24 sps:$4 sm:$0xff]   ;;  %v22354_v44 = vld [vmem:[%s30890_s1 + $0x3164] ss:$24 sps:$4 sm:$0xff]  }
 0xd25   :  { %13780 = vmatprep.subr.bf16.mxu1 %v22345_v39  ;;  %v22357_v39 = vld [vmem:[%s30890_s1 + $0x3464] ss:$24 sps:$4 sm:$0xff]  }
 0xd2b   :  { %13652 = vmatpush1.bf16.xpose.msra.mxu0 %v22340_v11  ;;  %v22352_v11 = vld [vmem:[%s30890_s1 + $0x3160] ss:$24 sps:$4 sm:$0xff]  }
 0xd2c   :  { %13781 = vmatpush1.bf16.xpose.msra.mxu1 %v22343_v19  ;;  %13653 = vmatprep.subr.bf16.mxu0 %v22348_v2  ;;  %v22355_v19 = vld [vmem:[%s30890_s1 + $0x3460] ss:$24 sps:$4 sm:$0xff]   ;;  %v22360_v2 = vld [vmem:[%s30890_s1 + $0x3194] ss:$24 sps:$4 sm:$0xff]  }
 0xd2d   :  { %13782 = vmatprep.subr.bf16.mxu1 %v22351_v48  ;;  %v22363_v48 = vld [vmem:[%s30890_s1 + $0x3494] ss:$24 sps:$4 sm:$0xff]  }
 0xd33   :  { %13654 = vmatpush1.bf16.xpose.msra.mxu0 %v22346_v20  ;;  %v22358_v20 = vld [vmem:[%s30890_s1 + $0x3190] ss:$24 sps:$4 sm:$0xff]  }
 0xd34   :  { %13783 = vmatpush1.bf16.xpose.msra.mxu1 %v22349_v49  ;;  %13655 = vmatprep.subr.bf16.mxu0 %v22354_v44  ;;  %v22361_v49 = vld [vmem:[%s30890_s1 + $0x3490] ss:$24 sps:$4 sm:$0xff]   ;;  %v22366_v44 = vld [vmem:[%s30890_s1 + $0x31c4] ss:$24 sps:$4 sm:$0xff]  }
 0xd35   :  { %13784 = vmatprep.subr.bf16.mxu1 %v22357_v39  ;;  %v22369_v39 = vld [vmem:[%s30890_s1 + $0x34c4] ss:$24 sps:$4 sm:$0xff]  }
 0xd3b   :  { %13656 = vmatpush1.bf16.xpose.msra.mxu0 %v22352_v11  ;;  %v22364_v11 = vld [vmem:[%s30890_s1 + $0x31c0] ss:$24 sps:$4 sm:$0xff]  }
 0xd3c   :  { %13785 = vmatpush1.bf16.xpose.msra.mxu1 %v22355_v19  ;;  %13657 = vmatprep.subr.bf16.mxu0 %v22360_v2  ;;  %v22367_v19 = vld [vmem:[%s30890_s1 + $0x34c0] ss:$24 sps:$4 sm:$0xff]   ;;  %v22372_v2 = vld [vmem:[%s30890_s1 + $0x31f4] ss:$24 sps:$4 sm:$0xff]  }
 0xd3d   :  { %13786 = vmatprep.subr.bf16.mxu1 %v22363_v48  ;;  %v22375_v48 = vld [vmem:[%s30890_s1 + $0x34f4] ss:$24 sps:$4 sm:$0xff]  }
 0xd43   :  { %13658 = vmatpush1.bf16.xpose.msra.mxu0 %v22358_v20  ;;  %v22370_v20 = vld [vmem:[%s30890_s1 + $0x31f0] ss:$24 sps:$4 sm:$0xff]  }
 0xd44   :  { %13787 = vmatpush1.bf16.xpose.msra.mxu1 %v22361_v49  ;;  %13659 = vmatprep.subr.bf16.mxu0 %v22366_v44  ;;  %v22373_v49 = vld [vmem:[%s30890_s1 + $0x34f0] ss:$24 sps:$4 sm:$0xff]   ;;  %v22378_v44 = vld [vmem:[%s30890_s1 + $0x3224] ss:$24 sps:$4 sm:$0xff]  }
 0xd45   :  { %13788 = vmatprep.subr.bf16.mxu1 %v22369_v39  ;;  %v22381_v39 = vld [vmem:[%s30890_s1 + $0x3524] ss:$24 sps:$4 sm:$0xff]  }
 0xd4b   :  { %13660 = vmatpush1.bf16.xpose.msra.mxu0 %v22364_v11  ;;  %v22376_v11 = vld [vmem:[%s30890_s1 + $0x3220] ss:$24 sps:$4 sm:$0xff]  }
 0xd4c   :  { %13789 = vmatpush1.bf16.xpose.msra.mxu1 %v22367_v19  ;;  %13661 = vmatprep.subr.bf16.mxu0 %v22372_v2  ;;  %v22379_v19 = vld [vmem:[%s30890_s1 + $0x3520] ss:$24 sps:$4 sm:$0xff]   ;;  %v22384_v2 = vld [vmem:[%s30890_s1 + $0x3254] ss:$24 sps:$4 sm:$0xff]  }
 0xd4d   :  { %13790 = vmatprep.subr.bf16.mxu1 %v22375_v48  ;;  %v22387_v48 = vld [vmem:[%s30890_s1 + $0x3554] ss:$24 sps:$4 sm:$0xff]  }
 0xd53   :  { %13662 = vmatpush1.bf16.xpose.msra.mxu0 %v22370_v20  ;;  %v22382_v20 = vld [vmem:[%s30890_s1 + $0x3250] ss:$24 sps:$4 sm:$0xff]  }
 0xd54   :  { %13791 = vmatpush1.bf16.xpose.msra.mxu1 %v22373_v49  ;;  %13663 = vmatprep.subr.bf16.mxu0 %v22378_v44  ;;  %v22385_v49 = vld [vmem:[%s30890_s1 + $0x3550] ss:$24 sps:$4 sm:$0xff]   ;;  %v22390_v44 = vld [vmem:[%s30890_s1 + $0x3284] ss:$24 sps:$4 sm:$0xff]  }
 0xd55   :  { %13792 = vmatprep.subr.bf16.mxu1 %v22381_v39  ;;  %v22393_v39 = vld [vmem:[%s30890_s1 + $0x3584] ss:$24 sps:$4 sm:$0xff]  }
 0xd5b   :  { %13664 = vmatpush1.bf16.xpose.msra.mxu0 %v22376_v11  ;;  %v22388_v11 = vld [vmem:[%s30890_s1 + $0x3280] ss:$24 sps:$4 sm:$0xff]  }
 0xd5c   :  { %13793 = vmatpush1.bf16.xpose.msra.mxu1 %v22379_v19  ;;  %13665 = vmatprep.subr.bf16.mxu0 %v22384_v2  ;;  %v22391_v19 = vld [vmem:[%s30890_s1 + $0x3580] ss:$24 sps:$4 sm:$0xff]   ;;  %v22396_v2 = vld [vmem:[%s30890_s1 + $0x32b4] ss:$24 sps:$4 sm:$0xff]  }
 0xd5d   :  { %13794 = vmatprep.subr.bf16.mxu1 %v22387_v48  ;;  %v22399_v48 = vld [vmem:[%s30890_s1 + $0x35b4] ss:$24 sps:$4 sm:$0xff]  }
 0xd63   :  { %13666 = vmatpush1.bf16.xpose.msra.mxu0 %v22382_v20  ;;  %v22394_v20 = vld [vmem:[%s30890_s1 + $0x32b0] ss:$24 sps:$4 sm:$0xff]  }
 0xd64   :  { %13795 = vmatpush1.bf16.xpose.msra.mxu1 %v22385_v49  ;;  %13667 = vmatprep.subr.bf16.mxu0 %v22390_v44  ;;  %v22397_v49 = vld [vmem:[%s30890_s1 + $0x35b0] ss:$24 sps:$4 sm:$0xff]   ;;  %v22402_v44 = vld [vmem:[%s30890_s1 + $0x32e4] ss:$24 sps:$4 sm:$0xff]  }
 0xd65   :  { %13796 = vmatprep.subr.bf16.mxu1 %v22393_v39  ;;  %v22405_v39 = vld [vmem:[%s30890_s1 + $0x35e4] ss:$24 sps:$4 sm:$0xff]  }
 0xd6b   :  { %13668 = vmatpush1.bf16.xpose.msra.mxu0 %v22388_v11  ;;  %v22400_v11 = vld [vmem:[%s30890_s1 + $0x32e0] ss:$24 sps:$4 sm:$0xff]  }
 0xd6c   :  { %13797 = vmatpush1.bf16.xpose.msra.mxu1 %v22391_v19  ;;  %13669 = vmatprep.subr.bf16.mxu0 %v22396_v2  ;;  %v22403_v19 = vld [vmem:[%s30890_s1 + $0x35e0] ss:$24 sps:$4 sm:$0xff]   ;;  %v22408_v2 = vld [vmem:[%s30890_s1 + $0x3604] ss:$24 sps:$4 sm:$0xff]  }
 0xd6d   :  { %13798 = vmatprep.subr.bf16.mxu1 %v22399_v48  ;;  %v22411_v48 = vld [vmem:[%s30890_s1 + $0x3904] ss:$24 sps:$4 sm:$0xff]  }
 0xd73   :  { %13670 = vmatpush1.bf16.xpose.msra.mxu0 %v22394_v20  ;;  %v22406_v20 = vld [vmem:[%s30890_s1 + $0x3600] ss:$24 sps:$4 sm:$0xff]  }
 0xd74   :  { %13799 = vmatpush1.bf16.xpose.msra.mxu1 %v22397_v49  ;;  %13671 = vmatprep.subr.bf16.mxu0 %v22402_v44  ;;  %v22409_v49 = vld [vmem:[%s30890_s1 + $0x3900] ss:$24 sps:$4 sm:$0xff]   ;;  %v22414_v44 = vld [vmem:[%s30890_s1 + $0x3634] ss:$24 sps:$4 sm:$0xff]  }
 0xd75   :  { %13800 = vmatprep.subr.bf16.mxu1 %v22405_v39  ;;  %v22417_v39 = vld [vmem:[%s30890_s1 + $0x3934] ss:$24 sps:$4 sm:$0xff]  }
 0xd7b   :  { %13672 = vmatpush1.bf16.xpose.msra.mxu0 %v22400_v11  ;;  %v22412_v11 = vld [vmem:[%s30890_s1 + $0x3630] ss:$24 sps:$4 sm:$0xff]  }
 0xd7c   :  { %13801 = vmatpush1.bf16.xpose.msra.mxu1 %v22403_v19  ;;  %13813 = vmatprep.subr.bf16.mxu0 %v22408_v2  ;;  %v22415_v19 = vld [vmem:[%s30890_s1 + $0x3930] ss:$24 sps:$4 sm:$0xff]   ;;  %v22423_v2 = vld [vmem:[%s30890_s1 + $0x3964] ss:$24 sps:$4 sm:$0xff]  }
 0xd7d   :  { %13942 = vmatprep.subr.bf16.mxu1 %v22411_v48  ;;  %v22421_v48 = vld [vmem:[%s30890_s1 + $0x3960] ss:$24 sps:$4 sm:$0xff]  }
 0xd82   :  { %13674 = vmatmul.mubr.bf16.vlgmr.msra.gmra.mrb[32].mxu0 %v27616_v40 }
 0xd83   :  { %13803 = vmatmul.mubr.bf16.vlgmr.msra.gmra.mrb[32].mxu1 %v27616_v40  ;;  %13814 = vmatpush1.bf16.xpose.msra.mxu0 %v22406_v20  ;;  %v22420_v40 = vld [vmem:[%s30890_s1 + $0x3664] ss:$24 sps:$4 sm:$0xff]   ;;  %v22426_v20 = vld [vmem:[%s30890_s1 + $0x3694] ss:$24 sps:$4 sm:$0xff]  }
 0xd84   :  { %13943 = vmatpush1.bf16.xpose.msra.mxu1 %v22409_v49  ;;  %13815 = vmatprep.subr.bf16.mxu0 %v22414_v44  ;;  %v22429_v49 = vld [vmem:[%s30890_s1 + $0x3994] ss:$24 sps:$4 sm:$0xff]   ;;  %v22424_v44 = vld [vmem:[%s30890_s1 + $0x3690] ss:$24 sps:$4 sm:$0xff]  }
 0xd85   :  { %13944 = vmatprep.subr.bf16.mxu1 %v22417_v39  ;;  %13974 = vmatprep.mubr.bf16.mxu1 %v27623_v47  ;;  %v22427_v39 = vld [vmem:[%s30890_s1 + $0x3990] ss:$24 sps:$4 sm:$0xff]  }
 0xd86   :  { %13845 = vmatprep.mubr.bf16.mxu0 %v27623_v47  ;;  %v22418_v47 = vld [vmem:[%s30890_s1 + $0x3660] ss:$24 sps:$4 sm:$0xff]  }
 0xd8b   :  { %13816 = vmatpush1.bf16.xpose.msra.mxu0 %v22412_v11  ;;  %v22432_v11 = vld [vmem:[%s30890_s1 + $0x36c4] ss:$24 sps:$4 sm:$0xff]  }
 0xd8c   :  { %13945 = vmatpush1.bf16.xpose.msra.mxu1 %v22415_v19  ;;  %13817 = vmatprep.subr.bf16.mxu0 %v22420_v40  ;;  %v22435_v19 = vld [vmem:[%s30890_s1 + $0x39c4] ss:$24 sps:$4 sm:$0xff]   ;;  %v22430_v40 = vld [vmem:[%s30890_s1 + $0x36c0] ss:$24 sps:$4 sm:$0xff]  }
 0xd8d   :  { %13946 = vmatprep.subr.bf16.mxu1 %v22423_v2  ;;  %v22433_v2 = vld [vmem:[%s30890_s1 + $0x39c0] ss:$24 sps:$4 sm:$0xff]  }
 0xd93   :  { %13818 = vmatpush1.bf16.xpose.msra.mxu0 %v22418_v47  ;;  %v22438_v47 = vld [vmem:[%s30890_s1 + $0x36f4] ss:$24 sps:$4 sm:$0xff]  }
 0xd94   :  { %13947 = vmatpush1.bf16.xpose.msra.mxu1 %v22421_v48  ;;  %13819 = vmatprep.subr.bf16.mxu0 %v22426_v20  ;;  %v22441_v48 = vld [vmem:[%s30890_s1 + $0x39f4] ss:$24 sps:$4 sm:$0xff]   ;;  %v22436_v20 = vld [vmem:[%s30890_s1 + $0x36f0] ss:$24 sps:$4 sm:$0xff]  }
 0xd95   :  { %13948 = vmatprep.subr.bf16.mxu1 %v22429_v49  ;;  %v22439_v49 = vld [vmem:[%s30890_s1 + $0x39f0] ss:$24 sps:$4 sm:$0xff]  }
 0xd9b   :  { %13820 = vmatpush1.bf16.xpose.msra.mxu0 %v22424_v44  ;;  %v22444_v44 = vld [vmem:[%s30890_s1 + $0x3724] ss:$24 sps:$4 sm:$0xff]  }
 0xd9c   :  { %13949 = vmatpush1.bf16.xpose.msra.mxu1 %v22427_v39  ;;  %13821 = vmatprep.subr.bf16.mxu0 %v22432_v11  ;;  %v22447_v39 = vld [vmem:[%s30890_s1 + $0x3a24] ss:$24 sps:$4 sm:$0xff]   ;;  %v22442_v11 = vld [vmem:[%s30890_s1 + $0x3720] ss:$24 sps:$4 sm:$0xff]  }
 0xd9d   :  { %13950 = vmatprep.subr.bf16.mxu1 %v22435_v19  ;;  %v22445_v19 = vld [vmem:[%s30890_s1 + $0x3a20] ss:$24 sps:$4 sm:$0xff]  }
 0xda3   :  { %13822 = vmatpush1.bf16.xpose.msra.mxu0 %v22430_v40  ;;  %v22450_v40 = vld [vmem:[%s30890_s1 + $0x3754] ss:$24 sps:$4 sm:$0xff]  }
 0xda4   :  { %13951 = vmatpush1.bf16.xpose.msra.mxu1 %v22433_v2  ;;  %13823 = vmatprep.subr.bf16.mxu0 %v22438_v47  ;;  %v22453_v2 = vld [vmem:[%s30890_s1 + $0x3a54] ss:$24 sps:$4 sm:$0xff]   ;;  %v22448_v47 = vld [vmem:[%s30890_s1 + $0x3750] ss:$24 sps:$4 sm:$0xff]  }
 0xda5   :  { %13952 = vmatprep.subr.bf16.mxu1 %v22441_v48  ;;  %v22451_v48 = vld [vmem:[%s30890_s1 + $0x3a50] ss:$24 sps:$4 sm:$0xff]  }
 0xdab   :  { %13824 = vmatpush1.bf16.xpose.msra.mxu0 %v22436_v20  ;;  %v22456_v20 = vld [vmem:[%s30890_s1 + $0x3784] ss:$24 sps:$4 sm:$0xff]  }
 0xdac   :  { %13953 = vmatpush1.bf16.xpose.msra.mxu1 %v22439_v49  ;;  %13825 = vmatprep.subr.bf16.mxu0 %v22444_v44  ;;  %v22459_v49 = vld [vmem:[%s30890_s1 + $0x390c] ss:$24 sps:$4 sm:$0xff]   ;;  %v22454_v44 = vld [vmem:[%s30890_s1 + $0x3780] ss:$24 sps:$4 sm:$0xff]  }
 0xdad   :  { %13954 = vmatprep.subr.bf16.mxu1 %v22447_v39  ;;  %v22457_v39 = vld [vmem:[%s30890_s1 + $0x3908] ss:$24 sps:$4 sm:$0xff]  }
 0xdb3   :  { %13826 = vmatpush1.bf16.xpose.msra.mxu0 %v22442_v11  ;;  %v22462_v11 = vld [vmem:[%s30890_s1 + $0x37b4] ss:$24 sps:$4 sm:$0xff]  }
 0xdb4   :  { %13955 = vmatpush1.bf16.xpose.msra.mxu1 %v22445_v19  ;;  %13827 = vmatprep.subr.bf16.mxu0 %v22450_v40  ;;  %v22465_v19 = vld [vmem:[%s30890_s1 + $0x393c] ss:$24 sps:$4 sm:$0xff]   ;;  %v22460_v40 = vld [vmem:[%s30890_s1 + $0x37b0] ss:$24 sps:$4 sm:$0xff]  }
 0xdb5   :  { %13956 = vmatprep.subr.bf16.mxu1 %v22453_v2  ;;  %v22463_v2 = vld [vmem:[%s30890_s1 + $0x3938] ss:$24 sps:$4 sm:$0xff]  }
 0xdbb   :  { %13828 = vmatpush1.bf16.xpose.msra.mxu0 %v22448_v47  ;;  %v22468_v47 = vld [vmem:[%s30890_s1 + $0x37e4] ss:$24 sps:$4 sm:$0xff]  }
 0xdbc   :  { %13957 = vmatpush1.bf16.xpose.msra.mxu1 %v22451_v48  ;;  %13829 = vmatprep.subr.bf16.mxu0 %v22456_v20  ;;  %v22471_v48 = vld [vmem:[%s30890_s1 + $0x396c] ss:$24 sps:$4 sm:$0xff]   ;;  %v22466_v20 = vld [vmem:[%s30890_s1 + $0x37e0] ss:$24 sps:$4 sm:$0xff]  }
 0xdbd   :  { %13983 = vmatprep.subr.bf16.mxu1 %v22459_v49  ;;  %v22469_v49 = vld [vmem:[%s30890_s1 + $0x3968] ss:$24 sps:$4 sm:$0xff]  }
 0xdc3   :  { %13975 = vmatmul.mubr.bf16.vlgmr.msra.gmra.mrb[36].mxu1 %v27822_v57  ;;  %13830 = vmatpush1.bf16.xpose.msra.mxu0 %v22454_v44  ;;  %v22474_v44 = vld [vmem:[%s30890_s1 + $0x3814] ss:$24 sps:$4 sm:$0xff]  }
 0xdc4   :  { %13984 = vmatpush1.bf16.xpose.msra.mxu1 %v22457_v39  ;;  %13831 = vmatprep.subr.bf16.mxu0 %v22462_v11  ;;  %v22477_v39 = vld [vmem:[%s30890_s1 + $0x399c] ss:$24 sps:$4 sm:$0xff]   ;;  %v22472_v11 = vld [vmem:[%s30890_s1 + $0x3810] ss:$24 sps:$4 sm:$0xff]  }
 0xdc5   :  { %13985 = vmatprep.subr.bf16.mxu1 %v22465_v19  ;;  %14015 = vmatprep.mubr.bf16.mxu1 %v27829_v12  ;;  %v22475_v19 = vld [vmem:[%s30890_s1 + $0x3998] ss:$24 sps:$4 sm:$0xff]  }
 0xdcb   :  { %13832 = vmatpush1.bf16.xpose.msra.mxu0 %v22460_v40  ;;  %v22480_v40 = vld [vmem:[%s30890_s1 + $0x3844] ss:$24 sps:$4 sm:$0xff]  }
 0xdcc   :  { %13986 = vmatpush1.bf16.xpose.msra.mxu1 %v22463_v2  ;;  %13833 = vmatprep.subr.bf16.mxu0 %v22468_v47  ;;  %v22483_v2 = vld [vmem:[%s30890_s1 + $0x39cc] ss:$24 sps:$4 sm:$0xff]   ;;  %v22478_v47 = vld [vmem:[%s30890_s1 + $0x3840] ss:$24 sps:$4 sm:$0xff]  }
 0xdcd   :  { %13987 = vmatprep.subr.bf16.mxu1 %v22471_v48  ;;  %v22481_v48 = vld [vmem:[%s30890_s1 + $0x39c8] ss:$24 sps:$4 sm:$0xff]  }
 0xdd3   :  { %13834 = vmatpush1.bf16.xpose.msra.mxu0 %v22466_v20  ;;  %v22486_v20 = vld [vmem:[%s30890_s1 + $0x3874] ss:$24 sps:$4 sm:$0xff]  }
 0xdd4   :  { %13988 = vmatpush1.bf16.xpose.msra.mxu1 %v22469_v49  ;;  %13835 = vmatprep.subr.bf16.mxu0 %v22474_v44  ;;  %v22489_v49 = vld [vmem:[%s30890_s1 + $0x39fc] ss:$24 sps:$4 sm:$0xff]   ;;  %v22484_v44 = vld [vmem:[%s30890_s1 + $0x3870] ss:$24 sps:$4 sm:$0xff]  }
 0xdd5   :  { %13989 = vmatprep.subr.bf16.mxu1 %v22477_v39  ;;  %v22487_v39 = vld [vmem:[%s30890_s1 + $0x39f8] ss:$24 sps:$4 sm:$0xff]  }
 0xddb   :  { %13836 = vmatpush1.bf16.xpose.msra.mxu0 %v22472_v11  ;;  %v22492_v11 = vld [vmem:[%s30890_s1 + $0x38a4] ss:$24 sps:$4 sm:$0xff]  }
 0xddc   :  { %13990 = vmatpush1.bf16.xpose.msra.mxu1 %v22475_v19  ;;  %13837 = vmatprep.subr.bf16.mxu0 %v22480_v40  ;;  %v22495_v19 = vld [vmem:[%s30890_s1 + $0x3a2c] ss:$24 sps:$4 sm:$0xff]   ;;  %v22490_v40 = vld [vmem:[%s30890_s1 + $0x38a0] ss:$24 sps:$4 sm:$0xff]  }
 0xddd   :  { %13991 = vmatprep.subr.bf16.mxu1 %v22483_v2  ;;  %v22493_v2 = vld [vmem:[%s30890_s1 + $0x3a28] ss:$24 sps:$4 sm:$0xff]  }
 0xde3   :  { %13838 = vmatpush1.bf16.xpose.msra.mxu0 %v22478_v47  ;;  %v22498_v47 = vld [vmem:[%s30890_s1 + $0x38d4] ss:$24 sps:$4 sm:$0xff]  }
 0xde4   :  { %13992 = vmatpush1.bf16.xpose.msra.mxu1 %v22481_v48  ;;  %13839 = vmatprep.subr.bf16.mxu0 %v22486_v20  ;;  %v22501_v48 = vld [vmem:[%s30890_s1 + $0x3a5c] ss:$24 sps:$4 sm:$0xff]   ;;  %v22496_v20 = vld [vmem:[%s30890_s1 + $0x38d0] ss:$24 sps:$4 sm:$0xff]  }
 0xde5   :  { %13993 = vmatprep.subr.bf16.mxu1 %v22489_v49  ;;  %v22499_v49 = vld [vmem:[%s30890_s1 + $0x3a58] ss:$24 sps:$4 sm:$0xff]  }
 0xdeb   :  { %13840 = vmatpush1.bf16.xpose.msra.mxu0 %v22484_v44  ;;  %v22504_v44 = vld [vmem:[%s30890_s1 + $0x360c] ss:$24 sps:$4 sm:$0xff]  }
 0xdec   :  { %13994 = vmatpush1.bf16.xpose.msra.mxu1 %v22487_v39  ;;  %13841 = vmatprep.subr.bf16.mxu0 %v22492_v11  ;;  %v22507_v39 = vld [vmem:[%s30890_s1 + $0x3914] ss:$24 sps:$4 sm:$0xff]   ;;  %v22502_v11 = vld [vmem:[%s30890_s1 + $0x3608] ss:$24 sps:$4 sm:$0xff]  }
 0xded   :  { %13995 = vmatprep.subr.bf16.mxu1 %v22495_v19  ;;  %v22505_v19 = vld [vmem:[%s30890_s1 + $0x3910] ss:$24 sps:$4 sm:$0xff]  }
 0xdf3   :  { %13842 = vmatpush1.bf16.xpose.msra.mxu0 %v22490_v40  ;;  %v22510_v40 = vld [vmem:[%s30890_s1 + $0x363c] ss:$24 sps:$4 sm:$0xff]  }
 0xdf4   :  { %13996 = vmatpush1.bf16.xpose.msra.mxu1 %v22493_v2  ;;  %13843 = vmatprep.subr.bf16.mxu0 %v22498_v47  ;;  %v22513_v2 = vld [vmem:[%s30890_s1 + $0x3944] ss:$24 sps:$4 sm:$0xff]   ;;  %v22508_v47 = vld [vmem:[%s30890_s1 + $0x3638] ss:$24 sps:$4 sm:$0xff]  }
 0xdf5   :  { %13997 = vmatprep.subr.bf16.mxu1 %v22501_v48  ;;  %v22511_v48 = vld [vmem:[%s30890_s1 + $0x3940] ss:$24 sps:$4 sm:$0xff]  }
 0xdfb   :  { %13844 = vmatpush1.bf16.xpose.msra.mxu0 %v22496_v20  ;;  %v22522_v20 = vld [vmem:[%s30890_s1 + $0x369c] ss:$24 sps:$4 sm:$0xff]  }
 0xdfc   :  { %13998 = vmatpush1.bf16.xpose.msra.mxu1 %v22499_v49  ;;  %13856 = vmatprep.subr.bf16.mxu0 %v22504_v44  ;;  %v22525_v49 = vld [vmem:[%s30890_s1 + $0x39a4] ss:$24 sps:$4 sm:$0xff]   ;;  %v22520_v44 = vld [vmem:[%s30890_s1 + $0x3698] ss:$24 sps:$4 sm:$0xff]  }
 0xdfd   :  { %14024 = vmatprep.subr.bf16.mxu1 %v22507_v39  ;;  %v22523_v39 = vld [vmem:[%s30890_s1 + $0x39a0] ss:$24 sps:$4 sm:$0xff]  }
 0xe02   :  { %13846 = vmatmul.mubr.bf16.vlgmr.msra.gmra.mrb[36].mxu0 %v27822_v57  ;;  %v22516_v57 = vld [vmem:[%s30890_s1 + $0x366c] ss:$24 sps:$4 sm:$0xff]  }
 0xe03   :  { %14016 = vmatmul.mubr.bf16.vlgmr.msra.gmra.mrb[36].mxu1 %v28044_v58  ;;  %13857 = vmatpush1.bf16.xpose.msra.mxu0 %v22502_v11  ;;  %v22519_v58 = vld [vmem:[%s30890_s1 + $0x3974] ss:$24 sps:$4 sm:$0xff]  }
 0xe04   :  { %14025 = vmatpush1.bf16.xpose.msra.mxu1 %v22505_v19  ;;  %13858 = vmatprep.subr.bf16.mxu0 %v22510_v40  ;;  %v22528_v11 = vld [vmem:[%s30890_s1 + $0x36cc] ss:$24 sps:$4 sm:$0xff]   ;;  %v22526_v40 = vld [vmem:[%s30890_s1 + $0x36c8] ss:$24 sps:$4 sm:$0xff]  }
 0xe05   :  { %14026 = vmatprep.subr.bf16.mxu1 %v22513_v2  ;;  %14056 = vmatprep.mubr.bf16.mxu1 %v28051_v33  ;;  %v22517_v33 = vld [vmem:[%s30890_s1 + $0x3970] ss:$24 sps:$4 sm:$0xff]   ;;  %v22531_v19 = vld [vmem:[%s30890_s1 + $0x39d4] ss:$24 sps:$4 sm:$0xff]  }
 0xe06   :  { %13888 = vmatprep.mubr.bf16.mxu0 %v27829_v12  ;;  %v22514_v12 = vld [vmem:[%s30890_s1 + $0x3668] ss:$24 sps:$4 sm:$0xff]  }
 0xe07   :  { %v22529_v2 = vld [vmem:[%s30890_s1 + $0x39d0] ss:$24 sps:$4 sm:$0xff]  }
 0xe0b   :  { %13859 = vmatpush1.bf16.xpose.msra.mxu0 %v22508_v47  ;;  %v22534_v47 = vld [vmem:[%s30890_s1 + $0x36fc] ss:$24 sps:$4 sm:$0xff]  }
 0xe0c   :  { %14027 = vmatpush1.bf16.xpose.msra.mxu1 %v22511_v48  ;;  %13860 = vmatprep.subr.bf16.mxu0 %v22516_v57  ;;  %v22537_v48 = vld [vmem:[%s30890_s1 + $0x3a04] ss:$24 sps:$4 sm:$0xff]   ;;  %v22532_v57 = vld [vmem:[%s30890_s1 + $0x36f8] ss:$24 sps:$4 sm:$0xff]  }
 0xe0d   :  { %14028 = vmatprep.subr.bf16.mxu1 %v22519_v58  ;;  %v22535_v58 = vld [vmem:[%s30890_s1 + $0x3a00] ss:$24 sps:$4 sm:$0xff]  }
 0xe13   :  { %13861 = vmatpush1.bf16.xpose.msra.mxu0 %v22514_v12  ;;  %v22540_v12 = vld [vmem:[%s30890_s1 + $0x372c] ss:$24 sps:$4 sm:$0xff]  }
 0xe14   :  { %14029 = vmatpush1.bf16.xpose.msra.mxu1 %v22517_v33  ;;  %13862 = vmatprep.subr.bf16.mxu0 %v22522_v20  ;;  %v22543_v33 = vld [vmem:[%s30890_s1 + $0x3a34] ss:$24 sps:$4 sm:$0xff]   ;;  %v1906_v20 = vlaneseq }
 0xe15   :  { %14030 = vmatprep.subr.bf16.mxu1 %v22525_v49  ;;  %v22538_v49 = vld [vmem:[%s30890_s1 + $0x3728] ss:$24 sps:$4 sm:$0xff]  }
 0xe1b   :  { %13863 = vmatpush1.bf16.xpose.msra.mxu0 %v22520_v44  ;;  %v22541_v44 = vld [vmem:[%s30890_s1 + $0x3a30] ss:$24 sps:$4 sm:$0xff]  }
 0xe1c   :  { %14031 = vmatpush1.bf16.xpose.msra.mxu1 %v22523_v39  ;;  %13864 = vmatprep.subr.bf16.mxu0 %v22528_v11  ;;  %v22546_v39 = vld [vmem:[%s30890_s1 + $0x375c] ss:$24 sps:$4 sm:$0xff]  }
 0xe1d   :  { %14032 = vmatprep.subr.bf16.mxu1 %v22531_v19  ;;  %v22549_v11 = vld [vmem:[%s30890_s1 + $0x3a64] ss:$24 sps:$4 sm:$0xff]   ;;  %v28521_v19 = vshrl.u32 %v1906_v20, 7 }
 0xe23   :  { %13865 = vmatpush1.bf16.xpose.msra.mxu0 %v22526_v40  ;;  %v14159_v40 = vld [vmem:[%s30892_s3 + $0x80] sm:$0xff] }
 0xe24   :  { %14033 = vmatpush1.bf16.xpose.msra.mxu1 %v22529_v2  ;;  %13866 = vmatprep.subr.bf16.mxu0 %v22534_v47  ;;  %v14160_v2 = vld [vmem:[%s30892_s3 + $0x88] sm:$0xff]  ;;  %v28530_v47 = vsub.s32 1, %v28521_v19 }
 0xe25   :  { %14034 = vmatprep.subr.bf16.mxu1 %v22537_v48  ;;  %v28535_v48 = vld [vmem:[%s30893_s2] sm:$0xff] }
 0xe26   :  { %v28548_v20 = vrot.slane %v28535_v48, %v28530_v47 }
 0xe2b   :  { %13867 = vmatpush1.bf16.xpose.msra.mxu0 %v22532_v57  ;;  %v22544_v57 = vld [vmem:[%s30890_s1 + $0x3758] ss:$24 sps:$4 sm:$0xff]  }
 0xe2c   :  { %14035 = vmatpush1.bf16.xpose.msra.mxu1 %v22535_v58  ;;  %13868 = vmatprep.subr.bf16.mxu0 %v22540_v12  ;;  %v22547_v58 = vld [vmem:[%s30890_s1 + $0x3a60] ss:$24 sps:$4 sm:$0xff]   ;;  %v22552_v12 = vld [vmem:[%s30890_s1 + $0x378c] ss:$24 sps:$4 sm:$0xff]  }
 0xe2d   :  { %14036 = vmatprep.subr.bf16.mxu1 %v22543_v33  ;;  %v18927_v33 = vpack.c.bf16 %v14160_v2, %v14159_v40  ;;  %v19568_v40 = vadd.f32 %v23623_v59, %v28548_v20  ;;  %v22550_v2 = vld [vmem:[%s30890_s1 + $0x3788] ss:$24 sps:$4 sm:$0xff]  }
 0xe2e   :  { %v14163_v59 = vld [vmem:[%s30892_s3 + $0xa0] sm:$0xff] }
 0xe33   :  { %13869 = vmatpush1.bf16.xpose.msra.mxu0 %v22538_v49  ;;  %v14143_v49 = vld [vmem:[%s30892_s3] sm:$0xff] }
 0xe34   :  { %14037 = vmatpush1.bf16.xpose.msra.mxu1 %v22541_v44  ;;  %13870 = vmatprep.subr.bf16.mxu0 %v22546_v39  ;;  %v14144_v44 = vld [vmem:[%s30892_s3 + $0x8] sm:$0xff]  ;;  %v14161_v39 = vld [vmem:[%s30892_s3 + $0x90] sm:$0xff] }
 0xe35   :  { %14038 = vmatprep.subr.bf16.mxu1 %v22549_v11  ;;  %v14162_v11 = vld [vmem:[%s30892_s3 + $0x98] sm:$0xff] }
 0xe3b   :  { %13871 = vmatpush1.bf16.xpose.msra.mxu0 %v22544_v57  ;;  %v18929_v57 = vpack.c.bf16 %v14144_v44, %v14143_v49  ;;  %v14164_v49 = vld [vmem:[%s30892_s3 + $0xa8] sm:$0xff]  ;;  %v14066_v44 = vmax.f32 %v19568_v40, 0.0  ;;  %v14165_v40 = vld [vmem:[%s30892_s3 + $0xb0] sm:$0xff] }
 0xe3c   :  { %14039 = vmatpush1.bf16.xpose.msra.mxu1 %v22547_v58  ;;  %13872 = vmatprep.subr.bf16.mxu0 %v22552_v12  ;;  %v18931_v58 = vpack.c.bf16 %v14162_v11, %v14161_v39  ;;  %v14145_v12 = vld [vmem:[%s30892_s3 + $0x10] sm:$0xff]  ;;  %v18935_v28 = vpack.c.bf16 %v14164_v49, %v14163_v59  ;;  %v22558_v59 = vld [vmem:[%s30890_s1 + $0x37ec] ss:$24 sps:$4 sm:$0xff]  }
 0xe3d   :  { %18928 = vmatprep.subr.bf16.mxu1 %v18927_v33  ;;  %v14146_v33 = vld [vmem:[%s30892_s3 + $0x18] sm:$0xff]  ;;  %v22651_v39 = vld [vmem:[%s30891_s0 + $0x10] ss:$24 sps:$4 sm:$0xff]   ;;  %v14167_v49 = vld [vmem:[%s30892_s3 + $0xc0] sm:$0xff] }
 0xe3e   :  { %v18933_v11 = vpack.c.bf16 %v14146_v33, %v14145_v12  ;;  %v14150_v33 = vld [vmem:[%s30892_s3 + $0x38] sm:$0xff] }
 0xe43   :  { %14057 = vmatmul.mubr.bf16.vlgmr.msra.gmra.mrb[36].mxu1 %v22651_v39  ;;  %13873 = vmatpush1.bf16.xpose.msra.mxu0 %v22550_v2  ;;  %v14166_v2 = vld [vmem:[%s30892_s3 + $0xb8] sm:$0xff]  ;;  %v14152_v39 = vld [vmem:[%s30892_s3 + $0x48] sm:$0xff] }
 0xe44   :  { %18930 = vmatpush3.bf16.msra.mxu1 %v18929_v57  ;;  %14831 = vmatprep.mubr.f32.mxu1 %v14066_v44  ;;  %v22553_v57 = vld [vmem:[%s30890_s1 + $0x37b8] ss:$24 sps:$4 sm:$0xff]   ;;  %v18939_v12 = vpack.c.bf16 %v14166_v2, %v14165_v40  ;;  %v14151_v44 = vld [vmem:[%s30892_s3 + $0x40] sm:$0xff] }
 0xe45   :  { %18932 = vmatprep.subr.bf16.mxu1 %v18931_v58  ;;  %13874 = vmatprep.subr.bf16.mxu0 %v22555_v36  ;;  %v18937_v58 = vpack.c.bf16 %v14148_v27, %v14147_v50  ;;  %v14149_v36 = vld [vmem:[%s30892_s3 + $0x30] sm:$0xff]  ;;  %v14168_v27 = vld [vmem:[%s30892_s3 + $0xc8] sm:$0xff]  ;;  %v14170_v40 = vld [vmem:[%s30892_s3 + $0xd8] sm:$0xff] }
 0xe46   :  { %v18943_v50 = vpack.c.bf16 %v14168_v27, %v14167_v49  ;;  %v22556_v2 = vld [vmem:[%s30890_s1 + $0x37e8] ss:$24 sps:$4 sm:$0xff]  }
 0xe47   :  { %v14172_v49 = vld [vmem:[%s30892_s3 + $0xe8] sm:$0xff] }
 0xe48   :  { %18934 = vmatpush3.bf16.msra.mxu1 %v18933_v11  ;;  %v14169_v11 = vld [vmem:[%s30892_s3 + $0xd0] sm:$0xff] }
 0xe49   :  { %18936 = vmatprep.subr.bf16.mxu1 %v18935_v28  ;;  %v18941_v28 = vpack.c.bf16 %v14150_v33, %v14149_v36  ;;  %v14154_v36 = vld [vmem:[%s30892_s3 + $0x58] sm:$0xff] }
 0xe4a   :  { %v22561_v33 = vld [vmem:[%s30890_s1 + $0x381c] ss:$24 sps:$4 sm:$0xff]  }
 0xe4b   :  { %13875 = vmatpush1.bf16.xpose.msra.mxu0 %v22553_v57  ;;  %v18945_v57 = vpack.c.bf16 %v14152_v39, %v14151_v44  ;;  %v14155_v44 = vld [vmem:[%s30892_s3 + $0x60] sm:$0xff]  ;;  %v14156_v39 = vld [vmem:[%s30892_s3 + $0x68] sm:$0xff] }
 0xe4c   :  { %18938 = vmatpush3.bf16.msra.mxu1 %v18937_v58  ;;  %13876 = vmatprep.subr.bf16.mxu0 %v22558_v59  ;;  %v18947_v58 = vpack.c.bf16 %v14170_v40, %v14169_v11  ;;  %v14171_v59 = vld [vmem:[%s30892_s3 + $0xe0] sm:$0xff] }
 0xe4d   :  { %18940 = vmatprep.subr.bf16.mxu1 %v18939_v12  ;;  %v14153_v12 = vld [vmem:[%s30892_s3 + $0x50] sm:$0xff] }
 0xe4e   :  { %v18949_v27 = vpack.c.bf16 %v14154_v36, %v14153_v12 }
 0xe50   :  { %18942 = vmatpush3.bf16.msra.mxu1 %v18941_v28  ;;  %v28646_v28 = vsub.s32 0, %v28521_v19 }
 0xe51   :  { %18944 = vmatprep.subr.bf16.mxu1 %v18943_v50  ;;  %v18951_v50 = vpack.c.bf16 %v14172_v49, %v14171_v59  ;;  %v22559_v59 = vld [vmem:[%s30890_s1 + $0x3818] ss:$24 sps:$4 sm:$0xff]   ;;  %v18953_v49 = vpack.c.bf16 %v14156_v39, %v14155_v44  ;;  %v22564_v44 = vld [vmem:[%s30890_s1 + $0x384c] ss:$24 sps:$4 sm:$0xff]   ;;  %v28691_v39 = vsub.s32 3, %v28521_v19 }
 0xe53   :  { %13877 = vmatpush1.bf16.xpose.msra.mxu0 %v22556_v2  ;;  %v14173_v2 = vld [vmem:[%s30892_s3 + $0xf0] sm:$0xff] }
 0xe54   :  { %18946 = vmatpush3.bf16.msra.mxu1 %v18945_v57  ;;  %13878 = vmatprep.subr.bf16.mxu0 %v22561_v33  ;;  %v14174_v57 = vld [vmem:[%s30892_s3 + $0xf8] sm:$0xff] }
 0xe55   :  { %18948 = vmatprep.subr.bf16.mxu1 %v18947_v58  ;;  %v28654_v11 = vpop.f32.mrb[32].mxu0 }
 0xe56   :  { %30915 = vst [vmem:[#allocation22_spill] sm:$0xff] %v28654_v11  ;;  %v28656_v40 = vpop.f32.mrb[32].mxu1  ;;  %v28664_v58 = vpop.f32.mrb[33].mxu0 }
 0xe57   :  { %30916 = vst [vmem:[#allocation23_spill] sm:$0xff] %v28656_v40  ;;  %30917 = vst [vmem:[#allocation24_spill] sm:$0xff] %v28664_v58  ;;  %v28666_v12 = vpop.f32.mrb[33].mxu1  ;;  %v28668_v36 = vpop.f32.mrb[34].mxu0  ;;  %v1909_v40 = vrot.slane %v28535_v48, %v28646_v28  ;;  %v18955_v58 = vpack.c.bf16 %v14174_v57, %v14173_v2  ;;  %v14192_v2 = vld [vmem:[%s30892_s3 + $0x188] sm:$0xff] }
 0xe58   :  { %30918 = vst [vmem:[#allocation25_spill] sm:$0xff] %v28666_v12  ;;  %30919 = vst [vmem:[#allocation26_spill] sm:$0xff] %v28668_v36  ;;  %v28670_v33 = vpop.f32.mrb[34].mxu1  ;;  %18950 = vmatpush3.bf16.msra.mxu1 %v18949_v27  ;;  %v28677_v11 = vpop.f32.mrb[35].mxu0  ;;  %v14157_v36 = vld [vmem:[%s30892_s3 + $0x70] sm:$0xff]  ;;  %v14158_v27 = vld [vmem:[%s30892_s3 + $0x78] sm:$0xff]  ;;  %v19570_v12 = vadd.f32 %v23634_v0, %v28548_v20 }
 0xe59   :  { %30920 = vst [vmem:[#allocation27_spill] sm:$0xff] %v28670_v33  ;;  %30921 = vst [vmem:[#allocation28_spill] sm:$0xff] %v28677_v11  ;;  %v28679_v43 = vpop.f32.mrb[35].mxu1  ;;  %18952 = vmatprep.subr.bf16.mxu1 %v18951_v50  ;;  %v14191_v50 = vld [vmem:[%s30892_s3 + $0x180] sm:$0xff]  ;;  %v18957_v57 = vpack.c.bf16 %v14158_v27, %v14157_v36  ;;  %v19567_v33 = vadd.f32 %v23613_v55, %v1909_v40  ;;  %v28702_v11 = vrot.slane %v28535_v48, %v28691_v39  ;;  %v14176_v36 = vld [vmem:[%s30892_s3 + $0x108] sm:$0xff] }
 0xe5a   :  { %30922 = vst [vmem:[#allocation29_spill] sm:$0xff] %v28679_v43  ;;  %v18959_v43 = vpack.c.bf16 %v14192_v2, %v14191_v50  ;;  %v14193_v55 = vld [vmem:[%s30892_s3 + $0x190] sm:$0xff]  ;;  %v22562_v0 = vld [vmem:[%s30890_s1 + $0x3848] ss:$24 sps:$4 sm:$0xff]   ;;  %v14105_v50 = vmax.f32 %v19570_v12, 0.0 }
 0xe5b   :  { %13879 = vmatpush1.bf16.xpose.msra.mxu0 %v22559_v59  ;;  %v14065_v20 = vmax.f32 %v19567_v33, 0.0  ;;  %v19569_v59 = vadd.f32 %v23630_v62, %v1909_v40  ;;  %v22567_v27 = vld [vmem:[%s30890_s1 + $0x387c] ss:$24 sps:$4 sm:$0xff]   ;;  %v14195_v62 = vld [vmem:[%s30892_s3 + $0x1a0] sm:$0xff] }
 0xe5c   :  { %18954 = vmatpush3.bf16.msra.mxu1 %v18953_v49  ;;  %13880 = vmatprep.subr.bf16.mxu0 %v22564_v44  ;;  %v18961_v49 = vpack.c.bf16 %v14176_v36, %v14175_v52  ;;  %v19572_v44 = vadd.f32 %v23625_v60, %v28702_v11  ;;  %v14178_v33 = vld [vmem:[%s30892_s3 + $0x118] sm:$0xff]  ;;  %v14196_v52 = vld [vmem:[%s30892_s3 + $0x1a8] sm:$0xff]  ;;  %v14179_v36 = vld [vmem:[%s30892_s3 + $0x120] sm:$0xff] }
 0xe5d   :  { %18956 = vmatprep.subr.bf16.mxu1 %v18955_v58  ;;  %v14194_v58 = vld [vmem:[%s30892_s3 + $0x198] sm:$0xff]  ;;  %v14104_v60 = vmax.f32 %v19569_v59, 0.0  ;;  %v18967_v12 = vpack.c.bf16 %v14196_v52, %v14195_v62  ;;  %v14183_v52 = vld [vmem:[%s30892_s3 + $0x140] sm:$0xff] }
 0xe5e   :  { %v18963_v2 = vpack.c.bf16 %v14194_v58, %v14193_v55  ;;  %v14068_v40 = vmax.f32 %v19572_v44, 0.0  ;;  %v14180_v55 = vld [vmem:[%s30892_s3 + $0x128] sm:$0xff]  ;;  %v14197_v58 = vld [vmem:[%s30892_s3 + $0x1b0] sm:$0xff] }
 0xe5f   :  { %v18969_v59 = vpack.c.bf16 %v14180_v55, %v14179_v36  ;;  %v14181_v44 = vld [vmem:[%s30892_s3 + $0x130] sm:$0xff] }
 0xe60   :  { %18958 = vmatpush3.bf16.msra.mxu1 %v18957_v57  ;;  %v14177_v57 = vld [vmem:[%s30892_s3 + $0x110] sm:$0xff] }
 0xe61   :  { %18960 = vmatprep.subr.bf16.mxu1 %v18959_v43  ;;  %v18965_v43 = vpack.c.bf16 %v14178_v33, %v14177_v57  ;;  %v14200_v57 = vld [vmem:[%s30892_s3 + $0x1c8] sm:$0xff]  ;;  %v22573_v55 = vld [vmem:[%s30890_s1 + $0x38dc] ss:$24 sps:$4 sm:$0xff]  }
 0xe63   :  { %14832 = vmatmul.mubr.f32.vlgmr.msra.gmra.mrb[40].mxu1 %v14065_v20  ;;  %13881 = vmatpush1.bf16.xpose.msra.mxu0 %v22562_v0  ;;  %v14198_v0 = vld [vmem:[%s30892_s3 + $0x1b8] sm:$0xff] }
 0xe64   :  { %14836 = vmatprep.mubr.f32.mxu1 %v14105_v50  ;;  %18962 = vmatpush3.bf16.msra.mxu1 %v18961_v49  ;;  %v22565_v20 = vld [vmem:[%s30890_s1 + $0x3878] ss:$24 sps:$4 sm:$0xff]   ;;  %v22570_v49 = vld [vmem:[%s30890_s1 + $0x38ac] ss:$24 sps:$4 sm:$0xff]  }
 0xe65   :  { %13882 = vmatprep.subr.bf16.mxu0 %v22567_v27  ;;  %18964 = vmatprep.subr.bf16.mxu1 %v18963_v2  ;;  %v18971_v27 = vpack.c.bf16 %v14198_v0, %v14197_v58  ;;  %v14182_v50 = vld [vmem:[%s30892_s3 + $0x138] sm:$0xff]  ;;  %v14199_v2 = vld [vmem:[%s30892_s3 + $0x1c0] sm:$0xff]  ;;  %v14185_v0 = vld [vmem:[%s30892_s3 + $0x150] sm:$0xff] }
 0xe66   :  { %v18973_v33 = vpack.c.bf16 %v14182_v50, %v14181_v44  ;;  %v18975_v62 = vpack.c.bf16 %v14200_v57, %v14199_v2  ;;  %v28800_v44 = vsub.s32 2, %v28521_v19  ;;  %v14187_v2 = vld [vmem:[%s30892_s3 + $0x160] sm:$0xff]  ;;  %v14188_v57 = vld [vmem:[%s30892_s3 + $0x168] sm:$0xff] }
 0xe67   :  { %14837 = vmatmul.mubr.f32.gmra.mrb[42].mxu1 %v14104_v60  ;;  %v14184_v60 = vld [vmem:[%s30892_s3 + $0x148] sm:$0xff] }
 0xe68   :  { %14906 = vmatprep.mubr.f32.mxu1 %v14068_v40  ;;  %18966 = vmatpush3.bf16.msra.mxu1 %v18965_v43  ;;  %v14201_v43 = vld [vmem:[%s30892_s3 + $0x1d0] sm:$0xff]  ;;  %v14202_v40 = vld [vmem:[%s30892_s3 + $0x1d8] sm:$0xff]  ;;  %v18977_v36 = vpack.c.bf16 %v14184_v60, %v14183_v52  ;;  %v18985_v60 = vpack.c.bf16 %v14188_v57, %v14187_v2  ;;  %v14208_v2 = vld [vmem:[%s30892_s3 + $0x208] sm:$0xff]  ;;  %v19574_v57 = vadd.f32 %v23636_v1, %v28702_v11 }
 0xe69   :  { %18968 = vmatprep.subr.bf16.mxu1 %v18967_v12  ;;  %v22568_v12 = vld [vmem:[%s30890_s1 + $0x38a8] ss:$24 sps:$4 sm:$0xff]   ;;  %v18979_v58 = vpack.c.bf16 %v14202_v40, %v14201_v43  ;;  %v22571_v52 = vld [vmem:[%s30890_s1 + $0x38d8] ss:$24 sps:$4 sm:$0xff]   ;;  %v22576_v43 = vld [vmem:[%s30890_s1 + $0x3614] ss:$24 sps:$4 sm:$0xff]   ;;  %v1917_v40 = vrot.slane %v28535_v48, %v28800_v44 }
 0xe6b   :  { %13883 = vmatpush1.bf16.xpose.msra.mxu0 %v22565_v20  ;;  %v14186_v20 = vld [vmem:[%s30892_s3 + $0x158] sm:$0xff]  ;;  %v19573_v1 = vadd.f32 %v23632_v63, %v1917_v40  ;;  %v22652_v63 = vld [vmem:[%s30891_s0 + $0x8] ss:$24 sps:$4 sm:$0xff]  }
 0xe6c   :  { %18970 = vmatpush3.bf16.msra.mxu1 %v18969_v59  ;;  %13884 = vmatprep.subr.bf16.mxu0 %v22570_v49  ;;  %v14203_v59 = vld [vmem:[%s30892_s3 + $0x1e0] sm:$0xff]  ;;  %v14204_v49 = vld [vmem:[%s30892_s3 + $0x1e8] sm:$0xff] }
 0xe6d   :  { %18972 = vmatprep.subr.bf16.mxu1 %v18971_v27  ;;  %v18981_v27 = vpack.c.bf16 %v14186_v20, %v14185_v0  ;;  %v18983_v50 = vpack.c.bf16 %v14204_v49, %v14203_v59  ;;  %v14223_v0 = vld [vmem:[%s30892_s3 + $0x280] sm:$0xff]  ;;  %v14224_v20 = vld [vmem:[%s30892_s3 + $0x288] sm:$0xff]  ;;  %v19571_v49 = vadd.f32 %v23615_v56, %v1917_v40  ;;  %v14225_v56 = vld [vmem:[%s30892_s3 + $0x290] sm:$0xff] }
 0xe6e   :  { %v14227_v40 = vld [vmem:[%s30892_s3 + $0x2a0] sm:$0xff] }
 0xe70   :  { %18974 = vmatpush3.bf16.msra.mxu1 %v18973_v33  ;;  %v14205_v33 = vld [vmem:[%s30892_s3 + $0x1f0] sm:$0xff] }
 0xe71   :  { %18976 = vmatprep.subr.bf16.mxu1 %v18975_v62  ;;  %v14206_v62 = vld [vmem:[%s30892_s3 + $0x1f8] sm:$0xff] }
 0xe73   :  { %13885 = vmatpush1.bf16.xpose.msra.mxu0 %v22568_v12  ;;  %v18987_v12 = vpack.c.bf16 %v14206_v62, %v14205_v33  ;;  %v14226_v62 = vld [vmem:[%s30892_s3 + $0x298] sm:$0xff] }
 0xe74   :  { %18978 = vmatpush3.bf16.msra.mxu1 %v18977_v36  ;;  %13886 = vmatprep.subr.bf16.mxu0 %v22573_v55  ;;  %v14189_v36 = vld [vmem:[%s30892_s3 + $0x170] sm:$0xff]  ;;  %v14190_v55 = vld [vmem:[%s30892_s3 + $0x178] sm:$0xff]  ;;  %v18995_v11 = vpack.c.bf16 %v14226_v62, %v14225_v56 }
 0xe75   :  { %18980 = vmatprep.subr.bf16.mxu1 %v18979_v58  ;;  %v28829_v58 = vsub.s32 5, %v28521_v19  ;;  %v18989_v59 = vpack.c.bf16 %v14190_v55, %v14189_v36  ;;  %v14210_v36 = vld [vmem:[%s30892_s3 + $0x218] sm:$0xff]  ;;  %v14229_v56 = vld [vmem:[%s30892_s3 + $0x2b0] sm:$0xff] }
 0xe76   :  { %v22579_v55 = vld [vmem:[%s30890_s1 + $0x3644] ss:$24 sps:$4 sm:$0xff]  }
 0xe77   :  { %v28848_v33 = vrot.slane %v28535_v48, %v28829_v58  ;;  %v14230_v62 = vld [vmem:[%s30892_s3 + $0x2b8] sm:$0xff] }
 0xe78   :  { %18982 = vmatpush3.bf16.msra.mxu1 %v18981_v27  ;;  %v18991_v27 = vpack.c.bf16 %v14224_v20, %v14223_v0  ;;  %v14107_v0 = vmax.f32 %v19574_v57, 0.0 }
 0xe79   :  { %18984 = vmatprep.subr.bf16.mxu1 %v18983_v50  ;;  %v14207_v50 = vld [vmem:[%s30892_s3 + $0x200] sm:$0xff]  ;;  %v19576_v20 = vadd.f32 %v24243_v34, %v28848_v33 }
 0xe7b   :  { %13887 = vmatpush1.bf16.xpose.msra.mxu0 %v22571_v52  ;;  %v22574_v52 = vld [vmem:[%s30890_s1 + $0x3610] ss:$24 sps:$4 sm:$0xff]   ;;  %v14070_v57 = vmax.f32 %v19576_v20, 0.0 }
 0xe7c   :  { %18986 = vmatpush3.bf16.msra.mxu1 %v18985_v60  ;;  %13899 = vmatprep.subr.bf16.mxu0 %v22576_v43  ;;  %v18993_v60 = vpack.c.bf16 %v14208_v2, %v14207_v50  ;;  %v14067_v43 = vmax.f32 %v19571_v49, 0.0  ;;  %v14211_v50 = vld [vmem:[%s30892_s3 + $0x220] sm:$0xff]  ;;  %v14212_v2 = vld [vmem:[%s30892_s3 + $0x228] sm:$0xff] }
 0xe7d   :  { %18988 = vmatprep.subr.bf16.mxu1 %v18987_v12  ;;  %v14209_v12 = vld [vmem:[%s30892_s3 + $0x210] sm:$0xff] }
 0xe7e   :  { %v18997_v49 = vpack.c.bf16 %v14210_v36, %v14209_v12  ;;  %v14213_v12 = vld [vmem:[%s30892_s3 + $0x230] sm:$0xff]  ;;  %v14214_v36 = vld [vmem:[%s30892_s3 + $0x238] sm:$0xff] }
 0xe7f   :  { %v19005_v20 = vpack.c.bf16 %v14214_v36, %v14213_v12  ;;  %v14219_v12 = vld [vmem:[%s30892_s3 + $0x260] sm:$0xff]  ;;  %v14220_v36 = vld [vmem:[%s30892_s3 + $0x268] sm:$0xff] }
 0xe80   :  { %18990 = vmatpush3.bf16.msra.mxu1 %v18989_v59  ;;  %v14228_v59 = vld [vmem:[%s30892_s3 + $0x2a8] sm:$0xff] }
 0xe81   :  { %18992 = vmatprep.subr.bf16.mxu1 %v18991_v27  ;;  %v14106_v27 = vmax.f32 %v19573_v1, 0.0  ;;  %v18999_v34 = vpack.c.bf16 %v14228_v59, %v14227_v40  ;;  %v22582_v1 = vld [vmem:[%s30890_s1 + $0x3674] ss:$24 sps:$4 sm:$0xff]   ;;  %v14215_v40 = vld [vmem:[%s30892_s3 + $0x240] sm:$0xff] }
 0xe82   :  { %13889 = vmatmul.mubr.bf16.vlgmr.msra.gmra.mrb[36].mxu0 %v22652_v63  ;;  %v14216_v59 = vld [vmem:[%s30892_s3 + $0x248] sm:$0xff] }
 0xe83   :  { %14907 = vmatmul.mubr.f32.vlgmr.msra.gmra.mrb[44].mxu1 %v14067_v43  ;;  %13900 = vmatpush1.bf16.xpose.msra.mxu0 %v22574_v52  ;;  %v22653_v52 = vld [vmem:[%s30891_s0 + $0x14] ss:$24 sps:$4 sm:$0xff]   ;;  %v19001_v43 = vpack.c.bf16 %v14212_v2, %v14211_v50  ;;  %v19009_v50 = vpack.c.bf16 %v14216_v59, %v14215_v40  ;;  %v22585_v2 = vld [vmem:[%s30890_s1 + $0x36a4] ss:$24 sps:$4 sm:$0xff]  }
 0xe84   :  { %14911 = vmatprep.mubr.f32.mxu1 %v14107_v0  ;;  %18994 = vmatpush3.bf16.msra.mxu1 %v18993_v60  ;;  %v22577_v60 = vld [vmem:[%s30890_s1 + $0x3640] ss:$24 sps:$4 sm:$0xff]   ;;  %v14232_v0 = vld [vmem:[%s30892_s3 + $0x2c8] sm:$0xff] }
 0xe85   :  { %18996 = vmatprep.subr.bf16.mxu1 %v18995_v11  ;;  %13901 = vmatprep.subr.bf16.mxu0 %v22579_v55  ;;  %v19003_v11 = vpack.c.bf16 %v14230_v62, %v14229_v56  ;;  %v14231_v55 = vld [vmem:[%s30892_s3 + $0x2c0] sm:$0xff]  ;;  %v14217_v56 = vld [vmem:[%s30892_s3 + $0x250] sm:$0xff]  ;;  %v14218_v62 = vld [vmem:[%s30892_s3 + $0x258] sm:$0xff] }
 0xe86   :  { %13931 = vmatprep.mubr.bf16.mxu0 %v22653_v52  ;;  %v19007_v63 = vpack.c.bf16 %v14232_v0, %v14231_v55  ;;  %v14235_v52 = vld [vmem:[%s30892_s3 + $0x2e0] sm:$0xff]  ;;  %v14237_v55 = vld [vmem:[%s30892_s3 + $0x2f0] sm:$0xff]  ;;  %v14238_v0 = vld [vmem:[%s30892_s3 + $0x2f8] sm:$0xff] }
 0xe87   :  { %14912 = vmatmul.mubr.f32.gmra.mrb[46].mxu1 %v14106_v27  ;;  %v14234_v27 = vld [vmem:[%s30892_s3 + $0x2d8] sm:$0xff]  ;;  %v22588_v40 = vld [vmem:[%s30890_s1 + $0x36d4] ss:$24 sps:$4 sm:$0xff]  }
 0xe88   :  { %18998 = vmatpush3.bf16.msra.mxu1 %v18997_v49  ;;  %14981 = vmatprep.mubr.f32.mxu1 %v14070_v57  ;;  %v14233_v49 = vld [vmem:[%s30892_s3 + $0x2d0] sm:$0xff] }
 0xe89   :  { %19000 = vmatprep.subr.bf16.mxu1 %v18999_v34  ;;  %v22580_v34 = vld [vmem:[%s30890_s1 + $0x3670] ss:$24 sps:$4 sm:$0xff]   ;;  %v19011_v57 = vpack.c.bf16 %v14234_v27, %v14233_v49  ;;  %v19019_v49 = vpack.c.bf16 %v14238_v0, %v14237_v55 }
 0xe8a   :  { %v14221_v27 = vld [vmem:[%s30892_s3 + $0x270] sm:$0xff] }
 0xe8b   :  { %13902 = vmatpush1.bf16.xpose.msra.mxu0 %v22577_v60  ;;  %v14236_v60 = vld [vmem:[%s30892_s3 + $0x2e8] sm:$0xff] }
 0xe8c   :  { %19002 = vmatpush3.bf16.msra.mxu1 %v19001_v43  ;;  %13903 = vmatprep.subr.bf16.mxu0 %v22582_v1  ;;  %v19013_v43 = vpack.c.bf16 %v14218_v62, %v14217_v56  ;;  %v28944_v1 = vsub.s32 4, %v28521_v19  ;;  %v22586_v55 = vld [vmem:[%s30890_s1 + $0x36d0] ss:$24 sps:$4 sm:$0xff]  }
 0xe8d   :  { %19004 = vmatprep.subr.bf16.mxu1 %v19003_v11  ;;  %v19015_v11 = vpack.c.bf16 %v14236_v60, %v14235_v52  ;;  %v14239_v60 = vld [vmem:[%s30892_s3 + $0x300] sm:$0xff] }
 0xe8e   :  { %v1925_v59 = vrot.slane %v28535_v48, %v28944_v1 }
 0xe90   :  { %19006 = vmatpush3.bf16.msra.mxu1 %v19005_v20  ;;  %v22583_v20 = vld [vmem:[%s30890_s1 + $0x36a0] ss:$24 sps:$4 sm:$0xff]   ;;  %v19575_v62 = vadd.f32 %v24239_v31, %v1925_v59  ;;  %v14257_v31 = vld [vmem:[%s30892_s3 + $0x390] sm:$0xff] }
 0xe91   :  { %19008 = vmatprep.subr.bf16.mxu1 %v19007_v63  ;;  %v19017_v63 = vpack.c.bf16 %v14220_v36, %v14219_v12  ;;  %v19578_v12 = vadd.f32 %v24257_v41, %v28848_v33  ;;  %v14258_v36 = vld [vmem:[%s30892_s3 + $0x398] sm:$0xff]  ;;  %v14241_v41 = vld [vmem:[%s30892_s3 + $0x310] sm:$0xff] }
 0xe92   :  { %v14242_v33 = vld [vmem:[%s30892_s3 + $0x318] sm:$0xff] }
 0xe93   :  { %13904 = vmatpush1.bf16.xpose.msra.mxu0 %v22580_v34  ;;  %v14222_v34 = vld [vmem:[%s30892_s3 + $0x278] sm:$0xff] }
 0xe94   :  { %19010 = vmatpush3.bf16.msra.mxu1 %v19009_v50  ;;  %13905 = vmatprep.subr.bf16.mxu0 %v22585_v2  ;;  %v28973_v50 = vsub.s32 7, %v28521_v19  ;;  %v14255_v2 = vld [vmem:[%s30892_s3 + $0x380] sm:$0xff]  ;;  %v19021_v56 = vpack.c.bf16 %v14222_v34, %v14221_v27  ;;  %v14109_v34 = vmax.f32 %v19578_v12, 0.0 }
 0xe95   :  { %19012 = vmatprep.subr.bf16.mxu1 %v19011_v57  ;;  %v14256_v57 = vld [vmem:[%s30892_s3 + $0x388] sm:$0xff]  ;;  %v22589_v12 = vld [vmem:[%s30890_s1 + $0x3700] ss:$24 sps:$4 sm:$0xff]  }
 0xe96   :  { %v19023_v52 = vpack.c.bf16 %v14256_v57, %v14255_v2  ;;  %v19029_v2 = vpack.c.bf16 %v14242_v33, %v14241_v41 }
 0xe98   :  { %19014 = vmatpush3.bf16.msra.mxu1 %v19013_v43  ;;  %v14240_v43 = vld [vmem:[%s30892_s3 + $0x308] sm:$0xff] }
 0xe99   :  { %19016 = vmatprep.subr.bf16.mxu1 %v19015_v11  ;;  %v28990_v11 = vrot.slane %v28535_v48, %v28973_v50  ;;  %v19025_v0 = vpack.c.bf16 %v14240_v43, %v14239_v60  ;;  %v14261_v60 = vld [vmem:[%s30892_s3 + $0x3b0] sm:$0xff]  ;;  %v14262_v43 = vld [vmem:[%s30892_s3 + $0x3b8] sm:$0xff] }
 0xe9b   :  { %13906 = vmatpush1.bf16.xpose.msra.mxu0 %v22583_v20  ;;  %v14069_v20 = vmax.f32 %v19575_v62, 0.0  ;;  %v19580_v27 = vadd.f32 %v24245_v35, %v28990_v11  ;;  %v14243_v35 = vld [vmem:[%s30892_s3 + $0x320] sm:$0xff]  ;;  %v14244_v62 = vld [vmem:[%s30892_s3 + $0x328] sm:$0xff] }
 0xe9c   :  { %19018 = vmatpush3.bf16.msra.mxu1 %v19017_v63  ;;  %13907 = vmatprep.subr.bf16.mxu0 %v22588_v40  ;;  %v19577_v63 = vadd.f32 %v24247_v37, %v1925_v59  ;;  %v19027_v40 = vpack.c.bf16 %v14258_v36, %v14257_v31  ;;  %v14259_v37 = vld [vmem:[%s30892_s3 + $0x3a0] sm:$0xff]  ;;  %v14260_v59 = vld [vmem:[%s30892_s3 + $0x3a8] sm:$0xff]  ;;  %v19033_v31 = vpack.c.bf16 %v14244_v62, %v14243_v35  ;;  %v14249_v35 = vld [vmem:[%s30892_s3 + $0x350] sm:$0xff] }
 0xe9d   :  { %19020 = vmatprep.subr.bf16.mxu1 %v19019_v49  ;;  %v22591_v49 = vld [vmem:[%s30890_s1 + $0x3704] ss:$24 sps:$4 sm:$0xff]   ;;  %v22594_v36 = vld [vmem:[%s30890_s1 + $0x3734] ss:$24 sps:$4 sm:$0xff]  }
 0xe9e   :  { %v14108_v57 = vmax.f32 %v19577_v63, 0.0  ;;  %v14263_v63 = vld [vmem:[%s30892_s3 + $0x3c0] sm:$0xff]  ;;  %v14250_v62 = vld [vmem:[%s30892_s3 + $0x358] sm:$0xff] }
 0xea0   :  { %19022 = vmatpush3.bf16.msra.mxu1 %v19021_v56  ;;  %v19031_v56 = vpack.c.bf16 %v14260_v59, %v14259_v37  ;;  %v14266_v37 = vld [vmem:[%s30892_s3 + $0x3d8] sm:$0xff]  ;;  %v22592_v59 = vld [vmem:[%s30890_s1 + $0x3730] ss:$24 sps:$4 sm:$0xff]  }
 0xea1   :  { %19024 = vmatprep.subr.bf16.mxu1 %v19023_v52  ;;  %v14072_v52 = vmax.f32 %v19580_v27, 0.0  ;;  %v14248_v27 = vld [vmem:[%s30892_s3 + $0x348] sm:$0xff] }
 0xea3   :  { %14982 = vmatmul.mubr.f32.vlgmr.msra.gmra.mrb[48].mxu1 %v14069_v20  ;;  %13908 = vmatpush1.bf16.xpose.msra.mxu0 %v22586_v55  ;;  %v19035_v55 = vpack.c.bf16 %v14262_v43, %v14261_v60  ;;  %v14246_v20 = vld [vmem:[%s30892_s3 + $0x338] sm:$0xff]  ;;  %v14268_v60 = vld [vmem:[%s30892_s3 + $0x3e8] sm:$0xff]  ;;  %v19045_v43 = vpack.c.bf16 %v14250_v62, %v14249_v35  ;;  %v19582_v62 = vadd.f32 %v24259_v42, %v28990_v11 }
 0xea4   :  { %14986 = vmatprep.mubr.f32.mxu1 %v14109_v34  ;;  %19026 = vmatpush3.bf16.msra.mxu1 %v19025_v0  ;;  %v14245_v0 = vld [vmem:[%s30892_s3 + $0x330] sm:$0xff]  ;;  %v14272_v35 = vld [vmem:[%s30892_s3 + $0x408] sm:$0xff] }
 0xea5   :  { %19028 = vmatprep.subr.bf16.mxu1 %v19027_v40  ;;  %13909 = vmatprep.subr.bf16.mxu0 %v22591_v49  ;;  %v14264_v40 = vld [vmem:[%s30892_s3 + $0x3c8] sm:$0xff]  ;;  %v19037_v41 = vpack.c.bf16 %v14246_v20, %v14245_v0  ;;  %v14247_v49 = vld [vmem:[%s30892_s3 + $0x340] sm:$0xff]  ;;  %v14265_v34 = vld [vmem:[%s30892_s3 + $0x3d0] sm:$0xff] }
 0xea6   :  { %v19039_v33 = vpack.c.bf16 %v14264_v40, %v14263_v63  ;;  %v14269_v0 = vld [vmem:[%s30892_s3 + $0x3f0] sm:$0xff]  ;;  %v14270_v20 = vld [vmem:[%s30892_s3 + $0x3f8] sm:$0xff] }
 0xea7   :  { %14987 = vmatmul.mubr.f32.gmra.mrb[50].mxu1 %v14108_v57  ;;  %v22597_v57 = vld [vmem:[%s30890_s1 + $0x3764] ss:$24 sps:$4 sm:$0xff]   ;;  %v22600_v40 = vld [vmem:[%s30890_s1 + $0x3794] ss:$24 sps:$4 sm:$0xff]  }
 0xea8   :  { %19030 = vmatpush3.bf16.msra.mxu1 %v19029_v2  ;;  %15056 = vmatprep.mubr.f32.mxu1 %v14072_v52  ;;  %v19041_v2 = vpack.c.bf16 %v14248_v27, %v14247_v49  ;;  %v14267_v52 = vld [vmem:[%s30892_s3 + $0x3e0] sm:$0xff]  ;;  %v14253_v49 = vld [vmem:[%s30892_s3 + $0x370] sm:$0xff]  ;;  %v14254_v27 = vld [vmem:[%s30892_s3 + $0x378] sm:$0xff] }
 0xea9   :  { %19032 = vmatprep.subr.bf16.mxu1 %v19031_v56  ;;  %v19043_v56 = vpack.c.bf16 %v14266_v37, %v14265_v34  ;;  %v14287_v34 = vld [vmem:[%s30892_s3 + $0x480] sm:$0xff]  ;;  %v14288_v37 = vld [vmem:[%s30892_s3 + $0x488] sm:$0xff] }
 0xeab   :  { %13910 = vmatpush1.bf16.xpose.msra.mxu0 %v22589_v12  ;;  %v29082_v12 = vsub.s32 6, %v28521_v19  ;;  %v22595_v19 = vld [vmem:[%s30890_s1 + $0x3760] ss:$24 sps:$4 sm:$0xff]  }
 0xeac   :  { %19034 = vmatpush3.bf16.msra.mxu1 %v19033_v31  ;;  %13911 = vmatprep.subr.bf16.mxu0 %v22594_v36  ;;  %v19047_v31 = vpack.c.bf16 %v14268_v60, %v14267_v52  ;;  %v14251_v36 = vld [vmem:[%s30892_s3 + $0x360] sm:$0xff]  ;;  %v14290_v60 = vld [vmem:[%s30892_s3 + $0x498] sm:$0xff] }
 0xead   :  { %19036 = vmatprep.subr.bf16.mxu1 %v19035_v55  ;;  %v14252_v55 = vld [vmem:[%s30892_s3 + $0x368] sm:$0xff] }
 0xeae   :  { %v19049_v63 = vpack.c.bf16 %v14252_v55, %v14251_v36  ;;  %v14273_v55 = vld [vmem:[%s30892_s3 + $0x410] sm:$0xff] }
 0xeb0   :  { %19038 = vmatpush3.bf16.msra.mxu1 %v19037_v41  ;;  %v1933_v41 = vrot.slane %v28535_v48, %v29082_v12  ;;  %v29119_v48 = vld [vmem:[%s30893_s2 + $0x8] sm:$0xff] }
 0xeb1   :  { %19040 = vmatprep.subr.bf16.mxu1 %v19039_v33  ;;  %v19051_v33 = vpack.c.bf16 %v14270_v20, %v14269_v0  ;;  %v29132_v52 = vrot.slane %v29119_v48, %v28530_v47  ;;  %v14274_v0 = vld [vmem:[%s30892_s3 + $0x418] sm:$0xff] }
 0xeb2   :  { %v19581_v42 = vadd.f32 %v24249_v38, %v1933_v41  ;;  %v22603_v20 = vld [vmem:[%s30890_s1 + $0x37c4] ss:$24 sps:$4 sm:$0xff]  }
 0xeb3   :  { %13912 = vmatpush1.bf16.xpose.msra.mxu0 %v22592_v59  ;;  %v19053_v59 = vpack.c.bf16 %v14254_v27, %v14253_v49  ;;  %v14291_v38 = vld [vmem:[%s30892_s3 + $0x4a0] sm:$0xff]  ;;  %v14276_v27 = vld [vmem:[%s30892_s3 + $0x428] sm:$0xff] }
 0xeb4   :  { %19042 = vmatpush3.bf16.msra.mxu1 %v19041_v2  ;;  %13913 = vmatprep.subr.bf16.mxu0 %v22597_v57  ;;  %v19579_v2 = vadd.f32 %v24241_v32, %v1933_v41  ;;  %v19055_v57 = vpack.c.bf16 %v14288_v37, %v14287_v34  ;;  %v14289_v32 = vld [vmem:[%s30892_s3 + $0x490] sm:$0xff]  ;;  %v19061_v41 = vpack.c.bf16 %v14274_v0, %v14273_v55  ;;  %v14298_v0 = vld [vmem:[%s30892_s3 + $0x4d8] sm:$0xff] }
 0xeb5   :  { %19044 = vmatprep.subr.bf16.mxu1 %v19043_v56  ;;  %v14271_v56 = vld [vmem:[%s30892_s3 + $0x400] sm:$0xff]  ;;  %v19059_v11 = vpack.c.bf16 %v14290_v60, %v14289_v32  ;;  %v14293_v37 = vld [vmem:[%s30892_s3 + $0x4b0] sm:$0xff]  ;;  %v14278_v32 = vld [vmem:[%s30892_s3 + $0x438] sm:$0xff] }
 0xeb6   :  { %v14071_v36 = vmax.f32 %v19579_v2, 0.0  ;;  %v22601_v2 = vld [vmem:[%s30890_s1 + $0x37c0] ss:$24 sps:$4 sm:$0xff]   ;;  %v14297_v55 = vld [vmem:[%s30892_s3 + $0x4d0] sm:$0xff] }
 0xeb7   :  { %v14295_v60 = vld [vmem:[%s30892_s3 + $0x4c0] sm:$0xff] }
 0xeb8   :  { %19046 = vmatpush3.bf16.msra.mxu1 %v19045_v43  ;;  %v22598_v43 = vld [vmem:[%s30890_s1 + $0x3790] ss:$24 sps:$4 sm:$0xff]  }
 0xeb9   :  { %19048 = vmatprep.subr.bf16.mxu1 %v19047_v31  ;;  %v19057_v31 = vpack.c.bf16 %v14272_v35, %v14271_v56  ;;  %v22606_v56 = vld [vmem:[%s30890_s1 + $0x37f4] ss:$24 sps:$4 sm:$0xff]  }
 0xebb   :  { %13914 = vmatpush1.bf16.xpose.msra.mxu0 %v22595_v19  ;;  %v14111_v19 = vmax.f32 %v19582_v62, 0.0  ;;  %v14277_v62 = vld [vmem:[%s30892_s3 + $0x430] sm:$0xff] }
 0xebc   :  { %19050 = vmatpush3.bf16.msra.mxu1 %v19049_v63  ;;  %13915 = vmatprep.subr.bf16.mxu0 %v22600_v40  ;;  %v19584_v63 = vadd.f32 %v24857_v5, %v29132_v52  ;;  %v14292_v40 = vld [vmem:[%s30892_s3 + $0x4a8] sm:$0xff]  ;;  %v14275_v5 = vld [vmem:[%s30892_s3 + $0x420] sm:$0xff] }
 0xebd   :  { %19052 = vmatprep.subr.bf16.mxu1 %v19051_v33  ;;  %v14110_v33 = vmax.f32 %v19581_v42, 0.0  ;;  %v19063_v49 = vpack.c.bf16 %v14292_v40, %v14291_v38  ;;  %v14279_v42 = vld [vmem:[%s30892_s3 + $0x440] sm:$0xff]  ;;  %v19075_v38 = vpack.c.bf16 %v14298_v0, %v14297_v55  ;;  %v14281_v40 = vld [vmem:[%s30892_s3 + $0x450] sm:$0xff] }
 0xebe   :  { %v14074_v34 = vmax.f32 %v19584_v63, 0.0  ;;  %v22609_v63 = vld [vmem:[%s30890_s1 + $0x3824] ss:$24 sps:$4 sm:$0xff]  }
 0xebf   :  { %v14303_v0 = vld [vmem:[%s30892_s3 + $0x500] sm:$0xff] }
 0xec0   :  { %19054 = vmatpush3.bf16.msra.mxu1 %v19053_v59  ;;  %v14294_v59 = vld [vmem:[%s30892_s3 + $0x4b8] sm:$0xff] }
 0xec1   :  { %19056 = vmatprep.subr.bf16.mxu1 %v19055_v57  ;;  %v19065_v57 = vpack.c.bf16 %v14276_v27, %v14275_v5  ;;  %v19067_v35 = vpack.c.bf16 %v14294_v59, %v14293_v37  ;;  %v14284_v37 = vld [vmem:[%s30892_s3 + $0x468] sm:$0xff]  ;;  %v14301_v59 = vld [vmem:[%s30892_s3 + $0x4f0] sm:$0xff] }
 0xec3   :  { %15057 = vmatmul.mubr.f32.vlgmr.msra.gmra.mrb[52].mxu1 %v14071_v36  ;;  %13916 = vmatpush1.bf16.xpose.msra.mxu0 %v22598_v43  ;;  %v14296_v43 = vld [vmem:[%s30892_s3 + $0x4c8] sm:$0xff] }
 0xec4   :  { %15061 = vmatprep.mubr.f32.mxu1 %v14111_v19  ;;  %19058 = vmatpush3.bf16.msra.mxu1 %v19057_v31  ;;  %v19069_v31 = vpack.c.bf16 %v14278_v32, %v14277_v62  ;;  %v19071_v36 = vpack.c.bf16 %v14296_v43, %v14295_v60  ;;  %v1941_v62 = vrot.slane %v29119_v48, %v28646_v28  ;;  %v14285_v60 = vld [vmem:[%s30892_s3 + $0x470] sm:$0xff]  ;;  %v14286_v43 = vld [vmem:[%s30892_s3 + $0x478] sm:$0xff] }
 0xec5   :  { %19060 = vmatprep.subr.bf16.mxu1 %v19059_v11  ;;  %13917 = vmatprep.subr.bf16.mxu0 %v22603_v20  ;;  %v14280_v11 = vld [vmem:[%s30892_s3 + $0x448] sm:$0xff] }
 0xec6   :  { %v22604_v20 = vld [vmem:[%s30890_s1 + $0x37f0] ss:$24 sps:$4 sm:$0xff]   ;;  %v19073_v19 = vpack.c.bf16 %v14280_v11, %v14279_v42  ;;  %v19085_v42 = vpack.c.bf16 %v14286_v43, %v14285_v60  ;;  %v19583_v11 = vadd.f32 %v24853_v3, %v1941_v62  ;;  %v14326_v60 = vld [vmem:[%s30892_s3 + $0x5b8] sm:$0xff] }
 0xec7   :  { %15062 = vmatmul.mubr.f32.gmra.mrb[54].mxu1 %v14110_v33  ;;  %v14299_v33 = vld [vmem:[%s30892_s3 + $0x4e0] sm:$0xff]  ;;  %v14321_v3 = vld [vmem:[%s30892_s3 + $0x590] sm:$0xff] }
 0xec8   :  { %19062 = vmatpush3.bf16.msra.mxu1 %v19061_v41  ;;  %15131 = vmatprep.mubr.f32.mxu1 %v14074_v34  ;;  %v14282_v41 = vld [vmem:[%s30892_s3 + $0x458] sm:$0xff]  ;;  %v14283_v34 = vld [vmem:[%s30892_s3 + $0x460] sm:$0xff] }
 0xec9   :  { %19064 = vmatprep.subr.bf16.mxu1 %v19063_v49  ;;  %v14300_v49 = vld [vmem:[%s30892_s3 + $0x4e8] sm:$0xff]  ;;  %v19077_v5 = vpack.c.bf16 %v14282_v41, %v14281_v40  ;;  %v22613_v43 = vld [vmem:[%s30890_s1 + $0x3880] ss:$24 sps:$4 sm:$0xff]  }
 0xeca   :  { %v19079_v27 = vpack.c.bf16 %v14300_v49, %v14299_v33  ;;  %v22610_v40 = vld [vmem:[%s30890_s1 + $0x3850] ss:$24 sps:$4 sm:$0xff]   ;;  %v14073_v33 = vmax.f32 %v19583_v11, 0.0  ;;  %v19585_v49 = vadd.f32 %v24861_v7, %v1941_v62  ;;  %v14323_v7 = vld [vmem:[%s30892_s3 + $0x5a0] sm:$0xff] }
 0xecb   :  { %13918 = vmatpush1.bf16.xpose.msra.mxu0 %v22601_v2  ;;  %v14302_v2 = vld [vmem:[%s30892_s3 + $0x4f8] sm:$0xff]  ;;  %v14309_v11 = vld [vmem:[%s30892_s3 + $0x530] sm:$0xff] }
 0xecc   :  { %19066 = vmatpush3.bf16.msra.mxu1 %v19065_v57  ;;  %13919 = vmatprep.subr.bf16.mxu0 %v22606_v56  ;;  %v22607_v57 = vld [vmem:[%s30890_s1 + $0x3820] ss:$24 sps:$4 sm:$0xff]   ;;  %v19081_v56 = vpack.c.bf16 %v14284_v37, %v14283_v34  ;;  %v19083_v32 = vpack.c.bf16 %v14302_v2, %v14301_v59  ;;  %v14324_v59 = vld [vmem:[%s30892_s3 + $0x5a8] sm:$0xff] }
 0xecd   :  { %19068 = vmatprep.subr.bf16.mxu1 %v19067_v35  ;;  %v22612_v35 = vld [vmem:[%s30890_s1 + $0x3854] ss:$24 sps:$4 sm:$0xff]  }
 0xed0   :  { %19070 = vmatpush3.bf16.msra.mxu1 %v19069_v31  ;;  %v14319_v31 = vld [vmem:[%s30892_s3 + $0x580] sm:$0xff] }
 0xed1   :  { %19072 = vmatprep.subr.bf16.mxu1 %v19071_v36  ;;  %v14320_v36 = vld [vmem:[%s30892_s3 + $0x588] sm:$0xff] }
 0xed2   :  { %v19087_v55 = vpack.c.bf16 %v14320_v36, %v14319_v31  ;;  %v22618_v36 = vld [vmem:[%s30890_s1 + $0x38b4] ss:$24 sps:$4 sm:$0xff]  }
 0xed3   :  { %13920 = vmatpush1.bf16.xpose.msra.mxu0 %v22604_v20  ;;  %v14304_v20 = vld [vmem:[%s30892_s3 + $0x508] sm:$0xff] }
 0xed4   :  { %19074 = vmatpush3.bf16.msra.mxu1 %v19073_v19  ;;  %13921 = vmatprep.subr.bf16.mxu0 %v22609_v63  ;;  %v29262_v19 = vrot.slane %v29119_v48, %v28691_v39  ;;  %v19586_v63 = vadd.f32 %v24871_v45, %v29132_v52  ;;  %v19089_v41 = vpack.c.bf16 %v14304_v20, %v14303_v0  ;;  %v14305_v45 = vld [vmem:[%s30892_s3 + $0x510] sm:$0xff]  ;;  %v14306_v52 = vld [vmem:[%s30892_s3 + $0x518] sm:$0xff]  ;;  %v14327_v0 = vld [vmem:[%s30892_s3 + $0x5c0] sm:$0xff] }
 0xed5   :  { %19076 = vmatprep.subr.bf16.mxu1 %v19075_v38  ;;  %v14322_v38 = vld [vmem:[%s30892_s3 + $0x598] sm:$0xff]  ;;  %v19093_v2 = vpack.c.bf16 %v14306_v52, %v14305_v45  ;;  %v14328_v20 = vld [vmem:[%s30892_s3 + $0x5c8] sm:$0xff] }
 0xed6   :  { %v19588_v34 = vadd.f32 %v24859_v6, %v29262_v19  ;;  %v14113_v37 = vmax.f32 %v19586_v63, 0.0  ;;  %v14307_v6 = vld [vmem:[%s30892_s3 + $0x520] sm:$0xff] }
 0xed7   :  { %v22621_v45 = vld [vmem:[%s30890_s1 + $0x38e4] ss:$24 sps:$4 sm:$0xff]  }
 0xed8   :  { %19078 = vmatpush3.bf16.msra.mxu1 %v19077_v5  ;;  %v19091_v5 = vpack.c.bf16 %v14322_v38, %v14321_v3  ;;  %v14076_v62 = vmax.f32 %v19588_v34, 0.0  ;;  %v19103_v3 = vpack.c.bf16 %v14328_v20, %v14327_v0  ;;  %v14311_v38 = vld [vmem:[%s30892_s3 + $0x540] sm:$0xff]  ;;  %v14314_v34 = vld [vmem:[%s30892_s3 + $0x558] sm:$0xff]  ;;  %v29384_v0 = vrot.slane %v29119_v48, %v28829_v58 }
 0xed9   :  { %19080 = vmatprep.subr.bf16.mxu1 %v19079_v27  ;;  %v22615_v27 = vld [vmem:[%s30890_s1 + $0x3884] ss:$24 sps:$4 sm:$0xff]  }
 0xeda   :  { %v14383_v20 = vld [vmem:[%s30892_s3 + $0x780] sm:$0xff] }
 0xedb   :  { %13922 = vmatpush1.bf16.xpose.msra.mxu0 %v22607_v57  ;;  %v14112_v57 = vmax.f32 %v19585_v49, 0.0  ;;  %v22616_v49 = vld [vmem:[%s30890_s1 + $0x38b0] ss:$24 sps:$4 sm:$0xff]  }
 0xedc   :  { %19082 = vmatpush3.bf16.msra.mxu1 %v19081_v56  ;;  %13923 = vmatprep.subr.bf16.mxu0 %v22612_v35  ;;  %v19095_v56 = vpack.c.bf16 %v14324_v59, %v14323_v7  ;;  %v14308_v35 = vld [vmem:[%s30892_s3 + $0x528] sm:$0xff] }
 0xedd   :  { %19084 = vmatprep.subr.bf16.mxu1 %v19083_v32  ;;  %v14325_v32 = vld [vmem:[%s30892_s3 + $0x5b0] sm:$0xff]  ;;  %v19097_v31 = vpack.c.bf16 %v14308_v35, %v14307_v6  ;;  %v14332_v7 = vld [vmem:[%s30892_s3 + $0x5e8] sm:$0xff]  ;;  %v14351_v6 = vld [vmem:[%s30892_s3 + $0x680] sm:$0xff] }
 0xede   :  { %v14352_v35 = vld [vmem:[%s30892_s3 + $0x688] sm:$0xff] }
 0xee0   :  { %19086 = vmatpush3.bf16.msra.mxu1 %v19085_v42  ;;  %v19099_v42 = vpack.c.bf16 %v14326_v60, %v14325_v32  ;;  %v14334_v32 = vld [vmem:[%s30892_s3 + $0x5f8] sm:$0xff] }
 0xee1   :  { %19088 = vmatprep.subr.bf16.mxu1 %v19087_v55  ;;  %v14310_v55 = vld [vmem:[%s30892_s3 + $0x538] sm:$0xff] }
 0xee2   :  { %v19101_v63 = vpack.c.bf16 %v14310_v55, %v14309_v11  ;;  %v22619_v60 = vld [vmem:[%s30890_s1 + $0x38e0] ss:$24 sps:$4 sm:$0xff]   ;;  %v14317_v11 = vld [vmem:[%s30892_s3 + $0x570] sm:$0xff] }
 0xee3   :  { %15132 = vmatmul.mubr.f32.vlgmr.msra.gmra.mrb[56].mxu1 %v14073_v33  ;;  %13924 = vmatpush1.bf16.xpose.msra.mxu0 %v22610_v40  ;;  %v14312_v40 = vld [vmem:[%s30892_s3 + $0x548] sm:$0xff]  ;;  %v14330_v33 = vld [vmem:[%s30892_s3 + $0x5d8] sm:$0xff] }
 0xee4   :  { %15136 = vmatprep.mubr.f32.mxu1 %v14113_v37  ;;  %19090 = vmatpush3.bf16.msra.mxu1 %v19089_v41  ;;  %v14329_v41 = vld [vmem:[%s30892_s3 + $0x5d0] sm:$0xff]  ;;  %v14331_v37 = vld [vmem:[%s30892_s3 + $0x5e0] sm:$0xff]  ;;  %v14318_v55 = vld [vmem:[%s30892_s3 + $0x578] sm:$0xff] }
 0xee5   :  { %19092 = vmatprep.subr.bf16.mxu1 %v19091_v5  ;;  %13925 = vmatprep.subr.bf16.mxu0 %v22615_v27  ;;  %v19105_v5 = vpack.c.bf16 %v14312_v40, %v14311_v38  ;;  %v19107_v52 = vpack.c.bf16 %v14330_v33, %v14329_v41  ;;  %v14313_v27 = vld [vmem:[%s30892_s3 + $0x550] sm:$0xff]  ;;  %v14335_v38 = vld [vmem:[%s30892_s3 + $0x600] sm:$0xff]  ;;  %v14336_v40 = vld [vmem:[%s30892_s3 + $0x608] sm:$0xff] }
 0xee6   :  { %v19109_v59 = vpack.c.bf16 %v14314_v34, %v14313_v27  ;;  %v14353_v27 = vld [vmem:[%s30892_s3 + $0x690] sm:$0xff]  ;;  %v14354_v34 = vld [vmem:[%s30892_s3 + $0x698] sm:$0xff] }
 0xee7   :  { %15137 = vmatmul.mubr.f32.gmra.mrb[58].mxu1 %v14112_v57  ;;  %v19111_v57 = vpack.c.bf16 %v14332_v7, %v14331_v37  ;;  %v14337_v37 = vld [vmem:[%s30892_s3 + $0x610] sm:$0xff]  ;;  %v14338_v7 = vld [vmem:[%s30892_s3 + $0x618] sm:$0xff] }
 0xee8   :  { %19094 = vmatpush3.bf16.msra.mxu1 %v19093_v2  ;;  %15206 = vmatprep.mubr.f32.mxu1 %v14076_v62  ;;  %v14315_v2 = vld [vmem:[%s30892_s3 + $0x560] sm:$0xff]  ;;  %v14333_v62 = vld [vmem:[%s30892_s3 + $0x5f0] sm:$0xff] }
 0xee9   :  { %19096 = vmatprep.subr.bf16.mxu1 %v19095_v56  ;;  %v14316_v56 = vld [vmem:[%s30892_s3 + $0x568] sm:$0xff] }
 0xeeb   :  { %13926 = vmatpush1.bf16.xpose.msra.mxu0 %v22613_v43  ;;  %v19113_v43 = vpack.c.bf16 %v14316_v56, %v14315_v2  ;;  %v19123_v56 = vpack.c.bf16 %v14354_v34, %v14353_v27  ;;  %v14389_v27 = vld [vmem:[%s30892_s3 + $0x7b0] sm:$0xff]  ;;  %v14390_v34 = vld [vmem:[%s30892_s3 + $0x7b8] sm:$0xff] }
 0xeec   :  { %19098 = vmatpush3.bf16.msra.mxu1 %v19097_v31  ;;  %13927 = vmatprep.subr.bf16.mxu0 %v22618_v36  ;;  %v19119_v31 = vpack.c.bf16 %v14352_v35, %v14351_v6  ;;  %v1949_v36 = vrot.slane %v29119_v48, %v28800_v44  ;;  %v14355_v6 = vld [vmem:[%s30892_s3 + $0x6a0] sm:$0xff]  ;;  %v14356_v35 = vld [vmem:[%s30892_s3 + $0x6a8] sm:$0xff] }
 0xeed   :  { %19100 = vmatprep.subr.bf16.mxu1 %v19099_v42  ;;  %v19115_v42 = vpack.c.bf16 %v14334_v32, %v14333_v62 }
 0xeee   :  { %v19587_v41 = vadd.f32 %v24855_v4, %v1949_v36  ;;  %v14368_v4 = vld [vmem:[%s30892_s3 + $0x708] sm:$0xff]  ;;  %v19589_v2 = vadd.f32 %v24863_v8, %v1949_v36  ;;  %v14370_v36 = vld [vmem:[%s30892_s3 + $0x718] sm:$0xff] }
 0xeef   :  { %v22654_v8 = vld [vmem:[%s30891_s0 + $0x10] ss:$24 sps:$4 sm:$0xff]  }
 0xef0   :  { %19102 = vmatpush3.bf16.msra.mxu1 %v19101_v63  ;;  %v14384_v63 = vld [vmem:[%s30892_s3 + $0x788] sm:$0xff] }
 0xef1   :  { %19104 = vmatprep.subr.bf16.mxu1 %v19103_v3  ;;  %v19117_v3 = vpack.c.bf16 %v14318_v55, %v14317_v11  ;;  %v19151_v33 = vpack.c.bf16 %v14384_v63, %v14383_v20  ;;  %v14388_v11 = vld [vmem:[%s30892_s3 + $0x7a8] sm:$0xff]  ;;  %v19127_v55 = vpack.c.bf16 %v14356_v35, %v14355_v6  ;;  %v14339_v20 = vld [vmem:[%s30892_s3 + $0x620] sm:$0xff] }
 0xef2   :  { %v14340_v63 = vld [vmem:[%s30892_s3 + $0x628] sm:$0xff]  ;;  %v14391_v35 = vld [vmem:[%s30892_s3 + $0x7c0] sm:$0xff] }
 0xef3   :  { %13928 = vmatpush1.bf16.xpose.msra.mxu0 %v22616_v49  ;;  %v14367_v49 = vld [vmem:[%s30892_s3 + $0x700] sm:$0xff] }
 0xef4   :  { %19106 = vmatpush3.bf16.msra.mxu1 %v19105_v5  ;;  %13929 = vmatprep.subr.bf16.mxu0 %v22621_v45  ;;  %v19590_v5 = vadd.f32 %v24873_v13, %v29262_v19  ;;  %v19592_v45 = vadd.f32 %v25481_v15, %v29384_v0  ;;  %v19121_v13 = vpack.c.bf16 %v14336_v40, %v14335_v38  ;;  %v14385_v15 = vld [vmem:[%s30892_s3 + $0x790] sm:$0xff]  ;;  %v14386_v19 = vld [vmem:[%s30892_s3 + $0x798] sm:$0xff] }
 0xef5   :  { %19108 = vmatprep.subr.bf16.mxu1 %v19107_v52  ;;  %v29408_v52 = vrot.slane %v29119_v48, %v28973_v50  ;;  %v14357_v40 = vld [vmem:[%s30892_s3 + $0x6b0] sm:$0xff] }
 0xef6   :  { %v14115_v62 = vmax.f32 %v19590_v5, 0.0  ;;  %v14078_v32 = vmax.f32 %v19592_v45, 0.0  ;;  %v14371_v5 = vld [vmem:[%s30892_s3 + $0x720] sm:$0xff]  ;;  %v14372_v45 = vld [vmem:[%s30892_s3 + $0x728] sm:$0xff] }
 0xef8   :  { %19110 = vmatpush3.bf16.msra.mxu1 %v19109_v59  ;;  %v14075_v59 = vmax.f32 %v19587_v41, 0.0  ;;  %v14358_v41 = vld [vmem:[%s30892_s3 + $0x6b8] sm:$0xff] }
 0xef9   :  { %19112 = vmatprep.subr.bf16.mxu1 %v19111_v57  ;;  %v19153_v57 = vpack.c.bf16 %v14368_v4, %v14367_v49  ;;  %v19129_v4 = vpack.c.bf16 %v14340_v63, %v14339_v20  ;;  %v14393_v20 = vld [vmem:[%s30892_s3 + $0x7d0] sm:$0xff]  ;;  %v14394_v63 = vld [vmem:[%s30892_s3 + $0x7d8] sm:$0xff] }
 0xefb   :  { %13930 = vmatpush1.bf16.xpose.msra.mxu0 %v22619_v60  ;;  %v19596_v60 = vadd.f32 %v25483_v16, %v29408_v52  ;;  %v14387_v16 = vld [vmem:[%s30892_s3 + $0x7a0] sm:$0xff] }
 0xefc   :  { %19114 = vmatpush3.bf16.msra.mxu1 %v19113_v43  ;;  %19120 = vmatprep.subr.bf16.mxu0 %v19119_v31  ;;  %v19155_v43 = vpack.c.bf16 %v14386_v19, %v14385_v15  ;;  %v14369_v31 = vld [vmem:[%s30892_s3 + $0x710] sm:$0xff]  ;;  %v19159_v49 = vpack.c.bf16 %v14388_v11, %v14387_v16  ;;  %v14342_v19 = vld [vmem:[%s30892_s3 + $0x638] sm:$0xff]  ;;  %v14375_v16 = vld [vmem:[%s30892_s3 + $0x740] sm:$0xff] }
 0xefd   :  { %19116 = vmatprep.subr.bf16.mxu1 %v19115_v42  ;;  %v19125_v42 = vpack.c.bf16 %v14338_v7, %v14337_v37  ;;  %v19157_v38 = vpack.c.bf16 %v14370_v36, %v14369_v31  ;;  %v14341_v15 = vld [vmem:[%s30892_s3 + $0x630] sm:$0xff]  ;;  %v19161_v37 = vpack.c.bf16 %v14372_v45, %v14371_v5  ;;  %v14359_v7 = vld [vmem:[%s30892_s3 + $0x6c0] sm:$0xff]  ;;  %v14362_v36 = vld [vmem:[%s30892_s3 + $0x6d8] sm:$0xff]  ;;  %v19171_v5 = vpack.c.bf16 %v14394_v63, %v14393_v20 }
 0xefe   :  { %v19133_v6 = vpack.c.bf16 %v14342_v19, %v14341_v15  ;;  %v14361_v31 = vld [vmem:[%s30892_s3 + $0x6d0] sm:$0xff]  ;;  %v14376_v11 = vld [vmem:[%s30892_s3 + $0x748] sm:$0xff]  ;;  %v14347_v19 = vld [vmem:[%s30892_s3 + $0x660] sm:$0xff] }
 0xeff   :  { %v14377_v45 = vld [vmem:[%s30892_s3 + $0x750] sm:$0xff]  ;;  %v14415_v20 = vld [vmem:[%s30892_s3 + $0x880] sm:$0xff]  ;;  %v14416_v63 = vld [vmem:[%s30892_s3 + $0x888] sm:$0xff] }
 0xf00   :  { %19118 = vmatpush3.bf16.msra.mxu1 %v19117_v3  ;;  %v14114_v3 = vmax.f32 %v19589_v2, 0.0  ;;  %v19163_v2 = vpack.c.bf16 %v14390_v34, %v14389_v27  ;;  %v14395_v34 = vld [vmem:[%s30892_s3 + $0x7e0] sm:$0xff] }
 0xf01   :  { %19152 = vmatprep.subr.bf16.mxu1 %v19151_v33  ;;  %v14080_v33 = vmax.f32 %v19596_v60, 0.0  ;;  %v14343_v60 = vld [vmem:[%s30892_s3 + $0x640] sm:$0xff] }
 0xf02   :  { %13932 = vmatmul.mubr.bf16.vlgmr.msra.gmra.mrb[36].mxu0 %v22654_v8  ;;  %v14344_v8 = vld [vmem:[%s30892_s3 + $0x648] sm:$0xff] }
 0xf03   :  { %15207 = vmatmul.mubr.f32.vlgmr.msra.gmra.mrb[60].mxu1 %v14075_v59  ;;  %19122 = vmatpush3.bf16.msra.mxu0 %v19121_v13  ;;  %v19131_v13 = vpack.c.bf16 %v14358_v41, %v14357_v40  ;;  %v14360_v59 = vld [vmem:[%s30892_s3 + $0x6c8] sm:$0xff]  ;;  %v14346_v40 = vld [vmem:[%s30892_s3 + $0x658] sm:$0xff]  ;;  %v19169_v41 = vpack.c.bf16 %v14376_v11, %v14375_v16  ;;  %v14349_v16 = vld [vmem:[%s30892_s3 + $0x670] sm:$0xff] }
 0xf04   :  { %15211 = vmatprep.mubr.f32.mxu1 %v14115_v62  ;;  %15281 = vmatprep.mubr.f32.mxu0 %v14078_v32  ;;  %v14392_v62 = vld [vmem:[%s30892_s3 + $0x7c8] sm:$0xff]  ;;  %v19135_v32 = vpack.c.bf16 %v14360_v59, %v14359_v7  ;;  %v14350_v11 = vld [vmem:[%s30892_s3 + $0x678] sm:$0xff] }
 0xf05   :  { %19154 = vmatpush3.bf16.msra.mxu1 %v19153_v57  ;;  %19124 = vmatprep.subr.bf16.mxu0 %v19123_v56  ;;  %v14373_v57 = vld [vmem:[%s30892_s3 + $0x730] sm:$0xff]  ;;  %v14374_v56 = vld [vmem:[%s30892_s3 + $0x738] sm:$0xff] }
 0xf06   :  { %19156 = vmatprep.subr.bf16.mxu1 %v19155_v43  ;;  %v19165_v43 = vpack.c.bf16 %v14374_v56, %v14373_v57  ;;  %v14366_v57 = vld [vmem:[%s30892_s3 + $0x6f8] sm:$0xff] }
 0xf07   :  { %15212 = vmatmul.mubr.f32.gmra.mrb[62].mxu1 %v14114_v3  ;;  %19126 = vmatpush3.bf16.msra.mxu0 %v19125_v42  ;;  %v19167_v42 = vpack.c.bf16 %v14392_v62, %v14391_v35  ;;  %v19139_v3 = vpack.c.bf16 %v14362_v36, %v14361_v31  ;;  %v14379_v35 = vld [vmem:[%s30892_s3 + $0x760] sm:$0xff]  ;;  %v14380_v62 = vld [vmem:[%s30892_s3 + $0x768] sm:$0xff]  ;;  %v1957_v31 = vrot.slane %v29119_v48, %v28944_v1 }
 0xf08   :  { %15356 = vmatprep.mubr.f32.mxu1 %v14080_v33  ;;  %19128 = vmatprep.subr.bf16.mxu0 %v19127_v55  ;;  %v19137_v55 = vpack.c.bf16 %v14344_v8, %v14343_v60  ;;  %v14363_v33 = vld [vmem:[%s30892_s3 + $0x6e0] sm:$0xff]  ;;  %v14397_v8 = vld [vmem:[%s30892_s3 + $0x7f0] sm:$0xff] }
 0xf09   :  { %19158 = vmatpush3.bf16.msra.mxu1 %v19157_v38  ;;  %v14345_v38 = vld [vmem:[%s30892_s3 + $0x650] sm:$0xff] }
 0xf0a   :  { %19160 = vmatprep.subr.bf16.mxu1 %v19159_v49  ;;  %v14364_v49 = vld [vmem:[%s30892_s3 + $0x6e8] sm:$0xff]  ;;  %v19141_v27 = vpack.c.bf16 %v14346_v40, %v14345_v38  ;;  %v29598_v38 = vld [vmem:[%s30893_s2 + $0x10] sm:$0xff] }
 0xf0b   :  { %19130 = vmatpush3.bf16.msra.mxu0 %v19129_v4  ;;  %v14378_v4 = vld [vmem:[%s30892_s3 + $0x758] sm:$0xff]  ;;  %v19143_v15 = vpack.c.bf16 %v14364_v49, %v14363_v33  ;;  %v19149_v49 = vpack.c.bf16 %v14350_v11, %v14349_v16 }
 0xf0c   :  { %19132 = vmatprep.subr.bf16.mxu0 %v19131_v13  ;;  %v14396_v13 = vld [vmem:[%s30892_s3 + $0x7e8] sm:$0xff]  ;;  %v19173_v59 = vpack.c.bf16 %v14378_v4, %v14377_v45  ;;  %v14382_v33 = vld [vmem:[%s30892_s3 + $0x778] sm:$0xff]  ;;  %v19591_v45 = vadd.f32 %v25477_v46, %v1957_v31  ;;  %v19183_v4 = vpack.c.bf16 %v14416_v63, %v14415_v20  ;;  %v14417_v46 = vld [vmem:[%s30892_s3 + $0x890] sm:$0xff] }
 0xf0d   :  { %19162 = vmatpush3.bf16.msra.mxu1 %v19161_v37  ;;  %v14348_v37 = vld [vmem:[%s30892_s3 + $0x668] sm:$0xff]  ;;  %v14434_v20 = vld [vmem:[%s30892_s3 + $0x918] sm:$0xff] }
 0xf0e   :  { %19164 = vmatprep.subr.bf16.mxu1 %v19163_v2  ;;  %v14365_v2 = vld [vmem:[%s30892_s3 + $0x6f0] sm:$0xff]  ;;  %v19145_v60 = vpack.c.bf16 %v14348_v37, %v14347_v19  ;;  %v14418_v37 = vld [vmem:[%s30892_s3 + $0x898] sm:$0xff] }
 0xf0f   :  { %19134 = vmatpush3.bf16.msra.mxu0 %v19133_v6  ;;  %v19175_v6 = vpack.c.bf16 %v14396_v13, %v14395_v34  ;;  %v14400_v34 = vld [vmem:[%s30892_s3 + $0x808] sm:$0xff]  ;;  %v19594_v13 = vadd.f32 %v25495_v23, %v29384_v0  ;;  %v14431_v23 = vld [vmem:[%s30892_s3 + $0x900] sm:$0xff] }
 0xf10   :  { %19136 = vmatprep.subr.bf16.mxu0 %v19135_v32  ;;  %v14432_v0 = vld [vmem:[%s30892_s3 + $0x908] sm:$0xff] }
 0xf11   :  { %19166 = vmatpush3.bf16.msra.mxu1 %v19165_v43  ;;  %v14398_v43 = vld [vmem:[%s30892_s3 + $0x7f8] sm:$0xff] }
 0xf12   :  { %19168 = vmatprep.subr.bf16.mxu1 %v19167_v42  ;;  %v19147_v42 = vpack.c.bf16 %v14366_v57, %v14365_v2  ;;  %v19179_v40 = vpack.c.bf16 %v14398_v43, %v14397_v8  ;;  %v19598_v57 = vadd.f32 %v25497_v24, %v29408_v52  ;;  %v19187_v8 = vpack.c.bf16 %v14418_v37, %v14417_v46  ;;  %v14401_v24 = vld [vmem:[%s30892_s3 + $0x810] sm:$0xff]  ;;  %v14402_v52 = vld [vmem:[%s30892_s3 + $0x818] sm:$0xff]  ;;  %v14436_v46 = vld [vmem:[%s30892_s3 + $0x928] sm:$0xff] }
 0xf13   :  { %19138 = vmatpush3.bf16.msra.mxu0 %v19137_v55  ;;  %v19177_v55 = vpack.c.bf16 %v14380_v62, %v14379_v35  ;;  %v14450_v35 = vld [vmem:[%s30892_s3 + $0x998] sm:$0xff]  ;;  %v14077_v62 = vmax.f32 %v19591_v45, 0.0  ;;  %v14117_v43 = vmax.f32 %v19594_v13, 0.0 }
 0xf14   :  { %19140 = vmatprep.subr.bf16.mxu0 %v19139_v3  ;;  %v1965_v3 = vrot.slane %v29119_v48, %v29082_v12  ;;  %v14447_v48 = vld [vmem:[%s30892_s3 + $0x980] sm:$0xff]  ;;  %v14119_v63 = vmax.f32 %v19598_v57, 0.0  ;;  %v14405_v57 = vld [vmem:[%s30892_s3 + $0x830] sm:$0xff] }
 0xf15   :  { %19170 = vmatpush3.bf16.msra.mxu1 %v19169_v41  ;;  %v14381_v41 = vld [vmem:[%s30892_s3 + $0x770] sm:$0xff] }
 0xf16   :  { %v29557_v7 = vpop.f32.mrb[36].mxu1  ;;  %19172 = vmatprep.subr.bf16.mxu1 %v19171_v5  ;;  %v14448_v5 = vld [vmem:[%s30892_s3 + $0x988] sm:$0xff]  ;;  %v19181_v19 = vpack.c.bf16 %v14382_v33, %v14381_v41  ;;  %v19597_v11 = vadd.f32 %v25487_v18, %v1965_v3  ;;  %v19189_v41 = vpack.c.bf16 %v14402_v52, %v14401_v24  ;;  %v14451_v18 = vld [vmem:[%s30892_s3 + $0x9a0] sm:$0xff]  ;;  %v14438_v24 = vld [vmem:[%s30892_s3 + $0x938] sm:$0xff] }
 0xf17   :  { %v14060_v56 = vpop.f32.mrb[37].mxu1  ;;  %19142 = vmatpush3.bf16.msra.mxu0 %v19141_v27  ;;  %v14399_v27 = vld [vmem:[%s30892_s3 + $0x800] sm:$0xff]  ;;  %v19215_v2 = vpack.c.bf16 %v14448_v5, %v14447_v48 }
 0xf18   :  { %v29571_v32 = vpop.f32.mrb[38].mxu1  ;;  %19144 = vmatprep.subr.bf16.mxu0 %v19143_v15  ;;  %v29623_v15 = vrot.slane %v29598_v38, %v28530_v47  ;;  %v29642_v56 = vrot.slane %v29598_v38, %v28691_v39  ;;  %v14403_v48 = vld [vmem:[%s30892_s3 + $0x820] sm:$0xff] }
 0xf19   :  { %v14063_v36 = vpop.f32.mrb[39].mxu1  ;;  %19174 = vmatpush3.bf16.msra.mxu1 %v19173_v59  ;;  %v19595_v59 = vadd.f32 %v25479_v14, %v1965_v3  ;;  %v14449_v14 = vld [vmem:[%s30892_s3 + $0x990] sm:$0xff]  ;;  %v14452_v3 = vld [vmem:[%s30892_s3 + $0x9a8] sm:$0xff] }
 0xf1a   :  { %19176 = vmatprep.subr.bf16.mxu1 %v19175_v6  ;;  %v19185_v6 = vpack.c.bf16 %v14400_v34, %v14399_v27  ;;  %v19600_v36 = vadd.f32 %v26095_v21, %v29623_v15  ;;  %v14433_v21 = vld [vmem:[%s30892_s3 + $0x910] sm:$0xff]  ;;  %v14422_v27 = vld [vmem:[%s30892_s3 + $0x8b8] sm:$0xff]  ;;  %v14118_v34 = vmax.f32 %v19597_v11, 0.0  ;;  %v19223_v13 = vpack.c.bf16 %v14452_v3, %v14451_v18 }
 0xf1b   :  { %19146 = vmatpush3.bf16.msra.mxu0 %v19145_v60  ;;  %v19593_v60 = vadd.f32 %v25485_v17, %v1957_v31  ;;  %v14419_v17 = vld [vmem:[%s30892_s3 + $0x8a0] sm:$0xff]  ;;  %v14420_v31 = vld [vmem:[%s30892_s3 + $0x8a8] sm:$0xff]  ;;  %v14079_v16 = vmax.f32 %v19595_v59, 0.0  ;;  %v19221_v45 = vpack.c.bf16 %v14434_v20, %v14433_v21  ;;  %v14425_v11 = vld [vmem:[%s30892_s3 + $0x8d0] sm:$0xff] }
 0xf1c   :  { %19148 = vmatprep.subr.bf16.mxu0 %v19147_v42  ;;  %v19217_v42 = vpack.c.bf16 %v14432_v0, %v14431_v23  ;;  %v14082_v5 = vmax.f32 %v19600_v36, 0.0  ;;  %v14454_v23 = vld [vmem:[%s30892_s3 + $0x9b8] sm:$0xff]  ;;  %v14456_v36 = vld [vmem:[%s30892_s3 + $0x9c8] sm:$0xff]  ;;  %v14439_v20 = vld [vmem:[%s30892_s3 + $0x940] sm:$0xff] }
 0xf1d   :  { %19178 = vmatpush3.bf16.msra.mxu1 %v19177_v55  ;;  %v19219_v55 = vpack.c.bf16 %v14450_v35, %v14449_v14  ;;  %v14116_v33 = vmax.f32 %v19593_v60, 0.0  ;;  %v14423_v35 = vld [vmem:[%s30892_s3 + $0x8c0] sm:$0xff]  ;;  %v14458_v18 = vld [vmem:[%s30892_s3 + $0x9d8] sm:$0xff] }
 0xf1e   :  { %19180 = vmatprep.subr.bf16.mxu1 %v19179_v40  ;;  %v19604_v40 = vadd.f32 %v26097_v22, %v29642_v56  ;;  %v14404_v22 = vld [vmem:[%s30892_s3 + $0x828] sm:$0xff] }
 0xf1f   :  { %19150 = vmatpush3.bf16.msra.mxu0 %v19149_v49  ;;  %v19191_v49 = vpack.c.bf16 %v14420_v31, %v14419_v17  ;;  %v19193_v59 = vpack.c.bf16 %v14404_v22, %v14403_v48  ;;  %v14407_v17 = vld [vmem:[%s30892_s3 + $0x840] sm:$0xff]  ;;  %v14408_v31 = vld [vmem:[%s30892_s3 + $0x848] sm:$0xff] }
 0xf20   :  { %19184 = vmatprep.subr.bf16.mxu0 %v19183_v4  ;;  %v14421_v4 = vld [vmem:[%s30892_s3 + $0x8b0] sm:$0xff]  ;;  %v14084_v37 = vmax.f32 %v19604_v40, 0.0  ;;  %v19201_v40 = vpack.c.bf16 %v14408_v31, %v14407_v17  ;;  %v14427_v22 = vld [vmem:[%s30892_s3 + $0x8e0] sm:$0xff]  ;;  %v14414_v17 = vld [vmem:[%s30892_s3 + $0x878] sm:$0xff] }
 0xf21   :  { %19182 = vmatpush3.bf16.msra.mxu1 %v19181_v19  ;;  %v14435_v19 = vld [vmem:[%s30892_s3 + $0x920] sm:$0xff]  ;;  %v19195_v0 = vpack.c.bf16 %v14422_v27, %v14421_v4  ;;  %v14441_v4 = vld [vmem:[%s30892_s3 + $0x950] sm:$0xff]  ;;  %v14442_v27 = vld [vmem:[%s30892_s3 + $0x958] sm:$0xff] }
 0xf22   :  { %15282 = vmatmul.mubr.f32.vlgmr.msra.gmra.mrb[40].mxu0 %v14077_v62  ;;  %19216 = vmatprep.subr.bf16.mxu1 %v19215_v2  ;;  %v14453_v2 = vld [vmem:[%s30892_s3 + $0x9b0] sm:$0xff]  ;;  %v19225_v14 = vpack.c.bf16 %v14436_v46, %v14435_v19  ;;  %v14424_v62 = vld [vmem:[%s30892_s3 + $0x8c8] sm:$0xff] }
 0xf23   :  { %15286 = vmatprep.mubr.f32.mxu0 %v14117_v43  ;;  %19186 = vmatpush3.bf16.msra.mxu0 %v19185_v6  ;;  %v14406_v6 = vld [vmem:[%s30892_s3 + $0x838] sm:$0xff]  ;;  %v19227_v60 = vpack.c.bf16 %v14454_v23, %v14453_v2  ;;  %v14455_v43 = vld [vmem:[%s30892_s3 + $0x9c0] sm:$0xff]  ;;  %v14460_v19 = vld [vmem:[%s30892_s3 + $0x9e8] sm:$0xff]  ;;  %v19237_v23 = vpack.c.bf16 %v14442_v27, %v14441_v4  ;;  %v19602_v4 = vadd.f32 %v26109_v29, %v29623_v15 }
 0xf24   :  { %15357 = vmatmul.mubr.f32.vlgmr.msra.gmra.mrb[64].mxu1 %v14079_v16  ;;  %19188 = vmatprep.subr.bf16.mxu0 %v19187_v8  ;;  %v14437_v8 = vld [vmem:[%s30892_s3 + $0x930] sm:$0xff]  ;;  %v19197_v52 = vpack.c.bf16 %v14406_v6, %v14405_v57  ;;  %v19231_v21 = vpack.c.bf16 %v14456_v36, %v14455_v43  ;;  %v14430_v57 = vld [vmem:[%s30892_s3 + $0x8f8] sm:$0xff]  ;;  %v1973_v43 = vrot.slane %v29598_v38, %v28646_v28  ;;  %v14495_v29 = vld [vmem:[%s30892_s3 + $0xb00] sm:$0xff] }
 0xf25   :  { %15361 = vmatprep.mubr.f32.mxu1 %v14119_v63  ;;  %19218 = vmatpush3.bf16.msra.mxu1 %v19217_v42  ;;  %v19199_v42 = vpack.c.bf16 %v14424_v62, %v14423_v35  ;;  %v19229_v16 = vpack.c.bf16 %v14438_v24, %v14437_v8  ;;  %v14440_v63 = vld [vmem:[%s30892_s3 + $0x948] sm:$0xff]  ;;  %v14443_v35 = vld [vmem:[%s30892_s3 + $0x960] sm:$0xff]  ;;  %v14461_v24 = vld [vmem:[%s30892_s3 + $0x9f0] sm:$0xff]  ;;  %v29843_v27 = vrot.slane %v29598_v38, %v28829_v58 }
 0xf26   :  { %15287 = vmatmul.mubr.f32.gmra.mrb[42].mxu0 %v14116_v33  ;;  %19220 = vmatprep.subr.bf16.mxu1 %v19219_v55  ;;  %v14426_v55 = vld [vmem:[%s30892_s3 + $0x8d8] sm:$0xff]  ;;  %v14409_v33 = vld [vmem:[%s30892_s3 + $0x850] sm:$0xff]  ;;  %v19233_v48 = vpack.c.bf16 %v14440_v63, %v14439_v20  ;;  %v14444_v62 = vld [vmem:[%s30892_s3 + $0x968] sm:$0xff] }
 0xf27   :  { %19190 = vmatpush3.bf16.msra.mxu0 %v19189_v41  ;;  %15431 = vmatprep.mubr.f32.mxu0 %v14082_v5  ;;  %v14457_v41 = vld [vmem:[%s30892_s3 + $0x9d0] sm:$0xff]  ;;  %v19203_v3 = vpack.c.bf16 %v14426_v55, %v14425_v11  ;;  %v14428_v5 = vld [vmem:[%s30892_s3 + $0x8e8] sm:$0xff]  ;;  %v14479_v11 = vld [vmem:[%s30892_s3 + $0xa80] sm:$0xff] }
 0xf28   :  { %15362 = vmatmul.mubr.f32.gmra.mrb[66].mxu1 %v14118_v34  ;;  %19192 = vmatprep.subr.bf16.mxu0 %v19191_v49  ;;  %v14410_v49 = vld [vmem:[%s30892_s3 + $0x858] sm:$0xff]  ;;  %v19207_v46 = vpack.c.bf16 %v14428_v5, %v14427_v22  ;;  %v14480_v55 = vld [vmem:[%s30892_s3 + $0xa88] sm:$0xff]  ;;  %v14463_v5 = vld [vmem:[%s30892_s3 + $0xa00] sm:$0xff] }
 0xf29   :  { %19222 = vmatpush3.bf16.msra.mxu1 %v19221_v45  ;;  %15506 = vmatprep.mubr.f32.mxu1 %v14084_v37  ;;  %v19235_v45 = vpack.c.bf16 %v14458_v18, %v14457_v41  ;;  %v19205_v34 = vpack.c.bf16 %v14410_v49, %v14409_v33  ;;  %v14411_v37 = vld [vmem:[%s30892_s3 + $0x860] sm:$0xff]  ;;  %v14446_v41 = vld [vmem:[%s30892_s3 + $0x978] sm:$0xff]  ;;  %v14512_v49 = vld [vmem:[%s30892_s3 + $0xb88] sm:$0xff]  ;;  %v19247_v22 = vpack.c.bf16 %v14480_v55, %v14479_v11 }
 0xf2a   :  { %19224 = vmatprep.subr.bf16.mxu1 %v19223_v13  ;;  %v14459_v13 = vld [vmem:[%s30892_s3 + $0x9e0] sm:$0xff]  ;;  %v14496_v15 = vld [vmem:[%s30892_s3 + $0xb08] sm:$0xff] }
 0xf2b   :  { %19194 = vmatpush3.bf16.msra.mxu0 %v19193_v59  ;;  %v14412_v59 = vld [vmem:[%s30892_s3 + $0x868] sm:$0xff]  ;;  %v14511_v33 = vld [vmem:[%s30892_s3 + $0xb80] sm:$0xff] }
 0xf2c   :  { %19196 = vmatprep.subr.bf16.mxu0 %v19195_v0  ;;  %v14429_v0 = vld [vmem:[%s30892_s3 + $0x8f0] sm:$0xff]  ;;  %v19209_v8 = vpack.c.bf16 %v14412_v59, %v14411_v37  ;;  %v19606_v37 = vadd.f32 %v26111_v30, %v29642_v56  ;;  %v29862_v59 = vrot.slane %v29598_v38, %v28973_v50  ;;  %v14466_v56 = vld [vmem:[%s30892_s3 + $0xa18] sm:$0xff] }
 0xf2d   :  { %19226 = vmatpush3.bf16.msra.mxu1 %v19225_v14  ;;  %v19239_v14 = vpack.c.bf16 %v14460_v19, %v14459_v13  ;;  %v19211_v36 = vpack.c.bf16 %v14430_v57, %v14429_v0  ;;  %v14482_v13 = vld [vmem:[%s30892_s3 + $0xa98] sm:$0xff]  ;;  %v19601_v57 = vadd.f32 %v26099_v25, %v1973_v43  ;;  %v14465_v30 = vld [vmem:[%s30892_s3 + $0xa10] sm:$0xff]  ;;  %v14483_v25 = vld [vmem:[%s30892_s3 + $0xaa0] sm:$0xff] }
 0xf2e   :  { %19228 = vmatprep.subr.bf16.mxu1 %v19227_v60 }
 0xf2f   :  { %19198 = vmatpush3.bf16.msra.mxu0 %v19197_v52  ;;  %v14462_v52 = vld [vmem:[%s30892_s3 + $0x9f8] sm:$0xff]  ;;  %v14120_v11 = vmax.f32 %v19601_v57, 0.0 }
 0xf30   :  { %19200 = vmatprep.subr.bf16.mxu0 %v19199_v42  ;;  %v14413_v42 = vld [vmem:[%s30892_s3 + $0x870] sm:$0xff]  ;;  %v19243_v63 = vpack.c.bf16 %v14462_v52, %v14461_v24 }
 0xf31   :  { %19230 = vmatpush3.bf16.msra.mxu1 %v19229_v16  ;;  %v19241_v16 = vpack.c.bf16 %v14444_v62, %v14443_v35  ;;  %v19608_v35 = vadd.f32 %v26719_v53, %v29843_v27  ;;  %v19281_v62 = vpack.c.bf16 %v14496_v15, %v14495_v29  ;;  %v14497_v53 = vld [vmem:[%s30892_s3 + $0xb10] sm:$0xff]  ;;  %v14488_v29 = vld [vmem:[%s30892_s3 + $0xac8] sm:$0xff] }
 0xf32   :  { %19232 = vmatprep.subr.bf16.mxu1 %v19231_v21  ;;  %v1981_v21 = vrot.slane %v29598_v38, %v28800_v44 }
 0xf33   :  { %19202 = vmatpush3.bf16.msra.mxu0 %v19201_v40  ;;  %v14445_v40 = vld [vmem:[%s30892_s3 + $0x970] sm:$0xff] }
 0xf34   :  { %19204 = vmatprep.subr.bf16.mxu0 %v19203_v3  ;;  %v19213_v3 = vpack.c.bf16 %v14414_v17, %v14413_v42  ;;  %v19603_v19 = vadd.f32 %v26093_v10, %v1981_v21  ;;  %v14513_v10 = vld [vmem:[%s30892_s3 + $0xb90] sm:$0xff]  ;;  %v19605_v52 = vadd.f32 %v26101_v26, %v1981_v21  ;;  %v14123_v42 = vmax.f32 %v19606_v37, 0.0  ;;  %v14515_v26 = vld [vmem:[%s30892_s3 + $0xba0] sm:$0xff] }
 0xf35   :  { %19234 = vmatpush3.bf16.msra.mxu1 %v19233_v48  ;;  %v19599_v48 = vadd.f32 %v26091_v9, %v1973_v43  ;;  %v14481_v9 = vld [vmem:[%s30892_s3 + $0xa90] sm:$0xff]  ;;  %v19612_v17 = vadd.f32 %v26721_v54, %v29862_v59  ;;  %v14467_v21 = vld [vmem:[%s30892_s3 + $0xa20] sm:$0xff]  ;;  %v14468_v54 = vld [vmem:[%s30892_s3 + $0xa28] sm:$0xff] }
 0xf36   :  { %v18184_v2 = vpop.f32.mrb[40].mxu1  ;;  %19236 = vmatprep.subr.bf16.mxu1 %v19235_v45  ;;  %v14464_v45 = vld [vmem:[%s30892_s3 + $0xa08] sm:$0xff]  ;;  %v14083_v24 = vmax.f32 %v19603_v19, 0.0  ;;  %v14501_v37 = vld [vmem:[%s30892_s3 + $0xb30] sm:$0xff] }
 0xf37   :  { %v18185_v6 = vpop.f32.mrb[41].mxu1  ;;  %19206 = vmatpush3.bf16.msra.mxu0 %v19205_v34  ;;  %v19245_v34 = vpack.c.bf16 %v14446_v41, %v14445_v40  ;;  %v14081_v0 = vmax.f32 %v19599_v48, 0.0  ;;  %v14485_v40 = vld [vmem:[%s30892_s3 + $0xab0] sm:$0xff]  ;;  %v14486_v41 = vld [vmem:[%s30892_s3 + $0xab8] sm:$0xff]  ;;  %v14500_v48 = vld [vmem:[%s30892_s3 + $0xb28] sm:$0xff] }
 0xf38   :  { %v29794_v60 = vadd.f32 %v18185_v6, %v18184_v2  ;;  %19208 = vmatprep.subr.bf16.mxu0 %v19207_v46  ;;  %v19279_v46 = vpack.c.bf16 %v14512_v49, %v14511_v33  ;;  %v19249_v2 = vpack.c.bf16 %v14464_v45, %v14463_v5  ;;  %v19251_v6 = vpack.c.bf16 %v14482_v13, %v14481_v9  ;;  %v14499_v49 = vld [vmem:[%s30892_s3 + $0xb20] sm:$0xff]  ;;  %v14517_v45 = vld [vmem:[%s30892_s3 + $0xbb0] sm:$0xff]  ;;  %v14470_v13 = vld [vmem:[%s30892_s3 + $0xa38] sm:$0xff] }
 0xf39   :  { %19238 = vmatpush3.bf16.msra.mxu1 %v19237_v23  ;;  %v14514_v23 = vld [vmem:[%s30892_s3 + $0xb98] sm:$0xff]  ;;  %v19257_v5 = vpack.c.bf16 %v14468_v54, %v14467_v21  ;;  %v14469_v9 = vld [vmem:[%s30892_s3 + $0xa30] sm:$0xff]  ;;  %v19289_v19 = vpack.c.bf16 %v14500_v48, %v14499_v49  ;;  %v14523_v54 = vld [vmem:[%s30892_s3 + $0xbe0] sm:$0xff] }
 0xf3a   :  { %v18187_v31 = vpop.f32.mrb[42].mxu1  ;;  %19240 = vmatprep.subr.bf16.mxu1 %v19239_v14  ;;  %v14121_v14 = vmax.f32 %v19602_v4, 0.0  ;;  %v19283_v43 = vpack.c.bf16 %v14514_v23, %v14513_v10  ;;  %v14518_v4 = vld [vmem:[%s30892_s3 + $0xbb8] sm:$0xff]  ;;  %v19261_v10 = vpack.c.bf16 %v14470_v13, %v14469_v9  ;;  %v14519_v23 = vld [vmem:[%s30892_s3 + $0xbc0] sm:$0xff]  ;;  %v14525_v9 = vld [vmem:[%s30892_s3 + $0xbf0] sm:$0xff] }
 0xf3b   :  { %v18188_v20 = vpop.f32.mrb[43].mxu1  ;;  %19210 = vmatpush3.bf16.msra.mxu0 %v19209_v8  ;;  %v14484_v8 = vld [vmem:[%s30892_s3 + $0xaa8] sm:$0xff]  ;;  %v19291_v15 = vpack.c.bf16 %v14518_v4, %v14517_v45  ;;  %v14494_v49 = vld [vmem:[%s30892_s3 + $0xaf8] sm:$0xff] }
 0xf3c   :  { %v29824_v18 = vadd.f32 %v18188_v20, %v18187_v31  ;;  %19212 = vmatprep.subr.bf16.mxu0 %v19211_v36  ;;  %v14498_v36 = vld [vmem:[%s30892_s3 + $0xb18] sm:$0xff]  ;;  %v19253_v31 = vpack.c.bf16 %v14466_v56, %v14465_v30  ;;  %v19255_v55 = vpack.c.bf16 %v14484_v8, %v14483_v25  ;;  %v14086_v20 = vmax.f32 %v19608_v35, 0.0  ;;  %v14472_v30 = vld [vmem:[%s30892_s3 + $0xa48] sm:$0xff]  ;;  %v14503_v25 = vld [vmem:[%s30892_s3 + $0xb40] sm:$0xff] }
 0xf3d   :  { %19242 = vmatpush3.bf16.msra.mxu1 %v19241_v16  ;;  %v14516_v16 = vld [vmem:[%s30892_s3 + $0xba8] sm:$0xff]  ;;  %v14490_v35 = vld [vmem:[%s30892_s3 + $0xad8] sm:$0xff] }
 0xf3e   :  { %19244 = vmatprep.subr.bf16.mxu1 %v19243_v63  ;;  %v19285_v63 = vpack.c.bf16 %v14498_v36, %v14497_v53  ;;  %v19287_v33 = vpack.c.bf16 %v14516_v16, %v14515_v26  ;;  %v14504_v8 = vld [vmem:[%s30892_s3 + $0xb48] sm:$0xff]  ;;  %v14473_v36 = vld [vmem:[%s30892_s3 + $0xa50] sm:$0xff]  ;;  %v14526_v13 = vld [vmem:[%s30892_s3 + $0xbf8] sm:$0xff] }
 0xf3f   :  { %19214 = vmatpush3.bf16.msra.mxu0 %v19213_v3  ;;  %v14122_v3 = vmax.f32 %v19605_v52, 0.0  ;;  %v14521_v52 = vld [vmem:[%s30892_s3 + $0xbd0] sm:$0xff]  ;;  %v14492_v26 = vld [vmem:[%s30892_s3 + $0xae8] sm:$0xff] }
 0xf40   :  { %19248 = vmatprep.subr.bf16.mxu0 %v19247_v22  ;;  %v14088_v22 = vmax.f32 %v19612_v17, 0.0  ;;  %v19297_v17 = vpack.c.bf16 %v14504_v8, %v14503_v25  ;;  %v14508_v45 = vld [vmem:[%s30892_s3 + $0xb68] sm:$0xff]  ;;  %v14575_v25 = vld [vmem:[%s30892_s3 + $0xd80] sm:$0xff] }
 0xf41   :  { %19246 = vmatpush3.bf16.msra.mxu1 %v19245_v34  ;;  %v19259_v34 = vpack.c.bf16 %v14486_v41, %v14485_v40  ;;  %v14475_v40 = vld [vmem:[%s30892_s3 + $0xa60] sm:$0xff]  ;;  %v14476_v41 = vld [vmem:[%s30892_s3 + $0xa68] sm:$0xff] }
 0xf42   :  { %15432 = vmatmul.mubr.f32.vlgmr.msra.gmra.mrb[44].mxu0 %v14081_v0  ;;  %19280 = vmatprep.subr.bf16.mxu1 %v19279_v46  ;;  %v14487_v46 = vld [vmem:[%s30892_s3 + $0xac0] sm:$0xff]  ;;  %v14520_v0 = vld [vmem:[%s30892_s3 + $0xbc8] sm:$0xff] }
 0xf43   :  { %15436 = vmatprep.mubr.f32.mxu0 %v14121_v14  ;;  %19250 = vmatpush3.bf16.msra.mxu0 %v19249_v2  ;;  %v14502_v2 = vld [vmem:[%s30892_s3 + $0xb38] sm:$0xff]  ;;  %v19263_v57 = vpack.c.bf16 %v14488_v29, %v14487_v46  ;;  %v14489_v14 = vld [vmem:[%s30892_s3 + $0xad0] sm:$0xff] }
 0xf44   :  { %15507 = vmatmul.mubr.f32.vlgmr.msra.gmra.mrb[68].mxu1 %v14083_v24  ;;  %19252 = vmatprep.subr.bf16.mxu0 %v19251_v6  ;;  %v14471_v6 = vld [vmem:[%s30892_s3 + $0xa40] sm:$0xff]  ;;  %v19293_v56 = vpack.c.bf16 %v14502_v2, %v14501_v37  ;;  %v19267_v53 = vpack.c.bf16 %v14490_v35, %v14489_v14  ;;  %v14478_v37 = vld [vmem:[%s30892_s3 + $0xa78] sm:$0xff]  ;;  %v14509_v14 = vld [vmem:[%s30892_s3 + $0xb70] sm:$0xff] }
 0xf45   :  { %15511 = vmatprep.mubr.f32.mxu1 %v14123_v42  ;;  %19282 = vmatpush3.bf16.msra.mxu1 %v19281_v62  ;;  %v19295_v62 = vpack.c.bf16 %v14520_v0, %v14519_v23  ;;  %v19265_v24 = vpack.c.bf16 %v14472_v30, %v14471_v6  ;;  %v14474_v42 = vld [vmem:[%s30892_s3 + $0xa58] sm:$0xff]  ;;  %v14544_v23 = vld [vmem:[%s30892_s3 + $0xc88] sm:$0xff]  ;;  %v1997_v0 = vrot.slane %v29598_v38, %v29082_v12 }
 0xf46   :  { %15437 = vmatmul.mubr.f32.gmra.mrb[46].mxu0 %v14120_v11  ;;  %19284 = vmatprep.subr.bf16.mxu1 %v19283_v43  ;;  %v14522_v43 = vld [vmem:[%s30892_s3 + $0xbd8] sm:$0xff]  ;;  %v14505_v11 = vld [vmem:[%s30892_s3 + $0xb50] sm:$0xff]  ;;  %v19269_v21 = vpack.c.bf16 %v14474_v42, %v14473_v36  ;;  %v19610_v36 = vadd.f32 %v26733_v61, %v29843_v27  ;;  %v14559_v27 = vld [vmem:[%s30892_s3 + $0xd00] sm:$0xff] }
 0xf47   :  { %19254 = vmatpush3.bf16.msra.mxu0 %v19253_v31  ;;  %15581 = vmatprep.mubr.f32.mxu0 %v14086_v20  ;;  %v14491_v31 = vld [vmem:[%s30892_s3 + $0xae0] sm:$0xff]  ;;  %v19299_v16 = vpack.c.bf16 %v14522_v43, %v14521_v52  ;;  %v14524_v20 = vld [vmem:[%s30892_s3 + $0xbe8] sm:$0xff]  ;;  %v14510_v35 = vld [vmem:[%s30892_s3 + $0xb78] sm:$0xff] }
 0xf48   :  { %15512 = vmatmul.mubr.f32.gmra.mrb[70].mxu1 %v14122_v3  ;;  %19256 = vmatprep.subr.bf16.mxu0 %v19255_v55  ;;  %v14506_v55 = vld [vmem:[%s30892_s3 + $0xb58] sm:$0xff]  ;;  %v14527_v43 = vld [vmem:[%s30892_s3 + $0xc00] sm:$0xff] }
 0xf49   :  { %19286 = vmatpush3.bf16.msra.mxu1 %v19285_v63  ;;  %15656 = vmatprep.mubr.f32.mxu1 %v14088_v22  ;;  %v19271_v63 = vpack.c.bf16 %v14492_v26, %v14491_v31  ;;  %v19301_v3 = vpack.c.bf16 %v14506_v55, %v14505_v11  ;;  %v19303_v22 = vpack.c.bf16 %v14524_v20, %v14523_v54  ;;  %v14546_v31 = vld [vmem:[%s30892_s3 + $0xc98] sm:$0xff]  ;;  %v30923_v26 = vld [vmem:[#allocation2_spill] sm:$0xff]  ;;  %v14560_v55 = vld [vmem:[%s30892_s3 + $0xd08] sm:$0xff] }
 0xf4a   :  { %19288 = vmatprep.subr.bf16.mxu1 %v19287_v33  ;;  %v14493_v33 = vld [vmem:[%s30892_s3 + $0xaf0] sm:$0xff] }
 0xf4b   :  { %19258 = vmatpush3.bf16.msra.mxu0 %v19257_v5  ;;  %v14507_v5 = vld [vmem:[%s30892_s3 + $0xb60] sm:$0xff]  ;;  %v19275_v29 = vpack.c.bf16 %v14494_v49, %v14493_v33 }
 0xf4c   :  { %19260 = vmatprep.subr.bf16.mxu0 %v19259_v34  ;;  %v19273_v34 = vpack.c.bf16 %v14476_v41, %v14475_v40  ;;  %v19305_v2 = vpack.c.bf16 %v14508_v45, %v14507_v5  ;;  %v14578_v40 = vld [vmem:[%s30892_s3 + $0xd98] sm:$0xff]  ;;  %v30926_v5 = vld [vmem:[#allocation8_spill] sm:$0xff] }
 0xf4d   :  { %19290 = vmatpush3.bf16.msra.mxu1 %v19289_v19  ;;  %v1989_v19 = vrot.slane %v29598_v38, %v28944_v1 }
 0xf4e   :  { %19292 = vmatprep.subr.bf16.mxu1 %v19291_v15  ;;  %v14477_v15 = vld [vmem:[%s30892_s3 + $0xa70] sm:$0xff] }
 0xf4f   :  { %19262 = vmatpush3.bf16.msra.mxu0 %v19261_v10  ;;  %v14543_v10 = vld [vmem:[%s30892_s3 + $0xc80] sm:$0xff]  ;;  %v19607_v8 = vadd.f32 %v26715_v51, %v1989_v19  ;;  %v19309_v51 = vpack.c.bf16 %v14510_v35, %v14509_v14 }
 0xf50   :  { %19264 = vmatprep.subr.bf16.mxu0 %v19263_v57  ;;  %v30039_v57 = vld [vmem:[%s30893_s2 + $0x18] sm:$0xff]  ;;  %v19311_v52 = vpack.c.bf16 %v14544_v23, %v14543_v10 }
 0xf51   :  { %19294 = vmatpush3.bf16.msra.mxu1 %v19293_v56  ;;  %v19307_v56 = vpack.c.bf16 %v14526_v13, %v14525_v9  ;;  %v30067_v42 = vrot.slane %v30039_v57, %v28530_v47  ;;  %v30089_v20 = vrot.slane %v30039_v57, %v28691_v39  ;;  %v14085_v41 = vmax.f32 %v19607_v8, 0.0  ;;  %v14548_v9 = vld [vmem:[%s30892_s3 + $0xca8] sm:$0xff]  ;;  %v30928_v10 = vld [vmem:[#allocation9_spill] sm:$0xff]  ;;  %v14549_v8 = vld [vmem:[%s30892_s3 + $0xcb0] sm:$0xff] }
 0xf52   :  { %19296 = vmatprep.subr.bf16.mxu1 %v19295_v62  ;;  %v19277_v62 = vpack.c.bf16 %v14478_v37, %v14477_v15  ;;  %v14561_v15 = vld [vmem:[%s30892_s3 + $0xd10] sm:$0xff]  ;;  %v14562_v37 = vld [vmem:[%s30892_s3 + $0xd18] sm:$0xff] }
 0xf53   :  { %19266 = vmatpush3.bf16.msra.mxu0 %v19265_v24  ;;  %v19616_v45 = vadd.f32 %v30926_v5, %v30067_v42  ;;  %v19620_v23 = vadd.f32 %v30928_v10, %v30089_v20  ;;  %v14553_v5 = vld [vmem:[%s30892_s3 + $0xcd0] sm:$0xff]  ;;  %v14555_v10 = vld [vmem:[%s30892_s3 + $0xce0] sm:$0xff] }
 0xf54   :  { %19268 = vmatprep.subr.bf16.mxu0 %v19267_v53  ;;  %v14528_v53 = vld [vmem:[%s30892_s3 + $0xc08] sm:$0xff] }
 0xf55   :  { %19298 = vmatpush3.bf16.msra.mxu1 %v19297_v17  ;;  %v14545_v17 = vld [vmem:[%s30892_s3 + $0xc90] sm:$0xff] }
 0xf56   :  { %v18222_v48 = vpop.f32.mrb[44].mxu1  ;;  %19300 = vmatprep.subr.bf16.mxu1 %v19299_v16  ;;  %v19611_v16 = vadd.f32 %v30923_v26, %v1997_v0  ;;  %v19315_v49 = vpack.c.bf16 %v14546_v31, %v14545_v17  ;;  %v14581_v31 = vld [vmem:[%s30892_s3 + $0xdb0] sm:$0xff]  ;;  %v14582_v26 = vld [vmem:[%s30892_s3 + $0xdb8] sm:$0xff] }
 0xf57   :  { %v18223_v4 = vpop.f32.mrb[45].mxu1  ;;  %19270 = vmatpush3.bf16.msra.mxu0 %v19269_v21  ;;  %v30924_v21 = vld [vmem:[#allocation5_spill] sm:$0xff] }
 0xf58   :  { %v18224_v46 = vadd.f32 %v18223_v4, %v18222_v48  ;;  %19272 = vmatprep.subr.bf16.mxu0 %v19271_v63  ;;  %v19614_v54 = vadd.f32 %v30924_v21, %v29862_v59  ;;  %v14577_v63 = vld [vmem:[%s30892_s3 + $0xd90] sm:$0xff]  ;;  %v14530_v48 = vld [vmem:[%s30892_s3 + $0xc18] sm:$0xff]  ;;  %v19345_v4 = vpack.c.bf16 %v14560_v55, %v14559_v27  ;;  %v14087_v13 = vmax.f32 %v19611_v16, 0.0  ;;  %v14551_v21 = vld [vmem:[%s30892_s3 + $0xcc0] sm:$0xff] }
 0xf59   :  { %19302 = vmatpush3.bf16.msra.mxu1 %v19301_v3  ;;  %v30925_v3 = vld [vmem:[#allocation3_spill] sm:$0xff]  ;;  %v14529_v59 = vld [vmem:[%s30892_s3 + $0xc10] sm:$0xff]  ;;  %v14534_v27 = vld [vmem:[%s30892_s3 + $0xc38] sm:$0xff] }
 0xf5a   :  { %v30042_v6 = vadd.f32 %v18224_v46, %v29794_v60  ;;  %v18225_v30 = vpop.f32.mrb[46].mxu1  ;;  %19304 = vmatprep.subr.bf16.mxu1 %v19303_v22  ;;  %v14576_v60 = vld [vmem:[%s30892_s3 + $0xd88] sm:$0xff]  ;;  %v19609_v33 = vadd.f32 %v30925_v3, %v1989_v19  ;;  %v14125_v22 = vmax.f32 %v19610_v36, 0.0  ;;  %v30927_v19 = vld [vmem:[#allocation4_spill] sm:$0xff]  ;;  %v14583_v3 = vld [vmem:[%s30892_s3 + $0xdc0] sm:$0xff] }
 0xf5b   :  { %v18226_v38 = vpop.f32.mrb[47].mxu1  ;;  %19274 = vmatpush3.bf16.msra.mxu0 %v19273_v34  ;;  %v19343_v61 = vpack.c.bf16 %v14576_v60, %v14575_v25  ;;  %v14547_v34 = vld [vmem:[%s30892_s3 + $0xca0] sm:$0xff]  ;;  %v19613_v46 = vadd.f32 %v30927_v19, %v1997_v0  ;;  %v14090_v25 = vmax.f32 %v19616_v45, 0.0  ;;  %v19349_v60 = vpack.c.bf16 %v14562_v37, %v14561_v15  ;;  %v14564_v36 = vld [vmem:[%s30892_s3 + $0xd28] sm:$0xff]  ;;  %v14554_v45 = vld [vmem:[%s30892_s3 + $0xcd8] sm:$0xff] }
 0xf5c   :  { %v18227_v24 = vadd.f32 %v18226_v38, %v18225_v30  ;;  %19276 = vmatprep.subr.bf16.mxu0 %v19275_v29  ;;  %v19347_v29 = vpack.c.bf16 %v14578_v40, %v14577_v63  ;;  %v19317_v30 = vpack.c.bf16 %v14530_v48, %v14529_v59  ;;  %v14579_v0 = vld [vmem:[%s30892_s3 + $0xda0] sm:$0xff]  ;;  %v14124_v14 = vmax.f32 %v19609_v33, 0.0  ;;  %v14565_v63 = vld [vmem:[%s30892_s3 + $0xd30] sm:$0xff]  ;;  %v14566_v40 = vld [vmem:[%s30892_s3 + $0xd38] sm:$0xff] }
 0xf5d   :  { %19306 = vmatpush3.bf16.msra.mxu1 %v19305_v2  ;;  %v14127_v2 = vmax.f32 %v19614_v54, 0.0  ;;  %v19319_v35 = vpack.c.bf16 %v14548_v9, %v14547_v34  ;;  %v14531_v38 = vld [vmem:[%s30892_s3 + $0xc20] sm:$0xff]  ;;  %v14552_v54 = vld [vmem:[%s30892_s3 + $0xcc8] sm:$0xff]  ;;  %v14585_v19 = vld [vmem:[%s30892_s3 + $0xdd0] sm:$0xff] }
 0xf5e   :  { %v30077_v11 = vadd.f32 %v18227_v24, %v29824_v18  ;;  %19308 = vmatprep.subr.bf16.mxu1 %v19307_v56  ;;  %v19313_v18 = vpack.c.bf16 %v14528_v53, %v14527_v43  ;;  %v14580_v56 = vld [vmem:[%s30892_s3 + $0xda8] sm:$0xff]  ;;  %v14550_v24 = vld [vmem:[%s30892_s3 + $0xcb8] sm:$0xff]  ;;  %v14563_v53 = vld [vmem:[%s30892_s3 + $0xd20] sm:$0xff] }
 0xf5f   :  { %19278 = vmatpush3.bf16.msra.mxu0 %v19277_v62  ;;  %v14532_v62 = vld [vmem:[%s30892_s3 + $0xc28] sm:$0xff]  ;;  %v19351_v43 = vpack.c.bf16 %v14580_v56, %v14579_v0  ;;  %v19323_v16 = vpack.c.bf16 %v14550_v24, %v14549_v8  ;;  %v19353_v55 = vpack.c.bf16 %v14564_v36, %v14563_v53  ;;  %v14535_v59 = vld [vmem:[%s30892_s3 + $0xc40] sm:$0xff]  ;;  %v14537_v15 = vld [vmem:[%s30892_s3 + $0xc50] sm:$0xff] }
 0xf60   :  { %19312 = vmatprep.subr.bf16.mxu0 %v19311_v52  ;;  %v14126_v52 = vmax.f32 %v19613_v46, 0.0  ;;  %v19321_v17 = vpack.c.bf16 %v14532_v62, %v14531_v38  ;;  %v14584_v33 = vld [vmem:[%s30892_s3 + $0xdc8] sm:$0xff]  ;;  %v14567_v34 = vld [vmem:[%s30892_s3 + $0xd40] sm:$0xff]  ;;  %v14586_v46 = vld [vmem:[%s30892_s3 + $0xdd8] sm:$0xff] }
 0xf61   :  { %19310 = vmatpush3.bf16.msra.mxu1 %v19309_v51  ;;  %v14092_v51 = vmax.f32 %v19620_v23, 0.0  ;;  %v14536_v48 = vld [vmem:[%s30892_s3 + $0xc48] sm:$0xff]  ;;  %v14538_v37 = vld [vmem:[%s30892_s3 + $0xc58] sm:$0xff]  ;;  %v14569_v0 = vld [vmem:[%s30892_s3 + $0xd50] sm:$0xff] }
 0xf62   :  { %15582 = vmatmul.mubr.f32.vlgmr.msra.gmra.mrb[48].mxu0 %v14085_v41  ;;  %19344 = vmatprep.subr.bf16.mxu1 %v19343_v61  ;;  %v14533_v61 = vld [vmem:[%s30892_s3 + $0xc30] sm:$0xff]  ;;  %v14568_v9 = vld [vmem:[%s30892_s3 + $0xd48] sm:$0xff]  ;;  %v14570_v56 = vld [vmem:[%s30892_s3 + $0xd58] sm:$0xff] }
 0xf63   :  { %15586 = vmatprep.mubr.f32.mxu0 %v14125_v22  ;;  %19314 = vmatpush3.bf16.msra.mxu0 %v19313_v18  ;;  %v19355_v18 = vpack.c.bf16 %v14582_v26, %v14581_v31  ;;  %v19325_v41 = vpack.c.bf16 %v14534_v27, %v14533_v61  ;;  %v19357_v22 = vpack.c.bf16 %v14566_v40, %v14565_v63  ;;  %v14556_v23 = vld [vmem:[%s30892_s3 + $0xce8] sm:$0xff]  ;;  %v14557_v24 = vld [vmem:[%s30892_s3 + $0xcf0] sm:$0xff]  ;;  %v14571_v36 = vld [vmem:[%s30892_s3 + $0xd60] sm:$0xff] }
 0xf64   :  { %15657 = vmatmul.mubr.f32.vlgmr.msra.gmra.mrb[72].mxu1 %v14087_v13  ;;  %19316 = vmatprep.subr.bf16.mxu0 %v19315_v49  ;;  %v19327_v49 = vpack.c.bf16 %v14552_v54, %v14551_v21  ;;  %v19329_v13 = vpack.c.bf16 %v14536_v48, %v14535_v59  ;;  %v14588_v38 = vld [vmem:[%s30892_s3 + $0xde8] sm:$0xff]  ;;  %v19335_v62 = vpack.c.bf16 %v14556_v23, %v14555_v10  ;;  %v14589_v26 = vld [vmem:[%s30892_s3 + $0xdf0] sm:$0xff]  ;;  %v14542_v54 = vld [vmem:[%s30892_s3 + $0xc78] sm:$0xff] }
 0xf65   :  { %15661 = vmatprep.mubr.f32.mxu1 %v14127_v2  ;;  %19346 = vmatpush3.bf16.msra.mxu1 %v19345_v4  ;;  %v19359_v4 = vpack.c.bf16 %v14584_v33, %v14583_v3  ;;  %v19361_v2 = vpack.c.bf16 %v14568_v9, %v14567_v34  ;;  %v19365_v8 = vpack.c.bf16 %v14570_v56, %v14569_v0  ;;  %v14541_v21 = vld [vmem:[%s30892_s3 + $0xc70] sm:$0xff]  ;;  %v14607_v63 = vld [vmem:[%s30892_s3 + $0xe80] sm:$0xff]  ;;  %v14608_v40 = vld [vmem:[%s30892_s3 + $0xe88] sm:$0xff] }
 0xf66   :  { %15587 = vmatmul.mubr.f32.gmra.mrb[50].mxu0 %v14124_v14  ;;  %19348 = vmatprep.subr.bf16.mxu1 %v19347_v29  ;;  %v19331_v29 = vpack.c.bf16 %v14554_v45, %v14553_v5  ;;  %v19333_v14 = vpack.c.bf16 %v14538_v37, %v14537_v15  ;;  %v2005_v61 = vrot.slane %v30039_v57, %v28646_v28  ;;  %v14573_v59 = vld [vmem:[%s30892_s3 + $0xd70] sm:$0xff]  ;;  %v14574_v48 = vld [vmem:[%s30892_s3 + $0xd78] sm:$0xff]  ;;  %v14639_v45 = vld [vmem:[%s30892_s3 + $0xf80] sm:$0xff] }
 0xf67   :  { %19318 = vmatpush3.bf16.msra.mxu0 %v19317_v30  ;;  %15731 = vmatprep.mubr.f32.mxu0 %v14090_v25  ;;  %v19363_v30 = vpack.c.bf16 %v14586_v46, %v14585_v19  ;;  %v14539_v25 = vld [vmem:[%s30892_s3 + $0xc60] sm:$0xff]  ;;  %v19341_v5 = vpack.c.bf16 %v14542_v54, %v14541_v21  ;;  %v14592_v46 = vld [vmem:[%s30892_s3 + $0xe08] sm:$0xff]  ;;  %v30289_v37 = vrot.slane %v30039_v57, %v28829_v58  ;;  %v14609_v10 = vld [vmem:[%s30892_s3 + $0xe90] sm:$0xff] }
 0xf68   :  { %15662 = vmatmul.mubr.f32.gmra.mrb[74].mxu1 %v14126_v52  ;;  %19320 = vmatprep.subr.bf16.mxu0 %v19319_v35  ;;  %v14587_v35 = vld [vmem:[%s30892_s3 + $0xde0] sm:$0xff]  ;;  %v14558_v52 = vld [vmem:[%s30892_s3 + $0xcf8] sm:$0xff]  ;;  %v14625_v54 = vld [vmem:[%s30892_s3 + $0xf10] sm:$0xff] }
 0xf69   :  { %19350 = vmatpush3.bf16.msra.mxu1 %v19349_v60  ;;  %15806 = vmatprep.mubr.f32.mxu1 %v14092_v51  ;;  %v14540_v60 = vld [vmem:[%s30892_s3 + $0xc68] sm:$0xff]  ;;  %v19367_v53 = vpack.c.bf16 %v14588_v38, %v14587_v35  ;;  %v14591_v19 = vld [vmem:[%s30892_s3 + $0xe00] sm:$0xff]  ;;  %v14610_v23 = vld [vmem:[%s30892_s3 + $0xe98] sm:$0xff] }
 0xf6a   :  { %19352 = vmatprep.subr.bf16.mxu1 %v19351_v43  ;;  %v14572_v51 = vld [vmem:[%s30892_s3 + $0xd68] sm:$0xff]  ;;  %v19337_v31 = vpack.c.bf16 %v14540_v60, %v14539_v25  ;;  %v30932_v38 = vld [vmem:[#allocation13_spill] sm:$0xff]  ;;  %v30311_v25 = vrot.slane %v30039_v57, %v28973_v50  ;;  %v14641_v60 = vld [vmem:[%s30892_s3 + $0xf90] sm:$0xff] }
 0xf6b   :  { %19322 = vmatpush3.bf16.msra.mxu0 %v19321_v17  ;;  %v14624_v35 = vld [vmem:[%s30892_s3 + $0xf08] sm:$0xff]  ;;  %v14593_v50 = vld [vmem:[%s30892_s3 + $0xe10] sm:$0xff] }
 0xf6c   :  { %19324 = vmatprep.subr.bf16.mxu0 %v19323_v16  ;;  %v14590_v16 = vld [vmem:[%s30892_s3 + $0xdf8] sm:$0xff] }
 0xf6d   :  { %19354 = vmatpush3.bf16.msra.mxu1 %v19353_v55  ;;  %v19339_v55 = vpack.c.bf16 %v14558_v52, %v14557_v24  ;;  %v30933_v52 = vld [vmem:[#allocation10_spill] sm:$0xff] }
 0xf6e   :  { %19356 = vmatprep.subr.bf16.mxu1 %v19355_v18  ;;  %v19369_v18 = vpack.c.bf16 %v14572_v51, %v14571_v36  ;;  %v30934_v51 = vld [vmem:[#allocation16_spill] sm:$0xff] }
 0xf6f   :  { %19326 = vmatpush3.bf16.msra.mxu0 %v19325_v41  ;;  %v2013_v41 = vrot.slane %v30039_v57, %v28800_v44 }
 0xf70   :  { %19328 = vmatprep.subr.bf16.mxu0 %v19327_v49  ;;  %v19371_v49 = vpack.c.bf16 %v14590_v16, %v14589_v26  ;;  %v14611_v26 = vld [vmem:[%s30892_s3 + $0xea0] sm:$0xff]  ;;  %v14612_v16 = vld [vmem:[%s30892_s3 + $0xea8] sm:$0xff] }
 0xf71   :  { %19358 = vmatpush3.bf16.msra.mxu1 %v19357_v22 }
 0xf72   :  { %19360 = vmatprep.subr.bf16.mxu1 %v19359_v4  ;;  %v30929_v4 = vld [vmem:[#allocation6_spill] sm:$0xff] }
 0xf73   :  { %19330 = vmatpush3.bf16.msra.mxu0 %v19329_v13  ;;  %v19615_v34 = vadd.f32 %v30929_v4, %v2005_v61  ;;  %v19375_v13 = vpack.c.bf16 %v14608_v40, %v14607_v63  ;;  %v30936_v40 = vld [vmem:[#allocation17_spill] sm:$0xff] }
 0xf74   :  { %19332 = vmatprep.subr.bf16.mxu0 %v19331_v29  ;;  %v30930_v29 = vld [vmem:[#allocation12_spill] sm:$0xff] }
 0xf75   :  { %19362 = vmatpush3.bf16.msra.mxu1 %v19361_v2  ;;  %v19618_v15 = vadd.f32 %v30930_v29, %v30067_v42  ;;  %v19373_v2 = vpack.c.bf16 %v14574_v48, %v14573_v59  ;;  %v14089_v24 = vmax.f32 %v19615_v34, 0.0  ;;  %v14644_v59 = vld [vmem:[%s30892_s3 + $0xfa8] sm:$0xff]  ;;  %v14613_v34 = vld [vmem:[%s30892_s3 + $0xeb0] sm:$0xff] }
 0xf76   :  { %v18260_v43 = vpop.f32.mrb[48].mxu1  ;;  %19364 = vmatprep.subr.bf16.mxu1 %v19363_v30  ;;  %v30931_v30 = vld [vmem:[#allocation7_spill] sm:$0xff] }
 0xf77   :  { %v18261_v17 = vpop.f32.mrb[49].mxu1  ;;  %19334 = vmatpush3.bf16.msra.mxu0 %v19333_v14  ;;  %v19619_v0 = vadd.f32 %v30931_v30, %v2013_v41  ;;  %v14623_v14 = vld [vmem:[%s30892_s3 + $0xf00] sm:$0xff]  ;;  %v14129_v36 = vmax.f32 %v19618_v15, 0.0  ;;  %v14628_v29 = vld [vmem:[%s30892_s3 + $0xf28] sm:$0xff] }
 0xf78   :  { %v18262_v27 = vadd.f32 %v18261_v17, %v18260_v43  ;;  %19336 = vmatprep.subr.bf16.mxu0 %v19335_v62  ;;  %v19622_v62 = vadd.f32 %v30932_v38, %v30089_v20  ;;  %v19617_v43 = vadd.f32 %v30933_v52, %v2005_v61  ;;  %v14594_v20 = vld [vmem:[%s30892_s3 + $0xe18] sm:$0xff]  ;;  %v19624_v17 = vadd.f32 %v30934_v51, %v30289_v37  ;;  %v14616_v38 = vld [vmem:[%s30892_s3 + $0xec8] sm:$0xff] }
 0xf79   :  { %19366 = vmatpush3.bf16.msra.mxu1 %v19365_v8  ;;  %v14642_v8 = vld [vmem:[%s30892_s3 + $0xf98] sm:$0xff]  ;;  %v14091_v61 = vmax.f32 %v19619_v0, 0.0  ;;  %v14597_v0 = vld [vmem:[%s30892_s3 + $0xe30] sm:$0xff]  ;;  %v14648_v52 = vld [vmem:[%s30892_s3 + $0xfc8] sm:$0xff] }
 0xf7a   :  { %v30264_v3 = vadd.f32 %v18262_v27, %v30042_v6  ;;  %v18263_v33 = vpop.f32.mrb[50].mxu1  ;;  %19368 = vmatprep.subr.bf16.mxu1 %v19367_v53  ;;  %v14640_v6 = vld [vmem:[%s30892_s3 + $0xf88] sm:$0xff]  ;;  %v19379_v53 = vpack.c.bf16 %v14610_v23, %v14609_v10  ;;  %v19411_v21 = vpack.c.bf16 %v14642_v8, %v14641_v60  ;;  %v14131_v63 = vmax.f32 %v19622_v62, 0.0  ;;  %v14645_v10 = vld [vmem:[%s30892_s3 + $0xfb0] sm:$0xff]  ;;  %v14646_v23 = vld [vmem:[%s30892_s3 + $0xfb8] sm:$0xff] }
 0xf7b   :  { %v18264_v22 = vpop.f32.mrb[51].mxu1  ;;  %19338 = vmatpush3.bf16.msra.mxu0 %v19337_v31  ;;  %v19407_v42 = vpack.c.bf16 %v14640_v6, %v14639_v45  ;;  %v19409_v31 = vpack.c.bf16 %v14624_v35, %v14623_v14  ;;  %v30935_v27 = vld [vmem:[#allocation11_spill] sm:$0xff]  ;;  %v14128_v48 = vmax.f32 %v19617_v43, 0.0  ;;  %v14094_v6 = vmax.f32 %v19624_v17, 0.0  ;;  %v14615_v35 = vld [vmem:[%s30892_s3 + $0xec0] sm:$0xff]  ;;  %v14630_v60 = vld [vmem:[%s30892_s3 + $0xf38] sm:$0xff] }
 0xf7c   :  { %v18265_v9 = vadd.f32 %v18264_v22, %v18263_v33  ;;  %19340 = vmatprep.subr.bf16.mxu0 %v19339_v55  ;;  %v19621_v55 = vadd.f32 %v30935_v27, %v2013_v41  ;;  %v19628_v33 = vadd.f32 %v30936_v40, %v30311_v25  ;;  %v14643_v41 = vld [vmem:[%s30892_s3 + $0xfa0] sm:$0xff]  ;;  %v19383_v22 = vpack.c.bf16 %v14612_v16, %v14611_v26  ;;  %v14596_v45 = vld [vmem:[%s30892_s3 + $0xe28] sm:$0xff]  ;;  %v14618_v51 = vld [vmem:[%s30892_s3 + $0xed8] sm:$0xff] }
 0xf7d   :  { %19370 = vmatpush3.bf16.msra.mxu1 %v19369_v18  ;;  %v14626_v18 = vld [vmem:[%s30892_s3 + $0xf18] sm:$0xff]  ;;  %v19419_v62 = vpack.c.bf16 %v14646_v23, %v14645_v10  ;;  %v19391_v43 = vpack.c.bf16 %v14616_v38, %v14615_v35  ;;  %v14632_v26 = vld [vmem:[%s30892_s3 + $0xf48] sm:$0xff]  ;;  %v14653_v10 = vld [vmem:[%s30892_s3 + $0xff0] sm:$0xff] }
 0xf7e   :  { %v30299_v56 = vadd.f32 %v18265_v9, %v30077_v11  ;;  %19372 = vmatprep.subr.bf16.mxu1 %v19371_v49  ;;  %v19377_v11 = vpack.c.bf16 %v14592_v46, %v14591_v19  ;;  %v19381_v49 = vpack.c.bf16 %v14594_v20, %v14593_v50  ;;  %v19413_v4 = vpack.c.bf16 %v14626_v18, %v14625_v54  ;;  %v14614_v9 = vld [vmem:[%s30892_s3 + $0xeb8] sm:$0xff]  ;;  %v14627_v46 = vld [vmem:[%s30892_s3 + $0xf20] sm:$0xff]  ;;  %v14600_v50 = vld [vmem:[%s30892_s3 + $0xe48] sm:$0xff] }
 0xf7f   :  { %19342 = vmatpush3.bf16.msra.mxu0 %v19341_v5  ;;  %v14595_v5 = vld [vmem:[%s30892_s3 + $0xe20] sm:$0xff]  ;;  %v19415_v19 = vpack.c.bf16 %v14644_v59, %v14643_v41  ;;  %v14096_v15 = vmax.f32 %v19628_v33, 0.0  ;;  %v19387_v30 = vpack.c.bf16 %v14614_v9, %v14613_v34  ;;  %v19417_v14 = vpack.c.bf16 %v14628_v29, %v14627_v46  ;;  %v14650_v27 = vld [vmem:[%s30892_s3 + $0xfd8] sm:$0xff]  ;;  %v14620_v40 = vld [vmem:[%s30892_s3 + $0xee8] sm:$0xff] }
 0xf80   :  { %19376 = vmatprep.subr.bf16.mxu0 %v19375_v13  ;;  %v14130_v13 = vmax.f32 %v19621_v55, 0.0  ;;  %v14602_v54 = vld [vmem:[%s30892_s3 + $0xe58] sm:$0xff]  ;;  %v14621_v34 = vld [vmem:[%s30892_s3 + $0xef0] sm:$0xff]  ;;  %v14635_v46 = vld [vmem:[%s30892_s3 + $0xf60] sm:$0xff] }
 0xf81   :  { %19374 = vmatpush3.bf16.msra.mxu1 %v19373_v2  ;;  %v19385_v2 = vpack.c.bf16 %v14596_v45, %v14595_v5  ;;  %v14634_v41 = vld [vmem:[%s30892_s3 + $0xf58] sm:$0xff]  ;;  %v14603_v45 = vld [vmem:[%s30892_s3 + $0xe60] sm:$0xff]  ;;  %v14636_v29 = vld [vmem:[%s30892_s3 + $0xf68] sm:$0xff] }
 0xf82   :  { %15732 = vmatmul.mubr.f32.vlgmr.msra.gmra.mrb[52].mxu0 %v14089_v24  ;;  %19408 = vmatprep.subr.bf16.mxu1 %v19407_v42  ;;  %v14598_v42 = vld [vmem:[%s30892_s3 + $0xe38] sm:$0xff]  ;;  %v14647_v24 = vld [vmem:[%s30892_s3 + $0xfc0] sm:$0xff]  ;;  %v19433_v38 = vpack.c.bf16 %v14636_v29, %v14635_v46 }
 0xf83   :  { %15736 = vmatprep.mubr.f32.mxu0 %v14129_v36  ;;  %19378 = vmatpush3.bf16.msra.mxu0 %v19377_v11  ;;  %v14629_v11 = vld [vmem:[%s30892_s3 + $0xf30] sm:$0xff]  ;;  %v19389_v8 = vpack.c.bf16 %v14598_v42, %v14597_v0  ;;  %v19423_v17 = vpack.c.bf16 %v14648_v52, %v14647_v24  ;;  %v14622_v9 = vld [vmem:[%s30892_s3 + $0xef8] sm:$0xff] }
 0xf84   :  { %15807 = vmatmul.mubr.f32.vlgmr.msra.gmra.mrb[76].mxu1 %v14091_v61  ;;  %19380 = vmatprep.subr.bf16.mxu0 %v19379_v53  ;;  %v14599_v53 = vld [vmem:[%s30892_s3 + $0xe40] sm:$0xff]  ;;  %v19421_v20 = vpack.c.bf16 %v14630_v60, %v14629_v11  ;;  %v14617_v36 = vld [vmem:[%s30892_s3 + $0xed0] sm:$0xff]  ;;  %v14654_v23 = vld [vmem:[%s30892_s3 + $0xff8] sm:$0xff]  ;;  %v19403_v42 = vpack.c.bf16 %v14622_v9, %v14621_v34  ;;  %v2029_v60 = vrot.slane %v30039_v57, %v29082_v12 }
 0xf85   :  { %15811 = vmatprep.mubr.f32.mxu1 %v14131_v63  ;;  %19410 = vmatpush3.bf16.msra.mxu1 %v19409_v31  ;;  %v14631_v31 = vld [vmem:[%s30892_s3 + $0xf40] sm:$0xff]  ;;  %v19393_v16 = vpack.c.bf16 %v14600_v50, %v14599_v53  ;;  %v14649_v61 = vld [vmem:[%s30892_s3 + $0xfd0] sm:$0xff]  ;;  %v19395_v55 = vpack.c.bf16 %v14618_v51, %v14617_v36  ;;  %v14606_v35 = vld [vmem:[%s30892_s3 + $0xe78] sm:$0xff] }
 0xf86   :  { %15737 = vmatmul.mubr.f32.gmra.mrb[54].mxu0 %v14128_v48  ;;  %19412 = vmatprep.subr.bf16.mxu1 %v19411_v21  ;;  %v14601_v21 = vld [vmem:[%s30892_s3 + $0xe50] sm:$0xff]  ;;  %v19425_v18 = vpack.c.bf16 %v14632_v26, %v14631_v31  ;;  %v14619_v63 = vld [vmem:[%s30892_s3 + $0xee0] sm:$0xff]  ;;  %v19427_v33 = vpack.c.bf16 %v14650_v27, %v14649_v61  ;;  %v14672_v11 = vld [vmem:[%s30892_s3 + $0x1088] sm:$0xff] }
 0xf87   :  { %19382 = vmatpush3.bf16.msra.mxu0 %v19381_v49  ;;  %15881 = vmatprep.mubr.f32.mxu0 %v14094_v6  ;;  %v14633_v49 = vld [vmem:[%s30892_s3 + $0xf50] sm:$0xff]  ;;  %v19397_v59 = vpack.c.bf16 %v14602_v54, %v14601_v21  ;;  %v14651_v48 = vld [vmem:[%s30892_s3 + $0xfe0] sm:$0xff]  ;;  %v19399_v5 = vpack.c.bf16 %v14620_v40, %v14619_v63  ;;  %v14604_v6 = vld [vmem:[%s30892_s3 + $0xe68] sm:$0xff] }
 0xf88   :  { %15812 = vmatmul.mubr.f32.gmra.mrb[78].mxu1 %v14130_v13  ;;  %19384 = vmatprep.subr.bf16.mxu0 %v19383_v22  ;;  %v14652_v22 = vld [vmem:[%s30892_s3 + $0xfe8] sm:$0xff]  ;;  %v14637_v53 = vld [vmem:[%s30892_s3 + $0xf70] sm:$0xff]  ;;  %v14638_v50 = vld [vmem:[%s30892_s3 + $0xf78] sm:$0xff] }
 0xf89   :  { %19414 = vmatpush3.bf16.msra.mxu1 %v19413_v4  ;;  %15956 = vmatprep.mubr.f32.mxu1 %v14096_v15  ;;  %v19429_v4 = vpack.c.bf16 %v14634_v41, %v14633_v49  ;;  %v14703_v36 = vld [vmem:[%s30892_s3 + $0x1180] sm:$0xff]  ;;  %v14656_v61 = vld [vmem:[%s30892_s3 + $0x1008] sm:$0xff]  ;;  %v30938_v27 = vld [vmem:[#allocation20_spill] sm:$0xff]  ;;  %v19437_v54 = vpack.c.bf16 %v14638_v50, %v14637_v53 }
 0xf8a   :  { %19416 = vmatprep.subr.bf16.mxu1 %v19415_v19  ;;  %v19431_v19 = vpack.c.bf16 %v14652_v22, %v14651_v48  ;;  %v30937_v51 = vld [vmem:[#allocation14_spill] sm:$0xff]  ;;  %v14674_v63 = vld [vmem:[%s30892_s3 + $0x1098] sm:$0xff]  ;;  %v30939_v40 = vld [vmem:[#allocation15_spill] sm:$0xff] }
 0xf8b   :  { %19386 = vmatpush3.bf16.msra.mxu0 %v19385_v2  ;;  %v19401_v2 = vpack.c.bf16 %v14604_v6, %v14603_v45  ;;  %v14688_v41 = vld [vmem:[%s30892_s3 + $0x1108] sm:$0xff]  ;;  %v14706_v45 = vld [vmem:[%s30892_s3 + $0x1198] sm:$0xff]  ;;  %v14659_v50 = vld [vmem:[%s30892_s3 + $0x1020] sm:$0xff] }
 0xf8c   :  { %19388 = vmatprep.subr.bf16.mxu0 %v19387_v30  ;;  %v2021_v30 = vrot.slane %v30039_v57, %v28944_v1 }
 0xf8d   :  { %19418 = vmatpush3.bf16.msra.mxu1 %v19417_v14  ;;  %v14605_v14 = vld [vmem:[%s30892_s3 + $0xe70] sm:$0xff] }
 0xf8e   :  { %19420 = vmatprep.subr.bf16.mxu1 %v19419_v62  ;;  %v14671_v62 = vld [vmem:[%s30892_s3 + $0x1080] sm:$0xff] }
 0xf8f   :  { %19390 = vmatpush3.bf16.msra.mxu0 %v19389_v8  ;;  %v30488_v8 = vld [vmem:[%s30893_s2 + $0x20] sm:$0xff]  ;;  %v19439_v26 = vpack.c.bf16 %v14672_v11, %v14671_v62 }
 0xf90   :  { %19392 = vmatprep.subr.bf16.mxu0 %v19391_v43  ;;  %v19435_v43 = vpack.c.bf16 %v14654_v23, %v14653_v10  ;;  %v30516_v21 = vrot.slane %v30488_v8, %v28530_v47  ;;  %v14687_v47 = vld [vmem:[%s30892_s3 + $0x1100] sm:$0xff]  ;;  %v30538_v22 = vrot.slane %v30488_v8, %v28691_v39  ;;  %v14657_v39 = vld [vmem:[%s30892_s3 + $0x1010] sm:$0xff]  ;;  %v30943_v23 = vld [vmem:[#allocation19_spill] sm:$0xff] }
 0xf91   :  { %19422 = vmatpush3.bf16.msra.mxu1 %v19421_v20  ;;  %v19405_v20 = vpack.c.bf16 %v14606_v35, %v14605_v14  ;;  %v19473_v29 = vpack.c.bf16 %v14688_v41, %v14687_v47  ;;  %v14690_v14 = vld [vmem:[%s30892_s3 + $0x1118] sm:$0xff]  ;;  %v14680_v47 = vld [vmem:[%s30892_s3 + $0x10c8] sm:$0xff] }
 0xf92   :  { %19424 = vmatprep.subr.bf16.mxu1 %v19423_v17  ;;  %v19623_v17 = vadd.f32 %v30937_v51, %v2021_v30  ;;  %v14678_v51 = vld [vmem:[%s30892_s3 + $0x10b8] sm:$0xff] }
 0xf93   :  { %19394 = vmatpush3.bf16.msra.mxu0 %v19393_v16  ;;  %v14655_v16 = vld [vmem:[%s30892_s3 + $0x1000] sm:$0xff] }
 0xf94   :  { %19396 = vmatprep.subr.bf16.mxu0 %v19395_v55  ;;  %v19626_v55 = vadd.f32 %v30938_v27, %v30289_v37  ;;  %v14093_v6 = vmax.f32 %v19623_v17, 0.0 }
 0xf95   :  { %19426 = vmatpush3.bf16.msra.mxu1 %v19425_v18  ;;  %v14673_v18 = vld [vmem:[%s30892_s3 + $0x1090] sm:$0xff] }
 0xf96   :  { %v18298_v13 = vpop.f32.mrb[52].mxu1  ;;  %19428 = vmatprep.subr.bf16.mxu1 %v19427_v33  ;;  %v19627_v33 = vadd.f32 %v30939_v40, %v2029_v60  ;;  %v19443_v9 = vpack.c.bf16 %v14674_v63, %v14673_v18  ;;  %v14661_v63 = vld [vmem:[%s30892_s3 + $0x1030] sm:$0xff]  ;;  %v14662_v40 = vld [vmem:[%s30892_s3 + $0x1038] sm:$0xff] }
 0xf97   :  { %v18299_v15 = vpop.f32.mrb[53].mxu1  ;;  %19398 = vmatpush3.bf16.msra.mxu0 %v19397_v59  ;;  %v30940_v59 = vld [vmem:[#allocation21_spill] sm:$0xff] }
 0xf98   :  { %v18300_v0 = vadd.f32 %v18299_v15, %v18298_v13  ;;  %19400 = vmatprep.subr.bf16.mxu0 %v19399_v5  ;;  %v19630_v48 = vadd.f32 %v30940_v59, %v30311_v25  ;;  %v14705_v5 = vld [vmem:[%s30892_s3 + $0x1190] sm:$0xff]  ;;  %v14658_v25 = vld [vmem:[%s30892_s3 + $0x1018] sm:$0xff]  ;;  %v14133_v13 = vmax.f32 %v19626_v55, 0.0  ;;  %v14675_v15 = vld [vmem:[%s30892_s3 + $0x10a0] sm:$0xff]  ;;  %v14095_v10 = vmax.f32 %v19627_v33, 0.0 }
 0xf99   :  { %19430 = vmatpush3.bf16.msra.mxu1 %v19429_v4  ;;  %v30941_v4 = vld [vmem:[#allocation18_spill] sm:$0xff]  ;;  %v19445_v11 = vpack.c.bf16 %v14658_v25, %v14657_v39  ;;  %v14709_v55 = vld [vmem:[%s30892_s3 + $0x11b0] sm:$0xff]  ;;  %v14682_v25 = vld [vmem:[%s30892_s3 + $0x10d8] sm:$0xff] }
 0xf9a   :  { %v30491_v24 = vadd.f32 %v18300_v0, %v30264_v3  ;;  %v18301_v52 = vpop.f32.mrb[54].mxu1  ;;  %19432 = vmatprep.subr.bf16.mxu1 %v19431_v19  ;;  %v14704_v3 = vld [vmem:[%s30892_s3 + $0x1188] sm:$0xff]  ;;  %v19625_v34 = vadd.f32 %v30941_v4, %v2021_v30  ;;  %v30942_v19 = vld [vmem:[#allocation24_spill] sm:$0xff]  ;;  %v19629_v30 = vadd.f32 %v30943_v23, %v2029_v60  ;;  %v19475_v0 = vpack.c.bf16 %v14706_v45, %v14705_v5  ;;  %v14707_v60 = vld [vmem:[%s30892_s3 + $0x11a0] sm:$0xff] }
 0xf9b   :  { %v18302_v57 = vpop.f32.mrb[55].mxu1  ;;  %19402 = vmatpush3.bf16.msra.mxu0 %v19401_v2  ;;  %v19471_v37 = vpack.c.bf16 %v14704_v3, %v14703_v36  ;;  %v19632_v46 = vadd.f32 %v30942_v19, %v30516_v21  ;;  %v14676_v2 = vld [vmem:[%s30892_s3 + $0x10a8] sm:$0xff]  ;;  %v14135_v35 = vmax.f32 %v19630_v48, 0.0  ;;  %v14677_v3 = vld [vmem:[%s30892_s3 + $0x10b0] sm:$0xff]  ;;  %v14694_v48 = vld [vmem:[%s30892_s3 + $0x1138] sm:$0xff] }
 0xf9c   :  { %v18303_v31 = vadd.f32 %v18302_v57, %v18301_v52  ;;  %19404 = vmatprep.subr.bf16.mxu0 %v19403_v42  ;;  %v14689_v42 = vld [vmem:[%s30892_s3 + $0x1110] sm:$0xff]  ;;  %v14708_v52 = vld [vmem:[%s30892_s3 + $0x11a8] sm:$0xff]  ;;  %v19447_v53 = vpack.c.bf16 %v14676_v2, %v14675_v15  ;;  %v14134_v17 = vmax.f32 %v19629_v30, 0.0  ;;  %v19451_v18 = vpack.c.bf16 %v14678_v51, %v14677_v3  ;;  %v14711_v5 = vld [vmem:[%s30892_s3 + $0x11c0] sm:$0xff] }
 0xf9d   :  { %19434 = vmatpush3.bf16.msra.mxu1 %v19433_v38  ;;  %v30944_v38 = vld [vmem:[#allocation25_spill] sm:$0xff]  ;;  %v14660_v57 = vld [vmem:[%s30892_s3 + $0x1028] sm:$0xff]  ;;  %v19477_v36 = vpack.c.bf16 %v14690_v14, %v14689_v42  ;;  %v14693_v59 = vld [vmem:[%s30892_s3 + $0x1130] sm:$0xff] }
 0xf9e   :  { %v30526_v49 = vadd.f32 %v18303_v31, %v30299_v56  ;;  %19436 = vmatprep.subr.bf16.mxu1 %v19435_v43  ;;  %v19441_v56 = vpack.c.bf16 %v14656_v61, %v14655_v16  ;;  %v19636_v62 = vadd.f32 %v30944_v38, %v30538_v22  ;;  %v14132_v43 = vmax.f32 %v19625_v34, 0.0  ;;  %v14692_v16 = vld [vmem:[%s30892_s3 + $0x1128] sm:$0xff]  ;;  %v14663_v4 = vld [vmem:[%s30892_s3 + $0x1040] sm:$0xff]  ;;  %v14681_v39 = vld [vmem:[%s30892_s3 + $0x10d0] sm:$0xff] }
 0xf9f   :  { %19406 = vmatpush3.bf16.msra.mxu0 %v19405_v20  ;;  %v14098_v20 = vmax.f32 %v19632_v46, 0.0  ;;  %v19479_v31 = vpack.c.bf16 %v14708_v52, %v14707_v60  ;;  %v19449_v27 = vpack.c.bf16 %v14660_v57, %v14659_v50  ;;  %v14712_v45 = vld [vmem:[%s30892_s3 + $0x11c8] sm:$0xff]  ;;  %v14695_v19 = vld [vmem:[%s30892_s3 + $0x1140] sm:$0xff]  ;;  %v14713_v15 = vld [vmem:[%s30892_s3 + $0x11d0] sm:$0xff] }
 0xfa0   :  { %19440 = vmatprep.subr.bf16.mxu0 %v19439_v26  ;;  %v14691_v26 = vld [vmem:[%s30892_s3 + $0x1120] sm:$0xff]  ;;  %v14100_v61 = vmax.f32 %v19636_v62, 0.0  ;;  %v14664_v34 = vld [vmem:[%s30892_s3 + $0x1048] sm:$0xff]  ;;  %v14714_v2 = vld [vmem:[%s30892_s3 + $0x11d8] sm:$0xff] }
 0xfa1   :  { %19438 = vmatpush3.bf16.msra.mxu1 %v19437_v54  ;;  %v14710_v54 = vld [vmem:[%s30892_s3 + $0x11b8] sm:$0xff]  ;;  %v19481_v33 = vpack.c.bf16 %v14692_v16, %v14691_v26  ;;  %v14696_v46 = vld [vmem:[%s30892_s3 + $0x1148] sm:$0xff]  ;;  %v14665_v23 = vld [vmem:[%s30892_s3 + $0x1050] sm:$0xff] }
 0xfa2   :  { %15882 = vmatmul.mubr.f32.vlgmr.msra.gmra.mrb[56].mxu0 %v14093_v6  ;;  %19472 = vmatprep.subr.bf16.mxu1 %v19471_v37  ;;  %v14679_v37 = vld [vmem:[%s30892_s3 + $0x10c0] sm:$0xff]  ;;  %v19483_v41 = vpack.c.bf16 %v14710_v54, %v14709_v55  ;;  %v14666_v30 = vld [vmem:[%s30892_s3 + $0x1058] sm:$0xff]  ;;  %v14684_v14 = vld [vmem:[%s30892_s3 + $0x10e8] sm:$0xff]  ;;  %v2037_v55 = vrot.slane %v30488_v8, %v28646_v28 }
 0xfa3   :  { %15886 = vmatprep.mubr.f32.mxu0 %v14133_v13  ;;  %19442 = vmatpush3.bf16.msra.mxu0 %v19441_v56  ;;  %v19453_v56 = vpack.c.bf16 %v14662_v40, %v14661_v63  ;;  %v19455_v6 = vpack.c.bf16 %v14680_v47, %v14679_v37  ;;  %v19487_v13 = vpack.c.bf16 %v14712_v45, %v14711_v5  ;;  %v14683_v42 = vld [vmem:[%s30892_s3 + $0x10e0] sm:$0xff]  ;;  %v14697_v38 = vld [vmem:[%s30892_s3 + $0x1150] sm:$0xff]  ;;  %v14698_v62 = vld [vmem:[%s30892_s3 + $0x1158] sm:$0xff] }
 0xfa4   :  { %15957 = vmatmul.mubr.f32.vlgmr.msra.gmra.mrb[80].mxu1 %v14095_v10  ;;  %19444 = vmatprep.subr.bf16.mxu0 %v19443_v9  ;;  %v19485_v9 = vpack.c.bf16 %v14694_v48, %v14693_v59  ;;  %v19459_v10 = vpack.c.bf16 %v14682_v25, %v14681_v39  ;;  %v14715_v60 = vld [vmem:[%s30892_s3 + $0x11e0] sm:$0xff]  ;;  %v14716_v52 = vld [vmem:[%s30892_s3 + $0x11e8] sm:$0xff]  ;;  %v19493_v57 = vpack.c.bf16 %v14698_v62, %v14697_v38  ;;  %v14669_v63 = vld [vmem:[%s30892_s3 + $0x1070] sm:$0xff] }
 0xfa5   :  { %15961 = vmatprep.mubr.f32.mxu1 %v14135_v35  ;;  %19474 = vmatpush3.bf16.msra.mxu1 %v19473_v29  ;;  %v19457_v29 = vpack.c.bf16 %v14664_v34, %v14663_v4  ;;  %v19491_v35 = vpack.c.bf16 %v14714_v2, %v14713_v15  ;;  %v14668_v50 = vld [vmem:[%s30892_s3 + $0x1068] sm:$0xff]  ;;  %v19495_v51 = vpack.c.bf16 %v14716_v52, %v14715_v60  ;;  %v14670_v40 = vld [vmem:[%s30892_s3 + $0x1078] sm:$0xff]  ;;  %v14735_v37 = vld [vmem:[%s30892_s3 + $0x1280] sm:$0xff] }
 0xfa6   :  { %15887 = vmatmul.mubr.f32.gmra.mrb[58].mxu0 %v14132_v43  ;;  %19476 = vmatprep.subr.bf16.mxu1 %v19475_v0  ;;  %v19489_v0 = vpack.c.bf16 %v14696_v46, %v14695_v19  ;;  %v19463_v43 = vpack.c.bf16 %v14684_v14, %v14683_v42  ;;  %v14736_v28 = vld [vmem:[%s30892_s3 + $0x1288] sm:$0xff]  ;;  %v2045_v47 = vrot.slane %v30488_v8, %v28800_v44  ;;  %v14702_v5 = vld [vmem:[%s30892_s3 + $0x1178] sm:$0xff]  ;;  %v14751_v44 = vld [vmem:[%s30892_s3 + $0x1300] sm:$0xff] }
 0xfa7   :  { %19446 = vmatpush3.bf16.msra.mxu0 %v19445_v11  ;;  %16031 = vmatprep.mubr.f32.mxu0 %v14098_v20  ;;  %v19461_v11 = vpack.c.bf16 %v14666_v30, %v14665_v23  ;;  %v14685_v20 = vld [vmem:[%s30892_s3 + $0x10f0] sm:$0xff]  ;;  %v30945_v4 = vld [vmem:[#allocation22_spill] sm:$0xff]  ;;  %v19503_v39 = vpack.c.bf16 %v14736_v28, %v14735_v37  ;;  %v14738_v2 = vld [vmem:[%s30892_s3 + $0x1298] sm:$0xff]  ;;  %v30750_v14 = vrot.slane %v30488_v8, %v29082_v12 }
 0xfa8   :  { %15962 = vmatmul.mubr.f32.gmra.mrb[82].mxu1 %v14134_v17  ;;  %19448 = vmatprep.subr.bf16.mxu0 %v19447_v53  ;;  %v14667_v53 = vld [vmem:[%s30892_s3 + $0x1060] sm:$0xff]  ;;  %v19631_v34 = vadd.f32 %v30945_v4, %v2037_v55  ;;  %v30946_v19 = vld [vmem:[#allocation28_spill] sm:$0xff]  ;;  %v30948_v42 = vld [vmem:[#allocation29_spill] sm:$0xff] }
 0xfa9   :  { %19478 = vmatpush3.bf16.msra.mxu1 %v19477_v36  ;;  %16106 = vmatprep.mubr.f32.mxu1 %v14100_v61  ;;  %v14686_v36 = vld [vmem:[%s30892_s3 + $0x10f8] sm:$0xff]  ;;  %v14699_v17 = vld [vmem:[%s30892_s3 + $0x1160] sm:$0xff]  ;;  %v19465_v16 = vpack.c.bf16 %v14668_v50, %v14667_v53  ;;  %v14717_v61 = vld [vmem:[%s30892_s3 + $0x11f0] sm:$0xff]  ;;  %v19634_v46 = vadd.f32 %v30946_v19, %v30516_v21  ;;  %v19638_v21 = vadd.f32 %v30948_v42, %v30538_v22 }
 0xfaa   :  { %19480 = vmatprep.subr.bf16.mxu1 %v19479_v31  ;;  %v14700_v31 = vld [vmem:[%s30892_s3 + $0x1168] sm:$0xff]  ;;  %v14719_v25 = vld [vmem:[%s30892_s3 + $0x1200] sm:$0xff]  ;;  %v14737_v15 = vld [vmem:[%s30892_s3 + $0x1290] sm:$0xff]  ;;  %v14097_v62 = vmax.f32 %v19631_v34, 0.0 }
 0xfab   :  { %19450 = vmatpush3.bf16.msra.mxu0 %v19449_v27  ;;  %v14718_v27 = vld [vmem:[%s30892_s3 + $0x11f8] sm:$0xff]  ;;  %v14753_v38 = vld [vmem:[%s30892_s3 + $0x1310] sm:$0xff]  ;;  %v19507_v52 = vpack.c.bf16 %v14738_v2, %v14737_v15  ;;  %v14739_v53 = vld [vmem:[%s30892_s3 + $0x12a0] sm:$0xff] }
 0xfac   :  { %19452 = vmatprep.subr.bf16.mxu0 %v19451_v18  ;;  %v19467_v18 = vpack.c.bf16 %v14686_v36, %v14685_v20  ;;  %v19499_v48 = vpack.c.bf16 %v14718_v27, %v14717_v61  ;;  %v14721_v12 = vld [vmem:[%s30892_s3 + $0x1210] sm:$0xff]  ;;  %v14722_v22 = vld [vmem:[%s30892_s3 + $0x1218] sm:$0xff]  ;;  %v14740_v50 = vld [vmem:[%s30892_s3 + $0x12a8] sm:$0xff] }
 0xfad   :  { %19482 = vmatpush3.bf16.msra.mxu1 %v19481_v33  ;;  %v19497_v33 = vpack.c.bf16 %v14700_v31, %v14699_v17  ;;  %v30950_v20 = vld [vmem:[#allocation27_spill] sm:$0xff]  ;;  %v19643_v17 = vadd.f32 %v29557_v7, %v30750_v14  ;;  %v19509_v31 = vpack.c.bf16 %v14722_v22, %v14721_v12  ;;  %v19511_v27 = vpack.c.bf16 %v14740_v50, %v14739_v53  ;;  %v14757_v28 = vld [vmem:[%s30892_s3 + $0x1330] sm:$0xff]  ;;  %v14762_v15 = vld [vmem:[%s30892_s3 + $0x1358] sm:$0xff] }
 0xfae   :  { %19484 = vmatprep.subr.bf16.mxu1 %v19483_v41  ;;  %v19637_v36 = vadd.f32 %v30950_v20, %v2045_v47  ;;  %v14724_v7 = vld [vmem:[%s30892_s3 + $0x1228] sm:$0xff]  ;;  %v14749_v12 = vld [vmem:[%s30892_s3 + $0x12f0] sm:$0xff]  ;;  %v14750_v22 = vld [vmem:[%s30892_s3 + $0x12f8] sm:$0xff] }
 0xfaf   :  { %19454 = vmatpush3.bf16.msra.mxu0 %v19453_v56  ;;  %v14701_v56 = vld [vmem:[%s30892_s3 + $0x1170] sm:$0xff]  ;;  %v14760_v4 = vld [vmem:[%s30892_s3 + $0x1348] sm:$0xff] }
 0xfb0   :  { %19456 = vmatprep.subr.bf16.mxu0 %v19455_v6  ;;  %v19469_v6 = vpack.c.bf16 %v14670_v40, %v14669_v63  ;;  %v14138_v63 = vmax.f32 %v19637_v36, 0.0  ;;  %v14748_v42 = vld [vmem:[%s30892_s3 + $0x12e8] sm:$0xff] }
 0xfb1   :  { %19486 = vmatpush3.bf16.msra.mxu1 %v19485_v9 }
 0xfb2   :  { %19488 = vmatprep.subr.bf16.mxu1 %v19487_v13  ;;  %v14720_v13 = vld [vmem:[%s30892_s3 + $0x1208] sm:$0xff] }
 0xfb3   :  { %19458 = vmatpush3.bf16.msra.mxu0 %v19457_v29  ;;  %v19501_v29 = vpack.c.bf16 %v14702_v5, %v14701_v56  ;;  %v14726_v56 = vld [vmem:[%s30892_s3 + $0x1238] sm:$0xff]  ;;  %v14743_v5 = vld [vmem:[%s30892_s3 + $0x12c0] sm:$0xff] }
 0xfb4   :  { %19460 = vmatprep.subr.bf16.mxu0 %v19459_v10  ;;  %v30947_v10 = vld [vmem:[#allocation23_spill] sm:$0xff] }
 0xfb5   :  { %19490 = vmatpush3.bf16.msra.mxu1 %v19489_v0  ;;  %v19635_v23 = vadd.f32 %v30947_v10, %v2045_v47  ;;  %v14758_v47 = vld [vmem:[%s30892_s3 + $0x1338] sm:$0xff]  ;;  %v14729_v10 = vld [vmem:[%s30892_s3 + $0x1250] sm:$0xff] }
 0xfb6   :  { %v18336_v3 = vpop.f32.mrb[56].mxu1  ;;  %19492 = vmatprep.subr.bf16.mxu1 %v19491_v35  ;;  %v19505_v35 = vpack.c.bf16 %v14720_v13, %v14719_v25  ;;  %v14745_v25 = vld [vmem:[%s30892_s3 + $0x12d0] sm:$0xff]  ;;  %v14746_v13 = vld [vmem:[%s30892_s3 + $0x12d8] sm:$0xff] }
 0xfb7   :  { %v18337_v26 = vpop.f32.mrb[57].mxu1  ;;  %19462 = vmatpush3.bf16.msra.mxu0 %v19461_v11  ;;  %v30949_v11 = vld [vmem:[#allocation26_spill] sm:$0xff]  ;;  %v19523_v2 = vpack.c.bf16 %v14746_v13, %v14745_v25 }
 0xfb8   :  { %v18338_v54 = vadd.f32 %v18337_v26, %v18336_v3  ;;  %19464 = vmatprep.subr.bf16.mxu0 %v19463_v43  ;;  %v19633_v60 = vadd.f32 %v30949_v11, %v2037_v55  ;;  %v14137_v43 = vmax.f32 %v19634_v46, 0.0  ;;  %v14755_v26 = vld [vmem:[%s30892_s3 + $0x1320] sm:$0xff] }
 0xfb9   :  { %19494 = vmatpush3.bf16.msra.mxu1 %v19493_v57  ;;  %v14099_v57 = vmax.f32 %v19635_v23, 0.0  ;;  %v14723_v55 = vld [vmem:[%s30892_s3 + $0x1220] sm:$0xff]  ;;  %v14730_v23 = vld [vmem:[%s30892_s3 + $0x1258] sm:$0xff] }
 0xfba   :  { %v30713_v41 = vadd.f32 %v18338_v54, %v30491_v24  ;;  %v18339_v59 = vpop.f32.mrb[58].mxu1  ;;  %19496 = vmatprep.subr.bf16.mxu1 %v19495_v51  ;;  %v14752_v24 = vld [vmem:[%s30892_s3 + $0x1308] sm:$0xff]  ;;  %v14139_v51 = vmax.f32 %v19638_v21, 0.0  ;;  %v14136_v61 = vmax.f32 %v19633_v60, 0.0  ;;  %v14741_v54 = vld [vmem:[%s30892_s3 + $0x12b0] sm:$0xff]  ;;  %v19513_v37 = vpack.c.bf16 %v14724_v7, %v14723_v55  ;;  %v14731_v60 = vld [vmem:[%s30892_s3 + $0x1260] sm:$0xff] }
 0xfbb   :  { %v18340_v45 = vpop.f32.mrb[59].mxu1  ;;  %19466 = vmatpush3.bf16.msra.mxu0 %v19465_v16  ;;  %v19535_v0 = vpack.c.bf16 %v14752_v24, %v14751_v44  ;;  %v14756_v16 = vld [vmem:[%s30892_s3 + $0x1328] sm:$0xff]  ;;  %v14759_v24 = vld [vmem:[%s30892_s3 + $0x1340] sm:$0xff]  ;;  %v14734_v55 = vld [vmem:[%s30892_s3 + $0x1278] sm:$0xff] }
 0xfbc   :  { %v18341_v9 = vadd.f32 %v18340_v45, %v18339_v59  ;;  %19468 = vmatprep.subr.bf16.mxu0 %v19467_v18  ;;  %v14742_v18 = vld [vmem:[%s30892_s3 + $0x12b8] sm:$0xff]  ;;  %v19543_v40 = vpack.c.bf16 %v14756_v16, %v14755_v26  ;;  %v14744_v45 = vld [vmem:[%s30892_s3 + $0x12c8] sm:$0xff]  ;;  %v19551_v19 = vpack.c.bf16 %v14760_v4, %v14759_v24 }
 0xfbd   :  { %19498 = vmatpush3.bf16.msra.mxu1 %v19497_v33  ;;  %v14103_v33 = vmax.f32 %v19643_v17, 0.0  ;;  %v19515_v59 = vpack.c.bf16 %v14742_v18, %v14741_v54  ;;  %v19519_v34 = vpack.c.bf16 %v14744_v45, %v14743_v5  ;;  %v14766_v17 = vld [vmem:[%s30892_s3 + $0x1378] sm:$0xff] }
 0xfbe   :  { %v30744_v30 = vadd.f32 %v18341_v9, %v30526_v49  ;;  %19500 = vmatprep.subr.bf16.mxu1 %v19499_v48  ;;  %v14754_v49 = vld [vmem:[%s30892_s3 + $0x1318] sm:$0xff]  ;;  %v14725_v48 = vld [vmem:[%s30892_s3 + $0x1230] sm:$0xff]  ;;  %v14727_v9 = vld [vmem:[%s30892_s3 + $0x1240] sm:$0xff] }
 0xfbf   :  { %19470 = vmatpush3.bf16.msra.mxu0 %v19469_v6  ;;  %v19539_v3 = vpack.c.bf16 %v14754_v49, %v14753_v38  ;;  %v19547_v6 = vpack.c.bf16 %v14758_v47, %v14757_v28  ;;  %v19517_v44 = vpack.c.bf16 %v14726_v56, %v14725_v48  ;;  %v19525_v38 = vpack.c.bf16 %v14730_v23, %v14729_v10  ;;  %v14763_v49 = vld [vmem:[%s30892_s3 + $0x1360] sm:$0xff] }
 0xfc0   :  { %19504 = vmatprep.subr.bf16.mxu0 %v19503_v39  ;;  %v14728_v39 = vld [vmem:[%s30892_s3 + $0x1248] sm:$0xff]  ;;  %v19644_v28 = vadd.f32 %v29571_v32, %v30750_v14 }
 0xfc1   :  { %19502 = vmatpush3.bf16.msra.mxu1 %v19501_v29  ;;  %v19521_v46 = vpack.c.bf16 %v14728_v39, %v14727_v9  ;;  %v14761_v29 = vld [vmem:[%s30892_s3 + $0x1350] sm:$0xff] }
 0xfc2   :  { %16032 = vmatmul.mubr.f32.vlgmr.msra.gmra.mrb[60].mxu0 %v14097_v62  ;;  %19536 = vmatprep.subr.bf16.mxu1 %v19535_v0  ;;  %v19555_v21 = vpack.c.bf16 %v14762_v15, %v14761_v29  ;;  %v14764_v62 = vld [vmem:[%s30892_s3 + $0x1368] sm:$0xff]  ;;  %v14142_v56 = vmax.f32 %v19644_v28, 0.0 }
 0xfc3   :  { %16036 = vmatprep.mubr.f32.mxu0 %v14137_v43  ;;  %19506 = vmatpush3.bf16.msra.mxu0 %v19505_v35  ;;  %v2057_v35 = vrot.slane %v30488_v8, %v28829_v58  ;;  %v19559_v50 = vpack.c.bf16 %v14764_v62, %v14763_v49 }
 0xfc4   :  { %16107 = vmatmul.mubr.f32.vlgmr.msra.gmra.mrb[84].mxu1 %v14099_v57  ;;  %19508 = vmatprep.subr.bf16.mxu0 %v19507_v52  ;;  %v14732_v52 = vld [vmem:[%s30892_s3 + $0x1268] sm:$0xff] }
 0xfc5   :  { %16111 = vmatprep.mubr.f32.mxu1 %v14139_v51  ;;  %19538 = vmatpush3.bf16.msra.mxu1 %v19535_v0  ;;  %v14747_v0 = vld [vmem:[%s30892_s3 + $0x12e0] sm:$0xff]  ;;  %v14765_v51 = vld [vmem:[%s30892_s3 + $0x1370] sm:$0xff] }
 0xfc6   :  { %16037 = vmatmul.mubr.f32.gmra.mrb[62].mxu0 %v14136_v61  ;;  %19540 = vmatprep.subr.bf16.mxu1 %v19539_v3  ;;  %v19527_v11 = vpack.c.bf16 %v14748_v42, %v14747_v0  ;;  %v19531_v61 = vpack.c.bf16 %v14750_v22, %v14749_v12 }
 0xfc7   :  { %19510 = vmatpush3.bf16.msra.mxu0 %v19509_v31  ;;  %v2053_v31 = vrot.slane %v30488_v8, %v28944_v1 }
 0xfc8   :  { %16112 = vmatmul.mubr.f32.gmra.mrb[86].mxu1 %v14138_v63  ;;  %19512 = vmatprep.subr.bf16.mxu0 %v19511_v27  ;;  %v14733_v27 = vld [vmem:[%s30892_s3 + $0x1270] sm:$0xff]  ;;  %v19563_v63 = vpack.c.bf16 %v14766_v17, %v14765_v51 }
 0xfc9   :  { %19542 = vmatpush3.bf16.msra.mxu1 %v19539_v3  ;;  %18924 = vmatprep.mubr.f32.mxu1 %v14103_v33  ;;  %v19529_v3 = vpack.c.bf16 %v14732_v52, %v14731_v60  ;;  %v19533_v8 = vpack.c.bf16 %v14734_v55, %v14733_v27 }
 0xfca   :  { %19544 = vmatprep.subr.bf16.mxu1 %v19543_v40 }
 0xfcb   :  { %19514 = vmatpush3.bf16.msra.mxu0 %v19513_v37 }
 0xfcc   :  { %19516 = vmatprep.subr.bf16.mxu0 %v19515_v59 }
 0xfcd   :  { %19546 = vmatpush3.bf16.msra.mxu1 %v19543_v40 }
 0xfce   :  { %19548 = vmatprep.subr.bf16.mxu1 %v19547_v6 }
 0xfcf   :  { %19518 = vmatpush3.bf16.msra.mxu0 %v19517_v44 }
 0xfd0   :  { %19520 = vmatprep.subr.bf16.mxu0 %v19519_v34 }
 0xfd1   :  { %19550 = vmatpush3.bf16.msra.mxu1 %v19547_v6 }
 0xfd2   :  { %19552 = vmatprep.subr.bf16.mxu1 %v19551_v19 }
 0xfd3   :  { %19522 = vmatpush3.bf16.msra.mxu0 %v19521_v46 }
 0xfd4   :  { %19524 = vmatprep.subr.bf16.mxu0 %v19523_v2 }
 0xfd5   :  { %19554 = vmatpush3.bf16.msra.mxu1 %v19551_v19  ;;  %v13933_v58 = vpop.f32.mrb[36].mxu0 }
 0xfd6   :  { %v18374_v43 = vpop.f32.mrb[60].mxu1  ;;  %v13935_v53 = vpop.f32.mrb[37].mxu0  ;;  %19556 = vmatprep.subr.bf16.mxu1 %v19555_v21  ;;  %v19639_v40 = vadd.f32 %v13933_v58, %v2053_v31 }
 0xfd7   :  { %v19640_v57 = vadd.f32 %v13935_v53, %v2057_v35  ;;  %v18375_v20 = vpop.f32.mrb[61].mxu1  ;;  %v13937_v36 = vpop.f32.mrb[38].mxu0  ;;  %19526 = vmatpush3.bf16.msra.mxu0 %v19525_v38 }
 0xfd8   :  { %v18376_v26 = vadd.f32 %v18375_v20, %v18374_v43  ;;  %v13939_v16 = vpop.f32.mrb[39].mxu0  ;;  %19528 = vmatprep.subr.bf16.mxu0 %v19527_v11  ;;  %v19641_v59 = vadd.f32 %v13937_v36, %v2053_v31 }
 0xfd9   :  { %v14102_v7 = vmax.f32 %v19640_v57, 0.0  ;;  %19558 = vmatpush3.bf16.msra.mxu1 %v19555_v21  ;;  %v19642_v37 = vadd.f32 %v13939_v16, %v2057_v35 }
 0xfda   :  { %v15209_v54 = vadd.f32 %v18376_v26, %v30713_v41  ;;  %v18377_v18 = vpop.f32.mrb[62].mxu1  ;;  %19560 = vmatprep.subr.bf16.mxu1 %v19559_v50  ;;  %v14101_v41 = vmax.f32 %v19639_v40, 0.0  ;;  %v14140_v5 = vmax.f32 %v19641_v59, 0.0 }
 0xfdb   :  { %v18378_v1 = vpop.f32.mrb[63].mxu1  ;;  %19530 = vmatpush3.bf16.msra.mxu0 %v19529_v3  ;;  %16181 = vmatprep.mubr.f32.mxu0 %v14102_v7  ;;  %v14141_v48 = vmax.f32 %v19642_v37, 0.0 }
 0xfdc   :  { %v18379_v33 = vadd.f32 %v18378_v1, %v18377_v18  ;;  %19532 = vmatprep.subr.bf16.mxu0 %v19531_v61 }
 0xfdd   :  { %19562 = vmatpush3.bf16.msra.mxu1 %v19559_v50 }
 0xfde   :  { %v15214_v47 = vadd.f32 %v18379_v33, %v30744_v30  ;;  %19564 = vmatprep.subr.bf16.mxu1 %v19563_v63 }
 0xfdf   :  { %19534 = vmatpush3.bf16.msra.mxu0 %v19533_v8 }
 0xfe1   :  { %19566 = vmatpush3.bf16.msra.mxu1 %v19563_v63 }
 0xfe2   :  { %16182 = vmatmul.mubr.f32.vlgmr.msra.gmra.mrb[64].mxu0 %v14101_v41 }
 0xfe3   :  { %16186 = vmatprep.mubr.f32.mxu0 %v14141_v48 }
 0xfe4   :  { %18925 = vmatmul.mubr.f32.vlgmr.msra.gmra.mrb[88].mxu1 %v14142_v56 }
 0xfe6   :  { %16187 = vmatmul.mubr.f32.gmra.mrb[66].mxu0 %v14140_v5 }
 0xff5   :  { %v18412_v45 = vpop.f32.mrb[40].mxu0 }
 0xff6   :  { %v18413_v6 = vpop.f32.mrb[41].mxu0 }
 0xff7   :  { %v18450_v44 = vpop.f32.mrb[64].mxu1  ;;  %v18414_v24 = vadd.f32 %v18413_v6, %v18412_v45 }
 0xff8   :  { %v18451_v4 = vpop.f32.mrb[65].mxu1 }
 0xff9   :  { %v15284_v32 = vadd.f32 %v18414_v24, %v15209_v54  ;;  %v18452_v14 = vadd.f32 %v18451_v4, %v18450_v44  ;;  %v18415_v30 = vpop.f32.mrb[42].mxu0 }
 0xffa   :  { %v18416_v34 = vpop.f32.mrb[43].mxu0 }
 0xffb   :  { %v15359_v9 = vadd.f32 %v18452_v14, %v15284_v32  ;;  %v18453_v39 = vpop.f32.mrb[66].mxu1  ;;  %v18417_v25 = vadd.f32 %v18416_v34, %v18415_v30 }
 0xffc   :  { %v18454_v13 = vpop.f32.mrb[67].mxu1 }
 0xffd   :  { %v15289_v19 = vadd.f32 %v18417_v25, %v15214_v47  ;;  %v18455_v46 = vadd.f32 %v18454_v13, %v18453_v39 }
 0xfff   :  { %v15364_v29 = vadd.f32 %v18455_v46, %v15289_v19 }
0x1015   :  { %v18488_v15 = vpop.f32.mrb[44].mxu0 }
0x1016   :  { %v18489_v2 = vpop.f32.mrb[45].mxu0 }
0x1017   :  { %v18526_v10 = vpop.f32.mrb[68].mxu1  ;;  %v18490_v23 = vadd.f32 %v18489_v2, %v18488_v15 }
0x1018   :  { %v18527_v0 = vpop.f32.mrb[69].mxu1 }
0x1019   :  { %v15434_v42 = vadd.f32 %v18490_v23, %v15359_v9  ;;  %v18528_v21 = vadd.f32 %v18527_v0, %v18526_v10  ;;  %v18491_v35 = vpop.f32.mrb[46].mxu0 }
0x101a   :  { %v18492_v38 = vpop.f32.mrb[47].mxu0 }
0x101b   :  { %v15509_v49 = vadd.f32 %v18528_v21, %v15434_v42  ;;  %v18529_v62 = vpop.f32.mrb[70].mxu1  ;;  %v18493_v11 = vadd.f32 %v18492_v38, %v18491_v35 }
0x101c   :  { %v18530_v60 = vpop.f32.mrb[71].mxu1 }
0x101d   :  { %v15439_v52 = vadd.f32 %v18493_v11, %v15364_v29  ;;  %v18531_v58 = vadd.f32 %v18530_v60, %v18529_v62 }
0x101f   :  { %v15514_v12 = vadd.f32 %v18531_v58, %v15439_v52 }
0x1035   :  { %v18564_v22 = vpop.f32.mrb[48].mxu0 }
0x1036   :  { %v18565_v43 = vpop.f32.mrb[49].mxu0 }
0x1037   :  { %v18602_v53 = vpop.f32.mrb[72].mxu1  ;;  %v18566_v50 = vadd.f32 %v18565_v43, %v18564_v22 }
0x1038   :  { %v18603_v57 = vpop.f32.mrb[73].mxu1 }
0x1039   :  { %v15584_v20 = vadd.f32 %v18566_v50, %v15509_v49  ;;  %v18604_v36 = vadd.f32 %v18603_v57, %v18602_v53  ;;  %v18567_v3 = vpop.f32.mrb[50].mxu0 }
0x103a   :  { %v18568_v51 = vpop.f32.mrb[51].mxu0 }
0x103b   :  { %v15659_v17 = vadd.f32 %v18604_v36, %v15584_v20  ;;  %v18605_v31 = vpop.f32.mrb[74].mxu1  ;;  %v18569_v26 = vadd.f32 %v18568_v51, %v18567_v3 }
0x103c   :  { %v18606_v16 = vpop.f32.mrb[75].mxu1 }
0x103d   :  { %v15589_v61 = vadd.f32 %v18569_v26, %v15514_v12  ;;  %v18607_v27 = vadd.f32 %v18606_v16, %v18605_v31 }
0x103f   :  { %v15664_v55 = vadd.f32 %v18607_v27, %v15589_v61 }
0x1055   :  { %v18640_v7 = vpop.f32.mrb[52].mxu0 }
0x1056   :  { %v18641_v54 = vpop.f32.mrb[53].mxu0 }
0x1057   :  { %v18678_v18 = vpop.f32.mrb[76].mxu1  ;;  %v18642_v63 = vadd.f32 %v18641_v54, %v18640_v7 }
0x1058   :  { %v18679_v1 = vpop.f32.mrb[77].mxu1 }
0x1059   :  { %v15734_v8 = vadd.f32 %v18642_v63, %v15659_v17  ;;  %v18680_v40 = vadd.f32 %v18679_v1, %v18678_v18  ;;  %v18643_v33 = vpop.f32.mrb[54].mxu0 }
0x105a   :  { %v18644_v37 = vpop.f32.mrb[55].mxu0 }
0x105b   :  { %v15809_v28 = vadd.f32 %v18680_v40, %v15734_v8  ;;  %v18681_v47 = vpop.f32.mrb[78].mxu1  ;;  %v18645_v41 = vadd.f32 %v18644_v37, %v18643_v33 }
0x105c   :  { %v18682_v59 = vpop.f32.mrb[79].mxu1 }
0x105d   :  { %v15739_v48 = vadd.f32 %v18645_v41, %v15664_v55  ;;  %v18683_v56 = vadd.f32 %v18682_v59, %v18681_v47 }
0x105f   :  { %v15814_v5 = vadd.f32 %v18683_v56, %v15739_v48 }
0x1075   :  { %v18716_v45 = vpop.f32.mrb[56].mxu0 }
0x1076   :  { %v18717_v6 = vpop.f32.mrb[57].mxu0 }
0x1077   :  { %v18754_v44 = vpop.f32.mrb[80].mxu1  ;;  %v18718_v24 = vadd.f32 %v18717_v6, %v18716_v45 }
0x1078   :  { %v18755_v4 = vpop.f32.mrb[81].mxu1 }
0x1079   :  { %v15884_v32 = vadd.f32 %v18718_v24, %v15809_v28  ;;  %v18756_v14 = vadd.f32 %v18755_v4, %v18754_v44  ;;  %v18719_v30 = vpop.f32.mrb[58].mxu0 }
0x107a   :  { %v18720_v34 = vpop.f32.mrb[59].mxu0 }
0x107b   :  { %v15959_v9 = vadd.f32 %v18756_v14, %v15884_v32  ;;  %v18757_v39 = vpop.f32.mrb[82].mxu1  ;;  %v18721_v25 = vadd.f32 %v18720_v34, %v18719_v30 }
0x107c   :  { %v18758_v13 = vpop.f32.mrb[83].mxu1 }
0x107d   :  { %v15889_v19 = vadd.f32 %v18721_v25, %v15814_v5  ;;  %v18759_v46 = vadd.f32 %v18758_v13, %v18757_v39 }
0x107f   :  { %v15964_v29 = vadd.f32 %v18759_v46, %v15889_v19 }
0x1095   :  { %v18792_v15 = vpop.f32.mrb[60].mxu0 }
0x1096   :  { %v18793_v2 = vpop.f32.mrb[61].mxu0 }
0x1097   :  { %v18830_v10 = vpop.f32.mrb[84].mxu1  ;;  %v18794_v23 = vadd.f32 %v18793_v2, %v18792_v15 }
0x1098   :  { %v18831_v0 = vpop.f32.mrb[85].mxu1 }
0x1099   :  { %v16034_v42 = vadd.f32 %v18794_v23, %v15959_v9  ;;  %v18832_v21 = vadd.f32 %v18831_v0, %v18830_v10  ;;  %v18795_v35 = vpop.f32.mrb[62].mxu0 }
0x109a   :  { %v18796_v38 = vpop.f32.mrb[63].mxu0 }
0x109b   :  { %v16109_v49 = vadd.f32 %v18832_v21, %v16034_v42  ;;  %v18833_v62 = vpop.f32.mrb[86].mxu1  ;;  %v18797_v11 = vadd.f32 %v18796_v38, %v18795_v35 }
0x109c   :  { %v18834_v60 = vpop.f32.mrb[87].mxu1 }
0x109d   :  { %v16039_v52 = vadd.f32 %v18797_v11, %v15964_v29  ;;  %v18835_v58 = vadd.f32 %v18834_v60, %v18833_v62 }
0x109f   :  { %v16114_v12 = vadd.f32 %v18835_v58, %v16039_v52 }
0x10b5   :  { %v18868_v22 = vpop.f32.mrb[64].mxu0 }
0x10b6   :  { %v18869_v43 = vpop.f32.mrb[65].mxu0 }
0x10b7   :  { %v18926_v53 = vpop.f32.mrb[88].mxu1  ;;  %v18870_v50 = vadd.f32 %v18869_v43, %v18868_v22 }
0x10b8   :  { %v16258_v57 = vpop.f32.mrb[89].mxu1 }
0x10b9   :  { %v16184_v20 = vadd.f32 %v18870_v50, %v16109_v49  ;;  %v18871_v36 = vpop.f32.mrb[66].mxu0 }
0x10ba   :  { %v18872_v3 = vpop.f32.mrb[67].mxu0 }
0x10bb   :  { %v16259_v51 = vadd.f32 %v16258_v57, %v16184_v20  ;;  %v18873_v17 = vadd.f32 %v18872_v3, %v18871_v36 }
0x10bd   :  { %16268 = vst.msk [vmem:[%s30894_s4] sm:$0xff] %vm16267_vm0, %v16259_v51  ;;  %v16189_v31 = vadd.f32 %v18873_v17, %v16114_v12 }
0x10bf   :  { %v16264_v26 = vadd.f32 %v18926_v53, %v16189_v31 }
0x10c1   :  { %16269 = vst.msk [vmem:[%s30894_s4 + $0x8] sm:$0xff] %vm16267_vm0, %v16264_v26 }

</bundles_post_ra>
